<compile_context>
chip_gen: v7x
topology: tpu7x:2x2x1
jax: 0.10.0
libtpu: 0.0.40
codegen_flags: <defaults>
</compile_context>

<pallas_src>
import functools
import math

import numpy as np
import jax
import jax.numpy as jnp
from jax import lax
from jax.experimental import pallas as pl
from jax.experimental.pallas import tpu as pltpu

LANE = 128
_EPS = 1e-5
# Set True to use the tanh-approx GELU (EUP slot, helps v5e VPU) at the cost of
# deviating slightly from torch.nn.functional.gelu's default erf form.
_USE_TANH_GELU = False


def _gelu(x):
    if _USE_TANH_GELU:
        return jax.nn.gelu(x, approximate=True)
    return 0.5 * x * (1.0 + lax.erf(x * (1.0 / math.sqrt(2.0))))


def _gn_affine(y, count, gamma, beta, eps=_EPS):
    """GroupNorm(1, C) on (M, 128) f32 whose padded channels are exactly zero.

    `count` is the number of *real* elements (M * C_real); padded channels
    contribute zeros to the sums so the stats match torch GroupNorm(1, C)
    (biased variance).  Padded gamma/beta are zero, so padded outputs stay 0.
    """
    s = jnp.sum(y)
    ss = jnp.sum(y * y)
    mean = s * (1.0 / count)
    var = ss * (1.0 / count) - mean * mean
    inv = lax.rsqrt(var + eps)
    return (y - mean) * inv * gamma + beta


# --------------------------------------------------------------------------
# Constant 0/1 selection matrices: im2col tap gather expressed as an MXU GEMM
# --------------------------------------------------------------------------

def _make_sel_np(H, W, kh, kw, stride, pad):
    """(kh*kw*OH*OW, H*W) 0/1 matrix; row t*M+m picks input pixel of tap t for
    output pixel m (rows in the zero-padding halo are all-zero)."""
    OH = (H + 2 * pad - kh) // stride + 1
    OW = (W + 2 * pad - kw) // stride + 1
    M = OH * OW
    S = np.zeros((kh * kw * M, H * W), np.float32)
    for i in range(kh):
        for j in range(kw):
            t = i * kw + j
            for oh in range(OH):
                for ow in range(OW):
                    h = stride * oh + i - pad
                    w = stride * ow + j - pad
                    if 0 <= h < H and 0 <= w < W:
                        S[t * M + oh * OW + ow, h * W + w] = 1.0
    return S, OH, OW


# --------------------------------------------------------------------------
# Fused BasicBlock kernel (one grid step = one sample)
# --------------------------------------------------------------------------

def _block_kernel(x_ref, s1_ref, w1_ref, g1_ref, b1_ref,
                  s2_ref, w2_ref, g2_ref, b2_ref, *rest,
                  in_c, planes, m_out, has_sc):
    if has_sc:
        ssc_ref, wsc_ref, gsc_ref, bsc_ref, o_ref = rest
    else:
        (o_ref,) = rest

    x = x_ref[0]                                   # (H*W, 128) bf16, pad ch == 0
    count = float(m_out * planes)

    # ---- conv1: 3x3, stride s, pad 1 (tap gather on MXU, real-Cin GEMMs) ----
    a1 = jnp.dot(s1_ref[...], x,
                 preferred_element_type=jnp.float32).astype(jnp.bfloat16)
    y1 = jnp.zeros((m_out, LANE), jnp.float32)
    for t in range(9):
        y1 = y1 + jnp.dot(a1[t * m_out:(t + 1) * m_out, :in_c], w1_ref[t],
                          preferred_element_type=jnp.float32)

    # ---- gn1 + gelu (epilogue, stays in VMEM) ----
    y1 = _gelu(_gn_affine(y1, count, g1_ref[...], b1_ref[...]))
    y1 = y1.astype(jnp.bfloat16)

    # ---- conv2: 3x3, stride 1, pad 1, consuming gn1 output directly ----
    a2 = jnp.dot(s2_ref[...], y1,
                 preferred_element_type=jnp.float32).astype(jnp.bfloat16)
    y2 = jnp.zeros((m_out, LANE), jnp.float32)
    for t in range(9):
        y2 = y2 + jnp.dot(a2[t * m_out:(t + 1) * m_out, :planes], w2_ref[t],
                          preferred_element_type=jnp.float32)

    # ---- shortcut ----
    if has_sc:
        xd = jnp.dot(ssc_ref[...], x,
                     preferred_element_type=jnp.float32).astype(jnp.bfloat16)
        sc = jnp.dot(xd[:, :in_c], wsc_ref[...],
                     preferred_element_type=jnp.float32)
        sc = _gn_affine(sc, count, gsc_ref[...], bsc_ref[...])
    else:
        sc = x.astype(jnp.float32)                 # identity (stride 1, same C)

    # ---- gn2 + residual add + gelu, store bf16 ----
    out = _gelu(_gn_affine(y2, count, g2_ref[...], b2_ref[...]) + sc)
    o_ref[0] = out.astype(o_ref.dtype)


def basic_block_forward(x, bp, H, W):
    """x: (N, H*W, 128) bf16 -> (N, OH*OW, 128) bf16 in one pallas_call."""
    N = x.shape[0]
    s, in_c, planes = bp["stride"], bp["in_c"], bp["planes"]
    has_sc = "wsc" in bp

    S1_np, OH, OW = _make_sel_np(H, W, 3, 3, s, 1)
    S2_np, _, _ = _make_sel_np(OH, OW, 3, 3, 1, 1)
    m = OH * OW
    S1 = jnp.asarray(S1_np, jnp.bfloat16)
    S2 = jnp.asarray(S2_np, jnp.bfloat16)

    args = [x, S1, bp["w1"], bp["g1"], bp["b1"], S2, bp["w2"], bp["g2"], bp["b2"]]
    in_specs = [
        pl.BlockSpec((1, H * W, LANE), lambda n: (n, 0, 0)),
        pl.BlockSpec((9 * m, H * W), lambda n: (0, 0)),
        pl.BlockSpec((9, in_c, LANE), lambda n: (0, 0, 0)),
        pl.BlockSpec((1, LANE), lambda n: (0, 0)),
        pl.BlockSpec((1, LANE), lambda n: (0, 0)),
        pl.BlockSpec((9 * m, m), lambda n: (0, 0)),
        pl.BlockSpec((9, planes, LANE), lambda n: (0, 0, 0)),
        pl.BlockSpec((1, LANE), lambda n: (0, 0)),
        pl.BlockSpec((1, LANE), lambda n: (0, 0)),
    ]
    if has_sc:
        Ssc_np, _, _ = _make_sel_np(H, W, 1, 1, s, 0)
        args += [jnp.asarray(Ssc_np, jnp.bfloat16),
                 bp["wsc"], bp["gsc"], bp["bsc"]]
        in_specs += [
            pl.BlockSpec((m, H * W), lambda n: (0, 0)),
            pl.BlockSpec((in_c, LANE), lambda n: (0, 0)),
            pl.BlockSpec((1, LANE), lambda n: (0, 0)),
            pl.BlockSpec((1, LANE), lambda n: (0, 0)),
        ]

    kernel = functools.partial(_block_kernel, in_c=in_c, planes=planes,
                               m_out=m, has_sc=has_sc)
    out = pl.pallas_call(
        kernel,
        out_shape=jax.ShapeDtypeStruct((N, m, LANE), jnp.bfloat16),
        grid=(N,),
        in_specs=in_specs,
        out_specs=pl.BlockSpec((1, m, LANE), lambda n: (n, 0, 0)),
        compiler_params=pltpu.CompilerParams(
            dimension_semantics=("parallel",)),
    )(*args)
    return out, OH, OW


# --------------------------------------------------------------------------
# Stem: 7x7 / stride-2 / pad-3 conv (Cin=1) + GroupNorm(1, c0) + GELU, fused
# --------------------------------------------------------------------------

def _stem_kernel(a_ref, w_ref, g_ref, b_ref, o_ref, *, planes):
    a = a_ref[0].astype(jnp.bfloat16)              # (m, 49) patches
    y = jnp.dot(a, w_ref[...], preferred_element_type=jnp.float32)   # (m, 128)
    m = a.shape[0]
    y = _gn_affine(y, float(m * planes), g_ref[...], b_ref[...])
    o_ref[0] = _gelu(y).astype(o_ref.dtype)


def stem_forward(x_nchw, sp):
    N, _, H, W = x_nchw.shape
    OH = (H + 6 - 7) // 2 + 1
    OW = (W + 6 - 7) // 2 + 1
    m = OH * OW
    Hp, Wp = H + 6, W + 6
    xp = jnp.pad(x_nchw[:, 0], ((0, 0), (3, 3), (3, 3)))
    # TODO(synk): the Cin=1 stem patch extraction is one small XLA gather
    # (N*m*49 floats); the 3x3/1x1 convs gather in-kernel on the MXU instead.
    idx = np.zeros((m, 49), np.int32)
    for oh in range(OH):
        for ow in range(OW):
            for i in range(7):
                for j in range(7):
                    idx[oh * OW + ow, i * 7 + j] = (2 * oh + i) * Wp + (2 * ow + j)
    a = xp.reshape(N, Hp * Wp)[:, jnp.asarray(idx)]          # (N, m, 49) f32

    kernel = functools.partial(_stem_kernel, planes=sp["planes"])
    out = pl.pallas_call(
        kernel,
        out_shape=jax.ShapeDtypeStruct((N, m, LANE), jnp.bfloat16),
        grid=(N,),
        in_specs=[pl.BlockSpec((1, m, 49), lambda n: (n, 0, 0)),
                  pl.BlockSpec((49, LANE), lambda n: (0, 0)),
                  pl.BlockSpec((1, LANE), lambda n: (0, 0)),
                  pl.BlockSpec((1, LANE), lambda n: (0, 0))],
        out_specs=pl.BlockSpec((1, m, LANE), lambda n: (n, 0, 0)),
        compiler_params=pltpu.CompilerParams(
            dimension_semantics=("parallel",)),
    )(a, sp["w"], sp["g"], sp["b"])
    return out, OH, OW


# --------------------------------------------------------------------------
# AdaptiveAvgPool2d((1,1)) on (N, HW, 128) - all samples in one block
# --------------------------------------------------------------------------

def _pool_kernel(x_ref, o_ref):
    o_ref[...] = jnp.mean(x_ref[...].astype(jnp.float32), axis=1)


def adaptive_avgpool_pallas(x):
    N, HW, Cp = x.shape
    return pl.pallas_call(
        _pool_kernel,
        out_shape=jax.ShapeDtypeStruct((N, Cp), jnp.float32),
        grid=(1,),
        in_specs=[pl.BlockSpec((N, HW, Cp), lambda i: (0, 0, 0))],
        out_specs=pl.BlockSpec((N, Cp), lambda i: (0, 0)),
    )(x)


# --------------------------------------------------------------------------
# Parameter init / packing
# --------------------------------------------------------------------------

def _conv_weight(key, cout, cin, kh, kw):
    fan_in = cin * kh * kw
    return (jax.random.normal(key, (cout, cin, kh, kw), jnp.float32)
            * (1.0 / math.sqrt(float(fan_in))))


def _pack_conv(w):
    """(Cout, Cin, KH, KW) -> (KH*KW, Cin, 128) bf16, Cout zero-padded to 128."""
    cout, cin, kh, kw = w.shape
    wt = jnp.transpose(w, (2, 3, 1, 0)).reshape(kh * kw, cin, cout)
    wt = jnp.pad(wt, ((0, 0), (0, 0), (0, LANE - cout)))
    return wt.astype(jnp.bfloat16)


def _pack_gn(c):
    gamma = jnp.pad(jnp.ones((c,), jnp.float32), (0, LANE - c)).reshape(1, LANE)
    beta = jnp.zeros((1, LANE), jnp.float32)
    return gamma, beta


def init_resnet_params(key, num_channels=(8, 16, 32, 64), num_blocks=(1, 1, 1, 1)):
    assert max(num_channels) <= LANE
    keys = iter(jax.random.split(key, 128))
    c0 = num_channels[0]
    g0, b0 = _pack_gn(c0)
    params = {
        "stem": {"w": _pack_conv(_conv_weight(next(keys), c0, 1, 7, 7))[:, 0, :],
                 "g": g0, "b": b0, "planes": c0},
    }

    in_c = c0
    layers = []
    for li, (planes, nb) in enumerate(zip(num_channels, num_blocks)):
        stride0 = 1 if li == 0 else 2
        blocks = []
        for bi in range(nb):
            s = stride0 if bi == 0 else 1
            g1, b1 = _pack_gn(planes)
            g2, b2 = _pack_gn(planes)
            bp = {"stride": s, "in_c": in_c, "planes": planes,
                  "w1": _pack_conv(_conv_weight(next(keys), planes, in_c, 3, 3)),
                  "g1": g1, "b1": b1,
                  "w2": _pack_conv(_conv_weight(next(keys), planes, planes, 3, 3)),
                  "g2": g2, "b2": b2}
            if s != 1 or in_c != planes:
                gsc, bsc = _pack_gn(planes)
                bp["wsc"] = _pack_conv(_conv_weight(next(keys), planes, in_c, 1, 1))[0]
                bp["gsc"] = gsc
                bp["bsc"] = bsc
            blocks.append(bp)
            in_c = planes
        layers.append(blocks)
    params["layers"] = layers
    params["c_last"] = in_c
    return params


# --------------------------------------------------------------------------
# Forward pass
# --------------------------------------------------------------------------

def resnet_forward(x_nchw, params, *, pool=True):
    N = x_nchw.shape[0]
    out, H, W = stem_forward(x_nchw, params["stem"])        # (N, H*W, 128) bf16
    for blocks in params["layers"]:
        for bp in blocks:
            out, H, W = basic_block_forward(out, bp, H, W)
    c = params["c_last"]
    if pool:
        pooled = adaptive_avgpool_pallas(out)               # (N, 128) f32
        return pooled[:, :c].reshape(N, c, 1, 1)
    return jnp.transpose(out[:, :, :c].reshape(N, H, W, c), (0, 3, 1, 2))


# --------------------------------------------------------------------------

if __name__ == "__main__":
    key = jax.random.PRNGKey(0)
    k_params, k_x = jax.random.split(key)

    num_channels = (8, 16, 32, 64)
    num_blocks = (1, 1, 1, 1)
    params = init_resnet_params(k_params, num_channels, num_blocks)

    # input: NCHW with a single input channel, as in the module's conv1
    x = jax.random.normal(k_x, (2, 1, 16, 16), jnp.float32)

    fwd = jax.jit(lambda inp: resnet_forward(inp, params, pool=True))
    out = jax.block_until_ready(fwd(x))

    assert out.shape == (2, num_channels[-1], 1, 1), out.shape
    assert bool(jnp.all(jnp.isfinite(out)))
    print("KERNEL_OK")
</pallas_src>

<mosaic_0001>
module attributes {stable_mosaic.version = 11 : i64} {
  func.func @_stem_kernel(%arg0: i32, %arg1: memref<1x64x49xf32, #tpu.memory_space<vmem>>, %arg2: memref<49x128xbf16, #tpu.memory_space<vmem>>, %arg3: memref<1x128xf32, #tpu.memory_space<vmem>>, %arg4: memref<1x128xf32, #tpu.memory_space<vmem>>, %arg5: memref<1x64x128xbf16, #tpu.memory_space<vmem>>) attributes {dimension_semantics = [#tpu.dimension_semantics<parallel>], iteration_bounds = array<i64: 2>, scalar_prefetch = 0 : i64, scratch_operands = 0 : i64, tpu.core_type = #tpu.core_type<tc>, window_params = [{transform_indices = @transform_0, window_bounds = array<i64: 1, 64, 49>}, {pipeline_mode = #tpu.pipeline_mode<synchronous>, transform_indices = @transform_1, window_bounds = array<i64: 49, 128>}, {pipeline_mode = #tpu.pipeline_mode<synchronous>, transform_indices = @transform_2, window_bounds = array<i64: 1, 128>}, {pipeline_mode = #tpu.pipeline_mode<synchronous>, transform_indices = @transform_3, window_bounds = array<i64: 1, 128>}, {transform_indices = @transform_4, window_bounds = array<i64: 1, 64, 128>}]} {
    %c0 = arith.constant 0 : index
    %c0_0 = arith.constant 0 : index
    %c0_1 = arith.constant 0 : index
    %0 = vector.load %arg1[%c0, %c0_0, %c0_1] : memref<1x64x49xf32, #tpu.memory_space<vmem>>, vector<1x64x49xf32>
    %1 = vector.shape_cast %0 : vector<1x64x49xf32> to vector<64x49xf32>
    %2 = arith.truncf %1 : vector<64x49xf32> to vector<64x49xbf16>
    %c0_2 = arith.constant 0 : index
    %c0_3 = arith.constant 0 : index
    %3 = vector.load %arg2[%c0_2, %c0_3] : memref<49x128xbf16, #tpu.memory_space<vmem>>, vector<49x128xbf16>
    %cst = arith.constant dense<0.000000e+00> : vector<64x128xf32>
    %4 = tpu.matmul %2, %3, %cst {dimension_numbers = #tpu.dot_dimension_numbers<[1], [0], [0], [1], [0, 0, 1, 1], [], []>} : vector<64x49xbf16>, vector<49x128xbf16>, vector<64x128xf32> -> vector<64x128xf32>
    %c0_4 = arith.constant 0 : index
    %c0_5 = arith.constant 0 : index
    %5 = vector.load %arg3[%c0_4, %c0_5] : memref<1x128xf32, #tpu.memory_space<vmem>>, vector<1x128xf32>
    %c0_6 = arith.constant 0 : index
    %c0_7 = arith.constant 0 : index
    %6 = vector.load %arg4[%c0_6, %c0_7] : memref<1x128xf32, #tpu.memory_space<vmem>>, vector<1x128xf32>
    %7 = vector.shape_cast %4 : vector<64x128xf32> to vector<1x64x128xf32>
    %cst_8 = arith.constant dense<0.000000e+00> : vector<1xf32>
    %8 = vector.multi_reduction <add>, %7, %cst_8 [1, 2] : vector<1x64x128xf32> to vector<1xf32>
    %9 = vector.shape_cast %8 : vector<1xf32> to vector<1x1x1xf32>
    %10 = vector.extract %9[0, 0, 0] : f32 from vector<1x1x1xf32>
    %11 = arith.mulf %4, %4 : vector<64x128xf32>
    %12 = vector.shape_cast %11 : vector<64x128xf32> to vector<1x64x128xf32>
    %cst_9 = arith.constant dense<0.000000e+00> : vector<1xf32>
    %13 = vector.multi_reduction <add>, %12, %cst_9 [1, 2] : vector<1x64x128xf32> to vector<1xf32>
    %14 = vector.shape_cast %13 : vector<1xf32> to vector<1x1x1xf32>
    %15 = vector.extract %14[0, 0, 0] : f32 from vector<1x1x1xf32>
    %cst_10 = arith.constant 0.001953125 : f32
    %16 = arith.mulf %10, %cst_10 : f32
    %cst_11 = arith.constant 0.001953125 : f32
    %17 = arith.mulf %15, %cst_11 : f32
    %18 = arith.mulf %16, %16 : f32
    %19 = arith.subf %17, %18 : f32
    %cst_12 = arith.constant 9.99999974E-6 : f32
    %20 = arith.addf %19, %cst_12 : f32
    %21 = math.rsqrt %20 : f32
    %22 = vector.broadcast %16 : f32 to vector<64x128xf32>
    %23 = arith.subf %4, %22 : vector<64x128xf32>
    %24 = vector.broadcast %21 : f32 to vector<64x128xf32>
    %25 = arith.mulf %23, %24 : vector<64x128xf32>
    %26 = vector.broadcast %5 : vector<1x128xf32> to vector<64x128xf32>
    %27 = arith.mulf %25, %26 : vector<64x128xf32>
    %28 = vector.broadcast %6 : vector<1x128xf32> to vector<64x128xf32>
    %29 = arith.addf %27, %28 : vector<64x128xf32>
    %cst_13 = arith.constant 5.000000e-01 : f32
    %30 = vector.broadcast %cst_13 : f32 to vector<64x128xf32>
    %31 = arith.mulf %30, %29 : vector<64x128xf32>
    %cst_14 = arith.constant 0.707106769 : f32
    %32 = vector.broadcast %cst_14 : f32 to vector<64x128xf32>
    %33 = arith.mulf %29, %32 : vector<64x128xf32>
    %34 = math.erf %33 : vector<64x128xf32>
    %cst_15 = arith.constant 1.000000e+00 : f32
    %35 = vector.broadcast %cst_15 : f32 to vector<64x128xf32>
    %36 = arith.addf %35, %34 : vector<64x128xf32>
    %37 = arith.mulf %31, %36 : vector<64x128xf32>
    %38 = arith.truncf %37 : vector<64x128xf32> to vector<64x128xbf16>
    %c0_16 = arith.constant 0 : index
    %c0_17 = arith.constant 0 : index
    %c0_18 = arith.constant 0 : index
    %39 = vector.load %arg5[%c0_16, %c0_17, %c0_18] : memref<1x64x128xbf16, #tpu.memory_space<vmem>>, vector<1x64x128xbf16>
    %40 = vector.shape_cast %39 : vector<1x64x128xbf16> to vector<64x128xbf16>
    %41 = vector.shape_cast %38 : vector<64x128xbf16> to vector<1x64x128xbf16>
    tpu.vector_store %arg5[%c0_16, %c0_17, %c0_18], %41 {strides = array<i32>} : memref<1x64x128xbf16, #tpu.memory_space<vmem>>, vector<1x64x128xbf16>,
    return
  }
  func.func @transform_0(%arg0: i32) -> (i32, i32, i32) {
    %c0_i32 = arith.constant 0 : i32
    %c0_i32_0 = arith.constant 0 : i32
    %c0_i32_1 = arith.constant 0 : i32
    return %arg0, %c0_i32, %c0_i32_0 : i32, i32, i32
  }
  func.func @transform_1(%arg0: i32) -> (i32, i32) {
    %c0_i32 = arith.constant 0 : i32
    %c0_i32_0 = arith.constant 0 : i32
    %c0_i32_1 = arith.constant 0 : i32
    return %c0_i32, %c0_i32_0 : i32, i32
  }
  func.func @transform_2(%arg0: i32) -> (i32, i32) {
    %c0_i32 = arith.constant 0 : i32
    %c0_i32_0 = arith.constant 0 : i32
    %c0_i32_1 = arith.constant 0 : i32
    return %c0_i32, %c0_i32_0 : i32, i32
  }
  func.func @transform_3(%arg0: i32) -> (i32, i32) {
    %c0_i32 = arith.constant 0 : i32
    %c0_i32_0 = arith.constant 0 : i32
    %c0_i32_1 = arith.constant 0 : i32
    return %c0_i32, %c0_i32_0 : i32, i32
  }
  func.func @transform_4(%arg0: i32) -> (i32, i32, i32) {
    %c0_i32 = arith.constant 0 : i32
    %c0_i32_0 = arith.constant 0 : i32
    %c0_i32_1 = arith.constant 0 : i32
    return %arg0, %c0_i32, %c0_i32_0 : i32, i32, i32
  }
}

module attributes {stable_mosaic.version = 11 : i64} {
  func.func @_block_kernel(%arg0: i32, %arg1: memref<1x64x128xbf16, #tpu.memory_space<vmem>>, %arg2: memref<576x64xbf16, #tpu.memory_space<vmem>>, %arg3: memref<9x8x128xbf16, #tpu.memory_space<vmem>>, %arg4: memref<1x128xf32, #tpu.memory_space<vmem>>, %arg5: memref<1x128xf32, #tpu.memory_space<vmem>>, %arg6: memref<576x64xbf16, #tpu.memory_space<vmem>>, %arg7: memref<9x8x128xbf16, #tpu.memory_space<vmem>>, %arg8: memref<1x128xf32, #tpu.memory_space<vmem>>, %arg9: memref<1x128xf32, #tpu.memory_space<vmem>>, %arg10: memref<1x64x128xbf16, #tpu.memory_space<vmem>>) attributes {dimension_semantics = [#tpu.dimension_semantics<parallel>], iteration_bounds = array<i64: 2>, scalar_prefetch = 0 : i64, scratch_operands = 0 : i64, tpu.core_type = #tpu.core_type<tc>, window_params = [{transform_indices = @transform_0, window_bounds = array<i64: 1, 64, 128>}, {pipeline_mode = #tpu.pipeline_mode<synchronous>, transform_indices = @transform_1, window_bounds = array<i64: 576, 64>}, {pipeline_mode = #tpu.pipeline_mode<synchronous>, transform_indices = @transform_2, window_bounds = array<i64: 9, 8, 128>}, {pipeline_mode = #tpu.pipeline_mode<synchronous>, transform_indices = @transform_3, window_bounds = array<i64: 1, 128>}, {pipeline_mode = #tpu.pipeline_mode<synchronous>, transform_indices = @transform_4, window_bounds = array<i64: 1, 128>}, {pipeline_mode = #tpu.pipeline_mode<synchronous>, transform_indices = @transform_5, window_bounds = array<i64: 576, 64>}, {pipeline_mode = #tpu.pipeline_mode<synchronous>, transform_indices = @transform_6, window_bounds = array<i64: 9, 8, 128>}, {pipeline_mode = #tpu.pipeline_mode<synchronous>, transform_indices = @transform_7, window_bounds = array<i64: 1, 128>}, {pipeline_mode = #tpu.pipeline_mode<synchronous>, transform_indices = @transform_8, window_bounds = array<i64: 1, 128>}, {transform_indices = @transform_9, window_bounds = array<i64: 1, 64, 128>}]} {
    %c0 = arith.constant 0 : index
    %c0_0 = arith.constant 0 : index
    %c0_1 = arith.constant 0 : index
    %0 = vector.load %arg1[%c0, %c0_0, %c0_1] : memref<1x64x128xbf16, #tpu.memory_space<vmem>>, vector<1x64x128xbf16>
    %1 = vector.shape_cast %0 : vector<1x64x128xbf16> to vector<64x128xbf16>
    %c0_2 = arith.constant 0 : index
    %c0_3 = arith.constant 0 : index
    %2 = vector.load %arg2[%c0_2, %c0_3] : memref<576x64xbf16, #tpu.memory_space<vmem>>, vector<576x64xbf16>
    %cst = arith.constant dense<0.000000e+00> : vector<576x128xf32>
    %3 = tpu.matmul %2, %1, %cst {dimension_numbers = #tpu.dot_dimension_numbers<[1], [0], [0], [1], [0, 0, 1, 1], [], []>} : vector<576x64xbf16>, vector<64x128xbf16>, vector<576x128xf32> -> vector<576x128xf32>
    %4 = arith.truncf %3 : vector<576x128xf32> to vector<576x128xbf16>
    %cst_4 = arith.constant 0.000000e+00 : f32
    %5 = vector.broadcast %cst_4 : f32 to vector<64x128xf32>
    %6 = vector.extract_strided_slice %4 {offsets = [0, 0], sizes = [64, 8], strides = [1, 1]} : vector<576x128xbf16> to vector<64x8xbf16>
    %c0_5 = arith.constant 0 : index
    %c0_6 = arith.constant 0 : index
    %c0_7 = arith.constant 0 : index
    %7 = vector.load %arg3[%c0_5, %c0_6, %c0_7] : memref<9x8x128xbf16, #tpu.memory_space<vmem>>, vector<1x8x128xbf16>
    %8 = vector.shape_cast %7 : vector<1x8x128xbf16> to vector<8x128xbf16>
    %cst_8 = arith.constant dense<0.000000e+00> : vector<64x128xf32>
    %9 = tpu.matmul %6, %8, %cst_8 {dimension_numbers = #tpu.dot_dimension_numbers<[1], [0], [0], [1], [0, 0, 1, 1], [], []>} : vector<64x8xbf16>, vector<8x128xbf16>, vector<64x128xf32> -> vector<64x128xf32>
    %10 = arith.addf %5, %9 : vector<64x128xf32>
    %11 = vector.extract_strided_slice %4 {offsets = [64, 0], sizes = [64, 8], strides = [1, 1]} : vector<576x128xbf16> to vector<64x8xbf16>
    %c1 = arith.constant 1 : index
    %c0_9 = arith.constant 0 : index
    %c0_10 = arith.constant 0 : index
    %12 = vector.load %arg3[%c1, %c0_9, %c0_10] : memref<9x8x128xbf16, #tpu.memory_space<vmem>>, vector<1x8x128xbf16>
    %13 = vector.shape_cast %12 : vector<1x8x128xbf16> to vector<8x128xbf16>
    %cst_11 = arith.constant dense<0.000000e+00> : vector<64x128xf32>
    %14 = tpu.matmul %11, %13, %cst_11 {dimension_numbers = #tpu.dot_dimension_numbers<[1], [0], [0], [1], [0, 0, 1, 1], [], []>} : vector<64x8xbf16>, vector<8x128xbf16>, vector<64x128xf32> -> vector<64x128xf32>
    %15 = arith.addf %10, %14 : vector<64x128xf32>
    %16 = vector.extract_strided_slice %4 {offsets = [128, 0], sizes = [64, 8], strides = [1, 1]} : vector<576x128xbf16> to vector<64x8xbf16>
    %c2 = arith.constant 2 : index
    %c0_12 = arith.constant 0 : index
    %c0_13 = arith.constant 0 : index
    %17 = vector.load %arg3[%c2, %c0_12, %c0_13] : memref<9x8x128xbf16, #tpu.memory_space<vmem>>, vector<1x8x128xbf16>
    %18 = vector.shape_cast %17 : vector<1x8x128xbf16> to vector<8x128xbf16>
    %cst_14 = arith.constant dense<0.000000e+00> : vector<64x128xf32>
    %19 = tpu.matmul %16, %18, %cst_14 {dimension_numbers = #tpu.dot_dimension_numbers<[1], [0], [0], [1], [0, 0, 1, 1], [], []>} : vector<64x8xbf16>, vector<8x128xbf16>, vector<64x128xf32> -> vector<64x128xf32>
    %20 = arith.addf %15, %19 : vector<64x128xf32>
    %21 = vector.extract_strided_slice %4 {offsets = [192, 0], sizes = [64, 8], strides = [1, 1]} : vector<576x128xbf16> to vector<64x8xbf16>
    %c3 = arith.constant 3 : index
    %c0_15 = arith.constant 0 : index
    %c0_16 = arith.constant 0 : index
    %22 = vector.load %arg3[%c3, %c0_15, %c0_16] : memref<9x8x128xbf16, #tpu.memory_space<vmem>>, vector<1x8x128xbf16>
    %23 = vector.shape_cast %22 : vector<1x8x128xbf16> to vector<8x128xbf16>
    %cst_17 = arith.constant dense<0.000000e+00> : vector<64x128xf32>
    %24 = tpu.matmul %21, %23, %cst_17 {dimension_numbers = #tpu.dot_dimension_numbers<[1], [0], [0], [1], [0, 0, 1, 1], [], []>} : vector<64x8xbf16>, vector<8x128xbf16>, vector<64x128xf32> -> vector<64x128xf32>
    %25 = arith.addf %20, %24 : vector<64x128xf32>
    %26 = vector.extract_strided_slice %4 {offsets = [256, 0], sizes = [64, 8], strides = [1, 1]} : vector<576x128xbf16> to vector<64x8xbf16>
    %c4 = arith.constant 4 : index
    %c0_18 = arith.constant 0 : index
    %c0_19 = arith.constant 0 : index
    %27 = vector.load %arg3[%c4, %c0_18, %c0_19] : memref<9x8x128xbf16, #tpu.memory_space<vmem>>, vector<1x8x128xbf16>
    %28 = vector.shape_cast %27 : vector<1x8x128xbf16> to vector<8x128xbf16>
    %cst_20 = arith.constant dense<0.000000e+00> : vector<64x128xf32>
    %29 = tpu.matmul %26, %28, %cst_20 {dimension_numbers = #tpu.dot_dimension_numbers<[1], [0], [0], [1], [0, 0, 1, 1], [], []>} : vector<64x8xbf16>, vector<8x128xbf16>, vector<64x128xf32> -> vector<64x128xf32>
    %30 = arith.addf %25, %29 : vector<64x128xf32>
    %31 = vector.extract_strided_slice %4 {offsets = [320, 0], sizes = [64, 8], strides = [1, 1]} : vector<576x128xbf16> to vector<64x8xbf16>
    %c5 = arith.constant 5 : index
    %c0_21 = arith.constant 0 : index
    %c0_22 = arith.constant 0 : index
    %32 = vector.load %arg3[%c5, %c0_21, %c0_22] : memref<9x8x128xbf16, #tpu.memory_space<vmem>>, vector<1x8x128xbf16>
    %33 = vector.shape_cast %32 : vector<1x8x128xbf16> to vector<8x128xbf16>
    %cst_23 = arith.constant dense<0.000000e+00> : vector<64x128xf32>
    %34 = tpu.matmul %31, %33, %cst_23 {dimension_numbers = #tpu.dot_dimension_numbers<[1], [0], [0], [1], [0, 0, 1, 1], [], []>} : vector<64x8xbf16>, vector<8x128xbf16>, vector<64x128xf32> -> vector<64x128xf32>
    %35 = arith.addf %30, %34 : vector<64x128xf32>
    %36 = vector.extract_strided_slice %4 {offsets = [384, 0], sizes = [64, 8], strides = [1, 1]} : vector<576x128xbf16> to vector<64x8xbf16>
    %c6 = arith.constant 6 : index
    %c0_24 = arith.constant 0 : index
    %c0_25 = arith.constant 0 : index
    %37 = vector.load %arg3[%c6, %c0_24, %c0_25] : memref<9x8x128xbf16, #tpu.memory_space<vmem>>, vector<1x8x128xbf16>
    %38 = vector.shape_cast %37 : vector<1x8x128xbf16> to vector<8x128xbf16>
    %cst_26 = arith.constant dense<0.000000e+00> : vector<64x128xf32>
    %39 = tpu.matmul %36, %38, %cst_26 {dimension_numbers = #tpu.dot_dimension_numbers<[1], [0], [0], [1], [0, 0, 1, 1], [], []>} : vector<64x8xbf16>, vector<8x128xbf16>, vector<64x128xf32> -> vector<64x128xf32>
    %40 = arith.addf %35, %39 : vector<64x128xf32>
    %41 = vector.extract_strided_slice %4 {offsets = [448, 0], sizes = [64, 8], strides = [1, 1]} : vector<576x128xbf16> to vector<64x8xbf16>
    %c7 = arith.constant 7 : index
    %c0_27 = arith.constant 0 : index
    %c0_28 = arith.constant 0 : index
    %42 = vector.load %arg3[%c7, %c0_27, %c0_28] : memref<9x8x128xbf16, #tpu.memory_space<vmem>>, vector<1x8x128xbf16>
    %43 = vector.shape_cast %42 : vector<1x8x128xbf16> to vector<8x128xbf16>
    %cst_29 = arith.constant dense<0.000000e+00> : vector<64x128xf32>
    %44 = tpu.matmul %41, %43, %cst_29 {dimension_numbers = #tpu.dot_dimension_numbers<[1], [0], [0], [1], [0, 0, 1, 1], [], []>} : vector<64x8xbf16>, vector<8x128xbf16>, vector<64x128xf32> -> vector<64x128xf32>
    %45 = arith.addf %40, %44 : vector<64x128xf32>
    %46 = vector.extract_strided_slice %4 {offsets = [512, 0], sizes = [64, 8], strides = [1, 1]} : vector<576x128xbf16> to vector<64x8xbf16>
    %c8 = arith.constant 8 : index
    %c0_30 = arith.constant 0 : index
    %c0_31 = arith.constant 0 : index
    %47 = vector.load %arg3[%c8, %c0_30, %c0_31] : memref<9x8x128xbf16, #tpu.memory_space<vmem>>, vector<1x8x128xbf16>
    %48 = vector.shape_cast %47 : vector<1x8x128xbf16> to vector<8x128xbf16>
    %cst_32 = arith.constant dense<0.000000e+00> : vector<64x128xf32>
    %49 = tpu.matmul %46, %48, %cst_32 {dimension_numbers = #tpu.dot_dimension_numbers<[1], [0], [0], [1], [0, 0, 1, 1], [], []>} : vector<64x8xbf16>, vector<8x128xbf16>, vector<64x128xf32> -> vector<64x128xf32>
    %50 = arith.addf %45, %49 : vector<64x128xf32>
    %c0_33 = arith.constant 0 : index
    %c0_34 = arith.constant 0 : index
    %51 = vector.load %arg4[%c0_33, %c0_34] : memref<1x128xf32, #tpu.memory_space<vmem>>, vector<1x128xf32>
    %c0_35 = arith.constant 0 : index
    %c0_36 = arith.constant 0 : index
    %52 = vector.load %arg5[%c0_35, %c0_36] : memref<1x128xf32, #tpu.memory_space<vmem>>, vector<1x128xf32>
    %53 = vector.shape_cast %50 : vector<64x128xf32> to vector<1x64x128xf32>
    %cst_37 = arith.constant dense<0.000000e+00> : vector<1xf32>
    %54 = vector.multi_reduction <add>, %53, %cst_37 [1, 2] : vector<1x64x128xf32> to vector<1xf32>
    %55 = vector.shape_cast %54 : vector<1xf32> to vector<1x1x1xf32>
    %56 = vector.extract %55[0, 0, 0] : f32 from vector<1x1x1xf32>
    %57 = arith.mulf %50, %50 : vector<64x128xf32>
    %58 = vector.shape_cast %57 : vector<64x128xf32> to vector<1x64x128xf32>
    %cst_38 = arith.constant dense<0.000000e+00> : vector<1xf32>
    %59 = vector.multi_reduction <add>, %58, %cst_38 [1, 2] : vector<1x64x128xf32> to vector<1xf32>
    %60 = vector.shape_cast %59 : vector<1xf32> to vector<1x1x1xf32>
    %61 = vector.extract %60[0, 0, 0] : f32 from vector<1x1x1xf32>
    %cst_39 = arith.constant 0.001953125 : f32
    %62 = arith.mulf %56, %cst_39 : f32
    %cst_40 = arith.constant 0.001953125 : f32
    %63 = arith.mulf %61, %cst_40 : f32
    %64 = arith.mulf %62, %62 : f32
    %65 = arith.subf %63, %64 : f32
    %cst_41 = arith.constant 9.99999974E-6 : f32
    %66 = arith.addf %65, %cst_41 : f32
    %67 = math.rsqrt %66 : f32
    %68 = vector.broadcast %62 : f32 to vector<64x128xf32>
    %69 = arith.subf %50, %68 : vector<64x128xf32>
    %70 = vector.broadcast %67 : f32 to vector<64x128xf32>
    %71 = arith.mulf %69, %70 : vector<64x128xf32>
    %72 = vector.broadcast %51 : vector<1x128xf32> to vector<64x128xf32>
    %73 = arith.mulf %71, %72 : vector<64x128xf32>
    %74 = vector.broadcast %52 : vector<1x128xf32> to vector<64x128xf32>
    %75 = arith.addf %73, %74 : vector<64x128xf32>
    %cst_42 = arith.constant 5.000000e-01 : f32
    %76 = vector.broadcast %cst_42 : f32 to vector<64x128xf32>
    %77 = arith.mulf %76, %75 : vector<64x128xf32>
    %cst_43 = arith.constant 0.707106769 : f32
    %78 = vector.broadcast %cst_43 : f32 to vector<64x128xf32>
    %79 = arith.mulf %75, %78 : vector<64x128xf32>
    %80 = math.erf %79 : vector<64x128xf32>
    %cst_44 = arith.constant 1.000000e+00 : f32
    %81 = vector.broadcast %cst_44 : f32 to vector<64x128xf32>
    %82 = arith.addf %81, %80 : vector<64x128xf32>
    %83 = arith.mulf %77, %82 : vector<64x128xf32>
    %84 = arith.truncf %83 : vector<64x128xf32> to vector<64x128xbf16>
    %c0_45 = arith.constant 0 : index
    %c0_46 = arith.constant 0 : index
    %85 = vector.load %arg6[%c0_45, %c0_46] : memref<576x64xbf16, #tpu.memory_space<vmem>>, vector<576x64xbf16>
    %cst_47 = arith.constant dense<0.000000e+00> : vector<576x128xf32>
    %86 = tpu.matmul %85, %84, %cst_47 {dimension_numbers = #tpu.dot_dimension_numbers<[1], [0], [0], [1], [0, 0, 1, 1], [], []>} : vector<576x64xbf16>, vector<64x128xbf16>, vector<576x128xf32> -> vector<576x128xf32>
    %87 = arith.truncf %86 : vector<576x128xf32> to vector<576x128xbf16>
    %cst_48 = arith.constant 0.000000e+00 : f32
    %88 = vector.broadcast %cst_48 : f32 to vector<64x128xf32>
    %89 = vector.extract_strided_slice %87 {offsets = [0, 0], sizes = [64, 8], strides = [1, 1]} : vector<576x128xbf16> to vector<64x8xbf16>
    %c0_49 = arith.constant 0 : index
    %c0_50 = arith.constant 0 : index
    %c0_51 = arith.constant 0 : index
    %90 = vector.load %arg7[%c0_49, %c0_50, %c0_51] : memref<9x8x128xbf16, #tpu.memory_space<vmem>>, vector<1x8x128xbf16>
    %91 = vector.shape_cast %90 : vector<1x8x128xbf16> to vector<8x128xbf16>
    %cst_52 = arith.constant dense<0.000000e+00> : vector<64x128xf32>
    %92 = tpu.matmul %89, %91, %cst_52 {dimension_numbers = #tpu.dot_dimension_numbers<[1], [0], [0], [1], [0, 0, 1, 1], [], []>} : vector<64x8xbf16>, vector<8x128xbf16>, vector<64x128xf32> -> vector<64x128xf32>
    %93 = arith.addf %88, %92 : vector<64x128xf32>
    %94 = vector.extract_strided_slice %87 {offsets = [64, 0], sizes = [64, 8], strides = [1, 1]} : vector<576x128xbf16> to vector<64x8xbf16>
    %c1_53 = arith.constant 1 : index
    %c0_54 = arith.constant 0 : index
    %c0_55 = arith.constant 0 : index
    %95 = vector.load %arg7[%c1_53, %c0_54, %c0_55] : memref<9x8x128xbf16, #tpu.memory_space<vmem>>, vector<1x8x128xbf16>
    %96 = vector.shape_cast %95 : vector<1x8x128xbf16> to vector<8x128xbf16>
    %cst_56 = arith.constant dense<0.000000e+00> : vector<64x128xf32>
    %97 = tpu.matmul %94, %96, %cst_56 {dimension_numbers = #tpu.dot_dimension_numbers<[1], [0], [0], [1], [0, 0, 1, 1], [], []>} : vector<64x8xbf16>, vector<8x128xbf16>, vector<64x128xf32> -> vector<64x128xf32>
    %98 = arith.addf %93, %97 : vector<64x128xf32>
    %99 = vector.extract_strided_slice %87 {offsets = [128, 0], sizes = [64, 8], strides = [1, 1]} : vector<576x128xbf16> to vector<64x8xbf16>
    %c2_57 = arith.constant 2 : index
    %c0_58 = arith.constant 0 : index
    %c0_59 = arith.constant 0 : index
    %100 = vector.load %arg7[%c2_57, %c0_58, %c0_59] : memref<9x8x128xbf16, #tpu.memory_space<vmem>>, vector<1x8x128xbf16>
    %101 = vector.shape_cast %100 : vector<1x8x128xbf16> to vector<8x128xbf16>
    %cst_60 = arith.constant dense<0.000000e+00> : vector<64x128xf32>
    %102 = tpu.matmul %99, %101, %cst_60 {dimension_numbers = #tpu.dot_dimension_numbers<[1], [0], [0], [1], [0, 0, 1, 1], [], []>} : vector<64x8xbf16>, vector<8x128xbf16>, vector<64x128xf32> -> vector<64x128xf32>
    %103 = arith.addf %98, %102 : vector<64x128xf32>
    %104 = vector.extract_strided_slice %87 {offsets = [192, 0], sizes = [64, 8], strides = [1, 1]} : vector<576x128xbf16> to vector<64x8xbf16>
    %c3_61 = arith.constant 3 : index
    %c0_62 = arith.constant 0 : index
    %c0_63 = arith.constant 0 : index
    %105 = vector.load %arg7[%c3_61, %c0_62, %c0_63] : memref<9x8x128xbf16, #tpu.memory_space<vmem>>, vector<1x8x128xbf16>
    %106 = vector.shape_cast %105 : vector<1x8x128xbf16> to vector<8x128xbf16>
    %cst_64 = arith.constant dense<0.000000e+00> : vector<64x128xf32>
    %107 = tpu.matmul %104, %106, %cst_64 {dimension_numbers = #tpu.dot_dimension_numbers<[1], [0], [0], [1], [0, 0, 1, 1], [], []>} : vector<64x8xbf16>, vector<8x128xbf16>, vector<64x128xf32> -> vector<64x128xf32>
    %108 = arith.addf %103, %107 : vector<64x128xf32>
    %109 = vector.extract_strided_slice %87 {offsets = [256, 0], sizes = [64, 8], strides = [1, 1]} : vector<576x128xbf16> to vector<64x8xbf16>
    %c4_65 = arith.constant 4 : index
    %c0_66 = arith.constant 0 : index
    %c0_67 = arith.constant 0 : index
    %110 = vector.load %arg7[%c4_65, %c0_66, %c0_67] : memref<9x8x128xbf16, #tpu.memory_space<vmem>>, vector<1x8x128xbf16>
    %111 = vector.shape_cast %110 : vector<1x8x128xbf16> to vector<8x128xbf16>
    %cst_68 = arith.constant dense<0.000000e+00> : vector<64x128xf32>
    %112 = tpu.matmul %109, %111, %cst_68 {dimension_numbers = #tpu.dot_dimension_numbers<[1], [0], [0], [1], [0, 0, 1, 1], [], []>} : vector<64x8xbf16>, vector<8x128xbf16>, vector<64x128xf32> -> vector<64x128xf32>
    %113 = arith.addf %108, %112 : vector<64x128xf32>
    %114 = vector.extract_strided_slice %87 {offsets = [320, 0], sizes = [64, 8], strides = [1, 1]} : vector<576x128xbf16> to vector<64x8xbf16>
    %c5_69 = arith.constant 5 : index
    %c0_70 = arith.constant 0 : index
    %c0_71 = arith.constant 0 : index
    %115 = vector.load %arg7[%c5_69, %c0_70, %c0_71] : memref<9x8x128xbf16, #tpu.memory_space<vmem>>, vector<1x8x128xbf16>
    %116 = vector.shape_cast %115 : vector<1x8x128xbf16> to vector<8x128xbf16>
    %cst_72 = arith.constant dense<0.000000e+00> : vector<64x128xf32>
    %117 = tpu.matmul %114, %116, %cst_72 {dimension_numbers = #tpu.dot_dimension_numbers<[1], [0], [0], [1], [0, 0, 1, 1], [], []>} : vector<64x8xbf16>, vector<8x128xbf16>, vector<64x128xf32> -> vector<64x128xf32>
    %118 = arith.addf %113, %117 : vector<64x128xf32>
    %119 = vector.extract_strided_slice %87 {offsets = [384, 0], sizes = [64, 8], strides = [1, 1]} : vector<576x128xbf16> to vector<64x8xbf16>
    %c6_73 = arith.constant 6 : index
    %c0_74 = arith.constant 0 : index
    %c0_75 = arith.constant 0 : index
    %120 = vector.load %arg7[%c6_73, %c0_74, %c0_75] : memref<9x8x128xbf16, #tpu.memory_space<vmem>>, vector<1x8x128xbf16>
    %121 = vector.shape_cast %120 : vector<1x8x128xbf16> to vector<8x128xbf16>
    %cst_76 = arith.constant dense<0.000000e+00> : vector<64x128xf32>
    %122 = tpu.matmul %119, %121, %cst_76 {dimension_numbers = #tpu.dot_dimension_numbers<[1], [0], [0], [1], [0, 0, 1, 1], [], []>} : vector<64x8xbf16>, vector<8x128xbf16>, vector<64x128xf32> -> vector<64x128xf32>
    %123 = arith.addf %118, %122 : vector<64x128xf32>
    %124 = vector.extract_strided_slice %87 {offsets = [448, 0], sizes = [64, 8], strides = [1, 1]} : vector<576x128xbf16> to vector<64x8xbf16>
    %c7_77 = arith.constant 7 : index
    %c0_78 = arith.constant 0 : index
    %c0_79 = arith.constant 0 : index
    %125 = vector.load %arg7[%c7_77, %c0_78, %c0_79] : memref<9x8x128xbf16, #tpu.memory_space<vmem>>, vector<1x8x128xbf16>
    %126 = vector.shape_cast %125 : vector<1x8x128xbf16> to vector<8x128xbf16>
    %cst_80 = arith.constant dense<0.000000e+00> : vector<64x128xf32>
    %127 = tpu.matmul %124, %126, %cst_80 {dimension_numbers = #tpu.dot_dimension_numbers<[1], [0], [0], [1], [0, 0, 1, 1], [], []>} : vector<64x8xbf16>, vector<8x128xbf16>, vector<64x128xf32> -> vector<64x128xf32>
    %128 = arith.addf %123, %127 : vector<64x128xf32>
    %129 = vector.extract_strided_slice %87 {offsets = [512, 0], sizes = [64, 8], strides = [1, 1]} : vector<576x128xbf16> to vector<64x8xbf16>
    %c8_81 = arith.constant 8 : index
    %c0_82 = arith.constant 0 : index
    %c0_83 = arith.constant 0 : index
    %130 = vector.load %arg7[%c8_81, %c0_82, %c0_83] : memref<9x8x128xbf16, #tpu.memory_space<vmem>>, vector<1x8x128xbf16>
    %131 = vector.shape_cast %130 : vector<1x8x128xbf16> to vector<8x128xbf16>
    %cst_84 = arith.constant dense<0.000000e+00> : vector<64x128xf32>
    %132 = tpu.matmul %129, %131, %cst_84 {dimension_numbers = #tpu.dot_dimension_numbers<[1], [0], [0], [1], [0, 0, 1, 1], [], []>} : vector<64x8xbf16>, vector<8x128xbf16>, vector<64x128xf32> -> vector<64x128xf32>
    %133 = arith.addf %128, %132 : vector<64x128xf32>
    %134 = arith.extf %1 : vector<64x128xbf16> to vector<64x128xf32>
    %c0_85 = arith.constant 0 : index
    %c0_86 = arith.constant 0 : index
    %135 = vector.load %arg8[%c0_85, %c0_86] : memref<1x128xf32, #tpu.memory_space<vmem>>, vector<1x128xf32>
    %c0_87 = arith.constant 0 : index
    %c0_88 = arith.constant 0 : index
    %136 = vector.load %arg9[%c0_87, %c0_88] : memref<1x128xf32, #tpu.memory_space<vmem>>, vector<1x128xf32>
    %137 = vector.shape_cast %133 : vector<64x128xf32> to vector<1x64x128xf32>
    %cst_89 = arith.constant dense<0.000000e+00> : vector<1xf32>
    %138 = vector.multi_reduction <add>, %137, %cst_89 [1, 2] : vector<1x64x128xf32> to vector<1xf32>
    %139 = vector.shape_cast %138 : vector<1xf32> to vector<1x1x1xf32>
    %140 = vector.extract %139[0, 0, 0] : f32 from vector<1x1x1xf32>
    %141 = arith.mulf %133, %133 : vector<64x128xf32>
    %142 = vector.shape_cast %141 : vector<64x128xf32> to vector<1x64x128xf32>
    %cst_90 = arith.constant dense<0.000000e+00> : vector<1xf32>
    %143 = vector.multi_reduction <add>, %142, %cst_90 [1, 2] : vector<1x64x128xf32> to vector<1xf32>
    %144 = vector.shape_cast %143 : vector<1xf32> to vector<1x1x1xf32>
    %145 = vector.extract %144[0, 0, 0] : f32 from vector<1x1x1xf32>
    %cst_91 = arith.constant 0.001953125 : f32
    %146 = arith.mulf %140, %cst_91 : f32
    %cst_92 = arith.constant 0.001953125 : f32
    %147 = arith.mulf %145, %cst_92 : f32
    %148 = arith.mulf %146, %146 : f32
    %149 = arith.subf %147, %148 : f32
    %cst_93 = arith.constant 9.99999974E-6 : f32
    %150 = arith.addf %149, %cst_93 : f32
    %151 = math.rsqrt %150 : f32
    %152 = vector.broadcast %146 : f32 to vector<64x128xf32>
    %153 = arith.subf %133, %152 : vector<64x128xf32>
    %154 = vector.broadcast %151 : f32 to vector<64x128xf32>
    %155 = arith.mulf %153, %154 : vector<64x128xf32>
    %156 = vector.broadcast %135 : vector<1x128xf32> to vector<64x128xf32>
    %157 = arith.mulf %155, %156 : vector<64x128xf32>
    %158 = vector.broadcast %136 : vector<1x128xf32> to vector<64x128xf32>
    %159 = arith.addf %157, %158 : vector<64x128xf32>
    %160 = arith.addf %159, %134 : vector<64x128xf32>
    %cst_94 = arith.constant 5.000000e-01 : f32
    %161 = vector.broadcast %cst_94 : f32 to vector<64x128xf32>
    %162 = arith.mulf %161, %160 : vector<64x128xf32>
    %cst_95 = arith.constant 0.707106769 : f32
    %163 = vector.broadcast %cst_95 : f32 to vector<64x128xf32>
    %164 = arith.mulf %160, %163 : vector<64x128xf32>
    %165 = math.erf %164 : vector<64x128xf32>
    %cst_96 = arith.constant 1.000000e+00 : f32
    %166 = vector.broadcast %cst_96 : f32 to vector<64x128xf32>
    %167 = arith.addf %166, %165 : vector<64x128xf32>
    %168 = arith.mulf %162, %167 : vector<64x128xf32>
    %169 = arith.truncf %168 : vector<64x128xf32> to vector<64x128xbf16>
    %c0_97 = arith.constant 0 : index
    %c0_98 = arith.constant 0 : index
    %c0_99 = arith.constant 0 : index
    %170 = vector.load %arg10[%c0_97, %c0_98, %c0_99] : memref<1x64x128xbf16, #tpu.memory_space<vmem>>, vector<1x64x128xbf16>
    %171 = vector.shape_cast %170 : vector<1x64x128xbf16> to vector<64x128xbf16>
    %172 = vector.shape_cast %169 : vector<64x128xbf16> to vector<1x64x128xbf16>
    tpu.vector_store %arg10[%c0_97, %c0_98, %c0_99], %172 {strides = array<i32>} : memref<1x64x128xbf16, #tpu.memory_space<vmem>>, vector<1x64x128xbf16>,
    return
  }
  func.func @transform_0(%arg0: i32) -> (i32, i32, i32) {
    %c0_i32 = arith.constant 0 : i32
    %c0_i32_0 = arith.constant 0 : i32
    %c0_i32_1 = arith.constant 0 : i32
    return %arg0, %c0_i32, %c0_i32_0 : i32, i32, i32
  }
  func.func @transform_1(%arg0: i32) -> (i32, i32) {
    %c0_i32 = arith.constant 0 : i32
    %c0_i32_0 = arith.constant 0 : i32
    %c0_i32_1 = arith.constant 0 : i32
    return %c0_i32, %c0_i32_0 : i32, i32
  }
  func.func @transform_2(%arg0: i32) -> (i32, i32, i32) {
    %c0_i32 = arith.constant 0 : i32
    %c0_i32_0 = arith.constant 0 : i32
    %c0_i32_1 = arith.constant 0 : i32
    %c0_i32_2 = arith.constant 0 : i32
    return %c0_i32, %c0_i32_0, %c0_i32_1 : i32, i32, i32
  }
  func.func @transform_3(%arg0: i32) -> (i32, i32) {
    %c0_i32 = arith.constant 0 : i32
    %c0_i32_0 = arith.constant 0 : i32
    %c0_i32_1 = arith.constant 0 : i32
    return %c0_i32, %c0_i32_0 : i32, i32
  }
  func.func @transform_4(%arg0: i32) -> (i32, i32) {
    %c0_i32 = arith.constant 0 : i32
    %c0_i32_0 = arith.constant 0 : i32
    %c0_i32_1 = arith.constant 0 : i32
    return %c0_i32, %c0_i32_0 : i32, i32
  }
  func.func @transform_5(%arg0: i32) -> (i32, i32) {
    %c0_i32 = arith.constant 0 : i32
    %c0_i32_0 = arith.constant 0 : i32
    %c0_i32_1 = arith.constant 0 : i32
    return %c0_i32, %c0_i32_0 : i32, i32
  }
  func.func @transform_6(%arg0: i32) -> (i32, i32, i32) {
    %c0_i32 = arith.constant 0 : i32
    %c0_i32_0 = arith.constant 0 : i32
    %c0_i32_1 = arith.constant 0 : i32
    %c0_i32_2 = arith.constant 0 : i32
    return %c0_i32, %c0_i32_0, %c0_i32_1 : i32, i32, i32
  }
  func.func @transform_7(%arg0: i32) -> (i32, i32) {
    %c0_i32 = arith.constant 0 : i32
    %c0_i32_0 = arith.constant 0 : i32
    %c0_i32_1 = arith.constant 0 : i32
    return %c0_i32, %c0_i32_0 : i32, i32
  }
  func.func @transform_8(%arg0: i32) -> (i32, i32) {
    %c0_i32 = arith.constant 0 : i32
    %c0_i32_0 = arith.constant 0 : i32
    %c0_i32_1 = arith.constant 0 : i32
    return %c0_i32, %c0_i32_0 : i32, i32
  }
  func.func @transform_9(%arg0: i32) -> (i32, i32, i32) {
    %c0_i32 = arith.constant 0 : i32
    %c0_i32_0 = arith.constant 0 : i32
    %c0_i32_1 = arith.constant 0 : i32
    return %arg0, %c0_i32, %c0_i32_0 : i32, i32, i32
  }
}

module attributes {stable_mosaic.version = 11 : i64} {
  func.func @_block_kernel(%arg0: i32, %arg1: memref<1x64x128xbf16, #tpu.memory_space<vmem>>, %arg2: memref<144x64xbf16, #tpu.memory_space<vmem>>, %arg3: memref<9x8x128xbf16, #tpu.memory_space<vmem>>, %arg4: memref<1x128xf32, #tpu.memory_space<vmem>>, %arg5: memref<1x128xf32, #tpu.memory_space<vmem>>, %arg6: memref<144x16xbf16, #tpu.memory_space<vmem>>, %arg7: memref<9x16x128xbf16, #tpu.memory_space<vmem>>, %arg8: memref<1x128xf32, #tpu.memory_space<vmem>>, %arg9: memref<1x128xf32, #tpu.memory_space<vmem>>, %arg10: memref<16x64xbf16, #tpu.memory_space<vmem>>, %arg11: memref<8x128xbf16, #tpu.memory_space<vmem>>, %arg12: memref<1x128xf32, #tpu.memory_space<vmem>>, %arg13: memref<1x128xf32, #tpu.memory_space<vmem>>, %arg14: memref<1x16x128xbf16, #tpu.memory_space<vmem>>) attributes {dimension_semantics = [#tpu.dimension_semantics<parallel>], iteration_bounds = array<i64: 2>, scalar_prefetch = 0 : i64, scratch_operands = 0 : i64, tpu.core_type = #tpu.core_type<tc>, window_params = [{transform_indices = @transform_0, window_bounds = array<i64: 1, 64, 128>}, {pipeline_mode = #tpu.pipeline_mode<synchronous>, transform_indices = @transform_1, window_bounds = array<i64: 144, 64>}, {pipeline_mode = #tpu.pipeline_mode<synchronous>, transform_indices = @transform_2, window_bounds = array<i64: 9, 8, 128>}, {pipeline_mode = #tpu.pipeline_mode<synchronous>, transform_indices = @transform_3, window_bounds = array<i64: 1, 128>}, {pipeline_mode = #tpu.pipeline_mode<synchronous>, transform_indices = @transform_4, window_bounds = array<i64: 1, 128>}, {pipeline_mode = #tpu.pipeline_mode<synchronous>, transform_indices = @transform_5, window_bounds = array<i64: 144, 16>}, {pipeline_mode = #tpu.pipeline_mode<synchronous>, transform_indices = @transform_6, window_bounds = array<i64: 9, 16, 128>}, {pipeline_mode = #tpu.pipeline_mode<synchronous>, transform_indices = @transform_7, window_bounds = array<i64: 1, 128>}, {pipeline_mode = #tpu.pipeline_mode<synchronous>, transform_indices = @transform_8, window_bounds = array<i64: 1, 128>}, {pipeline_mode = #tpu.pipeline_mode<synchronous>, transform_indices = @transform_9, window_bounds = array<i64: 16, 64>}, {pipeline_mode = #tpu.pipeline_mode<synchronous>, transform_indices = @transform_10, window_bounds = array<i64: 8, 128>}, {pipeline_mode = #tpu.pipeline_mode<synchronous>, transform_indices = @transform_11, window_bounds = array<i64: 1, 128>}, {pipeline_mode = #tpu.pipeline_mode<synchronous>, transform_indices = @transform_12, window_bounds = array<i64: 1, 128>}, {transform_indices = @transform_13, window_bounds = array<i64: 1, 16, 128>}]} {
    %c0 = arith.constant 0 : index
    %c0_0 = arith.constant 0 : index
    %c0_1 = arith.constant 0 : index
    %0 = vector.load %arg1[%c0, %c0_0, %c0_1] : memref<1x64x128xbf16, #tpu.memory_space<vmem>>, vector<1x64x128xbf16>
    %1 = vector.shape_cast %0 : vector<1x64x128xbf16> to vector<64x128xbf16>
    %c0_2 = arith.constant 0 : index
    %c0_3 = arith.constant 0 : index
    %2 = vector.load %arg2[%c0_2, %c0_3] : memref<144x64xbf16, #tpu.memory_space<vmem>>, vector<144x64xbf16>
    %cst = arith.constant dense<0.000000e+00> : vector<144x128xf32>
    %3 = tpu.matmul %2, %1, %cst {dimension_numbers = #tpu.dot_dimension_numbers<[1], [0], [0], [1], [0, 0, 1, 1], [], []>} : vector<144x64xbf16>, vector<64x128xbf16>, vector<144x128xf32> -> vector<144x128xf32>
    %4 = arith.truncf %3 : vector<144x128xf32> to vector<144x128xbf16>
    %cst_4 = arith.constant 0.000000e+00 : f32
    %5 = vector.broadcast %cst_4 : f32 to vector<16x128xf32>
    %6 = vector.extract_strided_slice %4 {offsets = [0, 0], sizes = [16, 8], strides = [1, 1]} : vector<144x128xbf16> to vector<16x8xbf16>
    %c0_5 = arith.constant 0 : index
    %c0_6 = arith.constant 0 : index
    %c0_7 = arith.constant 0 : index
    %7 = vector.load %arg3[%c0_5, %c0_6, %c0_7] : memref<9x8x128xbf16, #tpu.memory_space<vmem>>, vector<1x8x128xbf16>
    %8 = vector.shape_cast %7 : vector<1x8x128xbf16> to vector<8x128xbf16>
    %cst_8 = arith.constant dense<0.000000e+00> : vector<16x128xf32>
    %9 = tpu.matmul %6, %8, %cst_8 {dimension_numbers = #tpu.dot_dimension_numbers<[1], [0], [0], [1], [0, 0, 1, 1], [], []>} : vector<16x8xbf16>, vector<8x128xbf16>, vector<16x128xf32> -> vector<16x128xf32>
    %10 = arith.addf %5, %9 : vector<16x128xf32>
    %11 = vector.extract_strided_slice %4 {offsets = [16, 0], sizes = [16, 8], strides = [1, 1]} : vector<144x128xbf16> to vector<16x8xbf16>
    %c1 = arith.constant 1 : index
    %c0_9 = arith.constant 0 : index
    %c0_10 = arith.constant 0 : index
    %12 = vector.load %arg3[%c1, %c0_9, %c0_10] : memref<9x8x128xbf16, #tpu.memory_space<vmem>>, vector<1x8x128xbf16>
    %13 = vector.shape_cast %12 : vector<1x8x128xbf16> to vector<8x128xbf16>
    %cst_11 = arith.constant dense<0.000000e+00> : vector<16x128xf32>
    %14 = tpu.matmul %11, %13, %cst_11 {dimension_numbers = #tpu.dot_dimension_numbers<[1], [0], [0], [1], [0, 0, 1, 1], [], []>} : vector<16x8xbf16>, vector<8x128xbf16>, vector<16x128xf32> -> vector<16x128xf32>
    %15 = arith.addf %10, %14 : vector<16x128xf32>
    %16 = vector.extract_strided_slice %4 {offsets = [32, 0], sizes = [16, 8], strides = [1, 1]} : vector<144x128xbf16> to vector<16x8xbf16>
    %c2 = arith.constant 2 : index
    %c0_12 = arith.constant 0 : index
    %c0_13 = arith.constant 0 : index
    %17 = vector.load %arg3[%c2, %c0_12, %c0_13] : memref<9x8x128xbf16, #tpu.memory_space<vmem>>, vector<1x8x128xbf16>
    %18 = vector.shape_cast %17 : vector<1x8x128xbf16> to vector<8x128xbf16>
    %cst_14 = arith.constant dense<0.000000e+00> : vector<16x128xf32>
    %19 = tpu.matmul %16, %18, %cst_14 {dimension_numbers = #tpu.dot_dimension_numbers<[1], [0], [0], [1], [0, 0, 1, 1], [], []>} : vector<16x8xbf16>, vector<8x128xbf16>, vector<16x128xf32> -> vector<16x128xf32>
    %20 = arith.addf %15, %19 : vector<16x128xf32>
    %21 = vector.extract_strided_slice %4 {offsets = [48, 0], sizes = [16, 8], strides = [1, 1]} : vector<144x128xbf16> to vector<16x8xbf16>
    %c3 = arith.constant 3 : index
    %c0_15 = arith.constant 0 : index
    %c0_16 = arith.constant 0 : index
    %22 = vector.load %arg3[%c3, %c0_15, %c0_16] : memref<9x8x128xbf16, #tpu.memory_space<vmem>>, vector<1x8x128xbf16>
    %23 = vector.shape_cast %22 : vector<1x8x128xbf16> to vector<8x128xbf16>
    %cst_17 = arith.constant dense<0.000000e+00> : vector<16x128xf32>
    %24 = tpu.matmul %21, %23, %cst_17 {dimension_numbers = #tpu.dot_dimension_numbers<[1], [0], [0], [1], [0, 0, 1, 1], [], []>} : vector<16x8xbf16>, vector<8x128xbf16>, vector<16x128xf32> -> vector<16x128xf32>
    %25 = arith.addf %20, %24 : vector<16x128xf32>
    %26 = vector.extract_strided_slice %4 {offsets = [64, 0], sizes = [16, 8], strides = [1, 1]} : vector<144x128xbf16> to vector<16x8xbf16>
    %c4 = arith.constant 4 : index
    %c0_18 = arith.constant 0 : index
    %c0_19 = arith.constant 0 : index
    %27 = vector.load %arg3[%c4, %c0_18, %c0_19] : memref<9x8x128xbf16, #tpu.memory_space<vmem>>, vector<1x8x128xbf16>
    %28 = vector.shape_cast %27 : vector<1x8x128xbf16> to vector<8x128xbf16>
    %cst_20 = arith.constant dense<0.000000e+00> : vector<16x128xf32>
    %29 = tpu.matmul %26, %28, %cst_20 {dimension_numbers = #tpu.dot_dimension_numbers<[1], [0], [0], [1], [0, 0, 1, 1], [], []>} : vector<16x8xbf16>, vector<8x128xbf16>, vector<16x128xf32> -> vector<16x128xf32>
    %30 = arith.addf %25, %29 : vector<16x128xf32>
    %31 = vector.extract_strided_slice %4 {offsets = [80, 0], sizes = [16, 8], strides = [1, 1]} : vector<144x128xbf16> to vector<16x8xbf16>
    %c5 = arith.constant 5 : index
    %c0_21 = arith.constant 0 : index
    %c0_22 = arith.constant 0 : index
    %32 = vector.load %arg3[%c5, %c0_21, %c0_22] : memref<9x8x128xbf16, #tpu.memory_space<vmem>>, vector<1x8x128xbf16>
    %33 = vector.shape_cast %32 : vector<1x8x128xbf16> to vector<8x128xbf16>
    %cst_23 = arith.constant dense<0.000000e+00> : vector<16x128xf32>
    %34 = tpu.matmul %31, %33, %cst_23 {dimension_numbers = #tpu.dot_dimension_numbers<[1], [0], [0], [1], [0, 0, 1, 1], [], []>} : vector<16x8xbf16>, vector<8x128xbf16>, vector<16x128xf32> -> vector<16x128xf32>
    %35 = arith.addf %30, %34 : vector<16x128xf32>
    %36 = vector.extract_strided_slice %4 {offsets = [96, 0], sizes = [16, 8], strides = [1, 1]} : vector<144x128xbf16> to vector<16x8xbf16>
    %c6 = arith.constant 6 : index
    %c0_24 = arith.constant 0 : index
    %c0_25 = arith.constant 0 : index
    %37 = vector.load %arg3[%c6, %c0_24, %c0_25] : memref<9x8x128xbf16, #tpu.memory_space<vmem>>, vector<1x8x128xbf16>
    %38 = vector.shape_cast %37 : vector<1x8x128xbf16> to vector<8x128xbf16>
    %cst_26 = arith.constant dense<0.000000e+00> : vector<16x128xf32>
    %39 = tpu.matmul %36, %38, %cst_26 {dimension_numbers = #tpu.dot_dimension_numbers<[1], [0], [0], [1], [0, 0, 1, 1], [], []>} : vector<16x8xbf16>, vector<8x128xbf16>, vector<16x128xf32> -> vector<16x128xf32>
    %40 = arith.addf %35, %39 : vector<16x128xf32>
    %41 = vector.extract_strided_slice %4 {offsets = [112, 0], sizes = [16, 8], strides = [1, 1]} : vector<144x128xbf16> to vector<16x8xbf16>
    %c7 = arith.constant 7 : index
    %c0_27 = arith.constant 0 : index
    %c0_28 = arith.constant 0 : index
    %42 = vector.load %arg3[%c7, %c0_27, %c0_28] : memref<9x8x128xbf16, #tpu.memory_space<vmem>>, vector<1x8x128xbf16>
    %43 = vector.shape_cast %42 : vector<1x8x128xbf16> to vector<8x128xbf16>
    %cst_29 = arith.constant dense<0.000000e+00> : vector<16x128xf32>
    %44 = tpu.matmul %41, %43, %cst_29 {dimension_numbers = #tpu.dot_dimension_numbers<[1], [0], [0], [1], [0, 0, 1, 1], [], []>} : vector<16x8xbf16>, vector<8x128xbf16>, vector<16x128xf32> -> vector<16x128xf32>
    %45 = arith.addf %40, %44 : vector<16x128xf32>
    %46 = vector.extract_strided_slice %4 {offsets = [128, 0], sizes = [16, 8], strides = [1, 1]} : vector<144x128xbf16> to vector<16x8xbf16>
    %c8 = arith.constant 8 : index
    %c0_30 = arith.constant 0 : index
    %c0_31 = arith.constant 0 : index
    %47 = vector.load %arg3[%c8, %c0_30, %c0_31] : memref<9x8x128xbf16, #tpu.memory_space<vmem>>, vector<1x8x128xbf16>
    %48 = vector.shape_cast %47 : vector<1x8x128xbf16> to vector<8x128xbf16>
    %cst_32 = arith.constant dense<0.000000e+00> : vector<16x128xf32>
    %49 = tpu.matmul %46, %48, %cst_32 {dimension_numbers = #tpu.dot_dimension_numbers<[1], [0], [0], [1], [0, 0, 1, 1], [], []>} : vector<16x8xbf16>, vector<8x128xbf16>, vector<16x128xf32> -> vector<16x128xf32>
    %50 = arith.addf %45, %49 : vector<16x128xf32>
    %c0_33 = arith.constant 0 : index
    %c0_34 = arith.constant 0 : index
    %51 = vector.load %arg4[%c0_33, %c0_34] : memref<1x128xf32, #tpu.memory_space<vmem>>, vector<1x128xf32>
    %c0_35 = arith.constant 0 : index
    %c0_36 = arith.constant 0 : index
    %52 = vector.load %arg5[%c0_35, %c0_36] : memref<1x128xf32, #tpu.memory_space<vmem>>, vector<1x128xf32>
    %53 = vector.shape_cast %50 : vector<16x128xf32> to vector<1x16x128xf32>
    %cst_37 = arith.constant dense<0.000000e+00> : vector<1xf32>
    %54 = vector.multi_reduction <add>, %53, %cst_37 [1, 2] : vector<1x16x128xf32> to vector<1xf32>
    %55 = vector.shape_cast %54 : vector<1xf32> to vector<1x1x1xf32>
    %56 = vector.extract %55[0, 0, 0] : f32 from vector<1x1x1xf32>
    %57 = arith.mulf %50, %50 : vector<16x128xf32>
    %58 = vector.shape_cast %57 : vector<16x128xf32> to vector<1x16x128xf32>
    %cst_38 = arith.constant dense<0.000000e+00> : vector<1xf32>
    %59 = vector.multi_reduction <add>, %58, %cst_38 [1, 2] : vector<1x16x128xf32> to vector<1xf32>
    %60 = vector.shape_cast %59 : vector<1xf32> to vector<1x1x1xf32>
    %61 = vector.extract %60[0, 0, 0] : f32 from vector<1x1x1xf32>
    %cst_39 = arith.constant 3.906250e-03 : f32
    %62 = arith.mulf %56, %cst_39 : f32
    %cst_40 = arith.constant 3.906250e-03 : f32
    %63 = arith.mulf %61, %cst_40 : f32
    %64 = arith.mulf %62, %62 : f32
    %65 = arith.subf %63, %64 : f32
    %cst_41 = arith.constant 9.99999974E-6 : f32
    %66 = arith.addf %65, %cst_41 : f32
    %67 = math.rsqrt %66 : f32
    %68 = vector.broadcast %62 : f32 to vector<16x128xf32>
    %69 = arith.subf %50, %68 : vector<16x128xf32>
    %70 = vector.broadcast %67 : f32 to vector<16x128xf32>
    %71 = arith.mulf %69, %70 : vector<16x128xf32>
    %72 = vector.broadcast %51 : vector<1x128xf32> to vector<16x128xf32>
    %73 = arith.mulf %71, %72 : vector<16x128xf32>
    %74 = vector.broadcast %52 : vector<1x128xf32> to vector<16x128xf32>
    %75 = arith.addf %73, %74 : vector<16x128xf32>
    %cst_42 = arith.constant 5.000000e-01 : f32
    %76 = vector.broadcast %cst_42 : f32 to vector<16x128xf32>
    %77 = arith.mulf %76, %75 : vector<16x128xf32>
    %cst_43 = arith.constant 0.707106769 : f32
    %78 = vector.broadcast %cst_43 : f32 to vector<16x128xf32>
    %79 = arith.mulf %75, %78 : vector<16x128xf32>
    %80 = math.erf %79 : vector<16x128xf32>
    %cst_44 = arith.constant 1.000000e+00 : f32
    %81 = vector.broadcast %cst_44 : f32 to vector<16x128xf32>
    %82 = arith.addf %81, %80 : vector<16x128xf32>
    %83 = arith.mulf %77, %82 : vector<16x128xf32>
    %84 = arith.truncf %83 : vector<16x128xf32> to vector<16x128xbf16>
    %c0_45 = arith.constant 0 : index
    %c0_46 = arith.constant 0 : index
    %85 = vector.load %arg6[%c0_45, %c0_46] : memref<144x16xbf16, #tpu.memory_space<vmem>>, vector<144x16xbf16>
    %cst_47 = arith.constant dense<0.000000e+00> : vector<144x128xf32>
    %86 = tpu.matmul %85, %84, %cst_47 {dimension_numbers = #tpu.dot_dimension_numbers<[1], [0], [0], [1], [0, 0, 1, 1], [], []>} : vector<144x16xbf16>, vector<16x128xbf16>, vector<144x128xf32> -> vector<144x128xf32>
    %87 = arith.truncf %86 : vector<144x128xf32> to vector<144x128xbf16>
    %cst_48 = arith.constant 0.000000e+00 : f32
    %88 = vector.broadcast %cst_48 : f32 to vector<16x128xf32>
    %89 = vector.extract_strided_slice %87 {offsets = [0, 0], sizes = [16, 16], strides = [1, 1]} : vector<144x128xbf16> to vector<16x16xbf16>
    %c0_49 = arith.constant 0 : index
    %c0_50 = arith.constant 0 : index
    %c0_51 = arith.constant 0 : index
    %90 = vector.load %arg7[%c0_49, %c0_50, %c0_51] : memref<9x16x128xbf16, #tpu.memory_space<vmem>>, vector<1x16x128xbf16>
    %91 = vector.shape_cast %90 : vector<1x16x128xbf16> to vector<16x128xbf16>
    %cst_52 = arith.constant dense<0.000000e+00> : vector<16x128xf32>
    %92 = tpu.matmul %89, %91, %cst_52 {dimension_numbers = #tpu.dot_dimension_numbers<[1], [0], [0], [1], [0, 0, 1, 1], [], []>} : vector<16x16xbf16>, vector<16x128xbf16>, vector<16x128xf32> -> vector<16x128xf32>
    %93 = arith.addf %88, %92 : vector<16x128xf32>
    %94 = vector.extract_strided_slice %87 {offsets = [16, 0], sizes = [16, 16], strides = [1, 1]} : vector<144x128xbf16> to vector<16x16xbf16>
    %c1_53 = arith.constant 1 : index
    %c0_54 = arith.constant 0 : index
    %c0_55 = arith.constant 0 : index
    %95 = vector.load %arg7[%c1_53, %c0_54, %c0_55] : memref<9x16x128xbf16, #tpu.memory_space<vmem>>, vector<1x16x128xbf16>
    %96 = vector.shape_cast %95 : vector<1x16x128xbf16> to vector<16x128xbf16>
    %cst_56 = arith.constant dense<0.000000e+00> : vector<16x128xf32>
    %97 = tpu.matmul %94, %96, %cst_56 {dimension_numbers = #tpu.dot_dimension_numbers<[1], [0], [0], [1], [0, 0, 1, 1], [], []>} : vector<16x16xbf16>, vector<16x128xbf16>, vector<16x128xf32> -> vector<16x128xf32>
    %98 = arith.addf %93, %97 : vector<16x128xf32>
    %99 = vector.extract_strided_slice %87 {offsets = [32, 0], sizes = [16, 16], strides = [1, 1]} : vector<144x128xbf16> to vector<16x16xbf16>
    %c2_57 = arith.constant 2 : index
    %c0_58 = arith.constant 0 : index
    %c0_59 = arith.constant 0 : index
    %100 = vector.load %arg7[%c2_57, %c0_58, %c0_59] : memref<9x16x128xbf16, #tpu.memory_space<vmem>>, vector<1x16x128xbf16>
    %101 = vector.shape_cast %100 : vector<1x16x128xbf16> to vector<16x128xbf16>
    %cst_60 = arith.constant dense<0.000000e+00> : vector<16x128xf32>
    %102 = tpu.matmul %99, %101, %cst_60 {dimension_numbers = #tpu.dot_dimension_numbers<[1], [0], [0], [1], [0, 0, 1, 1], [], []>} : vector<16x16xbf16>, vector<16x128xbf16>, vector<16x128xf32> -> vector<16x128xf32>
    %103 = arith.addf %98, %102 : vector<16x128xf32>
    %104 = vector.extract_strided_slice %87 {offsets = [48, 0], sizes = [16, 16], strides = [1, 1]} : vector<144x128xbf16> to vector<16x16xbf16>
    %c3_61 = arith.constant 3 : index
    %c0_62 = arith.constant 0 : index
    %c0_63 = arith.constant 0 : index
    %105 = vector.load %arg7[%c3_61, %c0_62, %c0_63] : memref<9x16x128xbf16, #tpu.memory_space<vmem>>, vector<1x16x128xbf16>
    %106 = vector.shape_cast %105 : vector<1x16x128xbf16> to vector<16x128xbf16>
    %cst_64 = arith.constant dense<0.000000e+00> : vector<16x128xf32>
    %107 = tpu.matmul %104, %106, %cst_64 {dimension_numbers = #tpu.dot_dimension_numbers<[1], [0], [0], [1], [0, 0, 1, 1], [], []>} : vector<16x16xbf16>, vector<16x128xbf16>, vector<16x128xf32> -> vector<16x128xf32>
    %108 = arith.addf %103, %107 : vector<16x128xf32>
    %109 = vector.extract_strided_slice %87 {offsets = [64, 0], sizes = [16, 16], strides = [1, 1]} : vector<144x128xbf16> to vector<16x16xbf16>
    %c4_65 = arith.constant 4 : index
    %c0_66 = arith.constant 0 : index
    %c0_67 = arith.constant 0 : index
    %110 = vector.load %arg7[%c4_65, %c0_66, %c0_67] : memref<9x16x128xbf16, #tpu.memory_space<vmem>>, vector<1x16x128xbf16>
    %111 = vector.shape_cast %110 : vector<1x16x128xbf16> to vector<16x128xbf16>
    %cst_68 = arith.constant dense<0.000000e+00> : vector<16x128xf32>
    %112 = tpu.matmul %109, %111, %cst_68 {dimension_numbers = #tpu.dot_dimension_numbers<[1], [0], [0], [1], [0, 0, 1, 1], [], []>} : vector<16x16xbf16>, vector<16x128xbf16>, vector<16x128xf32> -> vector<16x128xf32>
    %113 = arith.addf %108, %112 : vector<16x128xf32>
    %114 = vector.extract_strided_slice %87 {offsets = [80, 0], sizes = [16, 16], strides = [1, 1]} : vector<144x128xbf16> to vector<16x16xbf16>
    %c5_69 = arith.constant 5 : index
    %c0_70 = arith.constant 0 : index
    %c0_71 = arith.constant 0 : index
    %115 = vector.load %arg7[%c5_69, %c0_70, %c0_71] : memref<9x16x128xbf16, #tpu.memory_space<vmem>>, vector<1x16x128xbf16>
    %116 = vector.shape_cast %115 : vector<1x16x128xbf16> to vector<16x128xbf16>
    %cst_72 = arith.constant dense<0.000000e+00> : vector<16x128xf32>
    %117 = tpu.matmul %114, %116, %cst_72 {dimension_numbers = #tpu.dot_dimension_numbers<[1], [0], [0], [1], [0, 0, 1, 1], [], []>} : vector<16x16xbf16>, vector<16x128xbf16>, vector<16x128xf32> -> vector<16x128xf32>
    %118 = arith.addf %113, %117 : vector<16x128xf32>
    %119 = vector.extract_strided_slice %87 {offsets = [96, 0], sizes = [16, 16], strides = [1, 1]} : vector<144x128xbf16> to vector<16x16xbf16>
    %c6_73 = arith.constant 6 : index
    %c0_74 = arith.constant 0 : index
    %c0_75 = arith.constant 0 : index
    %120 = vector.load %arg7[%c6_73, %c0_74, %c0_75] : memref<9x16x128xbf16, #tpu.memory_space<vmem>>, vector<1x16x128xbf16>
    %121 = vector.shape_cast %120 : vector<1x16x128xbf16> to vector<16x128xbf16>
    %cst_76 = arith.constant dense<0.000000e+00> : vector<16x128xf32>
    %122 = tpu.matmul %119, %121, %cst_76 {dimension_numbers = #tpu.dot_dimension_numbers<[1], [0], [0], [1], [0, 0, 1, 1], [], []>} : vector<16x16xbf16>, vector<16x128xbf16>, vector<16x128xf32> -> vector<16x128xf32>
    %123 = arith.addf %118, %122 : vector<16x128xf32>
    %124 = vector.extract_strided_slice %87 {offsets = [112, 0], sizes = [16, 16], strides = [1, 1]} : vector<144x128xbf16> to vector<16x16xbf16>
    %c7_77 = arith.constant 7 : index
    %c0_78 = arith.constant 0 : index
    %c0_79 = arith.constant 0 : index
    %125 = vector.load %arg7[%c7_77, %c0_78, %c0_79] : memref<9x16x128xbf16, #tpu.memory_space<vmem>>, vector<1x16x128xbf16>
    %126 = vector.shape_cast %125 : vector<1x16x128xbf16> to vector<16x128xbf16>
    %cst_80 = arith.constant dense<0.000000e+00> : vector<16x128xf32>
    %127 = tpu.matmul %124, %126, %cst_80 {dimension_numbers = #tpu.dot_dimension_numbers<[1], [0], [0], [1], [0, 0, 1, 1], [], []>} : vector<16x16xbf16>, vector<16x128xbf16>, vector<16x128xf32> -> vector<16x128xf32>
    %128 = arith.addf %123, %127 : vector<16x128xf32>
    %129 = vector.extract_strided_slice %87 {offsets = [128, 0], sizes = [16, 16], strides = [1, 1]} : vector<144x128xbf16> to vector<16x16xbf16>
    %c8_81 = arith.constant 8 : index
    %c0_82 = arith.constant 0 : index
    %c0_83 = arith.constant 0 : index
    %130 = vector.load %arg7[%c8_81, %c0_82, %c0_83] : memref<9x16x128xbf16, #tpu.memory_space<vmem>>, vector<1x16x128xbf16>
    %131 = vector.shape_cast %130 : vector<1x16x128xbf16> to vector<16x128xbf16>
    %cst_84 = arith.constant dense<0.000000e+00> : vector<16x128xf32>
    %132 = tpu.matmul %129, %131, %cst_84 {dimension_numbers = #tpu.dot_dimension_numbers<[1], [0], [0], [1], [0, 0, 1, 1], [], []>} : vector<16x16xbf16>, vector<16x128xbf16>, vector<16x128xf32> -> vector<16x128xf32>
    %133 = arith.addf %128, %132 : vector<16x128xf32>
    %c0_85 = arith.constant 0 : index
    %c0_86 = arith.constant 0 : index
    %134 = vector.load %arg10[%c0_85, %c0_86] : memref<16x64xbf16, #tpu.memory_space<vmem>>, vector<16x64xbf16>
    %cst_87 = arith.constant dense<0.000000e+00> : vector<16x128xf32>
    %135 = tpu.matmul %134, %1, %cst_87 {dimension_numbers = #tpu.dot_dimension_numbers<[1], [0], [0], [1], [0, 0, 1, 1], [], []>} : vector<16x64xbf16>, vector<64x128xbf16>, vector<16x128xf32> -> vector<16x128xf32>
    %136 = arith.truncf %135 : vector<16x128xf32> to vector<16x128xbf16>
    %137 = vector.extract_strided_slice %136 {offsets = [0, 0], sizes = [16, 8], strides = [1, 1]} : vector<16x128xbf16> to vector<16x8xbf16>
    %c0_88 = arith.constant 0 : index
    %c0_89 = arith.constant 0 : index
    %138 = vector.load %arg11[%c0_88, %c0_89] : memref<8x128xbf16, #tpu.memory_space<vmem>>, vector<8x128xbf16>
    %cst_90 = arith.constant dense<0.000000e+00> : vector<16x128xf32>
    %139 = tpu.matmul %137, %138, %cst_90 {dimension_numbers = #tpu.dot_dimension_numbers<[1], [0], [0], [1], [0, 0, 1, 1], [], []>} : vector<16x8xbf16>, vector<8x128xbf16>, vector<16x128xf32> -> vector<16x128xf32>
    %c0_91 = arith.constant 0 : index
    %c0_92 = arith.constant 0 : index
    %140 = vector.load %arg12[%c0_91, %c0_92] : memref<1x128xf32, #tpu.memory_space<vmem>>, vector<1x128xf32>
    %c0_93 = arith.constant 0 : index
    %c0_94 = arith.constant 0 : index
    %141 = vector.load %arg13[%c0_93, %c0_94] : memref<1x128xf32, #tpu.memory_space<vmem>>, vector<1x128xf32>
    %142 = vector.shape_cast %139 : vector<16x128xf32> to vector<1x16x128xf32>
    %cst_95 = arith.constant dense<0.000000e+00> : vector<1xf32>
    %143 = vector.multi_reduction <add>, %142, %cst_95 [1, 2] : vector<1x16x128xf32> to vector<1xf32>
    %144 = vector.shape_cast %143 : vector<1xf32> to vector<1x1x1xf32>
    %145 = vector.extract %144[0, 0, 0] : f32 from vector<1x1x1xf32>
    %146 = arith.mulf %139, %139 : vector<16x128xf32>
    %147 = vector.shape_cast %146 : vector<16x128xf32> to vector<1x16x128xf32>
    %cst_96 = arith.constant dense<0.000000e+00> : vector<1xf32>
    %148 = vector.multi_reduction <add>, %147, %cst_96 [1, 2] : vector<1x16x128xf32> to vector<1xf32>
    %149 = vector.shape_cast %148 : vector<1xf32> to vector<1x1x1xf32>
    %150 = vector.extract %149[0, 0, 0] : f32 from vector<1x1x1xf32>
    %cst_97 = arith.constant 3.906250e-03 : f32
    %151 = arith.mulf %145, %cst_97 : f32
    %cst_98 = arith.constant 3.906250e-03 : f32
    %152 = arith.mulf %150, %cst_98 : f32
    %153 = arith.mulf %151, %151 : f32
    %154 = arith.subf %152, %153 : f32
    %cst_99 = arith.constant 9.99999974E-6 : f32
    %155 = arith.addf %154, %cst_99 : f32
    %156 = math.rsqrt %155 : f32
    %157 = vector.broadcast %151 : f32 to vector<16x128xf32>
    %158 = arith.subf %139, %157 : vector<16x128xf32>
    %159 = vector.broadcast %156 : f32 to vector<16x128xf32>
    %160 = arith.mulf %158, %159 : vector<16x128xf32>
    %161 = vector.broadcast %140 : vector<1x128xf32> to vector<16x128xf32>
    %162 = arith.mulf %160, %161 : vector<16x128xf32>
    %163 = vector.broadcast %141 : vector<1x128xf32> to vector<16x128xf32>
    %164 = arith.addf %162, %163 : vector<16x128xf32>
    %c0_100 = arith.constant 0 : index
    %c0_101 = arith.constant 0 : index
    %165 = vector.load %arg8[%c0_100, %c0_101] : memref<1x128xf32, #tpu.memory_space<vmem>>, vector<1x128xf32>
    %c0_102 = arith.constant 0 : index
    %c0_103 = arith.constant 0 : index
    %166 = vector.load %arg9[%c0_102, %c0_103] : memref<1x128xf32, #tpu.memory_space<vmem>>, vector<1x128xf32>
    %167 = vector.shape_cast %133 : vector<16x128xf32> to vector<1x16x128xf32>
    %cst_104 = arith.constant dense<0.000000e+00> : vector<1xf32>
    %168 = vector.multi_reduction <add>, %167, %cst_104 [1, 2] : vector<1x16x128xf32> to vector<1xf32>
    %169 = vector.shape_cast %168 : vector<1xf32> to vector<1x1x1xf32>
    %170 = vector.extract %169[0, 0, 0] : f32 from vector<1x1x1xf32>
    %171 = arith.mulf %133, %133 : vector<16x128xf32>
    %172 = vector.shape_cast %171 : vector<16x128xf32> to vector<1x16x128xf32>
    %cst_105 = arith.constant dense<0.000000e+00> : vector<1xf32>
    %173 = vector.multi_reduction <add>, %172, %cst_105 [1, 2] : vector<1x16x128xf32> to vector<1xf32>
    %174 = vector.shape_cast %173 : vector<1xf32> to vector<1x1x1xf32>
    %175 = vector.extract %174[0, 0, 0] : f32 from vector<1x1x1xf32>
    %cst_106 = arith.constant 3.906250e-03 : f32
    %176 = arith.mulf %170, %cst_106 : f32
    %cst_107 = arith.constant 3.906250e-03 : f32
    %177 = arith.mulf %175, %cst_107 : f32
    %178 = arith.mulf %176, %176 : f32
    %179 = arith.subf %177, %178 : f32
    %cst_108 = arith.constant 9.99999974E-6 : f32
    %180 = arith.addf %179, %cst_108 : f32
    %181 = math.rsqrt %180 : f32
    %182 = vector.broadcast %176 : f32 to vector<16x128xf32>
    %183 = arith.subf %133, %182 : vector<16x128xf32>
    %184 = vector.broadcast %181 : f32 to vector<16x128xf32>
    %185 = arith.mulf %183, %184 : vector<16x128xf32>
    %186 = vector.broadcast %165 : vector<1x128xf32> to vector<16x128xf32>
    %187 = arith.mulf %185, %186 : vector<16x128xf32>
    %188 = vector.broadcast %166 : vector<1x128xf32> to vector<16x128xf32>
    %189 = arith.addf %187, %188 : vector<16x128xf32>
    %190 = arith.addf %189, %164 : vector<16x128xf32>
    %cst_109 = arith.constant 5.000000e-01 : f32
    %191 = vector.broadcast %cst_109 : f32 to vector<16x128xf32>
    %192 = arith.mulf %191, %190 : vector<16x128xf32>
    %cst_110 = arith.constant 0.707106769 : f32
    %193 = vector.broadcast %cst_110 : f32 to vector<16x128xf32>
    %194 = arith.mulf %190, %193 : vector<16x128xf32>
    %195 = math.erf %194 : vector<16x128xf32>
    %cst_111 = arith.constant 1.000000e+00 : f32
    %196 = vector.broadcast %cst_111 : f32 to vector<16x128xf32>
    %197 = arith.addf %196, %195 : vector<16x128xf32>
    %198 = arith.mulf %192, %197 : vector<16x128xf32>
    %199 = arith.truncf %198 : vector<16x128xf32> to vector<16x128xbf16>
    %c0_112 = arith.constant 0 : index
    %c0_113 = arith.constant 0 : index
    %c0_114 = arith.constant 0 : index
    %200 = vector.load %arg14[%c0_112, %c0_113, %c0_114] : memref<1x16x128xbf16, #tpu.memory_space<vmem>>, vector<1x16x128xbf16>
    %201 = vector.shape_cast %200 : vector<1x16x128xbf16> to vector<16x128xbf16>
    %202 = vector.shape_cast %199 : vector<16x128xbf16> to vector<1x16x128xbf16>
    tpu.vector_store %arg14[%c0_112, %c0_113, %c0_114], %202 {strides = array<i32>} : memref<1x16x128xbf16, #tpu.memory_space<vmem>>, vector<1x16x128xbf16>,
    return
  }
  func.func @transform_0(%arg0: i32) -> (i32, i32, i32) {
    %c0_i32 = arith.constant 0 : i32
    %c0_i32_0 = arith.constant 0 : i32
    %c0_i32_1 = arith.constant 0 : i32
    return %arg0, %c0_i32, %c0_i32_0 : i32, i32, i32
  }
  func.func @transform_1(%arg0: i32) -> (i32, i32) {
    %c0_i32 = arith.constant 0 : i32
    %c0_i32_0 = arith.constant 0 : i32
    %c0_i32_1 = arith.constant 0 : i32
    return %c0_i32, %c0_i32_0 : i32, i32
  }
  func.func @transform_2(%arg0: i32) -> (i32, i32, i32) {
    %c0_i32 = arith.constant 0 : i32
    %c0_i32_0 = arith.constant 0 : i32
    %c0_i32_1 = arith.constant 0 : i32
    %c0_i32_2 = arith.constant 0 : i32
    return %c0_i32, %c0_i32_0, %c0_i32_1 : i32, i32, i32
  }
  func.func @transform_3(%arg0: i32) -> (i32, i32) {
    %c0_i32 = arith.constant 0 : i32
    %c0_i32_0 = arith.constant 0 : i32
    %c0_i32_1 = arith.constant 0 : i32
    return %c0_i32, %c0_i32_0 : i32, i32
  }
  func.func @transform_4(%arg0: i32) -> (i32, i32) {
    %c0_i32 = arith.constant 0 : i32
    %c0_i32_0 = arith.constant 0 : i32
    %c0_i32_1 = arith.constant 0 : i32
    return %c0_i32, %c0_i32_0 : i32, i32
  }
  func.func @transform_5(%arg0: i32) -> (i32, i32) {
    %c0_i32 = arith.constant 0 : i32
    %c0_i32_0 = arith.constant 0 : i32
    %c0_i32_1 = arith.constant 0 : i32
    return %c0_i32, %c0_i32_0 : i32, i32
  }
  func.func @transform_6(%arg0: i32) -> (i32, i32, i32) {
    %c0_i32 = arith.constant 0 : i32
    %c0_i32_0 = arith.constant 0 : i32
    %c0_i32_1 = arith.constant 0 : i32
    %c0_i32_2 = arith.constant 0 : i32
    return %c0_i32, %c0_i32_0, %c0_i32_1 : i32, i32, i32
  }
  func.func @transform_7(%arg0: i32) -> (i32, i32) {
    %c0_i32 = arith.constant 0 : i32
    %c0_i32_0 = arith.constant 0 : i32
    %c0_i32_1 = arith.constant 0 : i32
    return %c0_i32, %c0_i32_0 : i32, i32
  }
  func.func @transform_8(%arg0: i32) -> (i32, i32) {
    %c0_i32 = arith.constant 0 : i32
    %c0_i32_0 = arith.constant 0 : i32
    %c0_i32_1 = arith.constant 0 : i32
    return %c0_i32, %c0_i32_0 : i32, i32
  }
  func.func @transform_9(%arg0: i32) -> (i32, i32) {
    %c0_i32 = arith.constant 0 : i32
    %c0_i32_0 = arith.constant 0 : i32
    %c0_i32_1 = arith.constant 0 : i32
    return %c0_i32, %c0_i32_0 : i32, i32
  }
  func.func @transform_10(%arg0: i32) -> (i32, i32) {
    %c0_i32 = arith.constant 0 : i32
    %c0_i32_0 = arith.constant 0 : i32
    %c0_i32_1 = arith.constant 0 : i32
    return %c0_i32, %c0_i32_0 : i32, i32
  }
  func.func @transform_11(%arg0: i32) -> (i32, i32) {
    %c0_i32 = arith.constant 0 : i32
    %c0_i32_0 = arith.constant 0 : i32
    %c0_i32_1 = arith.constant 0 : i32
    return %c0_i32, %c0_i32_0 : i32, i32
  }
  func.func @transform_12(%arg0: i32) -> (i32, i32) {
    %c0_i32 = arith.constant 0 : i32
    %c0_i32_0 = arith.constant 0 : i32
    %c0_i32_1 = arith.constant 0 : i32
    return %c0_i32, %c0_i32_0 : i32, i32
  }
  func.func @transform_13(%arg0: i32) -> (i32, i32, i32) {
    %c0_i32 = arith.constant 0 : i32
    %c0_i32_0 = arith.constant 0 : i32
    %c0_i32_1 = arith.constant 0 : i32
    return %arg0, %c0_i32, %c0_i32_0 : i32, i32, i32
  }
}

module attributes {stable_mosaic.version = 11 : i64} {
  func.func @_block_kernel(%arg0: i32, %arg1: memref<1x4x128xbf16, #tpu.memory_space<vmem>>, %arg2: memref<9x4xbf16, #tpu.memory_space<vmem>>, %arg3: memref<9x32x128xbf16, #tpu.memory_space<vmem>>, %arg4: memref<1x128xf32, #tpu.memory_space<vmem>>, %arg5: memref<1x128xf32, #tpu.memory_space<vmem>>, %arg6: memref<9x1xbf16, #tpu.memory_space<vmem>>, %arg7: memref<9x64x128xbf16, #tpu.memory_space<vmem>>, %arg8: memref<1x128xf32, #tpu.memory_space<vmem>>, %arg9: memref<1x128xf32, #tpu.memory_space<vmem>>, %arg10: memref<1x4xbf16, #tpu.memory_space<vmem>>, %arg11: memref<32x128xbf16, #tpu.memory_space<vmem>>, %arg12: memref<1x128xf32, #tpu.memory_space<vmem>>, %arg13: memref<1x128xf32, #tpu.memory_space<vmem>>, %arg14: memref<1x1x128xbf16, #tpu.memory_space<vmem>>) attributes {dimension_semantics = [#tpu.dimension_semantics<parallel>], iteration_bounds = array<i64: 2>, scalar_prefetch = 0 : i64, scratch_operands = 0 : i64, tpu.core_type = #tpu.core_type<tc>, window_params = [{transform_indices = @transform_0, window_bounds = array<i64: 1, 4, 128>}, {pipeline_mode = #tpu.pipeline_mode<synchronous>, transform_indices = @transform_1, window_bounds = array<i64: 9, 4>}, {pipeline_mode = #tpu.pipeline_mode<synchronous>, transform_indices = @transform_2, window_bounds = array<i64: 9, 32, 128>}, {pipeline_mode = #tpu.pipeline_mode<synchronous>, transform_indices = @transform_3, window_bounds = array<i64: 1, 128>}, {pipeline_mode = #tpu.pipeline_mode<synchronous>, transform_indices = @transform_4, window_bounds = array<i64: 1, 128>}, {pipeline_mode = #tpu.pipeline_mode<synchronous>, transform_indices = @transform_5, window_bounds = array<i64: 9, 1>}, {pipeline_mode = #tpu.pipeline_mode<synchronous>, transform_indices = @transform_6, window_bounds = array<i64: 9, 64, 128>}, {pipeline_mode = #tpu.pipeline_mode<synchronous>, transform_indices = @transform_7, window_bounds = array<i64: 1, 128>}, {pipeline_mode = #tpu.pipeline_mode<synchronous>, transform_indices = @transform_8, window_bounds = array<i64: 1, 128>}, {pipeline_mode = #tpu.pipeline_mode<synchronous>, transform_indices = @transform_9, window_bounds = array<i64: 1, 4>}, {pipeline_mode = #tpu.pipeline_mode<synchronous>, transform_indices = @transform_10, window_bounds = array<i64: 32, 128>}, {pipeline_mode = #tpu.pipeline_mode<synchronous>, transform_indices = @transform_11, window_bounds = array<i64: 1, 128>}, {pipeline_mode = #tpu.pipeline_mode<synchronous>, transform_indices = @transform_12, window_bounds = array<i64: 1, 128>}, {transform_indices = @transform_13, window_bounds = array<i64: 1, 1, 128>}]} {
    %c0 = arith.constant 0 : index
    %c0_0 = arith.constant 0 : index
    %c0_1 = arith.constant 0 : index
    %0 = vector.load %arg1[%c0, %c0_0, %c0_1] : memref<1x4x128xbf16, #tpu.memory_space<vmem>>, vector<1x4x128xbf16>
    %1 = vector.shape_cast %0 : vector<1x4x128xbf16> to vector<4x128xbf16>
    %c0_2 = arith.constant 0 : index
    %c0_3 = arith.constant 0 : index
    %2 = vector.load %arg2[%c0_2, %c0_3] : memref<9x4xbf16, #tpu.memory_space<vmem>>, vector<9x4xbf16>
    %cst = arith.constant dense<0.000000e+00> : vector<9x128xf32>
    %3 = tpu.matmul %2, %1, %cst {dimension_numbers = #tpu.dot_dimension_numbers<[1], [0], [0], [1], [0, 0, 1, 1], [], []>} : vector<9x4xbf16>, vector<4x128xbf16>, vector<9x128xf32> -> vector<9x128xf32>
    %4 = arith.truncf %3 : vector<9x128xf32> to vector<9x128xbf16>
    %cst_4 = arith.constant 0.000000e+00 : f32
    %5 = vector.broadcast %cst_4 : f32 to vector<1x128xf32>
    %6 = vector.extract_strided_slice %4 {offsets = [0, 0], sizes = [1, 32], strides = [1, 1]} : vector<9x128xbf16> to vector<1x32xbf16>
    %c0_5 = arith.constant 0 : index
    %c0_6 = arith.constant 0 : index
    %c0_7 = arith.constant 0 : index
    %7 = vector.load %arg3[%c0_5, %c0_6, %c0_7] : memref<9x32x128xbf16, #tpu.memory_space<vmem>>, vector<1x32x128xbf16>
    %8 = vector.shape_cast %7 : vector<1x32x128xbf16> to vector<32x128xbf16>
    %cst_8 = arith.constant dense<0.000000e+00> : vector<1x128xf32>
    %9 = tpu.matmul %6, %8, %cst_8 {dimension_numbers = #tpu.dot_dimension_numbers<[1], [0], [0], [1], [0, 0, 1, 1], [], []>} : vector<1x32xbf16>, vector<32x128xbf16>, vector<1x128xf32> -> vector<1x128xf32>
    %10 = arith.addf %5, %9 : vector<1x128xf32>
    %11 = vector.extract_strided_slice %4 {offsets = [1, 0], sizes = [1, 32], strides = [1, 1]} : vector<9x128xbf16> to vector<1x32xbf16>
    %c1 = arith.constant 1 : index
    %c0_9 = arith.constant 0 : index
    %c0_10 = arith.constant 0 : index
    %12 = vector.load %arg3[%c1, %c0_9, %c0_10] : memref<9x32x128xbf16, #tpu.memory_space<vmem>>, vector<1x32x128xbf16>
    %13 = vector.shape_cast %12 : vector<1x32x128xbf16> to vector<32x128xbf16>
    %cst_11 = arith.constant dense<0.000000e+00> : vector<1x128xf32>
    %14 = tpu.matmul %11, %13, %cst_11 {dimension_numbers = #tpu.dot_dimension_numbers<[1], [0], [0], [1], [0, 0, 1, 1], [], []>} : vector<1x32xbf16>, vector<32x128xbf16>, vector<1x128xf32> -> vector<1x128xf32>
    %15 = arith.addf %10, %14 : vector<1x128xf32>
    %16 = vector.extract_strided_slice %4 {offsets = [2, 0], sizes = [1, 32], strides = [1, 1]} : vector<9x128xbf16> to vector<1x32xbf16>
    %c2 = arith.constant 2 : index
    %c0_12 = arith.constant 0 : index
    %c0_13 = arith.constant 0 : index
    %17 = vector.load %arg3[%c2, %c0_12, %c0_13] : memref<9x32x128xbf16, #tpu.memory_space<vmem>>, vector<1x32x128xbf16>
    %18 = vector.shape_cast %17 : vector<1x32x128xbf16> to vector<32x128xbf16>
    %cst_14 = arith.constant dense<0.000000e+00> : vector<1x128xf32>
    %19 = tpu.matmul %16, %18, %cst_14 {dimension_numbers = #tpu.dot_dimension_numbers<[1], [0], [0], [1], [0, 0, 1, 1], [], []>} : vector<1x32xbf16>, vector<32x128xbf16>, vector<1x128xf32> -> vector<1x128xf32>
    %20 = arith.addf %15, %19 : vector<1x128xf32>
    %21 = vector.extract_strided_slice %4 {offsets = [3, 0], sizes = [1, 32], strides = [1, 1]} : vector<9x128xbf16> to vector<1x32xbf16>
    %c3 = arith.constant 3 : index
    %c0_15 = arith.constant 0 : index
    %c0_16 = arith.constant 0 : index
    %22 = vector.load %arg3[%c3, %c0_15, %c0_16] : memref<9x32x128xbf16, #tpu.memory_space<vmem>>, vector<1x32x128xbf16>
    %23 = vector.shape_cast %22 : vector<1x32x128xbf16> to vector<32x128xbf16>
    %cst_17 = arith.constant dense<0.000000e+00> : vector<1x128xf32>
    %24 = tpu.matmul %21, %23, %cst_17 {dimension_numbers = #tpu.dot_dimension_numbers<[1], [0], [0], [1], [0, 0, 1, 1], [], []>} : vector<1x32xbf16>, vector<32x128xbf16>, vector<1x128xf32> -> vector<1x128xf32>
    %25 = arith.addf %20, %24 : vector<1x128xf32>
    %26 = vector.extract_strided_slice %4 {offsets = [4, 0], sizes = [1, 32], strides = [1, 1]} : vector<9x128xbf16> to vector<1x32xbf16>
    %c4 = arith.constant 4 : index
    %c0_18 = arith.constant 0 : index
    %c0_19 = arith.constant 0 : index
    %27 = vector.load %arg3[%c4, %c0_18, %c0_19] : memref<9x32x128xbf16, #tpu.memory_space<vmem>>, vector<1x32x128xbf16>
    %28 = vector.shape_cast %27 : vector<1x32x128xbf16> to vector<32x128xbf16>
    %cst_20 = arith.constant dense<0.000000e+00> : vector<1x128xf32>
    %29 = tpu.matmul %26, %28, %cst_20 {dimension_numbers = #tpu.dot_dimension_numbers<[1], [0], [0], [1], [0, 0, 1, 1], [], []>} : vector<1x32xbf16>, vector<32x128xbf16>, vector<1x128xf32> -> vector<1x128xf32>
    %30 = arith.addf %25, %29 : vector<1x128xf32>
    %31 = vector.extract_strided_slice %4 {offsets = [5, 0], sizes = [1, 32], strides = [1, 1]} : vector<9x128xbf16> to vector<1x32xbf16>
    %c5 = arith.constant 5 : index
    %c0_21 = arith.constant 0 : index
    %c0_22 = arith.constant 0 : index
    %32 = vector.load %arg3[%c5, %c0_21, %c0_22] : memref<9x32x128xbf16, #tpu.memory_space<vmem>>, vector<1x32x128xbf16>
    %33 = vector.shape_cast %32 : vector<1x32x128xbf16> to vector<32x128xbf16>
    %cst_23 = arith.constant dense<0.000000e+00> : vector<1x128xf32>
    %34 = tpu.matmul %31, %33, %cst_23 {dimension_numbers = #tpu.dot_dimension_numbers<[1], [0], [0], [1], [0, 0, 1, 1], [], []>} : vector<1x32xbf16>, vector<32x128xbf16>, vector<1x128xf32> -> vector<1x128xf32>
    %35 = arith.addf %30, %34 : vector<1x128xf32>
    %36 = vector.extract_strided_slice %4 {offsets = [6, 0], sizes = [1, 32], strides = [1, 1]} : vector<9x128xbf16> to vector<1x32xbf16>
    %c6 = arith.constant 6 : index
    %c0_24 = arith.constant 0 : index
    %c0_25 = arith.constant 0 : index
    %37 = vector.load %arg3[%c6, %c0_24, %c0_25] : memref<9x32x128xbf16, #tpu.memory_space<vmem>>, vector<1x32x128xbf16>
    %38 = vector.shape_cast %37 : vector<1x32x128xbf16> to vector<32x128xbf16>
    %cst_26 = arith.constant dense<0.000000e+00> : vector<1x128xf32>
    %39 = tpu.matmul %36, %38, %cst_26 {dimension_numbers = #tpu.dot_dimension_numbers<[1], [0], [0], [1], [0, 0, 1, 1], [], []>} : vector<1x32xbf16>, vector<32x128xbf16>, vector<1x128xf32> -> vector<1x128xf32>
    %40 = arith.addf %35, %39 : vector<1x128xf32>
    %41 = vector.extract_strided_slice %4 {offsets = [7, 0], sizes = [1, 32], strides = [1, 1]} : vector<9x128xbf16> to vector<1x32xbf16>
    %c7 = arith.constant 7 : index
    %c0_27 = arith.constant 0 : index
    %c0_28 = arith.constant 0 : index
    %42 = vector.load %arg3[%c7, %c0_27, %c0_28] : memref<9x32x128xbf16, #tpu.memory_space<vmem>>, vector<1x32x128xbf16>
    %43 = vector.shape_cast %42 : vector<1x32x128xbf16> to vector<32x128xbf16>
    %cst_29 = arith.constant dense<0.000000e+00> : vector<1x128xf32>
    %44 = tpu.matmul %41, %43, %cst_29 {dimension_numbers = #tpu.dot_dimension_numbers<[1], [0], [0], [1], [0, 0, 1, 1], [], []>} : vector<1x32xbf16>, vector<32x128xbf16>, vector<1x128xf32> -> vector<1x128xf32>
    %45 = arith.addf %40, %44 : vector<1x128xf32>
    %46 = vector.extract_strided_slice %4 {offsets = [8, 0], sizes = [1, 32], strides = [1, 1]} : vector<9x128xbf16> to vector<1x32xbf16>
    %c8 = arith.constant 8 : index
    %c0_30 = arith.constant 0 : index
    %c0_31 = arith.constant 0 : index
    %47 = vector.load %arg3[%c8, %c0_30, %c0_31] : memref<9x32x128xbf16, #tpu.memory_space<vmem>>, vector<1x32x128xbf16>
    %48 = vector.shape_cast %47 : vector<1x32x128xbf16> to vector<32x128xbf16>
    %cst_32 = arith.constant dense<0.000000e+00> : vector<1x128xf32>
    %49 = tpu.matmul %46, %48, %cst_32 {dimension_numbers = #tpu.dot_dimension_numbers<[1], [0], [0], [1], [0, 0, 1, 1], [], []>} : vector<1x32xbf16>, vector<32x128xbf16>, vector<1x128xf32> -> vector<1x128xf32>
    %50 = arith.addf %45, %49 : vector<1x128xf32>
    %c0_33 = arith.constant 0 : index
    %c0_34 = arith.constant 0 : index
    %51 = vector.load %arg4[%c0_33, %c0_34] : memref<1x128xf32, #tpu.memory_space<vmem>>, vector<1x128xf32>
    %c0_35 = arith.constant 0 : index
    %c0_36 = arith.constant 0 : index
    %52 = vector.load %arg5[%c0_35, %c0_36] : memref<1x128xf32, #tpu.memory_space<vmem>>, vector<1x128xf32>
    %53 = vector.shape_cast %50 : vector<1x128xf32> to vector<1x1x128xf32>
    %cst_37 = arith.constant dense<0.000000e+00> : vector<1xf32>
    %54 = vector.multi_reduction <add>, %53, %cst_37 [1, 2] : vector<1x1x128xf32> to vector<1xf32>
    %55 = vector.shape_cast %54 : vector<1xf32> to vector<1x1x1xf32>
    %56 = vector.extract %55[0, 0, 0] : f32 from vector<1x1x1xf32>
    %57 = arith.mulf %50, %50 : vector<1x128xf32>
    %58 = vector.shape_cast %57 : vector<1x128xf32> to vector<1x1x128xf32>
    %cst_38 = arith.constant dense<0.000000e+00> : vector<1xf32>
    %59 = vector.multi_reduction <add>, %58, %cst_38 [1, 2] : vector<1x1x128xf32> to vector<1xf32>
    %60 = vector.shape_cast %59 : vector<1xf32> to vector<1x1x1xf32>
    %61 = vector.extract %60[0, 0, 0] : f32 from vector<1x1x1xf32>
    %cst_39 = arith.constant 1.562500e-02 : f32
    %62 = arith.mulf %56, %cst_39 : f32
    %cst_40 = arith.constant 1.562500e-02 : f32
    %63 = arith.mulf %61, %cst_40 : f32
    %64 = arith.mulf %62, %62 : f32
    %65 = arith.subf %63, %64 : f32
    %cst_41 = arith.constant 9.99999974E-6 : f32
    %66 = arith.addf %65, %cst_41 : f32
    %67 = math.rsqrt %66 : f32
    %68 = vector.broadcast %62 : f32 to vector<1x128xf32>
    %69 = arith.subf %50, %68 : vector<1x128xf32>
    %70 = vector.broadcast %67 : f32 to vector<1x128xf32>
    %71 = arith.mulf %69, %70 : vector<1x128xf32>
    %72 = arith.mulf %71, %51 : vector<1x128xf32>
    %73 = arith.addf %72, %52 : vector<1x128xf32>
    %cst_42 = arith.constant 5.000000e-01 : f32
    %74 = vector.broadcast %cst_42 : f32 to vector<1x128xf32>
    %75 = arith.mulf %74, %73 : vector<1x128xf32>
    %cst_43 = arith.constant 0.707106769 : f32
    %76 = vector.broadcast %cst_43 : f32 to vector<1x128xf32>
    %77 = arith.mulf %73, %76 : vector<1x128xf32>
    %78 = math.erf %77 : vector<1x128xf32>
    %cst_44 = arith.constant 1.000000e+00 : f32
    %79 = vector.broadcast %cst_44 : f32 to vector<1x128xf32>
    %80 = arith.addf %79, %78 : vector<1x128xf32>
    %81 = arith.mulf %75, %80 : vector<1x128xf32>
    %82 = arith.truncf %81 : vector<1x128xf32> to vector<1x128xbf16>
    %c0_45 = arith.constant 0 : index
    %c0_46 = arith.constant 0 : index
    %83 = vector.load %arg6[%c0_45, %c0_46] : memref<9x1xbf16, #tpu.memory_space<vmem>>, vector<9x1xbf16>
    %cst_47 = arith.constant dense<0.000000e+00> : vector<9x128xf32>
    %84 = tpu.matmul %83, %82, %cst_47 {dimension_numbers = #tpu.dot_dimension_numbers<[1], [0], [0], [1], [0, 0, 1, 1], [], []>} : vector<9x1xbf16>, vector<1x128xbf16>, vector<9x128xf32> -> vector<9x128xf32>
    %85 = arith.truncf %84 : vector<9x128xf32> to vector<9x128xbf16>
    %cst_48 = arith.constant 0.000000e+00 : f32
    %86 = vector.broadcast %cst_48 : f32 to vector<1x128xf32>
    %87 = vector.extract_strided_slice %85 {offsets = [0, 0], sizes = [1, 64], strides = [1, 1]} : vector<9x128xbf16> to vector<1x64xbf16>
    %c0_49 = arith.constant 0 : index
    %c0_50 = arith.constant 0 : index
    %c0_51 = arith.constant 0 : index
    %88 = vector.load %arg7[%c0_49, %c0_50, %c0_51] : memref<9x64x128xbf16, #tpu.memory_space<vmem>>, vector<1x64x128xbf16>
    %89 = vector.shape_cast %88 : vector<1x64x128xbf16> to vector<64x128xbf16>
    %cst_52 = arith.constant dense<0.000000e+00> : vector<1x128xf32>
    %90 = tpu.matmul %87, %89, %cst_52 {dimension_numbers = #tpu.dot_dimension_numbers<[1], [0], [0], [1], [0, 0, 1, 1], [], []>} : vector<1x64xbf16>, vector<64x128xbf16>, vector<1x128xf32> -> vector<1x128xf32>
    %91 = arith.addf %86, %90 : vector<1x128xf32>
    %92 = vector.extract_strided_slice %85 {offsets = [1, 0], sizes = [1, 64], strides = [1, 1]} : vector<9x128xbf16> to vector<1x64xbf16>
    %c1_53 = arith.constant 1 : index
    %c0_54 = arith.constant 0 : index
    %c0_55 = arith.constant 0 : index
    %93 = vector.load %arg7[%c1_53, %c0_54, %c0_55] : memref<9x64x128xbf16, #tpu.memory_space<vmem>>, vector<1x64x128xbf16>
    %94 = vector.shape_cast %93 : vector<1x64x128xbf16> to vector<64x128xbf16>
    %cst_56 = arith.constant dense<0.000000e+00> : vector<1x128xf32>
    %95 = tpu.matmul %92, %94, %cst_56 {dimension_numbers = #tpu.dot_dimension_numbers<[1], [0], [0], [1], [0, 0, 1, 1], [], []>} : vector<1x64xbf16>, vector<64x128xbf16>, vector<1x128xf32> -> vector<1x128xf32>
    %96 = arith.addf %91, %95 : vector<1x128xf32>
    %97 = vector.extract_strided_slice %85 {offsets = [2, 0], sizes = [1, 64], strides = [1, 1]} : vector<9x128xbf16> to vector<1x64xbf16>
    %c2_57 = arith.constant 2 : index
    %c0_58 = arith.constant 0 : index
    %c0_59 = arith.constant 0 : index
    %98 = vector.load %arg7[%c2_57, %c0_58, %c0_59] : memref<9x64x128xbf16, #tpu.memory_space<vmem>>, vector<1x64x128xbf16>
    %99 = vector.shape_cast %98 : vector<1x64x128xbf16> to vector<64x128xbf16>
    %cst_60 = arith.constant dense<0.000000e+00> : vector<1x128xf32>
    %100 = tpu.matmul %97, %99, %cst_60 {dimension_numbers = #tpu.dot_dimension_numbers<[1], [0], [0], [1], [0, 0, 1, 1], [], []>} : vector<1x64xbf16>, vector<64x128xbf16>, vector<1x128xf32> -> vector<1x128xf32>
    %101 = arith.addf %96, %100 : vector<1x128xf32>
    %102 = vector.extract_strided_slice %85 {offsets = [3, 0], sizes = [1, 64], strides = [1, 1]} : vector<9x128xbf16> to vector<1x64xbf16>
    %c3_61 = arith.constant 3 : index
    %c0_62 = arith.constant 0 : index
    %c0_63 = arith.constant 0 : index
    %103 = vector.load %arg7[%c3_61, %c0_62, %c0_63] : memref<9x64x128xbf16, #tpu.memory_space<vmem>>, vector<1x64x128xbf16>
    %104 = vector.shape_cast %103 : vector<1x64x128xbf16> to vector<64x128xbf16>
    %cst_64 = arith.constant dense<0.000000e+00> : vector<1x128xf32>
    %105 = tpu.matmul %102, %104, %cst_64 {dimension_numbers = #tpu.dot_dimension_numbers<[1], [0], [0], [1], [0, 0, 1, 1], [], []>} : vector<1x64xbf16>, vector<64x128xbf16>, vector<1x128xf32> -> vector<1x128xf32>
    %106 = arith.addf %101, %105 : vector<1x128xf32>
    %107 = vector.extract_strided_slice %85 {offsets = [4, 0], sizes = [1, 64], strides = [1, 1]} : vector<9x128xbf16> to vector<1x64xbf16>
    %c4_65 = arith.constant 4 : index
    %c0_66 = arith.constant 0 : index
    %c0_67 = arith.constant 0 : index
    %108 = vector.load %arg7[%c4_65, %c0_66, %c0_67] : memref<9x64x128xbf16, #tpu.memory_space<vmem>>, vector<1x64x128xbf16>
    %109 = vector.shape_cast %108 : vector<1x64x128xbf16> to vector<64x128xbf16>
    %cst_68 = arith.constant dense<0.000000e+00> : vector<1x128xf32>
    %110 = tpu.matmul %107, %109, %cst_68 {dimension_numbers = #tpu.dot_dimension_numbers<[1], [0], [0], [1], [0, 0, 1, 1], [], []>} : vector<1x64xbf16>, vector<64x128xbf16>, vector<1x128xf32> -> vector<1x128xf32>
    %111 = arith.addf %106, %110 : vector<1x128xf32>
    %112 = vector.extract_strided_slice %85 {offsets = [5, 0], sizes = [1, 64], strides = [1, 1]} : vector<9x128xbf16> to vector<1x64xbf16>
    %c5_69 = arith.constant 5 : index
    %c0_70 = arith.constant 0 : index
    %c0_71 = arith.constant 0 : index
    %113 = vector.load %arg7[%c5_69, %c0_70, %c0_71] : memref<9x64x128xbf16, #tpu.memory_space<vmem>>, vector<1x64x128xbf16>
    %114 = vector.shape_cast %113 : vector<1x64x128xbf16> to vector<64x128xbf16>
    %cst_72 = arith.constant dense<0.000000e+00> : vector<1x128xf32>
    %115 = tpu.matmul %112, %114, %cst_72 {dimension_numbers = #tpu.dot_dimension_numbers<[1], [0], [0], [1], [0, 0, 1, 1], [], []>} : vector<1x64xbf16>, vector<64x128xbf16>, vector<1x128xf32> -> vector<1x128xf32>
    %116 = arith.addf %111, %115 : vector<1x128xf32>
    %117 = vector.extract_strided_slice %85 {offsets = [6, 0], sizes = [1, 64], strides = [1, 1]} : vector<9x128xbf16> to vector<1x64xbf16>
    %c6_73 = arith.constant 6 : index
    %c0_74 = arith.constant 0 : index
    %c0_75 = arith.constant 0 : index
    %118 = vector.load %arg7[%c6_73, %c0_74, %c0_75] : memref<9x64x128xbf16, #tpu.memory_space<vmem>>, vector<1x64x128xbf16>
    %119 = vector.shape_cast %118 : vector<1x64x128xbf16> to vector<64x128xbf16>
    %cst_76 = arith.constant dense<0.000000e+00> : vector<1x128xf32>
    %120 = tpu.matmul %117, %119, %cst_76 {dimension_numbers = #tpu.dot_dimension_numbers<[1], [0], [0], [1], [0, 0, 1, 1], [], []>} : vector<1x64xbf16>, vector<64x128xbf16>, vector<1x128xf32> -> vector<1x128xf32>
    %121 = arith.addf %116, %120 : vector<1x128xf32>
    %122 = vector.extract_strided_slice %85 {offsets = [7, 0], sizes = [1, 64], strides = [1, 1]} : vector<9x128xbf16> to vector<1x64xbf16>
    %c7_77 = arith.constant 7 : index
    %c0_78 = arith.constant 0 : index
    %c0_79 = arith.constant 0 : index
    %123 = vector.load %arg7[%c7_77, %c0_78, %c0_79] : memref<9x64x128xbf16, #tpu.memory_space<vmem>>, vector<1x64x128xbf16>
    %124 = vector.shape_cast %123 : vector<1x64x128xbf16> to vector<64x128xbf16>
    %cst_80 = arith.constant dense<0.000000e+00> : vector<1x128xf32>
    %125 = tpu.matmul %122, %124, %cst_80 {dimension_numbers = #tpu.dot_dimension_numbers<[1], [0], [0], [1], [0, 0, 1, 1], [], []>} : vector<1x64xbf16>, vector<64x128xbf16>, vector<1x128xf32> -> vector<1x128xf32>
    %126 = arith.addf %121, %125 : vector<1x128xf32>
    %127 = vector.extract_strided_slice %85 {offsets = [8, 0], sizes = [1, 64], strides = [1, 1]} : vector<9x128xbf16> to vector<1x64xbf16>
    %c8_81 = arith.constant 8 : index
    %c0_82 = arith.constant 0 : index
    %c0_83 = arith.constant 0 : index
    %128 = vector.load %arg7[%c8_81, %c0_82, %c0_83] : memref<9x64x128xbf16, #tpu.memory_space<vmem>>, vector<1x64x128xbf16>
    %129 = vector.shape_cast %128 : vector<1x64x128xbf16> to vector<64x128xbf16>
    %cst_84 = arith.constant dense<0.000000e+00> : vector<1x128xf32>
    %130 = tpu.matmul %127, %129, %cst_84 {dimension_numbers = #tpu.dot_dimension_numbers<[1], [0], [0], [1], [0, 0, 1, 1], [], []>} : vector<1x64xbf16>, vector<64x128xbf16>, vector<1x128xf32> -> vector<1x128xf32>
    %131 = arith.addf %126, %130 : vector<1x128xf32>
    %c0_85 = arith.constant 0 : index
    %c0_86 = arith.constant 0 : index
    %132 = vector.load %arg10[%c0_85, %c0_86] : memref<1x4xbf16, #tpu.memory_space<vmem>>, vector<1x4xbf16>
    %cst_87 = arith.constant dense<0.000000e+00> : vector<1x128xf32>
    %133 = tpu.matmul %132, %1, %cst_87 {dimension_numbers = #tpu.dot_dimension_numbers<[1], [0], [0], [1], [0, 0, 1, 1], [], []>} : vector<1x4xbf16>, vector<4x128xbf16>, vector<1x128xf32> -> vector<1x128xf32>
    %134 = arith.truncf %133 : vector<1x128xf32> to vector<1x128xbf16>
    %135 = vector.extract_strided_slice %134 {offsets = [0, 0], sizes = [1, 32], strides = [1, 1]} : vector<1x128xbf16> to vector<1x32xbf16>
    %c0_88 = arith.constant 0 : index
    %c0_89 = arith.constant 0 : index
    %136 = vector.load %arg11[%c0_88, %c0_89] : memref<32x128xbf16, #tpu.memory_space<vmem>>, vector<32x128xbf16>
    %cst_90 = arith.constant dense<0.000000e+00> : vector<1x128xf32>
    %137 = tpu.matmul %135, %136, %cst_90 {dimension_numbers = #tpu.dot_dimension_numbers<[1], [0], [0], [1], [0, 0, 1, 1], [], []>} : vector<1x32xbf16>, vector<32x128xbf16>, vector<1x128xf32> -> vector<1x128xf32>
    %c0_91 = arith.constant 0 : index
    %c0_92 = arith.constant 0 : index
    %138 = vector.load %arg12[%c0_91, %c0_92] : memref<1x128xf32, #tpu.memory_space<vmem>>, vector<1x128xf32>
    %c0_93 = arith.constant 0 : index
    %c0_94 = arith.constant 0 : index
    %139 = vector.load %arg13[%c0_93, %c0_94] : memref<1x128xf32, #tpu.memory_space<vmem>>, vector<1x128xf32>
    %140 = vector.shape_cast %137 : vector<1x128xf32> to vector<1x1x128xf32>
    %cst_95 = arith.constant dense<0.000000e+00> : vector<1xf32>
    %141 = vector.multi_reduction <add>, %140, %cst_95 [1, 2] : vector<1x1x128xf32> to vector<1xf32>
    %142 = vector.shape_cast %141 : vector<1xf32> to vector<1x1x1xf32>
    %143 = vector.extract %142[0, 0, 0] : f32 from vector<1x1x1xf32>
    %144 = arith.mulf %137, %137 : vector<1x128xf32>
    %145 = vector.shape_cast %144 : vector<1x128xf32> to vector<1x1x128xf32>
    %cst_96 = arith.constant dense<0.000000e+00> : vector<1xf32>
    %146 = vector.multi_reduction <add>, %145, %cst_96 [1, 2] : vector<1x1x128xf32> to vector<1xf32>
    %147 = vector.shape_cast %146 : vector<1xf32> to vector<1x1x1xf32>
    %148 = vector.extract %147[0, 0, 0] : f32 from vector<1x1x1xf32>
    %cst_97 = arith.constant 1.562500e-02 : f32
    %149 = arith.mulf %143, %cst_97 : f32
    %cst_98 = arith.constant 1.562500e-02 : f32
    %150 = arith.mulf %148, %cst_98 : f32
    %151 = arith.mulf %149, %149 : f32
    %152 = arith.subf %150, %151 : f32
    %cst_99 = arith.constant 9.99999974E-6 : f32
    %153 = arith.addf %152, %cst_99 : f32
    %154 = math.rsqrt %153 : f32
    %155 = vector.broadcast %149 : f32 to vector<1x128xf32>
    %156 = arith.subf %137, %155 : vector<1x128xf32>
    %157 = vector.broadcast %154 : f32 to vector<1x128xf32>
    %158 = arith.mulf %156, %157 : vector<1x128xf32>
    %159 = arith.mulf %158, %138 : vector<1x128xf32>
    %160 = arith.addf %159, %139 : vector<1x128xf32>
    %c0_100 = arith.constant 0 : index
    %c0_101 = arith.constant 0 : index
    %161 = vector.load %arg8[%c0_100, %c0_101] : memref<1x128xf32, #tpu.memory_space<vmem>>, vector<1x128xf32>
    %c0_102 = arith.constant 0 : index
    %c0_103 = arith.constant 0 : index
    %162 = vector.load %arg9[%c0_102, %c0_103] : memref<1x128xf32, #tpu.memory_space<vmem>>, vector<1x128xf32>
    %163 = vector.shape_cast %131 : vector<1x128xf32> to vector<1x1x128xf32>
    %cst_104 = arith.constant dense<0.000000e+00> : vector<1xf32>
    %164 = vector.multi_reduction <add>, %163, %cst_104 [1, 2] : vector<1x1x128xf32> to vector<1xf32>
    %165 = vector.shape_cast %164 : vector<1xf32> to vector<1x1x1xf32>
    %166 = vector.extract %165[0, 0, 0] : f32 from vector<1x1x1xf32>
    %167 = arith.mulf %131, %131 : vector<1x128xf32>
    %168 = vector.shape_cast %167 : vector<1x128xf32> to vector<1x1x128xf32>
    %cst_105 = arith.constant dense<0.000000e+00> : vector<1xf32>
    %169 = vector.multi_reduction <add>, %168, %cst_105 [1, 2] : vector<1x1x128xf32> to vector<1xf32>
    %170 = vector.shape_cast %169 : vector<1xf32> to vector<1x1x1xf32>
    %171 = vector.extract %170[0, 0, 0] : f32 from vector<1x1x1xf32>
    %cst_106 = arith.constant 1.562500e-02 : f32
    %172 = arith.mulf %166, %cst_106 : f32
    %cst_107 = arith.constant 1.562500e-02 : f32
    %173 = arith.mulf %171, %cst_107 : f32
    %174 = arith.mulf %172, %172 : f32
    %175 = arith.subf %173, %174 : f32
    %cst_108 = arith.constant 9.99999974E-6 : f32
    %176 = arith.addf %175, %cst_108 : f32
    %177 = math.rsqrt %176 : f32
    %178 = vector.broadcast %172 : f32 to vector<1x128xf32>
    %179 = arith.subf %131, %178 : vector<1x128xf32>
    %180 = vector.broadcast %177 : f32 to vector<1x128xf32>
    %181 = arith.mulf %179, %180 : vector<1x128xf32>
    %182 = arith.mulf %181, %161 : vector<1x128xf32>
    %183 = arith.addf %182, %162 : vector<1x128xf32>
    %184 = arith.addf %183, %160 : vector<1x128xf32>
    %cst_109 = arith.constant 5.000000e-01 : f32
    %185 = vector.broadcast %cst_109 : f32 to vector<1x128xf32>
    %186 = arith.mulf %185, %184 : vector<1x128xf32>
    %cst_110 = arith.constant 0.707106769 : f32
    %187 = vector.broadcast %cst_110 : f32 to vector<1x128xf32>
    %188 = arith.mulf %184, %187 : vector<1x128xf32>
    %189 = math.erf %188 : vector<1x128xf32>
    %cst_111 = arith.constant 1.000000e+00 : f32
    %190 = vector.broadcast %cst_111 : f32 to vector<1x128xf32>
    %191 = arith.addf %190, %189 : vector<1x128xf32>
    %192 = arith.mulf %186, %191 : vector<1x128xf32>
    %193 = arith.truncf %192 : vector<1x128xf32> to vector<1x128xbf16>
    %c0_112 = arith.constant 0 : index
    %c0_113 = arith.constant 0 : index
    %c0_114 = arith.constant 0 : index
    %194 = vector.load %arg14[%c0_112, %c0_113, %c0_114] : memref<1x1x128xbf16, #tpu.memory_space<vmem>>, vector<1x1x128xbf16>
    %195 = vector.shape_cast %194 : vector<1x1x128xbf16> to vector<1x128xbf16>
    %196 = vector.shape_cast %193 : vector<1x128xbf16> to vector<1x1x128xbf16>
    tpu.vector_store %arg14[%c0_112, %c0_113, %c0_114], %196 {strides = array<i32>} : memref<1x1x128xbf16, #tpu.memory_space<vmem>>, vector<1x1x128xbf16>,
    return
  }
  func.func @transform_0(%arg0: i32) -> (i32, i32, i32) {
    %c0_i32 = arith.constant 0 : i32
    %c0_i32_0 = arith.constant 0 : i32
    %c0_i32_1 = arith.constant 0 : i32
    return %arg0, %c0_i32, %c0_i32_0 : i32, i32, i32
  }
  func.func @transform_1(%arg0: i32) -> (i32, i32) {
    %c0_i32 = arith.constant 0 : i32
    %c0_i32_0 = arith.constant 0 : i32
    %c0_i32_1 = arith.constant 0 : i32
    return %c0_i32, %c0_i32_0 : i32, i32
  }
  func.func @transform_2(%arg0: i32) -> (i32, i32, i32) {
    %c0_i32 = arith.constant 0 : i32
    %c0_i32_0 = arith.constant 0 : i32
    %c0_i32_1 = arith.constant 0 : i32
    %c0_i32_2 = arith.constant 0 : i32
    return %c0_i32, %c0_i32_0, %c0_i32_1 : i32, i32, i32
  }
  func.func @transform_3(%arg0: i32) -> (i32, i32) {
    %c0_i32 = arith.constant 0 : i32
    %c0_i32_0 = arith.constant 0 : i32
    %c0_i32_1 = arith.constant 0 : i32
    return %c0_i32, %c0_i32_0 : i32, i32
  }
  func.func @transform_4(%arg0: i32) -> (i32, i32) {
    %c0_i32 = arith.constant 0 : i32
    %c0_i32_0 = arith.constant 0 : i32
    %c0_i32_1 = arith.constant 0 : i32
    return %c0_i32, %c0_i32_0 : i32, i32
  }
  func.func @transform_5(%arg0: i32) -> (i32, i32) {
    %c0_i32 = arith.constant 0 : i32
    %c0_i32_0 = arith.constant 0 : i32
    %c0_i32_1 = arith.constant 0 : i32
    return %c0_i32, %c0_i32_0 : i32, i32
  }
  func.func @transform_6(%arg0: i32) -> (i32, i32, i32) {
    %c0_i32 = arith.constant 0 : i32
    %c0_i32_0 = arith.constant 0 : i32
    %c0_i32_1 = arith.constant 0 : i32
    %c0_i32_2 = arith.constant 0 : i32
    return %c0_i32, %c0_i32_0, %c0_i32_1 : i32, i32, i32
  }
  func.func @transform_7(%arg0: i32) -> (i32, i32) {
    %c0_i32 = arith.constant 0 : i32
    %c0_i32_0 = arith.constant 0 : i32
    %c0_i32_1 = arith.constant 0 : i32
    return %c0_i32, %c0_i32_0 : i32, i32
  }
  func.func @transform_8(%arg0: i32) -> (i32, i32) {
    %c0_i32 = arith.constant 0 : i32
    %c0_i32_0 = arith.constant 0 : i32
    %c0_i32_1 = arith.constant 0 : i32
    return %c0_i32, %c0_i32_0 : i32, i32
  }
  func.func @transform_9(%arg0: i32) -> (i32, i32) {
    %c0_i32 = arith.constant 0 : i32
    %c0_i32_0 = arith.constant 0 : i32
    %c0_i32_1 = arith.constant 0 : i32
    return %c0_i32, %c0_i32_0 : i32, i32
  }
  func.func @transform_10(%arg0: i32) -> (i32, i32) {
    %c0_i32 = arith.constant 0 : i32
    %c0_i32_0 = arith.constant 0 : i32
    %c0_i32_1 = arith.constant 0 : i32
    return %c0_i32, %c0_i32_0 : i32, i32
  }
  func.func @transform_11(%arg0: i32) -> (i32, i32) {
    %c0_i32 = arith.constant 0 : i32
    %c0_i32_0 = arith.constant 0 : i32
    %c0_i32_1 = arith.constant 0 : i32
    return %c0_i32, %c0_i32_0 : i32, i32
  }
  func.func @transform_12(%arg0: i32) -> (i32, i32) {
    %c0_i32 = arith.constant 0 : i32
    %c0_i32_0 = arith.constant 0 : i32
    %c0_i32_1 = arith.constant 0 : i32
    return %c0_i32, %c0_i32_0 : i32, i32
  }
  func.func @transform_13(%arg0: i32) -> (i32, i32, i32) {
    %c0_i32 = arith.constant 0 : i32
    %c0_i32_0 = arith.constant 0 : i32
    %c0_i32_1 = arith.constant 0 : i32
    return %arg0, %c0_i32, %c0_i32_0 : i32, i32, i32
  }
}

module attributes {stable_mosaic.version = 11 : i64} {
  func.func @_block_kernel(%arg0: i32, %arg1: memref<1x16x128xbf16, #tpu.memory_space<vmem>>, %arg2: memref<36x16xbf16, #tpu.memory_space<vmem>>, %arg3: memref<9x16x128xbf16, #tpu.memory_space<vmem>>, %arg4: memref<1x128xf32, #tpu.memory_space<vmem>>, %arg5: memref<1x128xf32, #tpu.memory_space<vmem>>, %arg6: memref<36x4xbf16, #tpu.memory_space<vmem>>, %arg7: memref<9x32x128xbf16, #tpu.memory_space<vmem>>, %arg8: memref<1x128xf32, #tpu.memory_space<vmem>>, %arg9: memref<1x128xf32, #tpu.memory_space<vmem>>, %arg10: memref<4x16xbf16, #tpu.memory_space<vmem>>, %arg11: memref<16x128xbf16, #tpu.memory_space<vmem>>, %arg12: memref<1x128xf32, #tpu.memory_space<vmem>>, %arg13: memref<1x128xf32, #tpu.memory_space<vmem>>, %arg14: memref<1x4x128xbf16, #tpu.memory_space<vmem>>) attributes {dimension_semantics = [#tpu.dimension_semantics<parallel>], iteration_bounds = array<i64: 2>, scalar_prefetch = 0 : i64, scratch_operands = 0 : i64, tpu.core_type = #tpu.core_type<tc>, window_params = [{transform_indices = @transform_0, window_bounds = array<i64: 1, 16, 128>}, {pipeline_mode = #tpu.pipeline_mode<synchronous>, transform_indices = @transform_1, window_bounds = array<i64: 36, 16>}, {pipeline_mode = #tpu.pipeline_mode<synchronous>, transform_indices = @transform_2, window_bounds = array<i64: 9, 16, 128>}, {pipeline_mode = #tpu.pipeline_mode<synchronous>, transform_indices = @transform_3, window_bounds = array<i64: 1, 128>}, {pipeline_mode = #tpu.pipeline_mode<synchronous>, transform_indices = @transform_4, window_bounds = array<i64: 1, 128>}, {pipeline_mode = #tpu.pipeline_mode<synchronous>, transform_indices = @transform_5, window_bounds = array<i64: 36, 4>}, {pipeline_mode = #tpu.pipeline_mode<synchronous>, transform_indices = @transform_6, window_bounds = array<i64: 9, 32, 128>}, {pipeline_mode = #tpu.pipeline_mode<synchronous>, transform_indices = @transform_7, window_bounds = array<i64: 1, 128>}, {pipeline_mode = #tpu.pipeline_mode<synchronous>, transform_indices = @transform_8, window_bounds = array<i64: 1, 128>}, {pipeline_mode = #tpu.pipeline_mode<synchronous>, transform_indices = @transform_9, window_bounds = array<i64: 4, 16>}, {pipeline_mode = #tpu.pipeline_mode<synchronous>, transform_indices = @transform_10, window_bounds = array<i64: 16, 128>}, {pipeline_mode = #tpu.pipeline_mode<synchronous>, transform_indices = @transform_11, window_bounds = array<i64: 1, 128>}, {pipeline_mode = #tpu.pipeline_mode<synchronous>, transform_indices = @transform_12, window_bounds = array<i64: 1, 128>}, {transform_indices = @transform_13, window_bounds = array<i64: 1, 4, 128>}]} {
    %c0 = arith.constant 0 : index
    %c0_0 = arith.constant 0 : index
    %c0_1 = arith.constant 0 : index
    %0 = vector.load %arg1[%c0, %c0_0, %c0_1] : memref<1x16x128xbf16, #tpu.memory_space<vmem>>, vector<1x16x128xbf16>
    %1 = vector.shape_cast %0 : vector<1x16x128xbf16> to vector<16x128xbf16>
    %c0_2 = arith.constant 0 : index
    %c0_3 = arith.constant 0 : index
    %2 = vector.load %arg2[%c0_2, %c0_3] : memref<36x16xbf16, #tpu.memory_space<vmem>>, vector<36x16xbf16>
    %cst = arith.constant dense<0.000000e+00> : vector<36x128xf32>
    %3 = tpu.matmul %2, %1, %cst {dimension_numbers = #tpu.dot_dimension_numbers<[1], [0], [0], [1], [0, 0, 1, 1], [], []>} : vector<36x16xbf16>, vector<16x128xbf16>, vector<36x128xf32> -> vector<36x128xf32>
    %4 = arith.truncf %3 : vector<36x128xf32> to vector<36x128xbf16>
    %cst_4 = arith.constant 0.000000e+00 : f32
    %5 = vector.broadcast %cst_4 : f32 to vector<4x128xf32>
    %6 = vector.extract_strided_slice %4 {offsets = [0, 0], sizes = [4, 16], strides = [1, 1]} : vector<36x128xbf16> to vector<4x16xbf16>
    %c0_5 = arith.constant 0 : index
    %c0_6 = arith.constant 0 : index
    %c0_7 = arith.constant 0 : index
    %7 = vector.load %arg3[%c0_5, %c0_6, %c0_7] : memref<9x16x128xbf16, #tpu.memory_space<vmem>>, vector<1x16x128xbf16>
    %8 = vector.shape_cast %7 : vector<1x16x128xbf16> to vector<16x128xbf16>
    %cst_8 = arith.constant dense<0.000000e+00> : vector<4x128xf32>
    %9 = tpu.matmul %6, %8, %cst_8 {dimension_numbers = #tpu.dot_dimension_numbers<[1], [0], [0], [1], [0, 0, 1, 1], [], []>} : vector<4x16xbf16>, vector<16x128xbf16>, vector<4x128xf32> -> vector<4x128xf32>
    %10 = arith.addf %5, %9 : vector<4x128xf32>
    %11 = vector.extract_strided_slice %4 {offsets = [4, 0], sizes = [4, 16], strides = [1, 1]} : vector<36x128xbf16> to vector<4x16xbf16>
    %c1 = arith.constant 1 : index
    %c0_9 = arith.constant 0 : index
    %c0_10 = arith.constant 0 : index
    %12 = vector.load %arg3[%c1, %c0_9, %c0_10] : memref<9x16x128xbf16, #tpu.memory_space<vmem>>, vector<1x16x128xbf16>
    %13 = vector.shape_cast %12 : vector<1x16x128xbf16> to vector<16x128xbf16>
    %cst_11 = arith.constant dense<0.000000e+00> : vector<4x128xf32>
    %14 = tpu.matmul %11, %13, %cst_11 {dimension_numbers = #tpu.dot_dimension_numbers<[1], [0], [0], [1], [0, 0, 1, 1], [], []>} : vector<4x16xbf16>, vector<16x128xbf16>, vector<4x128xf32> -> vector<4x128xf32>
    %15 = arith.addf %10, %14 : vector<4x128xf32>
    %16 = vector.extract_strided_slice %4 {offsets = [8, 0], sizes = [4, 16], strides = [1, 1]} : vector<36x128xbf16> to vector<4x16xbf16>
    %c2 = arith.constant 2 : index
    %c0_12 = arith.constant 0 : index
    %c0_13 = arith.constant 0 : index
    %17 = vector.load %arg3[%c2, %c0_12, %c0_13] : memref<9x16x128xbf16, #tpu.memory_space<vmem>>, vector<1x16x128xbf16>
    %18 = vector.shape_cast %17 : vector<1x16x128xbf16> to vector<16x128xbf16>
    %cst_14 = arith.constant dense<0.000000e+00> : vector<4x128xf32>
    %19 = tpu.matmul %16, %18, %cst_14 {dimension_numbers = #tpu.dot_dimension_numbers<[1], [0], [0], [1], [0, 0, 1, 1], [], []>} : vector<4x16xbf16>, vector<16x128xbf16>, vector<4x128xf32> -> vector<4x128xf32>
    %20 = arith.addf %15, %19 : vector<4x128xf32>
    %21 = vector.extract_strided_slice %4 {offsets = [12, 0], sizes = [4, 16], strides = [1, 1]} : vector<36x128xbf16> to vector<4x16xbf16>
    %c3 = arith.constant 3 : index
    %c0_15 = arith.constant 0 : index
    %c0_16 = arith.constant 0 : index
    %22 = vector.load %arg3[%c3, %c0_15, %c0_16] : memref<9x16x128xbf16, #tpu.memory_space<vmem>>, vector<1x16x128xbf16>
    %23 = vector.shape_cast %22 : vector<1x16x128xbf16> to vector<16x128xbf16>
    %cst_17 = arith.constant dense<0.000000e+00> : vector<4x128xf32>
    %24 = tpu.matmul %21, %23, %cst_17 {dimension_numbers = #tpu.dot_dimension_numbers<[1], [0], [0], [1], [0, 0, 1, 1], [], []>} : vector<4x16xbf16>, vector<16x128xbf16>, vector<4x128xf32> -> vector<4x128xf32>
    %25 = arith.addf %20, %24 : vector<4x128xf32>
    %26 = vector.extract_strided_slice %4 {offsets = [16, 0], sizes = [4, 16], strides = [1, 1]} : vector<36x128xbf16> to vector<4x16xbf16>
    %c4 = arith.constant 4 : index
    %c0_18 = arith.constant 0 : index
    %c0_19 = arith.constant 0 : index
    %27 = vector.load %arg3[%c4, %c0_18, %c0_19] : memref<9x16x128xbf16, #tpu.memory_space<vmem>>, vector<1x16x128xbf16>
    %28 = vector.shape_cast %27 : vector<1x16x128xbf16> to vector<16x128xbf16>
    %cst_20 = arith.constant dense<0.000000e+00> : vector<4x128xf32>
    %29 = tpu.matmul %26, %28, %cst_20 {dimension_numbers = #tpu.dot_dimension_numbers<[1], [0], [0], [1], [0, 0, 1, 1], [], []>} : vector<4x16xbf16>, vector<16x128xbf16>, vector<4x128xf32> -> vector<4x128xf32>
    %30 = arith.addf %25, %29 : vector<4x128xf32>
    %31 = vector.extract_strided_slice %4 {offsets = [20, 0], sizes = [4, 16], strides = [1, 1]} : vector<36x128xbf16> to vector<4x16xbf16>
    %c5 = arith.constant 5 : index
    %c0_21 = arith.constant 0 : index
    %c0_22 = arith.constant 0 : index
    %32 = vector.load %arg3[%c5, %c0_21, %c0_22] : memref<9x16x128xbf16, #tpu.memory_space<vmem>>, vector<1x16x128xbf16>
    %33 = vector.shape_cast %32 : vector<1x16x128xbf16> to vector<16x128xbf16>
    %cst_23 = arith.constant dense<0.000000e+00> : vector<4x128xf32>
    %34 = tpu.matmul %31, %33, %cst_23 {dimension_numbers = #tpu.dot_dimension_numbers<[1], [0], [0], [1], [0, 0, 1, 1], [], []>} : vector<4x16xbf16>, vector<16x128xbf16>, vector<4x128xf32> -> vector<4x128xf32>
    %35 = arith.addf %30, %34 : vector<4x128xf32>
    %36 = vector.extract_strided_slice %4 {offsets = [24, 0], sizes = [4, 16], strides = [1, 1]} : vector<36x128xbf16> to vector<4x16xbf16>
    %c6 = arith.constant 6 : index
    %c0_24 = arith.constant 0 : index
    %c0_25 = arith.constant 0 : index
    %37 = vector.load %arg3[%c6, %c0_24, %c0_25] : memref<9x16x128xbf16, #tpu.memory_space<vmem>>, vector<1x16x128xbf16>
    %38 = vector.shape_cast %37 : vector<1x16x128xbf16> to vector<16x128xbf16>
    %cst_26 = arith.constant dense<0.000000e+00> : vector<4x128xf32>
    %39 = tpu.matmul %36, %38, %cst_26 {dimension_numbers = #tpu.dot_dimension_numbers<[1], [0], [0], [1], [0, 0, 1, 1], [], []>} : vector<4x16xbf16>, vector<16x128xbf16>, vector<4x128xf32> -> vector<4x128xf32>
    %40 = arith.addf %35, %39 : vector<4x128xf32>
    %41 = vector.extract_strided_slice %4 {offsets = [28, 0], sizes = [4, 16], strides = [1, 1]} : vector<36x128xbf16> to vector<4x16xbf16>
    %c7 = arith.constant 7 : index
    %c0_27 = arith.constant 0 : index
    %c0_28 = arith.constant 0 : index
    %42 = vector.load %arg3[%c7, %c0_27, %c0_28] : memref<9x16x128xbf16, #tpu.memory_space<vmem>>, vector<1x16x128xbf16>
    %43 = vector.shape_cast %42 : vector<1x16x128xbf16> to vector<16x128xbf16>
    %cst_29 = arith.constant dense<0.000000e+00> : vector<4x128xf32>
    %44 = tpu.matmul %41, %43, %cst_29 {dimension_numbers = #tpu.dot_dimension_numbers<[1], [0], [0], [1], [0, 0, 1, 1], [], []>} : vector<4x16xbf16>, vector<16x128xbf16>, vector<4x128xf32> -> vector<4x128xf32>
    %45 = arith.addf %40, %44 : vector<4x128xf32>
    %46 = vector.extract_strided_slice %4 {offsets = [32, 0], sizes = [4, 16], strides = [1, 1]} : vector<36x128xbf16> to vector<4x16xbf16>
    %c8 = arith.constant 8 : index
    %c0_30 = arith.constant 0 : index
    %c0_31 = arith.constant 0 : index
    %47 = vector.load %arg3[%c8, %c0_30, %c0_31] : memref<9x16x128xbf16, #tpu.memory_space<vmem>>, vector<1x16x128xbf16>
    %48 = vector.shape_cast %47 : vector<1x16x128xbf16> to vector<16x128xbf16>
    %cst_32 = arith.constant dense<0.000000e+00> : vector<4x128xf32>
    %49 = tpu.matmul %46, %48, %cst_32 {dimension_numbers = #tpu.dot_dimension_numbers<[1], [0], [0], [1], [0, 0, 1, 1], [], []>} : vector<4x16xbf16>, vector<16x128xbf16>, vector<4x128xf32> -> vector<4x128xf32>
    %50 = arith.addf %45, %49 : vector<4x128xf32>
    %c0_33 = arith.constant 0 : index
    %c0_34 = arith.constant 0 : index
    %51 = vector.load %arg4[%c0_33, %c0_34] : memref<1x128xf32, #tpu.memory_space<vmem>>, vector<1x128xf32>
    %c0_35 = arith.constant 0 : index
    %c0_36 = arith.constant 0 : index
    %52 = vector.load %arg5[%c0_35, %c0_36] : memref<1x128xf32, #tpu.memory_space<vmem>>, vector<1x128xf32>
    %53 = vector.shape_cast %50 : vector<4x128xf32> to vector<1x4x128xf32>
    %cst_37 = arith.constant dense<0.000000e+00> : vector<1xf32>
    %54 = vector.multi_reduction <add>, %53, %cst_37 [1, 2] : vector<1x4x128xf32> to vector<1xf32>
    %55 = vector.shape_cast %54 : vector<1xf32> to vector<1x1x1xf32>
    %56 = vector.extract %55[0, 0, 0] : f32 from vector<1x1x1xf32>
    %57 = arith.mulf %50, %50 : vector<4x128xf32>
    %58 = vector.shape_cast %57 : vector<4x128xf32> to vector<1x4x128xf32>
    %cst_38 = arith.constant dense<0.000000e+00> : vector<1xf32>
    %59 = vector.multi_reduction <add>, %58, %cst_38 [1, 2] : vector<1x4x128xf32> to vector<1xf32>
    %60 = vector.shape_cast %59 : vector<1xf32> to vector<1x1x1xf32>
    %61 = vector.extract %60[0, 0, 0] : f32 from vector<1x1x1xf32>
    %cst_39 = arith.constant 7.812500e-03 : f32
    %62 = arith.mulf %56, %cst_39 : f32
    %cst_40 = arith.constant 7.812500e-03 : f32
    %63 = arith.mulf %61, %cst_40 : f32
    %64 = arith.mulf %62, %62 : f32
    %65 = arith.subf %63, %64 : f32
    %cst_41 = arith.constant 9.99999974E-6 : f32
    %66 = arith.addf %65, %cst_41 : f32
    %67 = math.rsqrt %66 : f32
    %68 = vector.broadcast %62 : f32 to vector<4x128xf32>
    %69 = arith.subf %50, %68 : vector<4x128xf32>
    %70 = vector.broadcast %67 : f32 to vector<4x128xf32>
    %71 = arith.mulf %69, %70 : vector<4x128xf32>
    %72 = vector.broadcast %51 : vector<1x128xf32> to vector<4x128xf32>
    %73 = arith.mulf %71, %72 : vector<4x128xf32>
    %74 = vector.broadcast %52 : vector<1x128xf32> to vector<4x128xf32>
    %75 = arith.addf %73, %74 : vector<4x128xf32>
    %cst_42 = arith.constant 5.000000e-01 : f32
    %76 = vector.broadcast %cst_42 : f32 to vector<4x128xf32>
    %77 = arith.mulf %76, %75 : vector<4x128xf32>
    %cst_43 = arith.constant 0.707106769 : f32
    %78 = vector.broadcast %cst_43 : f32 to vector<4x128xf32>
    %79 = arith.mulf %75, %78 : vector<4x128xf32>
    %80 = math.erf %79 : vector<4x128xf32>
    %cst_44 = arith.constant 1.000000e+00 : f32
    %81 = vector.broadcast %cst_44 : f32 to vector<4x128xf32>
    %82 = arith.addf %81, %80 : vector<4x128xf32>
    %83 = arith.mulf %77, %82 : vector<4x128xf32>
    %84 = arith.truncf %83 : vector<4x128xf32> to vector<4x128xbf16>
    %c0_45 = arith.constant 0 : index
    %c0_46 = arith.constant 0 : index
    %85 = vector.load %arg6[%c0_45, %c0_46] : memref<36x4xbf16, #tpu.memory_space<vmem>>, vector<36x4xbf16>
    %cst_47 = arith.constant dense<0.000000e+00> : vector<36x128xf32>
    %86 = tpu.matmul %85, %84, %cst_47 {dimension_numbers = #tpu.dot_dimension_numbers<[1], [0], [0], [1], [0, 0, 1, 1], [], []>} : vector<36x4xbf16>, vector<4x128xbf16>, vector<36x128xf32> -> vector<36x128xf32>
    %87 = arith.truncf %86 : vector<36x128xf32> to vector<36x128xbf16>
    %cst_48 = arith.constant 0.000000e+00 : f32
    %88 = vector.broadcast %cst_48 : f32 to vector<4x128xf32>
    %89 = vector.extract_strided_slice %87 {offsets = [0, 0], sizes = [4, 32], strides = [1, 1]} : vector<36x128xbf16> to vector<4x32xbf16>
    %c0_49 = arith.constant 0 : index
    %c0_50 = arith.constant 0 : index
    %c0_51 = arith.constant 0 : index
    %90 = vector.load %arg7[%c0_49, %c0_50, %c0_51] : memref<9x32x128xbf16, #tpu.memory_space<vmem>>, vector<1x32x128xbf16>
    %91 = vector.shape_cast %90 : vector<1x32x128xbf16> to vector<32x128xbf16>
    %cst_52 = arith.constant dense<0.000000e+00> : vector<4x128xf32>
    %92 = tpu.matmul %89, %91, %cst_52 {dimension_numbers = #tpu.dot_dimension_numbers<[1], [0], [0], [1], [0, 0, 1, 1], [], []>} : vector<4x32xbf16>, vector<32x128xbf16>, vector<4x128xf32> -> vector<4x128xf32>
    %93 = arith.addf %88, %92 : vector<4x128xf32>
    %94 = vector.extract_strided_slice %87 {offsets = [4, 0], sizes = [4, 32], strides = [1, 1]} : vector<36x128xbf16> to vector<4x32xbf16>
    %c1_53 = arith.constant 1 : index
    %c0_54 = arith.constant 0 : index
    %c0_55 = arith.constant 0 : index
    %95 = vector.load %arg7[%c1_53, %c0_54, %c0_55] : memref<9x32x128xbf16, #tpu.memory_space<vmem>>, vector<1x32x128xbf16>
    %96 = vector.shape_cast %95 : vector<1x32x128xbf16> to vector<32x128xbf16>
    %cst_56 = arith.constant dense<0.000000e+00> : vector<4x128xf32>
    %97 = tpu.matmul %94, %96, %cst_56 {dimension_numbers = #tpu.dot_dimension_numbers<[1], [0], [0], [1], [0, 0, 1, 1], [], []>} : vector<4x32xbf16>, vector<32x128xbf16>, vector<4x128xf32> -> vector<4x128xf32>
    %98 = arith.addf %93, %97 : vector<4x128xf32>
    %99 = vector.extract_strided_slice %87 {offsets = [8, 0], sizes = [4, 32], strides = [1, 1]} : vector<36x128xbf16> to vector<4x32xbf16>
    %c2_57 = arith.constant 2 : index
    %c0_58 = arith.constant 0 : index
    %c0_59 = arith.constant 0 : index
    %100 = vector.load %arg7[%c2_57, %c0_58, %c0_59] : memref<9x32x128xbf16, #tpu.memory_space<vmem>>, vector<1x32x128xbf16>
    %101 = vector.shape_cast %100 : vector<1x32x128xbf16> to vector<32x128xbf16>
    %cst_60 = arith.constant dense<0.000000e+00> : vector<4x128xf32>
    %102 = tpu.matmul %99, %101, %cst_60 {dimension_numbers = #tpu.dot_dimension_numbers<[1], [0], [0], [1], [0, 0, 1, 1], [], []>} : vector<4x32xbf16>, vector<32x128xbf16>, vector<4x128xf32> -> vector<4x128xf32>
    %103 = arith.addf %98, %102 : vector<4x128xf32>
    %104 = vector.extract_strided_slice %87 {offsets = [12, 0], sizes = [4, 32], strides = [1, 1]} : vector<36x128xbf16> to vector<4x32xbf16>
    %c3_61 = arith.constant 3 : index
    %c0_62 = arith.constant 0 : index
    %c0_63 = arith.constant 0 : index
    %105 = vector.load %arg7[%c3_61, %c0_62, %c0_63] : memref<9x32x128xbf16, #tpu.memory_space<vmem>>, vector<1x32x128xbf16>
    %106 = vector.shape_cast %105 : vector<1x32x128xbf16> to vector<32x128xbf16>
    %cst_64 = arith.constant dense<0.000000e+00> : vector<4x128xf32>
    %107 = tpu.matmul %104, %106, %cst_64 {dimension_numbers = #tpu.dot_dimension_numbers<[1], [0], [0], [1], [0, 0, 1, 1], [], []>} : vector<4x32xbf16>, vector<32x128xbf16>, vector<4x128xf32> -> vector<4x128xf32>
    %108 = arith.addf %103, %107 : vector<4x128xf32>
    %109 = vector.extract_strided_slice %87 {offsets = [16, 0], sizes = [4, 32], strides = [1, 1]} : vector<36x128xbf16> to vector<4x32xbf16>
    %c4_65 = arith.constant 4 : index
    %c0_66 = arith.constant 0 : index
    %c0_67 = arith.constant 0 : index
    %110 = vector.load %arg7[%c4_65, %c0_66, %c0_67] : memref<9x32x128xbf16, #tpu.memory_space<vmem>>, vector<1x32x128xbf16>
    %111 = vector.shape_cast %110 : vector<1x32x128xbf16> to vector<32x128xbf16>
    %cst_68 = arith.constant dense<0.000000e+00> : vector<4x128xf32>
    %112 = tpu.matmul %109, %111, %cst_68 {dimension_numbers = #tpu.dot_dimension_numbers<[1], [0], [0], [1], [0, 0, 1, 1], [], []>} : vector<4x32xbf16>, vector<32x128xbf16>, vector<4x128xf32> -> vector<4x128xf32>
    %113 = arith.addf %108, %112 : vector<4x128xf32>
    %114 = vector.extract_strided_slice %87 {offsets = [20, 0], sizes = [4, 32], strides = [1, 1]} : vector<36x128xbf16> to vector<4x32xbf16>
    %c5_69 = arith.constant 5 : index
    %c0_70 = arith.constant 0 : index
    %c0_71 = arith.constant 0 : index
    %115 = vector.load %arg7[%c5_69, %c0_70, %c0_71] : memref<9x32x128xbf16, #tpu.memory_space<vmem>>, vector<1x32x128xbf16>
    %116 = vector.shape_cast %115 : vector<1x32x128xbf16> to vector<32x128xbf16>
    %cst_72 = arith.constant dense<0.000000e+00> : vector<4x128xf32>
    %117 = tpu.matmul %114, %116, %cst_72 {dimension_numbers = #tpu.dot_dimension_numbers<[1], [0], [0], [1], [0, 0, 1, 1], [], []>} : vector<4x32xbf16>, vector<32x128xbf16>, vector<4x128xf32> -> vector<4x128xf32>
    %118 = arith.addf %113, %117 : vector<4x128xf32>
    %119 = vector.extract_strided_slice %87 {offsets = [24, 0], sizes = [4, 32], strides = [1, 1]} : vector<36x128xbf16> to vector<4x32xbf16>
    %c6_73 = arith.constant 6 : index
    %c0_74 = arith.constant 0 : index
    %c0_75 = arith.constant 0 : index
    %120 = vector.load %arg7[%c6_73, %c0_74, %c0_75] : memref<9x32x128xbf16, #tpu.memory_space<vmem>>, vector<1x32x128xbf16>
    %121 = vector.shape_cast %120 : vector<1x32x128xbf16> to vector<32x128xbf16>
    %cst_76 = arith.constant dense<0.000000e+00> : vector<4x128xf32>
    %122 = tpu.matmul %119, %121, %cst_76 {dimension_numbers = #tpu.dot_dimension_numbers<[1], [0], [0], [1], [0, 0, 1, 1], [], []>} : vector<4x32xbf16>, vector<32x128xbf16>, vector<4x128xf32> -> vector<4x128xf32>
    %123 = arith.addf %118, %122 : vector<4x128xf32>
    %124 = vector.extract_strided_slice %87 {offsets = [28, 0], sizes = [4, 32], strides = [1, 1]} : vector<36x128xbf16> to vector<4x32xbf16>
    %c7_77 = arith.constant 7 : index
    %c0_78 = arith.constant 0 : index
    %c0_79 = arith.constant 0 : index
    %125 = vector.load %arg7[%c7_77, %c0_78, %c0_79] : memref<9x32x128xbf16, #tpu.memory_space<vmem>>, vector<1x32x128xbf16>
    %126 = vector.shape_cast %125 : vector<1x32x128xbf16> to vector<32x128xbf16>
    %cst_80 = arith.constant dense<0.000000e+00> : vector<4x128xf32>
    %127 = tpu.matmul %124, %126, %cst_80 {dimension_numbers = #tpu.dot_dimension_numbers<[1], [0], [0], [1], [0, 0, 1, 1], [], []>} : vector<4x32xbf16>, vector<32x128xbf16>, vector<4x128xf32> -> vector<4x128xf32>
    %128 = arith.addf %123, %127 : vector<4x128xf32>
    %129 = vector.extract_strided_slice %87 {offsets = [32, 0], sizes = [4, 32], strides = [1, 1]} : vector<36x128xbf16> to vector<4x32xbf16>
    %c8_81 = arith.constant 8 : index
    %c0_82 = arith.constant 0 : index
    %c0_83 = arith.constant 0 : index
    %130 = vector.load %arg7[%c8_81, %c0_82, %c0_83] : memref<9x32x128xbf16, #tpu.memory_space<vmem>>, vector<1x32x128xbf16>
    %131 = vector.shape_cast %130 : vector<1x32x128xbf16> to vector<32x128xbf16>
    %cst_84 = arith.constant dense<0.000000e+00> : vector<4x128xf32>
    %132 = tpu.matmul %129, %131, %cst_84 {dimension_numbers = #tpu.dot_dimension_numbers<[1], [0], [0], [1], [0, 0, 1, 1], [], []>} : vector<4x32xbf16>, vector<32x128xbf16>, vector<4x128xf32> -> vector<4x128xf32>
    %133 = arith.addf %128, %132 : vector<4x128xf32>
    %c0_85 = arith.constant 0 : index
    %c0_86 = arith.constant 0 : index
    %134 = vector.load %arg10[%c0_85, %c0_86] : memref<4x16xbf16, #tpu.memory_space<vmem>>, vector<4x16xbf16>
    %cst_87 = arith.constant dense<0.000000e+00> : vector<4x128xf32>
    %135 = tpu.matmul %134, %1, %cst_87 {dimension_numbers = #tpu.dot_dimension_numbers<[1], [0], [0], [1], [0, 0, 1, 1], [], []>} : vector<4x16xbf16>, vector<16x128xbf16>, vector<4x128xf32> -> vector<4x128xf32>
    %136 = arith.truncf %135 : vector<4x128xf32> to vector<4x128xbf16>
    %137 = vector.extract_strided_slice %136 {offsets = [0, 0], sizes = [4, 16], strides = [1, 1]} : vector<4x128xbf16> to vector<4x16xbf16>
    %c0_88 = arith.constant 0 : index
    %c0_89 = arith.constant 0 : index
    %138 = vector.load %arg11[%c0_88, %c0_89] : memref<16x128xbf16, #tpu.memory_space<vmem>>, vector<16x128xbf16>
    %cst_90 = arith.constant dense<0.000000e+00> : vector<4x128xf32>
    %139 = tpu.matmul %137, %138, %cst_90 {dimension_numbers = #tpu.dot_dimension_numbers<[1], [0], [0], [1], [0, 0, 1, 1], [], []>} : vector<4x16xbf16>, vector<16x128xbf16>, vector<4x128xf32> -> vector<4x128xf32>
    %c0_91 = arith.constant 0 : index
    %c0_92 = arith.constant 0 : index
    %140 = vector.load %arg12[%c0_91, %c0_92] : memref<1x128xf32, #tpu.memory_space<vmem>>, vector<1x128xf32>
    %c0_93 = arith.constant 0 : index
    %c0_94 = arith.constant 0 : index
    %141 = vector.load %arg13[%c0_93, %c0_94] : memref<1x128xf32, #tpu.memory_space<vmem>>, vector<1x128xf32>
    %142 = vector.shape_cast %139 : vector<4x128xf32> to vector<1x4x128xf32>
    %cst_95 = arith.constant dense<0.000000e+00> : vector<1xf32>
    %143 = vector.multi_reduction <add>, %142, %cst_95 [1, 2] : vector<1x4x128xf32> to vector<1xf32>
    %144 = vector.shape_cast %143 : vector<1xf32> to vector<1x1x1xf32>
    %145 = vector.extract %144[0, 0, 0] : f32 from vector<1x1x1xf32>
    %146 = arith.mulf %139, %139 : vector<4x128xf32>
    %147 = vector.shape_cast %146 : vector<4x128xf32> to vector<1x4x128xf32>
    %cst_96 = arith.constant dense<0.000000e+00> : vector<1xf32>
    %148 = vector.multi_reduction <add>, %147, %cst_96 [1, 2] : vector<1x4x128xf32> to vector<1xf32>
    %149 = vector.shape_cast %148 : vector<1xf32> to vector<1x1x1xf32>
    %150 = vector.extract %149[0, 0, 0] : f32 from vector<1x1x1xf32>
    %cst_97 = arith.constant 7.812500e-03 : f32
    %151 = arith.mulf %145, %cst_97 : f32
    %cst_98 = arith.constant 7.812500e-03 : f32
    %152 = arith.mulf %150, %cst_98 : f32
    %153 = arith.mulf %151, %151 : f32
    %154 = arith.subf %152, %153 : f32
    %cst_99 = arith.constant 9.99999974E-6 : f32
    %155 = arith.addf %154, %cst_99 : f32
    %156 = math.rsqrt %155 : f32
    %157 = vector.broadcast %151 : f32 to vector<4x128xf32>
    %158 = arith.subf %139, %157 : vector<4x128xf32>
    %159 = vector.broadcast %156 : f32 to vector<4x128xf32>
    %160 = arith.mulf %158, %159 : vector<4x128xf32>
    %161 = vector.broadcast %140 : vector<1x128xf32> to vector<4x128xf32>
    %162 = arith.mulf %160, %161 : vector<4x128xf32>
    %163 = vector.broadcast %141 : vector<1x128xf32> to vector<4x128xf32>
    %164 = arith.addf %162, %163 : vector<4x128xf32>
    %c0_100 = arith.constant 0 : index
    %c0_101 = arith.constant 0 : index
    %165 = vector.load %arg8[%c0_100, %c0_101] : memref<1x128xf32, #tpu.memory_space<vmem>>, vector<1x128xf32>
    %c0_102 = arith.constant 0 : index
    %c0_103 = arith.constant 0 : index
    %166 = vector.load %arg9[%c0_102, %c0_103] : memref<1x128xf32, #tpu.memory_space<vmem>>, vector<1x128xf32>
    %167 = vector.shape_cast %133 : vector<4x128xf32> to vector<1x4x128xf32>
    %cst_104 = arith.constant dense<0.000000e+00> : vector<1xf32>
    %168 = vector.multi_reduction <add>, %167, %cst_104 [1, 2] : vector<1x4x128xf32> to vector<1xf32>
    %169 = vector.shape_cast %168 : vector<1xf32> to vector<1x1x1xf32>
    %170 = vector.extract %169[0, 0, 0] : f32 from vector<1x1x1xf32>
    %171 = arith.mulf %133, %133 : vector<4x128xf32>
    %172 = vector.shape_cast %171 : vector<4x128xf32> to vector<1x4x128xf32>
    %cst_105 = arith.constant dense<0.000000e+00> : vector<1xf32>
    %173 = vector.multi_reduction <add>, %172, %cst_105 [1, 2] : vector<1x4x128xf32> to vector<1xf32>
    %174 = vector.shape_cast %173 : vector<1xf32> to vector<1x1x1xf32>
    %175 = vector.extract %174[0, 0, 0] : f32 from vector<1x1x1xf32>
    %cst_106 = arith.constant 7.812500e-03 : f32
    %176 = arith.mulf %170, %cst_106 : f32
    %cst_107 = arith.constant 7.812500e-03 : f32
    %177 = arith.mulf %175, %cst_107 : f32
    %178 = arith.mulf %176, %176 : f32
    %179 = arith.subf %177, %178 : f32
    %cst_108 = arith.constant 9.99999974E-6 : f32
    %180 = arith.addf %179, %cst_108 : f32
    %181 = math.rsqrt %180 : f32
    %182 = vector.broadcast %176 : f32 to vector<4x128xf32>
    %183 = arith.subf %133, %182 : vector<4x128xf32>
    %184 = vector.broadcast %181 : f32 to vector<4x128xf32>
    %185 = arith.mulf %183, %184 : vector<4x128xf32>
    %186 = vector.broadcast %165 : vector<1x128xf32> to vector<4x128xf32>
    %187 = arith.mulf %185, %186 : vector<4x128xf32>
    %188 = vector.broadcast %166 : vector<1x128xf32> to vector<4x128xf32>
    %189 = arith.addf %187, %188 : vector<4x128xf32>
    %190 = arith.addf %189, %164 : vector<4x128xf32>
    %cst_109 = arith.constant 5.000000e-01 : f32
    %191 = vector.broadcast %cst_109 : f32 to vector<4x128xf32>
    %192 = arith.mulf %191, %190 : vector<4x128xf32>
    %cst_110 = arith.constant 0.707106769 : f32
    %193 = vector.broadcast %cst_110 : f32 to vector<4x128xf32>
    %194 = arith.mulf %190, %193 : vector<4x128xf32>
    %195 = math.erf %194 : vector<4x128xf32>
    %cst_111 = arith.constant 1.000000e+00 : f32
    %196 = vector.broadcast %cst_111 : f32 to vector<4x128xf32>
    %197 = arith.addf %196, %195 : vector<4x128xf32>
    %198 = arith.mulf %192, %197 : vector<4x128xf32>
    %199 = arith.truncf %198 : vector<4x128xf32> to vector<4x128xbf16>
    %c0_112 = arith.constant 0 : index
    %c0_113 = arith.constant 0 : index
    %c0_114 = arith.constant 0 : index
    %200 = vector.load %arg14[%c0_112, %c0_113, %c0_114] : memref<1x4x128xbf16, #tpu.memory_space<vmem>>, vector<1x4x128xbf16>
    %201 = vector.shape_cast %200 : vector<1x4x128xbf16> to vector<4x128xbf16>
    %202 = vector.shape_cast %199 : vector<4x128xbf16> to vector<1x4x128xbf16>
    tpu.vector_store %arg14[%c0_112, %c0_113, %c0_114], %202 {strides = array<i32>} : memref<1x4x128xbf16, #tpu.memory_space<vmem>>, vector<1x4x128xbf16>,
    return
  }
  func.func @transform_0(%arg0: i32) -> (i32, i32, i32) {
    %c0_i32 = arith.constant 0 : i32
    %c0_i32_0 = arith.constant 0 : i32
    %c0_i32_1 = arith.constant 0 : i32
    return %arg0, %c0_i32, %c0_i32_0 : i32, i32, i32
  }
  func.func @transform_1(%arg0: i32) -> (i32, i32) {
    %c0_i32 = arith.constant 0 : i32
    %c0_i32_0 = arith.constant 0 : i32
    %c0_i32_1 = arith.constant 0 : i32
    return %c0_i32, %c0_i32_0 : i32, i32
  }
  func.func @transform_2(%arg0: i32) -> (i32, i32, i32) {
    %c0_i32 = arith.constant 0 : i32
    %c0_i32_0 = arith.constant 0 : i32
    %c0_i32_1 = arith.constant 0 : i32
    %c0_i32_2 = arith.constant 0 : i32
    return %c0_i32, %c0_i32_0, %c0_i32_1 : i32, i32, i32
  }
  func.func @transform_3(%arg0: i32) -> (i32, i32) {
    %c0_i32 = arith.constant 0 : i32
    %c0_i32_0 = arith.constant 0 : i32
    %c0_i32_1 = arith.constant 0 : i32
    return %c0_i32, %c0_i32_0 : i32, i32
  }
  func.func @transform_4(%arg0: i32) -> (i32, i32) {
    %c0_i32 = arith.constant 0 : i32
    %c0_i32_0 = arith.constant 0 : i32
    %c0_i32_1 = arith.constant 0 : i32
    return %c0_i32, %c0_i32_0 : i32, i32
  }
  func.func @transform_5(%arg0: i32) -> (i32, i32) {
    %c0_i32 = arith.constant 0 : i32
    %c0_i32_0 = arith.constant 0 : i32
    %c0_i32_1 = arith.constant 0 : i32
    return %c0_i32, %c0_i32_0 : i32, i32
  }
  func.func @transform_6(%arg0: i32) -> (i32, i32, i32) {
    %c0_i32 = arith.constant 0 : i32
    %c0_i32_0 = arith.constant 0 : i32
    %c0_i32_1 = arith.constant 0 : i32
    %c0_i32_2 = arith.constant 0 : i32
    return %c0_i32, %c0_i32_0, %c0_i32_1 : i32, i32, i32
  }
  func.func @transform_7(%arg0: i32) -> (i32, i32) {
    %c0_i32 = arith.constant 0 : i32
    %c0_i32_0 = arith.constant 0 : i32
    %c0_i32_1 = arith.constant 0 : i32
    return %c0_i32, %c0_i32_0 : i32, i32
  }
  func.func @transform_8(%arg0: i32) -> (i32, i32) {
    %c0_i32 = arith.constant 0 : i32
    %c0_i32_0 = arith.constant 0 : i32
    %c0_i32_1 = arith.constant 0 : i32
    return %c0_i32, %c0_i32_0 : i32, i32
  }
  func.func @transform_9(%arg0: i32) -> (i32, i32) {
    %c0_i32 = arith.constant 0 : i32
    %c0_i32_0 = arith.constant 0 : i32
    %c0_i32_1 = arith.constant 0 : i32
    return %c0_i32, %c0_i32_0 : i32, i32
  }
  func.func @transform_10(%arg0: i32) -> (i32, i32) {
    %c0_i32 = arith.constant 0 : i32
    %c0_i32_0 = arith.constant 0 : i32
    %c0_i32_1 = arith.constant 0 : i32
    return %c0_i32, %c0_i32_0 : i32, i32
  }
  func.func @transform_11(%arg0: i32) -> (i32, i32) {
    %c0_i32 = arith.constant 0 : i32
    %c0_i32_0 = arith.constant 0 : i32
    %c0_i32_1 = arith.constant 0 : i32
    return %c0_i32, %c0_i32_0 : i32, i32
  }
  func.func @transform_12(%arg0: i32) -> (i32, i32) {
    %c0_i32 = arith.constant 0 : i32
    %c0_i32_0 = arith.constant 0 : i32
    %c0_i32_1 = arith.constant 0 : i32
    return %c0_i32, %c0_i32_0 : i32, i32
  }
  func.func @transform_13(%arg0: i32) -> (i32, i32, i32) {
    %c0_i32 = arith.constant 0 : i32
    %c0_i32_0 = arith.constant 0 : i32
    %c0_i32_1 = arith.constant 0 : i32
    return %arg0, %c0_i32, %c0_i32_0 : i32, i32, i32
  }
}

module attributes {stable_mosaic.version = 11 : i64} {
  func.func @_pool_kernel(%arg0: i32, %arg1: memref<2x1x128xbf16, #tpu.memory_space<vmem>>, %arg2: memref<2x128xf32, #tpu.memory_space<vmem>>) attributes {dimension_semantics = [#tpu.dimension_semantics<arbitrary>], iteration_bounds = array<i64: 1>, scalar_prefetch = 0 : i64, scratch_operands = 0 : i64, tpu.core_type = #tpu.core_type<tc>, window_params = [{pipeline_mode = #tpu.pipeline_mode<synchronous>, transform_indices = @transform_0, window_bounds = array<i64: 2, 1, 128>}, {pipeline_mode = #tpu.pipeline_mode<synchronous>, transform_indices = @transform_1, window_bounds = array<i64: 2, 128>}]} {
    %c0 = arith.constant 0 : index
    %c0_0 = arith.constant 0 : index
    %c0_1 = arith.constant 0 : index
    %0 = vector.load %arg1[%c0, %c0_0, %c0_1] : memref<2x1x128xbf16, #tpu.memory_space<vmem>>, vector<2x1x128xbf16>
    %1 = arith.extf %0 : vector<2x1x128xbf16> to vector<2x1x128xf32>
    %cst = arith.constant dense<0.000000e+00> : vector<2x128xf32>
    %2 = vector.multi_reduction <add>, %1, %cst [1] : vector<2x1x128xf32> to vector<2x128xf32>
    %cst_2 = arith.constant 1.000000e+00 : f32
    %3 = vector.broadcast %cst_2 : f32 to vector<2x128xf32>
    %4 = arith.divf %2, %3 : vector<2x128xf32>
    %c0_3 = arith.constant 0 : index
    %c0_4 = arith.constant 0 : index
    %5 = vector.load %arg2[%c0_3, %c0_4] : memref<2x128xf32, #tpu.memory_space<vmem>>, vector<2x128xf32>
    tpu.vector_store %arg2[%c0_3, %c0_4], %4 {strides = array<i32>} : memref<2x128xf32, #tpu.memory_space<vmem>>, vector<2x128xf32>,
    return
  }
  func.func @transform_0(%arg0: i32) -> (i32, i32, i32) {
    %c0_i32 = arith.constant 0 : i32
    %c0_i32_0 = arith.constant 0 : i32
    %c0_i32_1 = arith.constant 0 : i32
    %c0_i32_2 = arith.constant 0 : i32
    return %c0_i32, %c0_i32_0, %c0_i32_1 : i32, i32, i32
  }
  func.func @transform_1(%arg0: i32) -> (i32, i32) {
    %c0_i32 = arith.constant 0 : i32
    %c0_i32_0 = arith.constant 0 : i32
    %c0_i32_1 = arith.constant 0 : i32
    return %c0_i32, %c0_i32_0 : i32, i32
  }
}

</mosaic_0001>

<bundles_post_ra>
// kernel: _lambda_.6
= control target key start
LH: loop header
LB: loop body
LE: loop exit
PB: predicated region body
PF: predicated region fallthrough
CT: control target
= control target key end

     0   :  { %s719_s15 = smov 0   ;;  %s810_s0 = inlined_call_operand.vmem [shape: f32[2,64,49], index: 0, kind: input, shape index: {}]   ;;  %s811_s1 = inlined_call_operand.vmem [shape: bf16[49,128], index: 1, kind: input, shape index: {}]   ;;  %s812_s2 = inlined_call_operand.vmem [shape: f32[1,128], index: 2, kind: input, shape index: {}]   ;;  %s813_s3 = inlined_call_operand.vmem [shape: f32[1,128], index: 3, kind: input, shape index: {}]   ;;  %s814_s4 = inlined_call_operand.vmem [shape: bf16[2,64,128], index: 4, kind: output, shape index: {}]  }
   0x1 LB: > { %s554_s16 = sadd.s32 4294967295, %s691_s15   ;;  %p558_p0 = scmp.ge.s32.totalorder %s691_s15, 1  ;;  %s691_s15 = sphi %s719_s15, %s14_s15  }
   0x2   : > { %p162_p1 = scmp.lt.s32.totalorder %s691_s15, 3 }
   0x4   : > { %p163_p2 = pnand %p558_p0, %p162_p1 }
   0x5   : > { %v663_v0 = vld [vmem:[%s811_s1] sm:$0xff] (!%p163_p2)   ;;  %v664_v1 = vld [vmem:[%s811_s1 + $0x8] sm:$0xff] (!%p163_p2)   ;;  %vm252_vm0 = vcmask (!%p163_p2), 1040384   ;;  %p188_p3 = scmp.lt.s32.totalorder (!%p163_p2), %s554_s16, 1  ;;  %v665_v2 = vld [vmem:[%s811_s1 + $0x10] sm:$0xff] (!%p163_p2)   ;;  %v693_v4 = vmov (!%p163_p2), 0  }
   0x6   : > { %166 = sbr.rel (%p163_p2) target bundleno = 561 (0x231), region = 36  ;;  %624 = vmatprep.subr.bf16.mxu0 (!%p163_p2), %v663_v0  ;;  %640 = vmatprep.subr.bf16.mxu1 (!%p163_p2), %v663_v0  ;;  %v666_v3 = vld [vmem:[%s811_s1 + $0x18] ss:$0 sps:$4 sm:$0x11] (!%p163_p2)   ;;  %v254_v5 = vsel (!%p163_p2), %vm252_vm0, 65535, %v693_v4  ;;  %vm239_vm1 = vcmask (!%p163_p2), 400384  }
   0x7   : > { %625 = vmatpush3.bf16.msra.mxu0 (!%p163_p2), %v663_v0  ;;  %644 = vmatpush3.bf16.msra.mxu1 (!%p163_p2), %v663_v0  ;;  %v256_v6 = vand.u32 (!%p163_p2), %v666_v3, %v254_v5 }
   0x8   : > { %626 = vmatprep.subr.bf16.mxu0 (!%p163_p2), %v664_v1  ;;  %641 = vmatprep.subr.bf16.mxu1 (!%p163_p2), %v664_v1 }
   0xb   : > { %627 = vmatpush3.bf16.msra.mxu0 (!%p163_p2), %v664_v1  ;;  %645 = vmatpush3.bf16.msra.mxu1 (!%p163_p2), %v664_v1 }
   0xc   : > { %628 = vmatprep.subr.bf16.mxu0 (!%p163_p2), %v665_v2  ;;  %642 = vmatprep.subr.bf16.mxu1 (!%p163_p2), %v665_v2 }
   0xd   : > { %s816_s16 = smov (!%p188_p3, %s554_s16), 1 }
   0xe   : > { %s583_s25 = sshll.u32 %s816_s16, 6  ;;  %s584_s17 = sshll.u32 %s816_s16, 5 }
   0xf   : > { %s192_s28 = scalar_lea.vmem %s810_s0, %s583_s25  ;;  %629 = vmatpush3.bf16.msra.mxu0 %v665_v2  ;;  %646 = vmatpush3.bf16.msra.mxu1 %v665_v2  ;;  %s197_s20 = scalar_lea.vmem %s814_s4, %s584_s17 }
  0x10   : > { %v199_v7 = vld [vmem:[%s192_s28] sm:$0xff]  ;;  %v200_v8 = vld [vmem:[%s192_s28 + $0x8] sm:$0xff]  ;;  %v201_v10 = vld [vmem:[%s192_s28 + $0x10] sm:$0xff]  ;;  %630 = vmatprep.subr.bf16.mxu0 %v256_v6  ;;  %643 = vmatprep.subr.bf16.mxu1 %v256_v6 }
  0x11   : > { %v207_v9 = vpack.c.bf16 %v200_v8, %v199_v7  ;;  %v203_v11 = vld [vmem:[%s192_s28 + $0x20] sm:$0xff]  ;;  %v204_v12 = vld [vmem:[%s192_s28 + $0x28] sm:$0xff]  ;;  %v202_v13 = vld [vmem:[%s192_s28 + $0x18] sm:$0xff] }
  0x12   : > { %v209_v14 = vpack.c.bf16 %v204_v12, %v203_v11  ;;  %v205_v15 = vld [vmem:[%s192_s28 + $0x30] sm:$0xff]  ;;  %v206_v16 = vld [vmem:[%s192_s28 + $0x38] sm:$0xff]  ;;  %v208_v17 = vpack.c.bf16 %v202_v13, %v201_v10  ;;  %v571_v10 = vld [vmem:[%s812_s2] ss:$0 sm:$0xff] }
  0x13   : > { %632 = vmatprep.mubr.msk.bf16.mxu0 %vm239_vm1, %v207_v9  ;;  %v210_v18 = vpack.c.bf16 %v206_v16, %v205_v15  ;;  %631 = vmatpush3.bf16.msra.mxu0 %v256_v6  ;;  %v572_v16 = vld [vmem:[%s813_s3] ss:$0 sm:$0xff] }
  0x14   : > { %636 = vmatprep.mubr.msk.bf16.mxu1 %vm239_vm1, %v209_v14  ;;  %647 = vmatpush3.bf16.msra.mxu1 %v256_v6 }
  0x16   : > { %633 = vmatmul.mubr.msk.bf16.vlgmr.msra.gmra.mrb[0].mxu0 %vm239_vm1, %v208_v17 }
  0x17   : > { %637 = vmatmul.mubr.msk.bf16.vlgmr.msra.gmra.mrb[0].mxu1 %vm239_vm1, %v210_v18 }
  0xe9   : > { %v749_v19 = vpop.f32.mrb[0].mxu0 }
  0xea   : > { %v751_v20 = vpop.f32.mrb[0].mxu1  ;;  %v753_v21 = vpop.f32.mrb[1].mxu0  ;;  %v343_v30 = vmul.f32 %v749_v19, %v749_v19 }
  0xeb   : > { %v755_v22 = vpop.f32.mrb[1].mxu1  ;;  %v757_v23 = vpop.f32.mrb[2].mxu0  ;;  %v341_v27 = vmul.f32 %v753_v21, %v753_v21  ;;  %v347_v42 = vmul.f32 %v751_v20, %v751_v20 }
  0xec   : > { %v759_v24 = vpop.f32.mrb[2].mxu1  ;;  %v761_v25 = vpop.f32.mrb[3].mxu0  ;;  %v344_v33 = vmul.f32 %v757_v23, %v757_v23  ;;  %v345_v36 = vmul.f32 %v755_v22, %v755_v22 }
  0xed   : > { %v763_v26 = vpop.f32.mrb[3].mxu1  ;;  %v325_v28 = vadd.f32 %v761_v25, %v753_v21  ;;  %v342_v29 = vmul.f32 %v761_v25, %v761_v25  ;;  %v348_v46 = vmul.f32 %v759_v24, %v759_v24 }
  0xee   : > { %v346_v41 = vmul.f32 %v763_v26, %v763_v26 }
  0xef   : > { %v326_v31 = vadd.f32 %v749_v19, %v325_v28  ;;  %v349_v32 = vadd.f32 %v342_v29, %v341_v27 }
  0xf1   : > { %v350_v34 = vadd.f32 %v349_v32, %v343_v30  ;;  %v327_v35 = vadd.f32 %v757_v23, %v326_v31 }
  0xf3   : > { %v328_v37 = vadd.f32 %v327_v35, %v755_v22  ;;  %v351_v38 = vadd.f32 %v350_v34, %v344_v33 }
  0xf5   : > { %v352_v39 = vadd.f32 %v351_v38, %v345_v36  ;;  %v329_v40 = vadd.f32 %v328_v37, %v763_v26 }
  0xf7   : > { %v353_v43 = vadd.f32 %v352_v39, %v346_v41  ;;  %v330_v44 = vadd.f32 %v751_v20, %v329_v40 }
  0xf9   : > { %v331_v45 = vadd.f32 %v759_v24, %v330_v44  ;;  %v354_v47 = vadd.f32 %v353_v43, %v347_v42 }
  0xfb   : > { %332 = vadd.xlane.f32.xlu0 %v331_v45  ;;  %v355_v48 = vadd.f32 %v354_v47, %v348_v46 }
  0xff   : > { %356 = vadd.xlane.f32.xlu0 %v355_v48 }
 0x188   : > { %v333_v49 = vpop.xlane.xlu0 %332 }
 0x189   : > { %v334_v50 = vrot.slane %v333_v49, 4 }
 0x18b   : > { %v335_v51 = vadd.f32 %v334_v50, %v333_v49 }
 0x18c   : > { %v357_v52 = vpop.xlane.xlu0 %356 }
 0x18d   : > { %v336_v53 = vrot.slane %v335_v51, 2  ;;  %v358_v54 = vrot.slane %v357_v52, 4 }
 0x18f   : > { %v359_v55 = vadd.f32 %v358_v54, %v357_v52  ;;  %v337_v56 = vadd.f32 %v336_v53, %v335_v51 }
 0x191   : > { %v360_v57 = vrot.slane %v359_v55, 2  ;;  %v338_v58 = vrot.slane %v337_v56, 1 }
 0x193   : > { %v361_v59 = vadd.f32 %v360_v57, %v359_v55  ;;  %v339_v60 = vadd.f32 %v338_v58, %v337_v56 }
 0x195   : > { %648 = vpush %v339_v60  ;;  %v362_v61 = vrot.slane %v361_v59, 1 }
 0x197   : > { %v363_v62 = vadd.f32 %v362_v61, %v361_v59 }
 0x199   : > { %650 = vpush %v363_v62 }
 0x1c6   : > { %s649_s29 = spop %648 }
 0x1c7   : > { %s365_s30 = smul.f32 0.001953125, %s649_s29 }
 0x1c9   : > { %v373_v63 = vstv %s365_s30  ;;  %s367_s5 = smul.f32 %s365_s30, %s365_s30 }
 0x1ca   : > { %s651_s6 = spop %650  ;;  %v374_v0 = vsub.f32 %v753_v21, %v373_v63  ;;  %v375_v1 = vsub.f32 %v761_v25, %v373_v63  ;;  %v376_v2 = vsub.f32 %v749_v19, %v373_v63  ;;  %v377_v3 = vsub.f32 %v757_v23, %v373_v63 }
 0x1cb   : > { %s366_s7 = smul.f32 0.001953125, %s651_s6  ;;  %v378_v4 = vsub.f32 %v755_v22, %v373_v63  ;;  %v379_v5 = vsub.f32 %v763_v26, %v373_v63  ;;  %v380_v6 = vsub.f32 %v751_v20, %v373_v63  ;;  %v381_v7 = vsub.f32 %v759_v24, %v373_v63 }
 0x1cd   : > { %s368_s8 = ssub.f32 %s366_s7, %s367_s5 }
 0x1cf   : > { %s369_s9 = sadd.f32 1e-05, %s368_s8 }
 0x1d1   : > { %v370_v8 = vstv %s369_s9 }
 0x1d2   : > { %667 = vrsqrt.f32 %v370_v8 }
 0x1dc   : > { %v668_v9 = vpop.eup %667 }
 0x1dd   : > { %652 = vpush %v668_v9 }
 0x20e   : > { %s653_s10 = spop %652 }
 0x20f   : > { %v382_v11 = vstv %s653_s10 }
 0x210   : > { %v383_v12 = vmul.f32 %v382_v11, %v374_v0  ;;  %v384_v13 = vmul.f32 %v382_v11, %v375_v1  ;;  %v385_v14 = vmul.f32 %v382_v11, %v376_v2  ;;  %v386_v15 = vmul.f32 %v382_v11, %v377_v3 }
 0x211   : > { %v387_v17 = vmul.f32 %v382_v11, %v378_v4  ;;  %v388_v18 = vmul.f32 %v382_v11, %v379_v5  ;;  %v389_v19 = vmul.f32 %v382_v11, %v380_v6  ;;  %v390_v20 = vmul.f32 %v382_v11, %v381_v7 }
 0x212   : > { %v397_v21 = vmul.f32 %v571_v10, %v383_v12  ;;  %v398_v22 = vmul.f32 %v571_v10, %v384_v13  ;;  %v399_v23 = vmul.f32 %v571_v10, %v385_v14  ;;  %v400_v24 = vmul.f32 %v571_v10, %v386_v15 }
 0x213   : > { %v401_v25 = vmul.f32 %v571_v10, %v387_v17  ;;  %v402_v26 = vmul.f32 %v571_v10, %v388_v18  ;;  %v403_v27 = vmul.f32 %v571_v10, %v389_v19  ;;  %v404_v31 = vmul.f32 %v571_v10, %v390_v20 }
 0x214   : > { %v411_v28 = vadd.f32 %v572_v16, %v397_v21  ;;  %v412_v29 = vadd.f32 %v572_v16, %v398_v22  ;;  %v413_v30 = vadd.f32 %v572_v16, %v399_v23  ;;  %v414_v32 = vadd.f32 %v572_v16, %v400_v24 }
 0x215   : > { %v415_v33 = vadd.f32 %v572_v16, %v401_v25  ;;  %v416_v34 = vadd.f32 %v572_v16, %v402_v26  ;;  %v417_v35 = vadd.f32 %v572_v16, %v403_v27  ;;  %v418_v39 = vadd.f32 %v572_v16, %v404_v31 }
 0x216   : > { %v427_v36 = vmul.f32 0.70710677, %v411_v28  ;;  %v428_v37 = vmul.f32 0.70710677, %v412_v29  ;;  %v429_v38 = vmul.f32 0.70710677, %v413_v30 }
 0x217   : > { %v430_v40 = vmul.f32 0.70710677, %v414_v32  ;;  %v431_v41 = vmul.f32 0.70710677, %v415_v33  ;;  %v432_v42 = vmul.f32 0.70710677, %v416_v34 }
 0x218   : > { %669 = verf.f32 %v427_v36  ;;  %v433_v43 = vmul.f32 0.70710677, %v417_v35  ;;  %v434_v44 = vmul.f32 0.70710677, %v418_v39  ;;  %v419_v47 = vmul.f32 0.5, %v411_v28 }
 0x219   : > { %671 = verf.f32 %v428_v37  ;;  %v420_v50 = vmul.f32 0.5, %v412_v29  ;;  %v421_v53 = vmul.f32 0.5, %v413_v30  ;;  %v422_v57 = vmul.f32 0.5, %v414_v32 }
 0x21a   : > { %673 = verf.f32 %v429_v38  ;;  %v423_v61 = vmul.f32 0.5, %v415_v33  ;;  %v424_v1 = vmul.f32 0.5, %v416_v34  ;;  %v425_v6 = vmul.f32 0.5, %v417_v35 }
 0x21b   : > { %675 = verf.f32 %v430_v40  ;;  %v426_v9 = vmul.f32 0.5, %v418_v39 }
 0x21c   : > { %677 = verf.f32 %v431_v41 }
 0x21d   : > { %679 = verf.f32 %v432_v42 }
 0x21e   : > { %681 = verf.f32 %v433_v43 }
 0x21f   : > { %683 = verf.f32 %v434_v44 }
 0x222   : > { %v670_v45 = vpop.eup %669 }
 0x223   : > { %v672_v46 = vpop.eup %671  ;;  %v443_v48 = vadd.f32 1.0, %v670_v45 }
 0x224   : > { %v674_v49 = vpop.eup %673  ;;  %v444_v51 = vadd.f32 1.0, %v672_v46 }
 0x225   : > { %v676_v52 = vpop.eup %675  ;;  %v445_v54 = vadd.f32 1.0, %v674_v49  ;;  %v451_v55 = vmul.f32 %v443_v48, %v419_v47 }
 0x226   : > { %v678_v56 = vpop.eup %677  ;;  %v446_v58 = vadd.f32 1.0, %v676_v52  ;;  %v452_v59 = vmul.f32 %v444_v51, %v420_v50 }
 0x227   : > { %v680_v60 = vpop.eup %679  ;;  %v447_v62 = vadd.f32 1.0, %v678_v56  ;;  %v453_v63 = vmul.f32 %v445_v54, %v421_v53 }
 0x228   : > { %v682_v0 = vpop.eup %681  ;;  %v448_v2 = vadd.f32 1.0, %v680_v60  ;;  %v454_v3 = vmul.f32 %v446_v58, %v422_v57  ;;  %v596_v4 = vpack.c.bf16 %v452_v59, %v451_v55 }
 0x229   : > { %v684_v5 = vpop.eup %683  ;;  %v449_v7 = vadd.f32 1.0, %v682_v0  ;;  %v455_v8 = vmul.f32 %v447_v62, %v423_v61 }
 0x22a   : > { %v450_v10 = vadd.f32 1.0, %v684_v5  ;;  %v456_v11 = vmul.f32 %v448_v2, %v424_v1  ;;  %597 = vst [vmem:[%s197_s20] sm:$0xff] %v596_v4   ;;  %v601_v12 = vpack.c.bf16 %v454_v3, %v453_v63 }
 0x22b   : > { %v457_v13 = vmul.f32 %v449_v7, %v425_v6 }
 0x22c   : > { %v458_v14 = vmul.f32 %v450_v10, %v426_v9  ;;  %613 = vst [vmem:[%s197_s20 + $0x8] sm:$0xff] %v601_v12   ;;  %v606_v15 = vpack.c.bf16 %v456_v11, %v455_v8 }
 0x22e   : > { %614 = vst [vmem:[%s197_s20 + $0x10] sm:$0xff] %v606_v15   ;;  %v611_v16 = vpack.c.bf16 %v458_v14, %v457_v13 }
 0x230   : > { %615 = vst [vmem:[%s197_s20 + $0x18] sm:$0xff] %v611_v16  }
 0x231 PF: > { %s14_s15 = sadd.s32 1, %s691_s15  }
 0x232   : > { %p11_p4 = scmp.ge.s32.totalorder %s14_s15, 4  }
 0x234   :  { %13 = sbr.rel (!%p11_p4) target bundleno = 1 (0x1), region = 66 }

// kernel: _lambda_.8
= control target key start
LH: loop header
LB: loop body
LE: loop exit
PB: predicated region body
PF: predicated region fallthrough
CT: control target
= control target key end

     0   :  { %s2794_s25 = smov 0   ;;  %s3127_s0 = inlined_call_operand.vmem [shape: bf16[2,64,128], index: 0, kind: input, shape index: {}]   ;;  %s3128_s1 = inlined_call_operand.vmem [shape: bf16[144,64], index: 1, kind: input, shape index: {}]   ;;  %s3129_s2 = inlined_call_operand.vmem [shape: bf16[9,8,128], index: 2, kind: input, shape index: {}]   ;;  %s3130_s3 = inlined_call_operand.vmem [shape: f32[1,128], index: 3, kind: input, shape index: {}, may-alias: {3,7,11}]   ;;  %s3131_s4 = inlined_call_operand.vmem [shape: f32[1,128], index: 4, kind: input, shape index: {}, may-alias: {4,8,12}]   ;;  %s3132_s5 = inlined_call_operand.vmem [shape: bf16[144,16], index: 5, kind: input, shape index: {}]   ;;  %s3133_s6 = inlined_call_operand.vmem [shape: bf16[9,16,128], index: 6, kind: input, shape index: {}]   ;;  %s3134_s7 = inlined_call_operand.vmem [shape: f32[1,128], index: 7, kind: input, shape index: {}, may-alias: {3,7,11}]   ;;  %s3135_s8 = inlined_call_operand.vmem [shape: f32[1,128], index: 8, kind: input, shape index: {}, may-alias: {4,8,12}]   ;;  %s3136_s9 = inlined_call_operand.vmem [shape: bf16[16,64], index: 9, kind: input, shape index: {}]   ;;  %s3137_s10 = inlined_call_operand.vmem [shape: bf16[8,128], index: 10, kind: input, shape index: {}]   ;;  %s3138_s11 = inlined_call_operand.vmem [shape: f32[1,128], index: 11, kind: input, shape index: {}, may-alias: {3,7,11}]   ;;  %s3139_s12 = inlined_call_operand.vmem [shape: f32[1,128], index: 12, kind: input, shape index: {}, may-alias: {4,8,12}]   ;;  %s3140_s13 = inlined_call_operand.vmem [shape: bf16[2,16,128], index: 13, kind: output, shape index: {}]  }
   0x1 LB: > { %s2180_s26 = sadd.s32 4294967295, %s2720_s25   ;;  %p2184_p0 = scmp.ge.s32.totalorder %s2720_s25, 1  ;;  %s2720_s25 = sphi %s2794_s25, %s23_s25  }
   0x2   : > { %p387_p1 = scmp.lt.s32.totalorder %s2720_s25, 3 }
   0x4   : > { %p388_p2 = pnand %p2184_p0, %p387_p1 }
   0x5   : > { %p431_p3 = scmp.lt.s32.totalorder (!%p388_p2), %s2180_s26, 1  ;;  %v2722_v0 = vmov (!%p388_p2), 0.0   ;;  %vm2723_vm0 = vmmov (!%p388_p2), 0   ;;  %vm537_vm1 = vcmask (!%p388_p2), 523264   ;;  %v2672_v5 = vld [vmem:[%s3128_s1] sm:$0xff] (!%p388_p2)   ;;  %v2673_v6 = vld [vmem:[%s3128_s1 + $0x8] sm:$0xff] (!%p388_p2)  }
   0x6   : > { %391 = sbr.rel (%p388_p2) target bundleno = 1755 (0x6db), region = 72  ;;  %2368 = vmatprep.subr.bf16.mxu0 (!%p388_p2), %v2722_v0  ;;  %2376 = vmatprep.mubr.msk.bf16.mxu0 (!%p388_p2), %vm2723_vm0, %v2722_v0  ;;  %v2674_v7 = vld [vmem:[%s3128_s1 + $0x10] sm:$0xff] (!%p388_p2)   ;;  %v2675_v8 = vld [vmem:[%s3128_s1 + $0x18] sm:$0xff] (!%p388_p2)   ;;  %v2676_v9 = vld [vmem:[%s3128_s1 + $0x20] sm:$0xff] (!%p388_p2)   ;;  %vm686_vm2 = vcmask (!%p388_p2), 1043456   ;;  %vm682_vm3 = vcmask (!%p388_p2), 64512  }
   0x7   : > { %2412 = vmatprep.subr.bf16.mxu1 (!%p388_p2), %v2722_v0  ;;  %2414 = vmatprep.mubr.msk.bf16.mxu1 (!%p388_p2), %vm2723_vm0, %v2722_v0  ;;  %v2677_v10 = vld [vmem:[%s3128_s1 + $0x28] sm:$0xff] (!%p388_p2)   ;;  %v2678_v11 = vld [vmem:[%s3128_s1 + $0x30] sm:$0xff] (!%p388_p2)   ;;  %v2679_v12 = vld [vmem:[%s3128_s1 + $0x38] sm:$0xff] (!%p388_p2)   ;;  %vm1263_vm4 = vcmask (!%p388_p2), 130048  }
   0x8   : > { %v2680_v13 = vld [vmem:[%s3128_s1 + $0x40] sm:$0xff] (!%p388_p2)   ;;  %v2214_v33 = vld [vmem:[%s3129_s2 + $0x8] sm:$0xf] (!%p388_p2)  ;;  %v2216_v40 = vld [vmem:[%s3129_s2 + $0xc] sm:$0xf] (!%p388_p2) }
   0x9   : > { %v2211_v14 = vld [vmem:[%s3129_s2 + $0x4] sm:$0xf] (!%p388_p2)  ;;  %v679_v22 = vld [vmem:[%s3129_s2] sm:$0xf] (!%p388_p2)  ;;  %v784_v34 = vsel (!%p388_p2), %vm686_vm2, %v2214_v33, 0  ;;  %v835_v44 = vsel (!%p388_p2), %vm686_vm2, %v2216_v40, 0 }
   0xa   : > { %v688_v15 = vsel (!%p388_p2), %vm686_vm2, %v2211_v14, 0  ;;  %v735_v27 = vsel (!%p388_p2), %vm686_vm2, %v679_v22, 0  ;;  %v2218_v52 = vld [vmem:[%s3129_s2 + $0x10] sm:$0xf] (!%p388_p2)  ;;  %v2220_v59 = vld [vmem:[%s3129_s2 + $0x14] sm:$0xf] (!%p388_p2) }
   0xb   : > { %2413 = vmatpush3.bf16.msra.mxu1 (!%p388_p2), %v688_v15  ;;  %v886_v53 = vsel (!%p388_p2), %vm686_vm2, %v2218_v52, 0  ;;  %v937_v63 = vsel (!%p388_p2), %vm686_vm2, %v2220_v59, 0  ;;  %v2224_v14 = vld [vmem:[%s3129_s2 + $0x1c] sm:$0xf] (!%p388_p2) }
   0xc   : > { %2418 = vmatprep.subr.bf16.mxu1 (!%p388_p2), %v2722_v0  ;;  %v1039_v15 = vsel (!%p388_p2), %vm686_vm2, %v2224_v14, 0 }
   0xd   : > { %s3142_s26 = smov (!%p431_p3, %s2180_s26), 1 }
   0xe   : > { %s2293_s27 = sshll.u32 %s3142_s26, 5 }
   0xf   : > { %s435_s30 = scalar_lea.vmem %s3127_s0, %s2293_s27 }
  0x10   : > { %v2814_v1 = vld [vmem:[%s435_s30] sm:$0xff]   ;;  %v2817_v2 = vld [vmem:[%s435_s30 + $0x8] sm:$0xff]   ;;  %v2821_v3 = vld [vmem:[%s435_s30 + $0x10] sm:$0xff]  }
  0x11   : > { %2369 = vmatpush3.bf16.msra.mxu0 %v2814_v1  ;;  %v2824_v4 = vld [vmem:[%s435_s30 + $0x18] sm:$0xff]  }
  0x12   : > { %2370 = vmatprep.subr.bf16.mxu0 %v2722_v0 }
  0x15   : > { %2371 = vmatpush3.bf16.msra.mxu0 %v2817_v2 }
  0x16   : > { %2372 = vmatprep.subr.bf16.mxu0 %v2722_v0 }
  0x19   : > { %2373 = vmatpush3.bf16.msra.mxu0 %v2821_v3 }
  0x1a   : > { %2374 = vmatprep.subr.bf16.mxu0 %v2722_v0 }
  0x1d   : > { %2375 = vmatpush3.bf16.msra.mxu0 %v2824_v4 }
  0x1e   : > { %2504 = vmatprep.subr.bf16.mxu0 %v2722_v0 }
  0x20   : > { %2377 = vmatmul.mubr.msk.bf16.vlgmr.msra.gmra.mrb[0].mxu0 %vm537_vm1, %v2672_v5 }
  0x21   : > { %2380 = vmatprep.mubr.msk.bf16.mxu0 %vm2723_vm0, %v2722_v0 }
  0x28   : > { %2381 = vmatmul.mubr.msk.bf16.gmra.mrb[4].mxu0 %vm537_vm1, %v2673_v6 }
  0x29   : > { %2384 = vmatprep.mubr.msk.bf16.mxu0 %vm2723_vm0, %v2722_v0 }
  0x30   : > { %2385 = vmatmul.mubr.msk.bf16.gmra.mrb[8].mxu0 %vm537_vm1, %v2674_v7 }
  0x31   : > { %2388 = vmatprep.mubr.msk.bf16.mxu0 %vm2723_vm0, %v2722_v0 }
  0x38   : > { %2389 = vmatmul.mubr.msk.bf16.gmra.mrb[12].mxu0 %vm537_vm1, %v2675_v8 }
  0x39   : > { %2392 = vmatprep.mubr.msk.bf16.mxu0 %vm2723_vm0, %v2722_v0 }
  0x40   : > { %2393 = vmatmul.mubr.msk.bf16.gmra.mrb[16].mxu0 %vm537_vm1, %v2676_v9 }
  0x41   : > { %2396 = vmatprep.mubr.msk.bf16.mxu0 %vm2723_vm0, %v2722_v0 }
  0x48   : > { %2397 = vmatmul.mubr.msk.bf16.gmra.mrb[20].mxu0 %vm537_vm1, %v2677_v10 }
  0x49   : > { %2400 = vmatprep.mubr.msk.bf16.mxu0 %vm2723_vm0, %v2722_v0 }
  0x50   : > { %2401 = vmatmul.mubr.msk.bf16.gmra.mrb[24].mxu0 %vm537_vm1, %v2678_v11 }
  0x51   : > { %2404 = vmatprep.mubr.msk.bf16.mxu0 %vm2723_vm0, %v2722_v0 }
  0x58   : > { %2405 = vmatmul.mubr.msk.bf16.gmra.mrb[28].mxu0 %vm537_vm1, %v2679_v12  ;;  %v2222_v12 = vld [vmem:[%s3129_s2 + $0x18] sm:$0xf] }
  0x59   : > { %2408 = vmatprep.mubr.msk.bf16.mxu0 %vm2723_vm0, %v2722_v0 }
  0x60   : > { %2409 = vmatmul.mubr.msk.bf16.gmra.mrb[32].mxu0 %vm537_vm1, %v2680_v13  ;;  %v988_v13 = vsel %vm686_vm2, %v2222_v12, 0  ;;  %v2690_v12 = vld [vmem:[%s3136_s9] sm:$0xff]  }
  0x61   : > { %2506 = vmatprep.mubr.msk.bf16.mxu0 %vm2723_vm0, %v2722_v0 }
  0xf3   : > { %v599_v16 = vpop.f32.mrb[0].mxu0 }
  0xf4   : > { %v2378_v17 = vpop.f32.mrb[1].mxu0 }
  0xf5   : > { %v602_v18 = vpop.f32.mrb[2].mxu0 }
  0xf6   : > { %v670_v19 = vpack.c.bf16 %v602_v18, %v599_v16  ;;  %v2379_v20 = vpop.f32.mrb[3].mxu0  ;;  %v2226_v16 = vld [vmem:[%s3129_s2 + $0x20] sm:$0xf] }
  0xf7   : > { %v1090_v17 = vsel %vm686_vm2, %v2226_v16, 0 }
  0xfb   : > { %v607_v21 = vpop.f32.mrb[4].mxu0 }
  0xfc   : > { %v2382_v23 = vpop.f32.mrb[5].mxu0 }
  0xfd   : > { %v610_v24 = vpop.f32.mrb[6].mxu0 }
  0xfe   : > { %v671_v25 = vpack.c.bf16 %v610_v24, %v607_v21  ;;  %v2383_v26 = vpop.f32.mrb[7].mxu0 }
 0x100   : > { %2415 = vmatmul.mubr.msk.bf16.vlgmr.msra.gmra.mrb[0].mxu1 %vm682_vm3, %v671_v25 }
 0x101   : > { %2419 = vmatpush3.bf16.msra.mxu1 %v735_v27  ;;  %2420 = vmatprep.mubr.msk.bf16.mxu1 %vm2723_vm0, %v2722_v0 }
 0x102   : > { %2424 = vmatprep.subr.bf16.mxu1 %v2722_v0 }
 0x103   : > { %v615_v28 = vpop.f32.mrb[8].mxu0 }
 0x104   : > { %v2386_v29 = vpop.f32.mrb[9].mxu0 }
 0x105   : > { %v618_v30 = vpop.f32.mrb[10].mxu0 }
 0x106   : > { %v672_v31 = vpack.c.bf16 %v618_v30, %v615_v28  ;;  %v2387_v32 = vpop.f32.mrb[11].mxu0 }
 0x10b   : > { %v623_v35 = vpop.f32.mrb[12].mxu0 }
 0x10c   : > { %2421 = vmatmul.mubr.msk.bf16.vlgmr.msra.gmra.mrb[0].mxu1 %vm682_vm3, %v670_v19  ;;  %v2390_v36 = vpop.f32.mrb[13].mxu0 }
 0x10d   : > { %2425 = vmatpush3.bf16.msra.mxu1 %v784_v34  ;;  %2426 = vmatprep.mubr.msk.bf16.mxu1 %vm2723_vm0, %v2722_v0  ;;  %v626_v37 = vpop.f32.mrb[14].mxu0 }
 0x10e   : > { %2430 = vmatprep.subr.bf16.mxu1 %v2722_v0  ;;  %v673_v38 = vpack.c.bf16 %v626_v37, %v623_v35  ;;  %v2391_v39 = vpop.f32.mrb[15].mxu0 }
 0x113   : > { %v631_v41 = vpop.f32.mrb[16].mxu0 }
 0x114   : > { %v2394_v42 = vpop.f32.mrb[17].mxu0 }
 0x115   : > { %v634_v43 = vpop.f32.mrb[18].mxu0 }
 0x116   : > { %v674_v45 = vpack.c.bf16 %v634_v43, %v631_v41  ;;  %v2395_v46 = vpop.f32.mrb[19].mxu0 }
 0x117   : > { %v2228_v46 = vld [vmem:[%s3130_s3] ss:$0 sm:$0xff] }
 0x118   : > { %2427 = vmatmul.mubr.msk.bf16.vlgmr.msra.gmra.mrb[0].mxu1 %vm682_vm3, %v672_v31 }
 0x119   : > { %2431 = vmatpush3.bf16.msra.mxu1 %v835_v44  ;;  %2432 = vmatprep.mubr.msk.bf16.mxu1 %vm2723_vm0, %v2722_v0 }
 0x11a   : > { %2436 = vmatprep.subr.bf16.mxu1 %v2722_v0 }
 0x11b   : > { %v639_v47 = vpop.f32.mrb[20].mxu0 }
 0x11c   : > { %v2398_v48 = vpop.f32.mrb[21].mxu0 }
 0x11d   : > { %v642_v49 = vpop.f32.mrb[22].mxu0 }
 0x11e   : > { %v675_v50 = vpack.c.bf16 %v642_v49, %v639_v47  ;;  %v2399_v51 = vpop.f32.mrb[23].mxu0 }
 0x123   : > { %v647_v54 = vpop.f32.mrb[24].mxu0 }
 0x124   : > { %2433 = vmatmul.mubr.msk.bf16.vlgmr.msra.gmra.mrb[0].mxu1 %vm682_vm3, %v673_v38  ;;  %v2402_v55 = vpop.f32.mrb[25].mxu0 }
 0x125   : > { %2437 = vmatpush3.bf16.msra.mxu1 %v886_v53  ;;  %2438 = vmatprep.mubr.msk.bf16.mxu1 %vm2723_vm0, %v2722_v0  ;;  %v650_v56 = vpop.f32.mrb[26].mxu0 }
 0x126   : > { %2442 = vmatprep.subr.bf16.mxu1 %v2722_v0  ;;  %v676_v57 = vpack.c.bf16 %v650_v56, %v647_v54  ;;  %v2403_v58 = vpop.f32.mrb[27].mxu0 }
 0x12b   : > { %v655_v60 = vpop.f32.mrb[28].mxu0 }
 0x12c   : > { %v2406_v61 = vpop.f32.mrb[29].mxu0 }
 0x12d   : > { %v658_v62 = vpop.f32.mrb[30].mxu0 }
 0x12e   : > { %v677_v5 = vpack.c.bf16 %v658_v62, %v655_v60  ;;  %v2407_v6 = vpop.f32.mrb[31].mxu0 }
 0x130   : > { %2439 = vmatmul.mubr.msk.bf16.vlgmr.msra.gmra.mrb[0].mxu1 %vm682_vm3, %v674_v45  ;;  %v2691_v45 = vld [vmem:[%s3133_s6 + $0x8] sm:$0xff]  }
 0x131   : > { %2443 = vmatpush3.bf16.msra.mxu1 %v937_v63  ;;  %2444 = vmatprep.mubr.msk.bf16.mxu1 %vm2723_vm0, %v2722_v0 }
 0x132   : > { %2448 = vmatprep.subr.bf16.mxu1 %v2722_v0  ;;  %2505 = vmatpush3.bf16.msra.mxu0 %v2691_v45 }
 0x133   : > { %v663_v7 = vpop.f32.mrb[32].mxu0  ;;  %2510 = vmatprep.subr.bf16.mxu0 %v2722_v0 }
 0x134   : > { %v2410_v8 = vpop.f32.mrb[33].mxu0 }
 0x135   : > { %v666_v9 = vpop.f32.mrb[34].mxu0  ;;  %v2682_v8 = vld [vmem:[%s3132_s5 + $0x8] sm:$0xff]  }
 0x136   : > { %v678_v10 = vpack.c.bf16 %v666_v9, %v663_v7  ;;  %v2411_v11 = vpop.f32.mrb[35].mxu0  ;;  %v2681_v7 = vld [vmem:[%s3132_s5] sm:$0xff]   ;;  %v2687_v9 = vld [vmem:[%s3132_s5 + $0x30] sm:$0xff]  }
 0x137   : > { %v2689_v11 = vld [vmem:[%s3132_s5 + $0x40] sm:$0xff]  }
 0x13c   : > { %2445 = vmatmul.mubr.msk.bf16.vlgmr.msra.gmra.mrb[0].mxu1 %vm682_vm3, %v675_v50  ;;  %v2229_v50 = vld [vmem:[%s3131_s4] ss:$0 sm:$0xff] }
 0x13d   : > { %2449 = vmatpush3.bf16.msra.mxu1 %v988_v13  ;;  %2450 = vmatprep.mubr.msk.bf16.mxu1 %vm2723_vm0, %v2722_v0  ;;  %v1947_v13 = vld [vmem:[%s3137_s10] sm:$0xf] }
 0x13e   : > { %2454 = vmatprep.subr.bf16.mxu1 %v2722_v0  ;;  %v1952_v14 = vsel %vm686_vm2, %v1947_v13, 0 }
 0x148   : > { %2451 = vmatmul.mubr.msk.bf16.vlgmr.msra.gmra.mrb[0].mxu1 %vm682_vm3, %v676_v57 }
 0x149   : > { %2455 = vmatpush3.bf16.msra.mxu1 %v1039_v15  ;;  %2456 = vmatprep.mubr.msk.bf16.mxu1 %vm2723_vm0, %v2722_v0 }
 0x14a   : > { %2460 = vmatprep.subr.bf16.mxu1 %v2722_v0 }
 0x154   : > { %2457 = vmatmul.mubr.msk.bf16.vlgmr.msra.gmra.mrb[0].mxu1 %vm682_vm3, %v677_v5 }
 0x155   : > { %2461 = vmatpush3.bf16.msra.mxu1 %v1090_v17  ;;  %2462 = vmatprep.mubr.msk.bf16.mxu1 %vm2723_vm0, %v2722_v0 }
 0x156   : > { %2466 = vmatprep.subr.bf16.mxu1 %v2722_v0 }
 0x160   : > { %2463 = vmatmul.mubr.msk.bf16.vlgmr.msra.gmra.mrb[0].mxu1 %vm682_vm3, %v678_v10  ;;  %v2688_v10 = vld [vmem:[%s3132_s5 + $0x38] sm:$0xff]  }
 0x161   : > { %2468 = vmatprep.mubr.msk.bf16.mxu1 %vm2723_vm0, %v2722_v0 }
 0x233   : > { %v1126_v18 = vpop.f32.mrb[0].mxu1 }
 0x234   : > { %v2464_v19 = vpop.f32.mrb[1].mxu1  ;;  %v1147_v23 = vmul.f32 %v1126_v18, %v1126_v18 }
 0x235   : > { %v1129_v20 = vpop.f32.mrb[2].mxu1 }
 0x236   : > { %v2465_v21 = vpop.f32.mrb[3].mxu1  ;;  %v1137_v22 = vadd.f32 %v1129_v20, %v1126_v18  ;;  %v1148_v24 = vmul.f32 %v1129_v20, %v1129_v20 }
 0x238   : > { %1138 = vadd.xlane.f32.xlu0 %v1137_v22  ;;  %v1149_v25 = vadd.f32 %v1148_v24, %v1147_v23  ;;  %v2692_v23 = vld [vmem:[%s3133_s6] sm:$0xff]  }
 0x23c   : > { %1150 = vadd.xlane.f32.xlu0 %v1149_v25 }
 0x2c5   : > { %v1139_v26 = vpop.xlane.xlu0 %1138 }
 0x2c6   : > { %v1140_v27 = vrot.slane %v1139_v26, 4 }
 0x2c8   : > { %v1141_v28 = vadd.f32 %v1140_v27, %v1139_v26 }
 0x2c9   : > { %v1151_v29 = vpop.xlane.xlu0 %1150 }
 0x2ca   : > { %v1142_v30 = vrot.slane %v1141_v28, 2  ;;  %v1152_v31 = vrot.slane %v1151_v29, 4 }
 0x2cc   : > { %v1153_v32 = vadd.f32 %v1152_v31, %v1151_v29  ;;  %v1143_v33 = vadd.f32 %v1142_v30, %v1141_v28  ;;  %v2693_v31 = vld [vmem:[%s3133_s6 + $0x10] sm:$0xff]  }
 0x2ce   : > { %v1154_v34 = vrot.slane %v1153_v32, 2  ;;  %v1144_v35 = vrot.slane %v1143_v33, 1 }
 0x2d0   : > { %v1145_v36 = vadd.f32 %v1144_v35, %v1143_v33  ;;  %v1155_v37 = vadd.f32 %v1154_v34, %v1153_v32 }
 0x2d2   : > { %2640 = vpush %v1145_v36  ;;  %v1156_v38 = vrot.slane %v1155_v37, 1 }
 0x2d4   : > { %v1157_v39 = vadd.f32 %v1156_v38, %v1155_v37 }
 0x2d6   : > { %2642 = vpush %v1157_v39 }
 0x303   : > { %s2641_s20 = spop %2640 }
 0x304   : > { %s1159_s21 = smul.f32 0.00390625, %s2641_s20 }
 0x306   : > { %v1167_v40 = vstv %s1159_s21  ;;  %s1161_s22 = smul.f32 %s1159_s21, %s1159_s21 }
 0x307   : > { %s2643_s23 = spop %2642  ;;  %v1168_v41 = vsub.f32 %v1126_v18, %v1167_v40  ;;  %v1169_v42 = vsub.f32 %v1129_v20, %v1167_v40  ;;  %v2694_v40 = vld [vmem:[%s3133_s6 + $0x18] sm:$0xff]  }
 0x308   : > { %s1160_s24 = smul.f32 0.00390625, %s2643_s23 }
 0x30a   : > { %s1162_s27 = ssub.f32 %s1160_s24, %s1161_s22 }
 0x30c   : > { %s1163_s28 = sadd.f32 1e-05, %s1162_s27 }
 0x30e   : > { %v1164_v43 = vstv %s1163_s28 }
 0x30f   : > { %2700 = vrsqrt.f32 %v1164_v43 }
 0x319   : > { %v2701_v44 = vpop.eup %2700 }
 0x31a   : > { %2644 = vpush %v2701_v44 }
 0x34b   : > { %s2645_s14 = spop %2644 }
 0x34c   : > { %v1170_v47 = vstv %s2645_s14 }
 0x34d   : > { %v1171_v48 = vmul.f32 %v1170_v47, %v1168_v41  ;;  %v1172_v49 = vmul.f32 %v1170_v47, %v1169_v42 }
 0x34f   : > { %v1179_v51 = vmul.f32 %v2228_v46, %v1171_v48  ;;  %v1180_v52 = vmul.f32 %v2228_v46, %v1172_v49  ;;  %v2695_v48 = vld [vmem:[%s3133_s6 + $0x20] sm:$0xff]  }
 0x351   : > { %v1187_v53 = vadd.f32 %v2229_v50, %v1179_v51  ;;  %v1188_v54 = vadd.f32 %v2229_v50, %v1180_v52 }
 0x353   : > { %v1191_v55 = vmul.f32 0.70710677, %v1187_v53  ;;  %v1192_v56 = vmul.f32 0.70710677, %v1188_v54  ;;  %v1189_v59 = vmul.f32 0.5, %v1187_v53  ;;  %v1190_v61 = vmul.f32 0.5, %v1188_v54 }
 0x355   : > { %2702 = verf.f32 %v1191_v55 }
 0x356   : > { %2704 = verf.f32 %v1192_v56 }
 0x35f   : > { %v2703_v57 = vpop.eup %2702 }
 0x360   : > { %v2705_v58 = vpop.eup %2704  ;;  %v1195_v60 = vadd.f32 1.0, %v2703_v57  ;;  %v2696_v57 = vld [vmem:[%s3133_s6 + $0x28] sm:$0xff]  }
 0x361   : > { %v1196_v62 = vadd.f32 1.0, %v2705_v58 }
 0x362   : > { %v1197_v63 = vmul.f32 %v1195_v60, %v1189_v59 }
 0x363   : > { %v1198_v5 = vmul.f32 %v1196_v62, %v1190_v61 }
 0x365   : > { %v1199_v6 = vpack.c.bf16 %v1198_v5, %v1197_v63 }
 0x367   : > { %2467 = vmatpush3.bf16.msra.mxu1 %v1199_v6  ;;  %v2697_v6 = vld [vmem:[%s3133_s6 + $0x30] sm:$0xff]  }
 0x368   : > { %2558 = vmatprep.subr.bf16.mxu1 %v2722_v0 }
 0x36a   : > { %2469 = vmatmul.mubr.msk.bf16.vlgmr.msra.gmra.mrb[4].mxu1 %vm1263_vm4, %v2681_v7 }
 0x36b   : > { %2559 = vmatpush3.bf16.msra.mxu1 %v2814_v1  ;;  %2472 = vmatprep.mubr.msk.bf16.mxu1 %vm2723_vm0, %v2722_v0  ;;  %v2683_v1 = vld [vmem:[%s3132_s5 + $0x10] sm:$0xff]  }
 0x36c   : > { %2560 = vmatprep.subr.bf16.mxu1 %v2722_v0 }
 0x36f   : > { %2561 = vmatpush3.bf16.msra.mxu1 %v2817_v2  ;;  %v2684_v2 = vld [vmem:[%s3132_s5 + $0x18] sm:$0xff]  }
 0x370   : > { %2562 = vmatprep.subr.bf16.mxu1 %v2722_v0 }
 0x372   : > { %2473 = vmatmul.mubr.msk.bf16.gmra.mrb[8].mxu1 %vm1263_vm4, %v2682_v8 }
 0x373   : > { %2476 = vmatprep.mubr.msk.bf16.mxu1 %vm2723_vm0, %v2722_v0  ;;  %2563 = vmatpush3.bf16.msra.mxu1 %v2821_v3  ;;  %v2685_v3 = vld [vmem:[%s3132_s5 + $0x20] sm:$0xff]  }
 0x374   : > { %2564 = vmatprep.subr.bf16.mxu1 %v2722_v0 }
 0x377   : > { %2565 = vmatpush3.bf16.msra.mxu1 %v2824_v4  ;;  %v2686_v4 = vld [vmem:[%s3132_s5 + $0x28] sm:$0xff]  }
 0x378   : > { %2570 = vmatprep.subr.bf16.mxu1 %v2722_v0 }
 0x37a   : > { %2477 = vmatmul.mubr.msk.bf16.gmra.mrb[12].mxu1 %vm1263_vm4, %v2683_v1 }
 0x37b   : > { %2480 = vmatprep.mubr.msk.bf16.mxu1 %vm2723_vm0, %v2722_v0 }
 0x382   : > { %2481 = vmatmul.mubr.msk.bf16.gmra.mrb[16].mxu1 %vm1263_vm4, %v2684_v2 }
 0x383   : > { %2484 = vmatprep.mubr.msk.bf16.mxu1 %vm2723_vm0, %v2722_v0 }
 0x38a   : > { %2485 = vmatmul.mubr.msk.bf16.gmra.mrb[20].mxu1 %vm1263_vm4, %v2685_v3 }
 0x38b   : > { %2488 = vmatprep.mubr.msk.bf16.mxu1 %vm2723_vm0, %v2722_v0 }
 0x392   : > { %2489 = vmatmul.mubr.msk.bf16.gmra.mrb[24].mxu1 %vm1263_vm4, %v2686_v4  ;;  %v2698_v4 = vld [vmem:[%s3133_s6 + $0x38] sm:$0xff]  }
 0x393   : > { %2492 = vmatprep.mubr.msk.bf16.mxu1 %vm2723_vm0, %v2722_v0 }
 0x39a   : > { %2493 = vmatmul.mubr.msk.bf16.gmra.mrb[28].mxu1 %vm1263_vm4, %v2687_v9  ;;  %v2699_v9 = vld [vmem:[%s3133_s6 + $0x40] sm:$0xff]  }
 0x39b   : > { %2496 = vmatprep.mubr.msk.bf16.mxu1 %vm2723_vm0, %v2722_v0 }
 0x3a2   : > { %2497 = vmatmul.mubr.msk.bf16.gmra.mrb[32].mxu1 %vm1263_vm4, %v2688_v10 }
 0x3a3   : > { %2500 = vmatprep.mubr.msk.bf16.mxu1 %vm2723_vm0, %v2722_v0 }
 0x3aa   : > { %2501 = vmatmul.mubr.msk.bf16.gmra.mrb[36].mxu1 %vm1263_vm4, %v2689_v11 }
 0x3ab   : > { %2566 = vmatprep.mubr.msk.bf16.mxu1 %vm2723_vm0, %v2722_v0 }
 0x3b2   : > { %2567 = vmatmul.mubr.msk.bf16.vlgmr.msra.gmra.mrb[40].mxu1 %vm537_vm1, %v2690_v12 }
 0x3b3   : > { %2572 = vmatprep.mubr.msk.bf16.mxu1 %vm2723_vm0, %v2722_v0  ;;  %2571 = vmatpush3.bf16.msra.mxu1 %v1952_v14 }
 0x43d   : > { %v1325_v15 = vpop.f32.mrb[4].mxu1 }
 0x43e   : > { %v2470_v16 = vpop.f32.mrb[5].mxu1 }
 0x43f   : > { %v1328_v17 = vpop.f32.mrb[6].mxu1 }
 0x440   : > { %v1396_v18 = vpack.c.bf16 %v1328_v17, %v1325_v15  ;;  %v2471_v19 = vpop.f32.mrb[7].mxu1 }
 0x445   : > { %v1333_v20 = vpop.f32.mrb[8].mxu1 }
 0x446   : > { %v2474_v21 = vpop.f32.mrb[9].mxu1 }
 0x447   : > { %v1336_v22 = vpop.f32.mrb[10].mxu1 }
 0x448   : > { %v1397_v24 = vpack.c.bf16 %v1336_v22, %v1333_v20  ;;  %v2475_v25 = vpop.f32.mrb[11].mxu1 }
 0x44a   : > { %2507 = vmatmul.mubr.msk.bf16.vlgmr.msra.gmra.mrb[36].mxu0 %vm1263_vm4, %v1397_v24 }
 0x44b   : > { %2511 = vmatpush3.bf16.msra.mxu0 %v2692_v23  ;;  %2512 = vmatprep.mubr.msk.bf16.mxu0 %vm2723_vm0, %v2722_v0 }
 0x44c   : > { %2516 = vmatprep.subr.bf16.mxu0 %v2722_v0 }
 0x44d   : > { %v1341_v26 = vpop.f32.mrb[12].mxu1 }
 0x44e   : > { %v2478_v27 = vpop.f32.mrb[13].mxu1 }
 0x44f   : > { %v1344_v28 = vpop.f32.mrb[14].mxu1 }
 0x450   : > { %v1398_v29 = vpack.c.bf16 %v1344_v28, %v1341_v26  ;;  %v2479_v30 = vpop.f32.mrb[15].mxu1 }
 0x455   : > { %v1349_v32 = vpop.f32.mrb[16].mxu1 }
 0x456   : > { %2513 = vmatmul.mubr.msk.bf16.vlgmr.msra.gmra.mrb[36].mxu0 %vm1263_vm4, %v1396_v18  ;;  %v2482_v33 = vpop.f32.mrb[17].mxu1 }
 0x457   : > { %v1352_v34 = vpop.f32.mrb[18].mxu1  ;;  %2517 = vmatpush3.bf16.msra.mxu0 %v2693_v31  ;;  %2518 = vmatprep.mubr.msk.bf16.mxu0 %vm2723_vm0, %v2722_v0 }
 0x458   : > { %v1399_v35 = vpack.c.bf16 %v1352_v34, %v1349_v32  ;;  %v2483_v36 = vpop.f32.mrb[19].mxu1  ;;  %2522 = vmatprep.subr.bf16.mxu0 %v2722_v0 }
 0x45d   : > { %v1357_v37 = vpop.f32.mrb[20].mxu1 }
 0x45e   : > { %v2486_v38 = vpop.f32.mrb[21].mxu1 }
 0x45f   : > { %v1360_v39 = vpop.f32.mrb[22].mxu1 }
 0x460   : > { %v1400_v41 = vpack.c.bf16 %v1360_v39, %v1357_v37  ;;  %v2487_v42 = vpop.f32.mrb[23].mxu1 }
 0x462   : > { %2519 = vmatmul.mubr.msk.bf16.vlgmr.msra.gmra.mrb[36].mxu0 %vm1263_vm4, %v1398_v29 }
 0x463   : > { %2523 = vmatpush3.bf16.msra.mxu0 %v2694_v40  ;;  %2524 = vmatprep.mubr.msk.bf16.mxu0 %vm2723_vm0, %v2722_v0 }
 0x464   : > { %2528 = vmatprep.subr.bf16.mxu0 %v2722_v0 }
 0x465   : > { %v1365_v43 = vpop.f32.mrb[24].mxu1 }
 0x466   : > { %v2490_v44 = vpop.f32.mrb[25].mxu1 }
 0x467   : > { %v1368_v45 = vpop.f32.mrb[26].mxu1 }
 0x468   : > { %v1401_v46 = vpack.c.bf16 %v1368_v45, %v1365_v43  ;;  %v2491_v47 = vpop.f32.mrb[27].mxu1 }
 0x46d   : > { %v1373_v49 = vpop.f32.mrb[28].mxu1 }
 0x46e   : > { %2525 = vmatmul.mubr.msk.bf16.vlgmr.msra.gmra.mrb[36].mxu0 %vm1263_vm4, %v1399_v35  ;;  %v2494_v50 = vpop.f32.mrb[29].mxu1 }
 0x46f   : > { %v1376_v51 = vpop.f32.mrb[30].mxu1  ;;  %2529 = vmatpush3.bf16.msra.mxu0 %v2695_v48  ;;  %2530 = vmatprep.mubr.msk.bf16.mxu0 %vm2723_vm0, %v2722_v0 }
 0x470   : > { %v1402_v52 = vpack.c.bf16 %v1376_v51, %v1373_v49  ;;  %v2495_v53 = vpop.f32.mrb[31].mxu1  ;;  %2534 = vmatprep.subr.bf16.mxu0 %v2722_v0 }
 0x475   : > { %v1381_v54 = vpop.f32.mrb[32].mxu1 }
 0x476   : > { %v2498_v55 = vpop.f32.mrb[33].mxu1 }
 0x477   : > { %v1384_v56 = vpop.f32.mrb[34].mxu1 }
 0x478   : > { %v1403_v58 = vpack.c.bf16 %v1384_v56, %v1381_v54  ;;  %v2499_v59 = vpop.f32.mrb[35].mxu1 }
 0x47a   : > { %2531 = vmatmul.mubr.msk.bf16.vlgmr.msra.gmra.mrb[36].mxu0 %vm1263_vm4, %v1400_v41 }
 0x47b   : > { %2535 = vmatpush3.bf16.msra.mxu0 %v2696_v57  ;;  %2536 = vmatprep.mubr.msk.bf16.mxu0 %vm2723_vm0, %v2722_v0 }
 0x47c   : > { %2540 = vmatprep.subr.bf16.mxu0 %v2722_v0 }
 0x47d   : > { %v1389_v60 = vpop.f32.mrb[36].mxu1 }
 0x47e   : > { %v2502_v61 = vpop.f32.mrb[37].mxu1 }
 0x47f   : > { %v1392_v62 = vpop.f32.mrb[38].mxu1 }
 0x480   : > { %v1404_v63 = vpack.c.bf16 %v1392_v62, %v1389_v60  ;;  %v2503_v5 = vpop.f32.mrb[39].mxu1 }
 0x485   : > { %v1939_v7 = vpop.f32.mrb[40].mxu1 }
 0x486   : > { %2537 = vmatmul.mubr.msk.bf16.vlgmr.msra.gmra.mrb[36].mxu0 %vm1263_vm4, %v1401_v46  ;;  %v2568_v8 = vpop.f32.mrb[41].mxu1 }
 0x487   : > { %v1942_v1 = vpop.f32.mrb[42].mxu1  ;;  %2541 = vmatpush3.bf16.msra.mxu0 %v2697_v6  ;;  %2542 = vmatprep.mubr.msk.bf16.mxu0 %vm2723_vm0, %v2722_v0  ;;  %v2287_v8 = vld [vmem:[%s3134_s7] ss:$0 sm:$0xff] }
 0x488   : > { %v1946_v2 = vpack.c.bf16 %v1942_v1, %v1939_v7  ;;  %v2569_v3 = vpop.f32.mrb[43].mxu1  ;;  %2546 = vmatprep.subr.bf16.mxu0 %v2722_v0  ;;  %v2285_v7 = vld [vmem:[%s3138_s11] ss:$0 sm:$0xff] }
 0x48a   : > { %2573 = vmatmul.mubr.msk.bf16.vlgmr.msra.gmra.mrb[44].mxu1 %vm682_vm3, %v1946_v2 }
 0x492   : > { %2543 = vmatmul.mubr.msk.bf16.vlgmr.msra.gmra.mrb[36].mxu0 %vm1263_vm4, %v1402_v52 }
 0x493   : > { %2547 = vmatpush3.bf16.msra.mxu0 %v2698_v4  ;;  %2548 = vmatprep.mubr.msk.bf16.mxu0 %vm2723_vm0, %v2722_v0 }
 0x494   : > { %2552 = vmatprep.subr.bf16.mxu0 %v2722_v0 }
 0x49e   : > { %2549 = vmatmul.mubr.msk.bf16.vlgmr.msra.gmra.mrb[36].mxu0 %vm1263_vm4, %v1403_v58 }
 0x49f   : > { %2553 = vmatpush3.bf16.msra.mxu0 %v2699_v9  ;;  %2554 = vmatprep.mubr.msk.bf16.mxu0 %vm2723_vm0, %v2722_v0 }
 0x4aa   : > { %2555 = vmatmul.mubr.msk.bf16.vlgmr.msra.gmra.mrb[36].mxu0 %vm1263_vm4, %v1404_v63 }
 0x55d   : > { %v1988_v10 = vpop.f32.mrb[44].mxu1 }
 0x55e   : > { %v2574_v11 = vpop.f32.mrb[45].mxu1  ;;  %v2007_v15 = vmul.f32 %v1988_v10, %v1988_v10 }
 0x55f   : > { %v1991_v12 = vpop.f32.mrb[46].mxu1  ;;  %v2288_v11 = vld [vmem:[%s3135_s8] ss:$0 sm:$0xff] }
 0x560   : > { %v2575_v13 = vpop.f32.mrb[47].mxu1  ;;  %v1997_v14 = vadd.f32 %v1991_v12, %v1988_v10  ;;  %v2008_v16 = vmul.f32 %v1991_v12, %v1991_v12 }
 0x562   : > { %1998 = vadd.xlane.f32.xlu1 %v1997_v14  ;;  %v2009_v17 = vadd.f32 %v2008_v16, %v2007_v15 }
 0x566   : > { %2010 = vadd.xlane.f32.xlu1 %v2009_v17 }
 0x57d   : > { %v3096_v18 = vpop.f32.mrb[36].mxu0 }
 0x57e   : > { %v2556_v19 = vpop.f32.mrb[37].mxu0  ;;  %v2061_v22 = vmul.f32 %v3096_v18, %v3096_v18 }
 0x57f   : > { %v3098_v20 = vpop.f32.mrb[38].mxu0 }
 0x580   : > { %v2557_v21 = vpop.f32.mrb[39].mxu0  ;;  %v2051_v0 = vadd.f32 %v3098_v20, %v3096_v18  ;;  %v2062_v23 = vmul.f32 %v3098_v20, %v3098_v20 }
 0x582   : > { %2052 = vadd.xlane.f32.xlu0 %v2051_v0  ;;  %v2063_v24 = vadd.f32 %v2062_v23, %v2061_v22 }
 0x584   : > { %2064 = vadd.xlane.f32.xlu1 %v2063_v24 }
 0x5ef   : > { %v1999_v25 = vpop.xlane.xlu1 %1998 }
 0x5f0   : > { %v2000_v26 = vrot.slane %v1999_v25, 4 }
 0x5f2   : > { %v2001_v27 = vadd.f32 %v2000_v26, %v1999_v25 }
 0x5f3   : > { %v2011_v28 = vpop.xlane.xlu1 %2010 }
 0x5f4   : > { %v2002_v29 = vrot.slane %v2001_v27, 2  ;;  %v2012_v30 = vrot.slane %v2011_v28, 4 }
 0x5f6   : > { %v2013_v31 = vadd.f32 %v2012_v30, %v2011_v28  ;;  %v2003_v32 = vadd.f32 %v2002_v29, %v2001_v27 }
 0x5f8   : > { %v2014_v33 = vrot.slane %v2013_v31, 2  ;;  %v2004_v34 = vrot.slane %v2003_v32, 1 }
 0x5fa   : > { %v2005_v35 = vadd.f32 %v2004_v34, %v2003_v32  ;;  %v2015_v36 = vadd.f32 %v2014_v33, %v2013_v31 }
 0x5fc   : > { %2646 = vpush %v2005_v35  ;;  %v2016_v37 = vrot.slane %v2015_v36, 1 }
 0x5fe   : > { %v2017_v38 = vadd.f32 %v2016_v37, %v2015_v36 }
 0x600   : > { %2648 = vpush %v2017_v38 }
 0x60f   : > { %v2053_v39 = vpop.xlane.xlu0 %2052 }
 0x610   : > { %v2054_v41 = vrot.slane %v2053_v39, 4 }
 0x611   : > { %v2065_v40 = vpop.xlane.xlu1 %2064 }
 0x612   : > { %v2066_v42 = vrot.slane %v2065_v40, 4  ;;  %v2055_v46 = vadd.f32 %v2054_v41, %v2053_v39 }
 0x614   : > { %v2067_v47 = vadd.f32 %v2066_v42, %v2065_v40  ;;  %v2056_v48 = vrot.slane %v2055_v46, 2 }
 0x616   : > { %v2068_v49 = vrot.slane %v2067_v47, 2  ;;  %v2057_v51 = vadd.f32 %v2056_v48, %v2055_v46 }
 0x618   : > { %v2069_v52 = vadd.f32 %v2068_v49, %v2067_v47  ;;  %v2058_v53 = vrot.slane %v2057_v51, 1 }
 0x61a   : > { %v2070_v54 = vrot.slane %v2069_v52, 1  ;;  %v2059_v56 = vadd.f32 %v2058_v53, %v2057_v51 }
 0x61c   : > { %v2071_v57 = vadd.f32 %v2070_v54, %v2069_v52 }
 0x62d   : > { %s2647_s29 = spop %2646 }
 0x62e   : > { %s2019_s30 = smul.f32 0.00390625, %s2647_s29 }
 0x630   : > { %v2027_v43 = vstv %s2019_s30  ;;  %s2021_s14 = smul.f32 %s2019_s30, %s2019_s30 }
 0x631   : > { %s2649_s15 = spop %2648  ;;  %v2028_v44 = vsub.f32 %v1988_v10, %v2027_v43  ;;  %v2029_v45 = vsub.f32 %v1991_v12, %v2027_v43  ;;  %v2286_v10 = vld [vmem:[%s3139_s12] ss:$0 sm:$0xff] }
 0x632   : > { %s2020_s16 = smul.f32 0.00390625, %s2649_s15 }
 0x634   : > { %s2022_s17 = ssub.f32 %s2020_s16, %s2021_s14 }
 0x636   : > { %s2023_s18 = sadd.f32 1e-05, %s2022_s17 }
 0x638   : > { %v2024_v50 = vstv %s2023_s18 }
 0x639   : > { %2706 = vrsqrt.f32 %v2024_v50 }
 0x643   : > { %v2707_v55 = vpop.eup %2706 }
 0x644   : > { %2650 = vpush %v2707_v55 }
 0x645   : > { %2652 = vpush %v2059_v56 }
 0x646   : > { %2654 = vpush %v2071_v57 }
 0x675   : > { %s2651_s19 = spop %2650 }
 0x676   : > { %v2030_v58 = vstv %s2651_s19  ;;  %s2653_s20 = spop %2652 }
 0x677   : > { %v2031_v59 = vmul.f32 %v2030_v58, %v2028_v44  ;;  %v2032_v60 = vmul.f32 %v2030_v58, %v2029_v45  ;;  %s2073_s21 = smul.f32 0.00390625, %s2653_s20  ;;  %s2655_s22 = spop %2654 }
 0x678   : > { %s2074_s23 = smul.f32 0.00390625, %s2655_s22 }
 0x679   : > { %s2075_s24 = smul.f32 %s2073_s21, %s2073_s21  ;;  %v2081_v61 = vstv %s2073_s21  ;;  %v2039_v2 = vmul.f32 %v2285_v7, %v2031_v59  ;;  %v2040_v3 = vmul.f32 %v2285_v7, %v2032_v60  ;;  %s2294_s21 = sshll.u32 %s3142_s26, 3 }
 0x67a   : > { %v2082_v62 = vsub.f32 %v3096_v18, %v2081_v61  ;;  %v2083_v63 = vsub.f32 %v3098_v20, %v2081_v61 }
 0x67b   : > { %s2076_s27 = ssub.f32 %s2074_s23, %s2075_s24  ;;  %v2047_v14 = vadd.f32 %v2286_v10, %v2039_v2  ;;  %v2048_v15 = vadd.f32 %v2286_v10, %v2040_v3  ;;  %s440_s24 = scalar_lea.vmem %s3140_s13, %s2294_s21 }
 0x67d   : > { %s2077_s28 = sadd.f32 1e-05, %s2076_s27 }
 0x67f   : > { %v2078_v5 = vstv %s2077_s28 }
 0x680   : > { %2708 = vrsqrt.f32 %v2078_v5 }
 0x68a   : > { %v2709_v6 = vpop.eup %2708 }
 0x68b   : > { %2656 = vpush %v2709_v6 }
 0x6bc   : > { %s2657_s14 = spop %2656 }
 0x6bd   : > { %v2084_v1 = vstv %s2657_s14 }
 0x6be   : > { %v2085_v4 = vmul.f32 %v2084_v1, %v2082_v62  ;;  %v2086_v9 = vmul.f32 %v2084_v1, %v2083_v63 }
 0x6c0   : > { %v2093_v12 = vmul.f32 %v2287_v8, %v2085_v4  ;;  %v2094_v13 = vmul.f32 %v2287_v8, %v2086_v9 }
 0x6c2   : > { %v2101_v16 = vadd.f32 %v2288_v11, %v2093_v12  ;;  %v2102_v17 = vadd.f32 %v2288_v11, %v2094_v13 }
 0x6c4   : > { %v2103_v18 = vadd.f32 %v2101_v16, %v2047_v14  ;;  %v2104_v19 = vadd.f32 %v2102_v17, %v2048_v15 }
 0x6c6   : > { %v2107_v20 = vmul.f32 0.70710677, %v2103_v18  ;;  %v2108_v21 = vmul.f32 0.70710677, %v2104_v19  ;;  %v2105_v23 = vmul.f32 0.5, %v2103_v18  ;;  %v2106_v25 = vmul.f32 0.5, %v2104_v19 }
 0x6c8   : > { %2710 = verf.f32 %v2107_v20 }
 0x6c9   : > { %2712 = verf.f32 %v2108_v21 }
 0x6d2   : > { %v2711_v0 = vpop.eup %2710 }
 0x6d3   : > { %v2713_v22 = vpop.eup %2712  ;;  %v2111_v24 = vadd.f32 1.0, %v2711_v0 }
 0x6d4   : > { %v2112_v26 = vadd.f32 1.0, %v2713_v22 }
 0x6d5   : > { %v2113_v27 = vmul.f32 %v2111_v24, %v2105_v23 }
 0x6d6   : > { %v2114_v28 = vmul.f32 %v2112_v26, %v2106_v25 }
 0x6d8   : > { %v2300_v29 = vpack.c.bf16 %v2114_v28, %v2113_v27 }
 0x6da   : > { %2301 = vst [vmem:[%s440_s24] sm:$0xff] %v2300_v29  }
 0x6db PF: > { %s23_s25 = sadd.s32 1, %s2720_s25  }
 0x6dc   : > { %p20_p4 = scmp.ge.s32.totalorder %s23_s25, 4  }
 0x6de   :  { %22 = sbr.rel (!%p20_p4) target bundleno = 1 (0x1), region = 118 }

// kernel: _lambda_.7
= control target key start
LH: loop header
LB: loop body
LE: loop exit
PB: predicated region body
PF: predicated region fallthrough
CT: control target
= control target key end

     0   :  { %s4925_s30 = smov 0   ;;  %s5527_s0 = inlined_call_operand.vmem [shape: bf16[2,64,128], index: 0, kind: input, shape index: {}]   ;;  %s5528_s1 = inlined_call_operand.vmem [shape: bf16[576,64], index: 1, kind: input, shape index: {}, may-alias: {1,5}]   ;;  %s5529_s2 = inlined_call_operand.vmem [shape: bf16[9,8,128], index: 2, kind: input, shape index: {}]   ;;  %s5530_s3 = inlined_call_operand.vmem [shape: f32[1,128], index: 3, kind: input, shape index: {}, may-alias: {3,7}]   ;;  %s5531_s4 = inlined_call_operand.vmem [shape: f32[1,128], index: 4, kind: input, shape index: {}, may-alias: {4,8}]   ;;  %s5532_s5 = inlined_call_operand.vmem [shape: bf16[576,64], index: 5, kind: input, shape index: {}, may-alias: {1,5}]   ;;  %s5533_s6 = inlined_call_operand.vmem [shape: bf16[9,8,128], index: 6, kind: input, shape index: {}]   ;;  %s5534_s7 = inlined_call_operand.vmem [shape: f32[1,128], index: 7, kind: input, shape index: {}, may-alias: {3,7}]   ;;  %s5535_s8 = inlined_call_operand.vmem [shape: f32[1,128], index: 8, kind: input, shape index: {}, may-alias: {4,8}]   ;;  %s5536_s9 = inlined_call_operand.vmem [shape: bf16[2,64,128], index: 9, kind: output, shape index: {}]  }
   0x1 LB: > { %s3776_s10 = sadd.s32 4294967295, %s4873_s30   ;;  %p3780_p0 = scmp.ge.s32.totalorder %s4873_s30, 1  ;;  %s4873_s30 = sphi %s4925_s30, %s19_s30  }
   0x2   : > { %p287_p1 = scmp.lt.s32.totalorder %s4873_s30, 3 }
   0x4   : > { %p288_p2 = pnand %p3780_p0, %p287_p1 }
   0x5   : > { %p323_p3 = scmp.lt.s32.totalorder (!%p288_p2), %s3776_s10, 1  ;;  %v4751_v0 = vld [vmem:[%s5528_s1] sm:$0xff] (!%p288_p2)   ;;  %vm618_vm0 = vcmask (!%p288_p2), 523264   ;;  %v4752_v5 = vld [vmem:[%s5528_s1 + $0x8] sm:$0xff] (!%p288_p2)   ;;  %v4753_v6 = vld [vmem:[%s5528_s1 + $0x10] sm:$0xff] (!%p288_p2)   ;;  %vm1100_vm1 = vcmask (!%p288_p2), 1043456  }
   0x6   : > { %291 = sbr.rel (%p288_p2) target bundleno = 1844 (0x734), region = 56  ;;  %4246 = vmatprep.mubr.msk.bf16.mxu0 (!%p288_p2), %vm618_vm0, %v4751_v0  ;;  %v4754_v7 = vld [vmem:[%s5528_s1 + $0x18] sm:$0xff] (!%p288_p2)   ;;  %v4755_v8 = vld [vmem:[%s5528_s1 + $0x20] sm:$0xff] (!%p288_p2)   ;;  %v4756_v9 = vld [vmem:[%s5528_s1 + $0x28] sm:$0xff] (!%p288_p2)   ;;  %vm1087_vm2 = vcmask (!%p288_p2), 64512  }
   0x7   : > { %v4757_v10 = vld [vmem:[%s5528_s1 + $0x30] sm:$0xff] (!%p288_p2)   ;;  %v4758_v11 = vld [vmem:[%s5528_s1 + $0x38] sm:$0xff] (!%p288_p2)   ;;  %v4759_v12 = vld [vmem:[%s5528_s1 + $0x40] sm:$0xff] (!%p288_p2)  }
   0x8   : > { %v4760_v13 = vld [vmem:[%s5528_s1 + $0x48] sm:$0xff] (!%p288_p2)   ;;  %v4761_v14 = vld [vmem:[%s5528_s1 + $0x50] sm:$0xff] (!%p288_p2)   ;;  %v4762_v15 = vld [vmem:[%s5528_s1 + $0x58] sm:$0xff] (!%p288_p2)  }
   0x9   : > { %v4763_v16 = vld [vmem:[%s5528_s1 + $0x60] sm:$0xff] (!%p288_p2)   ;;  %v4764_v17 = vld [vmem:[%s5528_s1 + $0x68] sm:$0xff] (!%p288_p2)   ;;  %v4765_v18 = vld [vmem:[%s5528_s1 + $0x70] sm:$0xff] (!%p288_p2)  }
   0xa   : > { %v4766_v19 = vld [vmem:[%s5528_s1 + $0x78] sm:$0xff] (!%p288_p2)   ;;  %v4767_v20 = vld [vmem:[%s5528_s1 + $0x80] sm:$0xff] (!%p288_p2)   ;;  %v4768_v21 = vld [vmem:[%s5528_s1 + $0x88] sm:$0xff] (!%p288_p2)  }
   0xb   : > { %v4769_v22 = vld [vmem:[%s5528_s1 + $0x90] sm:$0xff] (!%p288_p2)   ;;  %v4770_v23 = vld [vmem:[%s5528_s1 + $0x98] sm:$0xff] (!%p288_p2)   ;;  %v4771_v24 = vld [vmem:[%s5528_s1 + $0xa0] sm:$0xff] (!%p288_p2)  }
   0xc   : > { %v4772_v25 = vld [vmem:[%s5528_s1 + $0xa8] sm:$0xff] (!%p288_p2)   ;;  %v4773_v26 = vld [vmem:[%s5528_s1 + $0xb0] sm:$0xff] (!%p288_p2)   ;;  %v4774_v27 = vld [vmem:[%s5528_s1 + $0xb8] sm:$0xff] (!%p288_p2)  }
   0xd   : > { %s5538_s10 = smov (!%p323_p3, %s3776_s10), 1  ;;  %v4775_v28 = vld [vmem:[%s5528_s1 + $0xc0] sm:$0xff]   ;;  %v4776_v29 = vld [vmem:[%s5528_s1 + $0xc8] sm:$0xff]   ;;  %v4777_v30 = vld [vmem:[%s5528_s1 + $0xd0] sm:$0xff]  }
   0xe   : > { %s4035_s13 = sshll.u32 %s5538_s10, 5  ;;  %v4778_v31 = vld [vmem:[%s5528_s1 + $0xd8] sm:$0xff]   ;;  %v4779_v32 = vld [vmem:[%s5528_s1 + $0xe0] sm:$0xff]   ;;  %v4780_v36 = vld [vmem:[%s5528_s1 + $0xe8] sm:$0xff]  }
   0xf   : > { %s4945_s16 = scalar_lea.vmem %s5527_s0, %s4035_s13  ;;  %v3861_v33 = vld [vmem:[%s5529_s2 + $0x4] sm:$0xf]  ;;  %v1084_v35 = vld [vmem:[%s5529_s2] sm:$0xf]  ;;  %v4781_v37 = vld [vmem:[%s5528_s1 + $0xf0] sm:$0xff]   ;;  %s332_s15 = scalar_lea.vmem %s5536_s9, %s4035_s13 }
  0x10   : > { %v334_v1 = vld [vmem:[%s4945_s16] sm:$0xff]   ;;  %v336_v2 = vld [vmem:[%s4945_s16 + $0x8] sm:$0xff]   ;;  %v338_v3 = vld [vmem:[%s4945_s16 + $0x10] sm:$0xff]   ;;  %4708 = vmatprep.subr.msk.bf16.mxu1 %vm1100_vm1, %v3861_v33  ;;  %v1102_v34 = vsel %vm1100_vm1, %v3861_v33, 0  ;;  %v1182_v61 = vsel %vm1100_vm1, %v1084_v35, 0 }
  0x11   : > { %4238 = vmatprep.subr.bf16.mxu0 %v334_v1  ;;  %v340_v4 = vld [vmem:[%s4945_s16 + $0x18] sm:$0xff]   ;;  %4319 = vmatpush3.bf16.msra.mxu1 %v1102_v34  ;;  %v4783_v39 = vld [vmem:[%s5528_s1 + $0x100] sm:$0xff]   ;;  %v4784_v40 = vld [vmem:[%s5528_s1 + $0x108] sm:$0xff]  }
  0x12   : > { %4239 = vmatpush3.bf16.msra.mxu0 %v334_v1  ;;  %4709 = vmatprep.subr.msk.bf16.mxu1 %vm1100_vm1, %v1084_v35  ;;  %v4782_v38 = vld [vmem:[%s5528_s1 + $0xf8] sm:$0xff]   ;;  %v4785_v41 = vld [vmem:[%s5528_s1 + $0x110] sm:$0xff]   ;;  %v3870_v62 = vld [vmem:[%s5529_s2 + $0x8] sm:$0xf] }
  0x13   : > { %4240 = vmatprep.subr.bf16.mxu0 %v336_v2  ;;  %v4786_v42 = vld [vmem:[%s5528_s1 + $0x118] sm:$0xff]  }
  0x16   : > { %4241 = vmatpush3.bf16.msra.mxu0 %v336_v2 }
  0x17   : > { %4242 = vmatprep.subr.bf16.mxu0 %v338_v3 }
  0x1a   : > { %4243 = vmatpush3.bf16.msra.mxu0 %v338_v3 }
  0x1b   : > { %4244 = vmatprep.subr.bf16.mxu0 %v340_v4 }
  0x1e   : > { %4245 = vmatpush3.bf16.msra.mxu0 %v340_v4 }
  0x21   : > { %4247 = vmatmul.mubr.msk.bf16.vlgmr.msra.gmra.mrb[0].mxu0 %vm618_vm0, %v4752_v5 }
  0x22   : > { %4250 = vmatprep.mubr.msk.bf16.mxu0 %vm618_vm0, %v4753_v6 }
  0x29   : > { %4251 = vmatmul.mubr.msk.bf16.gmra.mrb[4].mxu0 %vm618_vm0, %v4754_v7 }
  0x2a   : > { %4254 = vmatprep.mubr.msk.bf16.mxu0 %vm618_vm0, %v4755_v8 }
  0x31   : > { %4255 = vmatmul.mubr.msk.bf16.gmra.mrb[8].mxu0 %vm618_vm0, %v4756_v9 }
  0x32   : > { %4258 = vmatprep.mubr.msk.bf16.mxu0 %vm618_vm0, %v4757_v10 }
  0x39   : > { %4259 = vmatmul.mubr.msk.bf16.gmra.mrb[12].mxu0 %vm618_vm0, %v4758_v11  ;;  %v1264_v11 = vsel %vm1100_vm1, %v3870_v62, 0 }
  0x3a   : > { %4262 = vmatprep.mubr.msk.bf16.mxu0 %vm618_vm0, %v4759_v12  ;;  %v3875_v12 = vld [vmem:[%s5529_s2 + $0xc] sm:$0xf] }
  0x41   : > { %4263 = vmatmul.mubr.msk.bf16.gmra.mrb[16].mxu0 %vm618_vm0, %v4760_v13 }
  0x42   : > { %4266 = vmatprep.mubr.msk.bf16.mxu0 %vm618_vm0, %v4761_v14 }
  0x49   : > { %4267 = vmatmul.mubr.msk.bf16.gmra.mrb[20].mxu0 %vm618_vm0, %v4762_v15 }
  0x4a   : > { %4270 = vmatprep.mubr.msk.bf16.mxu0 %vm618_vm0, %v4763_v16 }
  0x51   : > { %4271 = vmatmul.mubr.msk.bf16.gmra.mrb[24].mxu0 %vm618_vm0, %v4764_v17 }
  0x52   : > { %4274 = vmatprep.mubr.msk.bf16.mxu0 %vm618_vm0, %v4765_v18 }
  0x59   : > { %4275 = vmatmul.mubr.msk.bf16.gmra.mrb[28].mxu0 %vm618_vm0, %v4766_v19 }
  0x5a   : > { %4278 = vmatprep.mubr.msk.bf16.mxu0 %vm618_vm0, %v4767_v20 }
  0x61   : > { %4279 = vmatmul.mubr.msk.bf16.gmra.mrb[32].mxu0 %vm618_vm0, %v4768_v21 }
  0x62   : > { %4282 = vmatprep.mubr.msk.bf16.mxu0 %vm618_vm0, %v4769_v22 }
  0x69   : > { %4283 = vmatmul.mubr.msk.bf16.gmra.mrb[36].mxu0 %vm618_vm0, %v4770_v23 }
  0x6a   : > { %4286 = vmatprep.mubr.msk.bf16.mxu0 %vm618_vm0, %v4771_v24 }
  0x71   : > { %4287 = vmatmul.mubr.msk.bf16.gmra.mrb[40].mxu0 %vm618_vm0, %v4772_v25  ;;  %v1354_v25 = vsel %vm1100_vm1, %v3875_v12, 0 }
  0x72   : > { %4290 = vmatprep.mubr.msk.bf16.mxu0 %vm618_vm0, %v4773_v26  ;;  %v3880_v26 = vld [vmem:[%s5529_s2 + $0x10] sm:$0xf] }
  0x79   : > { %4291 = vmatmul.mubr.msk.bf16.gmra.mrb[44].mxu0 %vm618_vm0, %v4774_v27 }
  0x7a   : > { %4294 = vmatprep.mubr.msk.bf16.mxu0 %vm618_vm0, %v4775_v28 }
  0x81   : > { %4295 = vmatmul.mubr.msk.bf16.gmra.mrb[48].mxu0 %vm618_vm0, %v4776_v29 }
  0x82   : > { %4298 = vmatprep.mubr.msk.bf16.mxu0 %vm618_vm0, %v4777_v30 }
  0x89   : > { %4299 = vmatmul.mubr.msk.bf16.gmra.mrb[52].mxu0 %vm618_vm0, %v4778_v31 }
  0x8a   : > { %4302 = vmatprep.mubr.msk.bf16.mxu0 %vm618_vm0, %v4779_v32 }
  0x91   : > { %4303 = vmatmul.mubr.msk.bf16.gmra.mrb[56].mxu0 %vm618_vm0, %v4780_v36 }
  0x92   : > { %4306 = vmatprep.mubr.msk.bf16.mxu0 %vm618_vm0, %v4781_v37 }
  0x99   : > { %4307 = vmatmul.mubr.msk.bf16.gmra.mrb[60].mxu0 %vm618_vm0, %v4782_v38 }
  0x9a   : > { %4310 = vmatprep.mubr.msk.bf16.mxu0 %vm618_vm0, %v4783_v39  ;;  %v1444_v39 = vsel %vm1100_vm1, %v3880_v26, 0 }
  0xa1   : > { %4311 = vmatmul.mubr.msk.bf16.gmra.mrb[64].mxu0 %vm618_vm0, %v4784_v40  ;;  %v3885_v40 = vld [vmem:[%s5529_s2 + $0x14] sm:$0xf] }
  0xa2   : > { %4314 = vmatprep.mubr.msk.bf16.mxu0 %vm618_vm0, %v4785_v41 }
  0xa9   : > { %4315 = vmatmul.mubr.msk.bf16.gmra.mrb[68].mxu0 %vm618_vm0, %v4786_v42 }
  0xf4   : > { %v4248_v43 = vpop.f32.mrb[0].mxu0 }
  0xf5   : > { %v761_v44 = vpop.f32.mrb[1].mxu0 }
  0xf6   : > { %v4249_v45 = vpop.f32.mrb[2].mxu0 }
  0xf7   : > { %v1049_v46 = vpack.c.bf16 %v4249_v45, %v4248_v43  ;;  %v764_v47 = vpop.f32.mrb[3].mxu0 }
  0xf8   : > { %v1048_v48 = vpack.c.bf16 %v764_v47, %v761_v44 }
  0xfc   : > { %v4252_v49 = vpop.f32.mrb[4].mxu0 }
  0xfd   : > { %v777_v50 = vpop.f32.mrb[5].mxu0 }
  0xfe   : > { %v4253_v51 = vpop.f32.mrb[6].mxu0 }
  0xff   : > { %v1051_v52 = vpack.c.bf16 %v4253_v51, %v4252_v49  ;;  %v780_v53 = vpop.f32.mrb[7].mxu0 }
 0x100   : > { %v1050_v54 = vpack.c.bf16 %v780_v53, %v777_v50  ;;  %v1534_v53 = vsel %vm1100_vm1, %v3885_v40, 0 }
 0x104   : > { %v4256_v55 = vpop.f32.mrb[8].mxu0 }
 0x105   : > { %v793_v56 = vpop.f32.mrb[9].mxu0 }
 0x106   : > { %v4257_v57 = vpop.f32.mrb[10].mxu0 }
 0x107   : > { %v1053_v58 = vpack.c.bf16 %v4257_v57, %v4256_v55  ;;  %v796_v59 = vpop.f32.mrb[11].mxu0 }
 0x108   : > { %v1052_v60 = vpack.c.bf16 %v796_v59, %v793_v56 }
 0x10a   : > { %4320 = vmatprep.mubr.msk.bf16.mxu1 %vm1087_vm2, %v1052_v60 }
 0x10b   : > { %4321 = vmatmul.mubr.msk.bf16.vlgmr.msra.gmra.mrb[0].mxu1 %vm1087_vm2, %v1053_v58 }
 0x10c   : > { %v4260_v63 = vpop.f32.mrb[12].mxu0  ;;  %4329 = vmatpush3.bf16.msra.mxu1 %v1182_v61 }
 0x10d   : > { %v809_v0 = vpop.f32.mrb[13].mxu0  ;;  %4710 = vmatprep.subr.msk.bf16.mxu1 %vm1100_vm1, %v3870_v62 }
 0x10e   : > { %v4261_v1 = vpop.f32.mrb[14].mxu0 }
 0x10f   : > { %v1055_v2 = vpack.c.bf16 %v4261_v1, %v4260_v63  ;;  %v812_v3 = vpop.f32.mrb[15].mxu0 }
 0x110   : > { %v1054_v4 = vpack.c.bf16 %v812_v3, %v809_v0 }
 0x112   : > { %4324 = vmatprep.mubr.msk.bf16.mxu1 %vm1087_vm2, %v1054_v4  ;;  %v3895_v4 = vld [vmem:[%s5529_s2 + $0x1c] sm:$0xf] }
 0x113   : > { %4325 = vmatmul.mubr.msk.bf16.gmra.mrb[4].mxu1 %vm1087_vm2, %v1055_v2 }
 0x114   : > { %4330 = vmatprep.mubr.msk.bf16.mxu1 %vm1087_vm2, %v1048_v48  ;;  %v4264_v5 = vpop.f32.mrb[16].mxu0 }
 0x115   : > { %v825_v6 = vpop.f32.mrb[17].mxu0 }
 0x116   : > { %v4265_v7 = vpop.f32.mrb[18].mxu0 }
 0x117   : > { %v1057_v8 = vpack.c.bf16 %v4265_v7, %v4264_v5  ;;  %v828_v9 = vpop.f32.mrb[19].mxu0 }
 0x118   : > { %v1056_v10 = vpack.c.bf16 %v828_v9, %v825_v6 }
 0x11b   : > { %4331 = vmatmul.mubr.msk.bf16.vlgmr.msra.gmra.mrb[0].mxu1 %vm1087_vm2, %v1049_v46 }
 0x11c   : > { %4334 = vmatprep.mubr.msk.bf16.mxu1 %vm1087_vm2, %v1050_v54  ;;  %4339 = vmatpush3.bf16.msra.mxu1 %v1264_v11  ;;  %v4268_v13 = vpop.f32.mrb[20].mxu0  ;;  %v3890_v54 = vld [vmem:[%s5529_s2 + $0x18] sm:$0xf] }
 0x11d   : > { %v841_v14 = vpop.f32.mrb[21].mxu0  ;;  %4711 = vmatprep.subr.msk.bf16.mxu1 %vm1100_vm1, %v3875_v12  ;;  %v1624_v3 = vsel %vm1100_vm1, %v3890_v54, 0 }
 0x11e   : > { %v4269_v15 = vpop.f32.mrb[22].mxu0 }
 0x11f   : > { %v1059_v16 = vpack.c.bf16 %v4269_v15, %v4268_v13  ;;  %v844_v17 = vpop.f32.mrb[23].mxu0 }
 0x120   : > { %v1058_v18 = vpack.c.bf16 %v844_v17, %v841_v14  ;;  %v1714_v17 = vsel %vm1100_vm1, %v3895_v4, 0 }
 0x123   : > { %4335 = vmatmul.mubr.msk.bf16.gmra.mrb[4].mxu1 %vm1087_vm2, %v1051_v52 }
 0x124   : > { %4340 = vmatprep.mubr.msk.bf16.mxu1 %vm1087_vm2, %v1056_v10  ;;  %v4272_v19 = vpop.f32.mrb[24].mxu0 }
 0x125   : > { %v857_v20 = vpop.f32.mrb[25].mxu0 }
 0x126   : > { %v4273_v21 = vpop.f32.mrb[26].mxu0 }
 0x127   : > { %v1061_v22 = vpack.c.bf16 %v4273_v21, %v4272_v19  ;;  %v860_v23 = vpop.f32.mrb[27].mxu0 }
 0x128   : > { %v1060_v24 = vpack.c.bf16 %v860_v23, %v857_v20 }
 0x12b   : > { %4341 = vmatmul.mubr.msk.bf16.vlgmr.msra.gmra.mrb[0].mxu1 %vm1087_vm2, %v1057_v8 }
 0x12c   : > { %4349 = vmatpush3.bf16.msra.mxu1 %v1354_v25  ;;  %4344 = vmatprep.mubr.msk.bf16.mxu1 %vm1087_vm2, %v1058_v18  ;;  %v4276_v27 = vpop.f32.mrb[28].mxu0  ;;  %v3900_v18 = vld [vmem:[%s5529_s2 + $0x20] sm:$0xf] }
 0x12d   : > { %v873_v28 = vpop.f32.mrb[29].mxu0  ;;  %4712 = vmatprep.subr.msk.bf16.mxu1 %vm1100_vm1, %v3880_v26 }
 0x12e   : > { %v4277_v29 = vpop.f32.mrb[30].mxu0 }
 0x12f   : > { %v1063_v30 = vpack.c.bf16 %v4277_v29, %v4276_v27  ;;  %v876_v31 = vpop.f32.mrb[31].mxu0 }
 0x130   : > { %v1062_v32 = vpack.c.bf16 %v876_v31, %v873_v28  ;;  %v1804_v31 = vsel %vm1100_vm1, %v3900_v18, 0 }
 0x133   : > { %4345 = vmatmul.mubr.msk.bf16.gmra.mrb[4].mxu1 %vm1087_vm2, %v1059_v16 }
 0x134   : > { %4350 = vmatprep.mubr.msk.bf16.mxu1 %vm1087_vm2, %v1060_v24  ;;  %v4280_v33 = vpop.f32.mrb[32].mxu0 }
 0x135   : > { %v889_v34 = vpop.f32.mrb[33].mxu0 }
 0x136   : > { %v4281_v35 = vpop.f32.mrb[34].mxu0 }
 0x137   : > { %v1065_v36 = vpack.c.bf16 %v4281_v35, %v4280_v33  ;;  %v892_v37 = vpop.f32.mrb[35].mxu0 }
 0x138   : > { %v1064_v38 = vpack.c.bf16 %v892_v37, %v889_v34 }
 0x13b   : > { %4351 = vmatmul.mubr.msk.bf16.vlgmr.msra.gmra.mrb[0].mxu1 %vm1087_vm2, %v1061_v22 }
 0x13c   : > { %4359 = vmatpush3.bf16.msra.mxu1 %v1444_v39  ;;  %4354 = vmatprep.mubr.msk.bf16.mxu1 %vm1087_vm2, %v1062_v32  ;;  %v4284_v41 = vpop.f32.mrb[36].mxu0 }
 0x13d   : > { %v905_v42 = vpop.f32.mrb[37].mxu0  ;;  %4713 = vmatprep.subr.msk.bf16.mxu1 %vm1100_vm1, %v3885_v40 }
 0x13e   : > { %v4285_v43 = vpop.f32.mrb[38].mxu0 }
 0x13f   : > { %v1067_v44 = vpack.c.bf16 %v4285_v43, %v4284_v41  ;;  %v908_v45 = vpop.f32.mrb[39].mxu0 }
 0x140   : > { %v1066_v46 = vpack.c.bf16 %v908_v45, %v905_v42 }
 0x143   : > { %4355 = vmatmul.mubr.msk.bf16.gmra.mrb[4].mxu1 %vm1087_vm2, %v1063_v30 }
 0x144   : > { %4360 = vmatprep.mubr.msk.bf16.mxu1 %vm1087_vm2, %v1064_v38  ;;  %v4288_v47 = vpop.f32.mrb[40].mxu0 }
 0x145   : > { %v921_v48 = vpop.f32.mrb[41].mxu0 }
 0x146   : > { %v4289_v49 = vpop.f32.mrb[42].mxu0 }
 0x147   : > { %v1069_v50 = vpack.c.bf16 %v4289_v49, %v4288_v47  ;;  %v924_v51 = vpop.f32.mrb[43].mxu0 }
 0x148   : > { %v1068_v52 = vpack.c.bf16 %v924_v51, %v921_v48 }
 0x14b   : > { %4361 = vmatmul.mubr.msk.bf16.vlgmr.msra.gmra.mrb[0].mxu1 %vm1087_vm2, %v1065_v36 }
 0x14c   : > { %4369 = vmatpush3.bf16.msra.mxu1 %v1534_v53  ;;  %4364 = vmatprep.mubr.msk.bf16.mxu1 %vm1087_vm2, %v1066_v46  ;;  %v4292_v55 = vpop.f32.mrb[44].mxu0 }
 0x14d   : > { %v937_v56 = vpop.f32.mrb[45].mxu0  ;;  %4714 = vmatprep.subr.msk.bf16.mxu1 %vm1100_vm1, %v3890_v54 }
 0x14e   : > { %v4293_v57 = vpop.f32.mrb[46].mxu0 }
 0x14f   : > { %v1071_v58 = vpack.c.bf16 %v4293_v57, %v4292_v55  ;;  %v940_v59 = vpop.f32.mrb[47].mxu0 }
 0x150   : > { %v1070_v60 = vpack.c.bf16 %v940_v59, %v937_v56 }
 0x153   : > { %4365 = vmatmul.mubr.msk.bf16.gmra.mrb[4].mxu1 %vm1087_vm2, %v1067_v44 }
 0x154   : > { %4370 = vmatprep.mubr.msk.bf16.mxu1 %vm1087_vm2, %v1068_v52  ;;  %v4296_v61 = vpop.f32.mrb[48].mxu0 }
 0x155   : > { %v953_v62 = vpop.f32.mrb[49].mxu0 }
 0x156   : > { %v4297_v63 = vpop.f32.mrb[50].mxu0 }
 0x157   : > { %v1073_v0 = vpack.c.bf16 %v4297_v63, %v4296_v61  ;;  %v956_v1 = vpop.f32.mrb[51].mxu0 }
 0x158   : > { %v1072_v2 = vpack.c.bf16 %v956_v1, %v953_v62 }
 0x15b   : > { %4371 = vmatmul.mubr.msk.bf16.vlgmr.msra.gmra.mrb[0].mxu1 %vm1087_vm2, %v1069_v50 }
 0x15c   : > { %4379 = vmatpush3.bf16.msra.mxu1 %v1624_v3  ;;  %4374 = vmatprep.mubr.msk.bf16.mxu1 %vm1087_vm2, %v1070_v60  ;;  %v4300_v5 = vpop.f32.mrb[52].mxu0 }
 0x15d   : > { %v969_v6 = vpop.f32.mrb[53].mxu0  ;;  %4715 = vmatprep.subr.msk.bf16.mxu1 %vm1100_vm1, %v3895_v4 }
 0x15e   : > { %v4301_v7 = vpop.f32.mrb[54].mxu0 }
 0x15f   : > { %v1075_v8 = vpack.c.bf16 %v4301_v7, %v4300_v5  ;;  %v972_v9 = vpop.f32.mrb[55].mxu0 }
 0x160   : > { %v1074_v10 = vpack.c.bf16 %v972_v9, %v969_v6 }
 0x163   : > { %4375 = vmatmul.mubr.msk.bf16.gmra.mrb[4].mxu1 %vm1087_vm2, %v1071_v58 }
 0x164   : > { %4380 = vmatprep.mubr.msk.bf16.mxu1 %vm1087_vm2, %v1072_v2  ;;  %v4304_v11 = vpop.f32.mrb[56].mxu0 }
 0x165   : > { %v985_v12 = vpop.f32.mrb[57].mxu0 }
 0x166   : > { %v4305_v13 = vpop.f32.mrb[58].mxu0 }
 0x167   : > { %v1077_v14 = vpack.c.bf16 %v4305_v13, %v4304_v11  ;;  %v988_v15 = vpop.f32.mrb[59].mxu0 }
 0x168   : > { %v1076_v16 = vpack.c.bf16 %v988_v15, %v985_v12 }
 0x16b   : > { %4381 = vmatmul.mubr.msk.bf16.vlgmr.msra.gmra.mrb[0].mxu1 %vm1087_vm2, %v1073_v0 }
 0x16c   : > { %4389 = vmatpush3.bf16.msra.mxu1 %v1714_v17  ;;  %4384 = vmatprep.mubr.msk.bf16.mxu1 %vm1087_vm2, %v1074_v10  ;;  %v4308_v19 = vpop.f32.mrb[60].mxu0 }
 0x16d   : > { %v1001_v20 = vpop.f32.mrb[61].mxu0  ;;  %4716 = vmatprep.subr.msk.bf16.mxu1 %vm1100_vm1, %v3900_v18  ;;  %v4787_v18 = vld [vmem:[%s5532_s5] sm:$0xff]  }
 0x16e   : > { %v4309_v21 = vpop.f32.mrb[62].mxu0 }
 0x16f   : > { %v1079_v22 = vpack.c.bf16 %v4309_v21, %v4308_v19  ;;  %v1004_v23 = vpop.f32.mrb[63].mxu0 }
 0x170   : > { %v1078_v24 = vpack.c.bf16 %v1004_v23, %v1001_v20 }
 0x173   : > { %4385 = vmatmul.mubr.msk.bf16.gmra.mrb[4].mxu1 %vm1087_vm2, %v1075_v8 }
 0x174   : > { %4390 = vmatprep.mubr.msk.bf16.mxu1 %vm1087_vm2, %v1076_v16  ;;  %v4312_v25 = vpop.f32.mrb[64].mxu0 }
 0x175   : > { %v1017_v26 = vpop.f32.mrb[65].mxu0 }
 0x176   : > { %v4313_v27 = vpop.f32.mrb[66].mxu0 }
 0x177   : > { %v1081_v28 = vpack.c.bf16 %v4313_v27, %v4312_v25  ;;  %v1020_v29 = vpop.f32.mrb[67].mxu0 }
 0x178   : > { %v1080_v30 = vpack.c.bf16 %v1020_v29, %v1017_v26 }
 0x17b   : > { %4391 = vmatmul.mubr.msk.bf16.vlgmr.msra.gmra.mrb[0].mxu1 %vm1087_vm2, %v1077_v14 }
 0x17c   : > { %4399 = vmatpush3.bf16.msra.mxu1 %v1804_v31  ;;  %4394 = vmatprep.mubr.msk.bf16.mxu1 %vm1087_vm2, %v1078_v24  ;;  %v4316_v32 = vpop.f32.mrb[68].mxu0 }
 0x17d   : > { %v1033_v33 = vpop.f32.mrb[69].mxu0 }
 0x17e   : > { %v4317_v34 = vpop.f32.mrb[70].mxu0 }
 0x17f   : > { %v1083_v35 = vpack.c.bf16 %v4317_v34, %v4316_v32  ;;  %v1036_v36 = vpop.f32.mrb[71].mxu0 }
 0x180   : > { %v1082_v37 = vpack.c.bf16 %v1036_v36, %v1033_v33  ;;  %v3905_v33 = vld [vmem:[%s5530_s3] ss:$0 sm:$0xff] }
 0x183   : > { %4395 = vmatmul.mubr.msk.bf16.gmra.mrb[4].mxu1 %vm1087_vm2, %v1079_v22 }
 0x184   : > { %4400 = vmatprep.mubr.msk.bf16.mxu1 %vm1087_vm2, %v1080_v30  ;;  %v5227_v30 = vld [vmem:[%s5533_s6 + $0x4] sm:$0xf] }
 0x185   : > { %4717 = vmatprep.subr.msk.bf16.mxu0 %vm1100_vm1, %v5227_v30  ;;  %v5233_v31 = vsel %vm1100_vm1, %v5227_v30, 0 }
 0x186   : > { %4489 = vmatpush3.bf16.msra.mxu0 %v5233_v31 }
 0x18b   : > { %4401 = vmatmul.mubr.msk.bf16.vlgmr.msra.gmra.mrb[0].mxu1 %vm1087_vm2, %v1081_v28 }
 0x18c   : > { %4404 = vmatprep.mubr.msk.bf16.mxu1 %vm1087_vm2, %v1082_v37 }
 0x193   : > { %4405 = vmatmul.mubr.msk.bf16.gmra.mrb[4].mxu1 %vm1087_vm2, %v1083_v35 }
 0x194   : > { %4416 = vmatprep.mubr.msk.bf16.mxu1 %vm618_vm0, %v4787_v18 }
 0x25e   : > { %v5172_v38 = vpop.f32.mrb[0].mxu1 }
 0x25f   : > { %v5174_v39 = vpop.f32.mrb[1].mxu1  ;;  %v1899_v45 = vmul.f32 %v5172_v38, %v5172_v38 }
 0x260   : > { %v5176_v40 = vpop.f32.mrb[2].mxu1  ;;  %v1897_v42 = vmul.f32 %v5174_v39, %v5174_v39 }
 0x261   : > { %v5178_v41 = vpop.f32.mrb[3].mxu1  ;;  %v1900_v48 = vmul.f32 %v5176_v40, %v5176_v40 }
 0x262   : > { %v1881_v43 = vadd.f32 %v5178_v41, %v5174_v39  ;;  %v1898_v44 = vmul.f32 %v5178_v41, %v5178_v41 }
 0x264   : > { %v1882_v46 = vadd.f32 %v5172_v38, %v1881_v43  ;;  %v1905_v47 = vadd.f32 %v1898_v44, %v1897_v42 }
 0x266   : > { %v1906_v49 = vadd.f32 %v1905_v47, %v1899_v45  ;;  %v5191_v50 = vpop.f32.mrb[4].mxu1  ;;  %v1883_v51 = vadd.f32 %v5176_v40, %v1882_v46 }
 0x267   : > { %v5194_v52 = vpop.f32.mrb[5].mxu1  ;;  %v1903_v61 = vmul.f32 %v5191_v50, %v5191_v50 }
 0x268   : > { %v1884_v53 = vadd.f32 %v1883_v51, %v5194_v52  ;;  %v1901_v54 = vmul.f32 %v5194_v52, %v5194_v52  ;;  %v1907_v55 = vadd.f32 %v1906_v49, %v1900_v48  ;;  %v5199_v56 = vpop.f32.mrb[6].mxu1 }
 0x269   : > { %v5201_v57 = vpop.f32.mrb[7].mxu1  ;;  %v1904_v1 = vmul.f32 %v5199_v56, %v5199_v56 }
 0x26a   : > { %v1908_v58 = vadd.f32 %v1907_v55, %v1901_v54  ;;  %v1885_v59 = vadd.f32 %v1884_v53, %v5201_v57  ;;  %v1902_v60 = vmul.f32 %v5201_v57, %v5201_v57 }
 0x26c   : > { %v1886_v62 = vadd.f32 %v5191_v50, %v1885_v59  ;;  %v1909_v63 = vadd.f32 %v1908_v58, %v1902_v60 }
 0x26e   : > { %v1887_v0 = vadd.f32 %v5199_v56, %v1886_v62  ;;  %v1910_v2 = vadd.f32 %v1909_v63, %v1903_v61 }
 0x270   : > { %1888 = vadd.xlane.f32.xlu0 %v1887_v0  ;;  %v1911_v3 = vadd.f32 %v1910_v2, %v1904_v1 }
 0x274   : > { %1912 = vadd.xlane.f32.xlu0 %v1911_v3 }
 0x2fd   : > { %v1889_v4 = vpop.xlane.xlu0 %1888 }
 0x2fe   : > { %v1890_v5 = vrot.slane %v1889_v4, 4 }
 0x300   : > { %v1891_v6 = vadd.f32 %v1890_v5, %v1889_v4 }
 0x301   : > { %v1913_v7 = vpop.xlane.xlu0 %1912 }
 0x302   : > { %v1892_v8 = vrot.slane %v1891_v6, 2  ;;  %v1914_v9 = vrot.slane %v1913_v7, 4 }
 0x304   : > { %v1915_v10 = vadd.f32 %v1914_v9, %v1913_v7  ;;  %v1893_v11 = vadd.f32 %v1892_v8, %v1891_v6 }
 0x306   : > { %v1916_v12 = vrot.slane %v1915_v10, 2  ;;  %v1894_v13 = vrot.slane %v1893_v11, 1 }
 0x308   : > { %v1917_v14 = vadd.f32 %v1916_v12, %v1915_v10  ;;  %v1895_v15 = vadd.f32 %v1894_v13, %v1893_v11 }
 0x30a   : > { %4727 = vpush %v1895_v15  ;;  %v1918_v16 = vrot.slane %v1917_v14, 1 }
 0x30c   : > { %v1919_v17 = vadd.f32 %v1918_v16, %v1917_v14 }
 0x30e   : > { %4729 = vpush %v1919_v17 }
 0x33b   : > { %s4728_s22 = spop %4727 }
 0x33c   : > { %s1921_s23 = smul.f32 0.001953125, %s4728_s22 }
 0x33e   : > { %v1929_v19 = vstv %s1921_s23  ;;  %s1923_s24 = smul.f32 %s1921_s23, %s1921_s23 }
 0x33f   : > { %s4730_s25 = spop %4729  ;;  %v1930_v20 = vsub.f32 %v5174_v39, %v1929_v19  ;;  %v1931_v21 = vsub.f32 %v5178_v41, %v1929_v19  ;;  %v1932_v22 = vsub.f32 %v5172_v38, %v1929_v19  ;;  %v1933_v23 = vsub.f32 %v5176_v40, %v1929_v19  ;;  %v3906_v38 = vld [vmem:[%s5531_s4] ss:$0 sm:$0xff] }
 0x340   : > { %s1922_s26 = smul.f32 0.001953125, %s4730_s25  ;;  %v1934_v24 = vsub.f32 %v5194_v52, %v1929_v19  ;;  %v1935_v25 = vsub.f32 %v5201_v57, %v1929_v19  ;;  %v1936_v26 = vsub.f32 %v5191_v50, %v1929_v19  ;;  %v1937_v27 = vsub.f32 %v5199_v56, %v1929_v19 }
 0x342   : > { %s1924_s27 = ssub.f32 %s1922_s26, %s1923_s24 }
 0x344   : > { %s1925_s28 = sadd.f32 1e-05, %s1924_s27 }
 0x346   : > { %v1926_v28 = vstv %s1925_s28 }
 0x347   : > { %4827 = vrsqrt.f32 %v1926_v28 }
 0x351   : > { %v4828_v29 = vpop.eup %4827 }
 0x352   : > { %4731 = vpush %v4828_v29 }
 0x383   : > { %s4732_s12 = spop %4731 }
 0x384   : > { %v1938_v32 = vstv %s4732_s12 }
 0x385   : > { %v1939_v34 = vmul.f32 %v1938_v32, %v1930_v20  ;;  %v1940_v35 = vmul.f32 %v1938_v32, %v1931_v21  ;;  %v1941_v36 = vmul.f32 %v1938_v32, %v1932_v22  ;;  %v1942_v37 = vmul.f32 %v1938_v32, %v1933_v23 }
 0x386   : > { %v1943_v39 = vmul.f32 %v1938_v32, %v1934_v24  ;;  %v1944_v40 = vmul.f32 %v1938_v32, %v1935_v25  ;;  %v1945_v41 = vmul.f32 %v1938_v32, %v1936_v26  ;;  %v1946_v42 = vmul.f32 %v1938_v32, %v1937_v27 }
 0x387   : > { %v1953_v43 = vmul.f32 %v3905_v33, %v1939_v34  ;;  %v1954_v44 = vmul.f32 %v3905_v33, %v1940_v35  ;;  %v1955_v45 = vmul.f32 %v3905_v33, %v1941_v36  ;;  %v1956_v46 = vmul.f32 %v3905_v33, %v1942_v37 }
 0x388   : > { %v1957_v47 = vmul.f32 %v3905_v33, %v1943_v39  ;;  %v1958_v48 = vmul.f32 %v3905_v33, %v1944_v40  ;;  %v1959_v49 = vmul.f32 %v3905_v33, %v1945_v41  ;;  %v1960_v50 = vmul.f32 %v3905_v33, %v1946_v42  ;;  %v4788_v41 = vld [vmem:[%s5532_s5 + $0x8] sm:$0xff]   ;;  %v4789_v42 = vld [vmem:[%s5532_s5 + $0x10] sm:$0xff]  }
 0x389   : > { %v1967_v51 = vadd.f32 %v3906_v38, %v1953_v43  ;;  %v1968_v52 = vadd.f32 %v3906_v38, %v1954_v44  ;;  %v1969_v53 = vadd.f32 %v3906_v38, %v1955_v45  ;;  %v1970_v54 = vadd.f32 %v3906_v38, %v1956_v46  ;;  %v4790_v43 = vld [vmem:[%s5532_s5 + $0x18] sm:$0xff]   ;;  %v4791_v44 = vld [vmem:[%s5532_s5 + $0x20] sm:$0xff]  }
 0x38a   : > { %v1971_v55 = vadd.f32 %v3906_v38, %v1957_v47  ;;  %v1972_v56 = vadd.f32 %v3906_v38, %v1958_v48  ;;  %v1973_v59 = vadd.f32 %v3906_v38, %v1959_v49  ;;  %v1974_v62 = vadd.f32 %v3906_v38, %v1960_v50  ;;  %v4794_v45 = vld [vmem:[%s5532_s5 + $0x38] sm:$0xff]   ;;  %v4795_v46 = vld [vmem:[%s5532_s5 + $0x40] sm:$0xff]   ;;  %v4796_v47 = vld [vmem:[%s5532_s5 + $0x48] sm:$0xff]  }
 0x38b   : > { %v1983_v57 = vmul.f32 0.70710677, %v1967_v51  ;;  %v1984_v58 = vmul.f32 0.70710677, %v1968_v52  ;;  %v1985_v60 = vmul.f32 0.70710677, %v1969_v53 }
 0x38c   : > { %v1986_v61 = vmul.f32 0.70710677, %v1970_v54  ;;  %v1987_v63 = vmul.f32 0.70710677, %v1971_v55  ;;  %v1988_v0 = vmul.f32 0.70710677, %v1972_v56 }
 0x38d   : > { %4829 = verf.f32 %v1983_v57  ;;  %v1989_v1 = vmul.f32 0.70710677, %v1973_v59  ;;  %v1990_v2 = vmul.f32 0.70710677, %v1974_v62  ;;  %v1975_v5 = vmul.f32 0.5, %v1967_v51  ;;  %v4797_v48 = vld [vmem:[%s5532_s5 + $0x50] sm:$0xff]  }
 0x38e   : > { %4831 = verf.f32 %v1984_v58  ;;  %v1976_v8 = vmul.f32 0.5, %v1968_v52  ;;  %v1977_v12 = vmul.f32 0.5, %v1969_v53  ;;  %v1978_v16 = vmul.f32 0.5, %v1970_v54  ;;  %v4798_v49 = vld [vmem:[%s5532_s5 + $0x58] sm:$0xff]   ;;  %v4799_v50 = vld [vmem:[%s5532_s5 + $0x60] sm:$0xff]   ;;  %v4800_v51 = vld [vmem:[%s5532_s5 + $0x68] sm:$0xff]  }
 0x38f   : > { %4833 = verf.f32 %v1985_v60  ;;  %v1979_v20 = vmul.f32 0.5, %v1971_v55  ;;  %v1980_v25 = vmul.f32 0.5, %v1972_v56  ;;  %v1981_v29 = vmul.f32 0.5, %v1973_v59  ;;  %v4801_v52 = vld [vmem:[%s5532_s5 + $0x70] sm:$0xff]   ;;  %v4802_v53 = vld [vmem:[%s5532_s5 + $0x78] sm:$0xff]   ;;  %v4803_v54 = vld [vmem:[%s5532_s5 + $0x80] sm:$0xff]  }
 0x390   : > { %4835 = verf.f32 %v1986_v61  ;;  %v1982_v35 = vmul.f32 0.5, %v1974_v62  ;;  %v4804_v55 = vld [vmem:[%s5532_s5 + $0x88] sm:$0xff]   ;;  %v4805_v56 = vld [vmem:[%s5532_s5 + $0x90] sm:$0xff]   ;;  %v4806_v57 = vld [vmem:[%s5532_s5 + $0x98] sm:$0xff]  }
 0x391   : > { %4837 = verf.f32 %v1987_v63  ;;  %v4807_v58 = vld [vmem:[%s5532_s5 + $0xa0] sm:$0xff]   ;;  %v4808_v59 = vld [vmem:[%s5532_s5 + $0xa8] sm:$0xff]   ;;  %v4809_v60 = vld [vmem:[%s5532_s5 + $0xb0] sm:$0xff]  }
 0x392   : > { %4839 = verf.f32 %v1988_v0  ;;  %v4810_v61 = vld [vmem:[%s5532_s5 + $0xb8] sm:$0xff]   ;;  %v4811_v62 = vld [vmem:[%s5532_s5 + $0xc0] sm:$0xff]   ;;  %v4812_v63 = vld [vmem:[%s5532_s5 + $0xc8] sm:$0xff]  }
 0x393   : > { %4841 = verf.f32 %v1989_v1  ;;  %v4813_v0 = vld [vmem:[%s5532_s5 + $0xd0] sm:$0xff]   ;;  %v4814_v1 = vld [vmem:[%s5532_s5 + $0xd8] sm:$0xff]  }
 0x394   : > { %4843 = verf.f32 %v1990_v2  ;;  %v4815_v2 = vld [vmem:[%s5532_s5 + $0xe0] sm:$0xff]  }
 0x397   : > { %v4830_v3 = vpop.eup %4829 }
 0x398   : > { %v4832_v4 = vpop.eup %4831  ;;  %v1999_v6 = vadd.f32 1.0, %v4830_v3  ;;  %v2736_v3 = vld [vmem:[%s5533_s6] sm:$0xf] }
 0x399   : > { %v4834_v7 = vpop.eup %4833  ;;  %v2000_v9 = vadd.f32 1.0, %v4832_v4  ;;  %4719 = vmatprep.subr.msk.bf16.mxu0 %vm1100_vm1, %v2736_v3  ;;  %v4816_v4 = vld [vmem:[%s5532_s5 + $0xe8] sm:$0xff]  }
 0x39a   : > { %v4836_v10 = vpop.eup %4835  ;;  %v2007_v11 = vmul.f32 %v1999_v6, %v1975_v5  ;;  %v2001_v13 = vadd.f32 1.0, %v4834_v7  ;;  %v4817_v5 = vld [vmem:[%s5532_s5 + $0xf0] sm:$0xff]   ;;  %v4818_v6 = vld [vmem:[%s5532_s5 + $0xf8] sm:$0xff]   ;;  %v4819_v7 = vld [vmem:[%s5532_s5 + $0x100] sm:$0xff]  }
 0x39b   : > { %v4838_v14 = vpop.eup %4837  ;;  %v2008_v15 = vmul.f32 %v2000_v9, %v1976_v8  ;;  %v2002_v17 = vadd.f32 1.0, %v4836_v10  ;;  %v4820_v8 = vld [vmem:[%s5532_s5 + $0x108] sm:$0xff]   ;;  %v4821_v9 = vld [vmem:[%s5532_s5 + $0x110] sm:$0xff]   ;;  %v4822_v10 = vld [vmem:[%s5532_s5 + $0x118] sm:$0xff]  }
 0x39c   : > { %v4840_v18 = vpop.eup %4839  ;;  %v2009_v19 = vmul.f32 %v2001_v13, %v1977_v12  ;;  %v2003_v21 = vadd.f32 1.0, %v4838_v14 }
 0x39d   : > { %v4842_v22 = vpop.eup %4841  ;;  %v2015_v23 = vpack.c.bf16 %v2008_v15, %v2007_v11  ;;  %v2010_v24 = vmul.f32 %v2002_v17, %v1978_v16  ;;  %v2004_v26 = vadd.f32 1.0, %v4840_v18 }
 0x39e   : > { %v4844_v27 = vpop.eup %4843  ;;  %v2011_v28 = vmul.f32 %v2003_v21, %v1979_v20  ;;  %v2005_v32 = vadd.f32 1.0, %v4842_v22 }
 0x39f   : > { %4408 = vmatprep.subr.bf16.mxu1 %v2015_v23  ;;  %v2016_v33 = vpack.c.bf16 %v2010_v24, %v2009_v19  ;;  %v2012_v34 = vmul.f32 %v2004_v26, %v1980_v25  ;;  %v2006_v36 = vadd.f32 1.0, %v4844_v27 }
 0x3a0   : > { %4409 = vmatpush3.bf16.msra.mxu1 %v2015_v23  ;;  %v2013_v37 = vmul.f32 %v2005_v32, %v1981_v29  ;;  %v2832_v29 = vsel %vm1100_vm1, %v2736_v3, 0  ;;  %v3988_v32 = vld [vmem:[%s5533_s6 + $0x8] sm:$0xf] }
 0x3a1   : > { %4410 = vmatprep.subr.bf16.mxu1 %v2016_v33  ;;  %v2017_v38 = vpack.c.bf16 %v2012_v34, %v2011_v28  ;;  %v2014_v39 = vmul.f32 %v2006_v36, %v1982_v35 }
 0x3a3   : > { %v2018_v40 = vpack.c.bf16 %v2014_v39, %v2013_v37 }
 0x3a4   : > { %4411 = vmatpush3.bf16.msra.mxu1 %v2016_v33 }
 0x3a5   : > { %4412 = vmatprep.subr.bf16.mxu1 %v2017_v38 }
 0x3a8   : > { %4413 = vmatpush3.bf16.msra.mxu1 %v2017_v38 }
 0x3a9   : > { %4414 = vmatprep.subr.bf16.mxu1 %v2018_v40 }
 0x3ac   : > { %4415 = vmatpush3.bf16.msra.mxu1 %v2018_v40  ;;  %v2914_v40 = vsel %vm1100_vm1, %v3988_v32, 0 }
 0x3ad   : > { %4718 = vmatprep.subr.msk.bf16.mxu1 %vm1100_vm1, %v5227_v30  ;;  %v4792_v30 = vld [vmem:[%s5532_s5 + $0x28] sm:$0xff]  }
 0x3af   : > { %4417 = vmatmul.mubr.msk.bf16.vlgmr.msra.gmra.mrb[8].mxu1 %vm618_vm0, %v4788_v41 }
 0x3b0   : > { %4420 = vmatprep.mubr.msk.bf16.mxu1 %vm618_vm0, %v4789_v42  ;;  %4579 = vmatpush3.bf16.msra.mxu1 %v5233_v31  ;;  %v4793_v31 = vld [vmem:[%s5532_s5 + $0x30] sm:$0xff]  }
 0x3b7   : > { %4421 = vmatmul.mubr.msk.bf16.gmra.mrb[12].mxu1 %vm618_vm0, %v4790_v43  ;;  %v3993_v43 = vld [vmem:[%s5533_s6 + $0xc] sm:$0xf] }
 0x3b8   : > { %4424 = vmatprep.mubr.msk.bf16.mxu1 %vm618_vm0, %v4791_v44 }
 0x3bf   : > { %4425 = vmatmul.mubr.msk.bf16.gmra.mrb[16].mxu1 %vm618_vm0, %v4792_v30 }
 0x3c0   : > { %4428 = vmatprep.mubr.msk.bf16.mxu1 %vm618_vm0, %v4793_v31 }
 0x3c7   : > { %4429 = vmatmul.mubr.msk.bf16.gmra.mrb[20].mxu1 %vm618_vm0, %v4794_v45 }
 0x3c8   : > { %4432 = vmatprep.mubr.msk.bf16.mxu1 %vm618_vm0, %v4795_v46 }
 0x3cf   : > { %4433 = vmatmul.mubr.msk.bf16.gmra.mrb[24].mxu1 %vm618_vm0, %v4796_v47 }
 0x3d0   : > { %4436 = vmatprep.mubr.msk.bf16.mxu1 %vm618_vm0, %v4797_v48 }
 0x3d7   : > { %4437 = vmatmul.mubr.msk.bf16.gmra.mrb[28].mxu1 %vm618_vm0, %v4798_v49 }
 0x3d8   : > { %4440 = vmatprep.mubr.msk.bf16.mxu1 %vm618_vm0, %v4799_v50 }
 0x3df   : > { %4441 = vmatmul.mubr.msk.bf16.gmra.mrb[32].mxu1 %vm618_vm0, %v4800_v51 }
 0x3e0   : > { %4444 = vmatprep.mubr.msk.bf16.mxu1 %vm618_vm0, %v4801_v52  ;;  %v3004_v52 = vsel %vm1100_vm1, %v3993_v43, 0 }
 0x3e7   : > { %4445 = vmatmul.mubr.msk.bf16.gmra.mrb[36].mxu1 %vm618_vm0, %v4802_v53 }
 0x3e8   : > { %4448 = vmatprep.mubr.msk.bf16.mxu1 %vm618_vm0, %v4803_v54 }
 0x3ef   : > { %4449 = vmatmul.mubr.msk.bf16.gmra.mrb[40].mxu1 %vm618_vm0, %v4804_v55  ;;  %v3998_v55 = vld [vmem:[%s5533_s6 + $0x10] sm:$0xf] }
 0x3f0   : > { %4452 = vmatprep.mubr.msk.bf16.mxu1 %vm618_vm0, %v4805_v56 }
 0x3f7   : > { %4453 = vmatmul.mubr.msk.bf16.gmra.mrb[44].mxu1 %vm618_vm0, %v4806_v57 }
 0x3f8   : > { %4456 = vmatprep.mubr.msk.bf16.mxu1 %vm618_vm0, %v4807_v58 }
 0x3ff   : > { %4457 = vmatmul.mubr.msk.bf16.gmra.mrb[48].mxu1 %vm618_vm0, %v4808_v59 }
 0x400   : > { %4460 = vmatprep.mubr.msk.bf16.mxu1 %vm618_vm0, %v4809_v60 }
 0x407   : > { %4461 = vmatmul.mubr.msk.bf16.gmra.mrb[52].mxu1 %vm618_vm0, %v4810_v61 }
 0x408   : > { %4464 = vmatprep.mubr.msk.bf16.mxu1 %vm618_vm0, %v4811_v62 }
 0x40f   : > { %4465 = vmatmul.mubr.msk.bf16.gmra.mrb[56].mxu1 %vm618_vm0, %v4812_v63 }
 0x410   : > { %4468 = vmatprep.mubr.msk.bf16.mxu1 %vm618_vm0, %v4813_v0 }
 0x417   : > { %4469 = vmatmul.mubr.msk.bf16.gmra.mrb[60].mxu1 %vm618_vm0, %v4814_v1 }
 0x418   : > { %4472 = vmatprep.mubr.msk.bf16.mxu1 %vm618_vm0, %v4815_v2  ;;  %v3094_v2 = vsel %vm1100_vm1, %v3998_v55, 0 }
 0x41f   : > { %4473 = vmatmul.mubr.msk.bf16.gmra.mrb[64].mxu1 %vm618_vm0, %v4816_v4 }
 0x420   : > { %4476 = vmatprep.mubr.msk.bf16.mxu1 %vm618_vm0, %v4817_v5  ;;  %v4003_v5 = vld [vmem:[%s5533_s6 + $0x14] sm:$0xf] }
 0x427   : > { %4477 = vmatmul.mubr.msk.bf16.gmra.mrb[68].mxu1 %vm618_vm0, %v4818_v6 }
 0x428   : > { %4480 = vmatprep.mubr.msk.bf16.mxu1 %vm618_vm0, %v4819_v7 }
 0x42f   : > { %4481 = vmatmul.mubr.msk.bf16.gmra.mrb[72].mxu1 %vm618_vm0, %v4820_v8 }
 0x430   : > { %4484 = vmatprep.mubr.msk.bf16.mxu1 %vm618_vm0, %v4821_v9 }
 0x437   : > { %4485 = vmatmul.mubr.msk.bf16.gmra.mrb[76].mxu1 %vm618_vm0, %v4822_v10 }
 0x482   : > { %v4418_v11 = vpop.f32.mrb[8].mxu1 }
 0x483   : > { %v2413_v12 = vpop.f32.mrb[9].mxu1 }
 0x484   : > { %v4419_v13 = vpop.f32.mrb[10].mxu1 }
 0x485   : > { %v2701_v14 = vpack.c.bf16 %v4419_v13, %v4418_v11  ;;  %v2416_v15 = vpop.f32.mrb[11].mxu1 }
 0x486   : > { %v2700_v16 = vpack.c.bf16 %v2416_v15, %v2413_v12 }
 0x48a   : > { %v4422_v17 = vpop.f32.mrb[12].mxu1 }
 0x48b   : > { %v2429_v18 = vpop.f32.mrb[13].mxu1 }
 0x48c   : > { %v4423_v19 = vpop.f32.mrb[14].mxu1 }
 0x48d   : > { %v2703_v20 = vpack.c.bf16 %v4423_v19, %v4422_v17  ;;  %v2432_v21 = vpop.f32.mrb[15].mxu1  ;;  %v4008_v19 = vld [vmem:[%s5533_s6 + $0x18] sm:$0xf] }
 0x48e   : > { %v2702_v22 = vpack.c.bf16 %v2432_v21, %v2429_v18 }
 0x492   : > { %v4426_v23 = vpop.f32.mrb[16].mxu1 }
 0x493   : > { %v2445_v24 = vpop.f32.mrb[17].mxu1 }
 0x494   : > { %v4427_v25 = vpop.f32.mrb[18].mxu1 }
 0x495   : > { %v2705_v26 = vpack.c.bf16 %v4427_v25, %v4426_v23  ;;  %v2448_v27 = vpop.f32.mrb[19].mxu1 }
 0x496   : > { %v2704_v28 = vpack.c.bf16 %v2448_v27, %v2445_v24 }
 0x498   : > { %4490 = vmatprep.mubr.msk.bf16.mxu0 %vm1087_vm2, %v2704_v28 }
 0x499   : > { %4491 = vmatmul.mubr.msk.bf16.vlgmr.msra.gmra.mrb[72].mxu0 %vm1087_vm2, %v2705_v26 }
 0x49a   : > { %4499 = vmatpush3.bf16.msra.mxu0 %v2832_v29  ;;  %4500 = vmatprep.mubr.msk.bf16.mxu0 %vm1087_vm2, %v2700_v16  ;;  %v4430_v33 = vpop.f32.mrb[20].mxu1  ;;  %v3184_v16 = vsel %vm1100_vm1, %v4003_v5, 0 }
 0x49b   : > { %v2461_v34 = vpop.f32.mrb[21].mxu1  ;;  %4720 = vmatprep.subr.msk.bf16.mxu0 %vm1100_vm1, %v3988_v32  ;;  %v3274_v32 = vsel %vm1100_vm1, %v4008_v19, 0 }
 0x49c   : > { %v4431_v35 = vpop.f32.mrb[22].mxu1 }
 0x49d   : > { %v2707_v36 = vpack.c.bf16 %v4431_v35, %v4430_v33  ;;  %v2464_v37 = vpop.f32.mrb[23].mxu1  ;;  %v4013_v35 = vld [vmem:[%s5533_s6 + $0x1c] sm:$0xf] }
 0x49e   : > { %v2706_v38 = vpack.c.bf16 %v2464_v37, %v2461_v34 }
 0x4a0   : > { %4494 = vmatprep.mubr.msk.bf16.mxu1 %vm1087_vm2, %v2706_v38 }
 0x4a1   : > { %4495 = vmatmul.mubr.msk.bf16.vlgmr.msra.gmra.mrb[80].mxu1 %vm1087_vm2, %v2707_v36 }
 0x4a2   : > { %v4434_v39 = vpop.f32.mrb[24].mxu1 }
 0x4a3   : > { %v2477_v41 = vpop.f32.mrb[25].mxu1 }
 0x4a4   : > { %v4435_v42 = vpop.f32.mrb[26].mxu1 }
 0x4a5   : > { %4501 = vmatmul.mubr.msk.bf16.vlgmr.msra.gmra.mrb[72].mxu0 %vm1087_vm2, %v2701_v14  ;;  %v2709_v44 = vpack.c.bf16 %v4435_v42, %v4434_v39  ;;  %v2480_v30 = vpop.f32.mrb[27].mxu1 }
 0x4a6   : > { %4504 = vmatprep.mubr.msk.bf16.mxu0 %vm1087_vm2, %v2702_v22  ;;  %4509 = vmatpush3.bf16.msra.mxu0 %v2914_v40  ;;  %v2708_v31 = vpack.c.bf16 %v2480_v30, %v2477_v41 }
 0x4a7   : > { %4721 = vmatprep.subr.msk.bf16.mxu0 %vm1100_vm1, %v3993_v43 }
 0x4aa   : > { %v4438_v45 = vpop.f32.mrb[28].mxu1 }
 0x4ab   : > { %v2493_v46 = vpop.f32.mrb[29].mxu1 }
 0x4ac   : > { %v4439_v47 = vpop.f32.mrb[30].mxu1 }
 0x4ad   : > { %4505 = vmatmul.mubr.msk.bf16.gmra.mrb[76].mxu0 %vm1087_vm2, %v2703_v20  ;;  %v2711_v48 = vpack.c.bf16 %v4439_v47, %v4438_v45  ;;  %v2496_v49 = vpop.f32.mrb[31].mxu1  ;;  %v4018_v47 = vld [vmem:[%s5533_s6 + $0x20] sm:$0xf] }
 0x4ae   : > { %4510 = vmatprep.mubr.msk.bf16.mxu0 %vm1087_vm2, %v2708_v31  ;;  %v2710_v50 = vpack.c.bf16 %v2496_v49, %v2493_v46  ;;  %v3364_v31 = vsel %vm1100_vm1, %v4013_v35, 0 }
 0x4b2   : > { %v4442_v51 = vpop.f32.mrb[32].mxu1 }
 0x4b3   : > { %v2509_v53 = vpop.f32.mrb[33].mxu1 }
 0x4b4   : > { %v4443_v54 = vpop.f32.mrb[34].mxu1 }
 0x4b5   : > { %4511 = vmatmul.mubr.msk.bf16.vlgmr.msra.gmra.mrb[72].mxu0 %vm1087_vm2, %v2709_v44  ;;  %v2713_v56 = vpack.c.bf16 %v4443_v54, %v4442_v51  ;;  %v2512_v57 = vpop.f32.mrb[35].mxu1 }
 0x4b6   : > { %4519 = vmatpush3.bf16.msra.mxu0 %v3004_v52  ;;  %4514 = vmatprep.mubr.msk.bf16.mxu0 %vm1087_vm2, %v2710_v50  ;;  %v2712_v58 = vpack.c.bf16 %v2512_v57, %v2509_v53 }
 0x4b7   : > { %4722 = vmatprep.subr.msk.bf16.mxu0 %vm1100_vm1, %v3998_v55 }
 0x4ba   : > { %v4446_v59 = vpop.f32.mrb[36].mxu1 }
 0x4bb   : > { %v2525_v60 = vpop.f32.mrb[37].mxu1 }
 0x4bc   : > { %v4447_v61 = vpop.f32.mrb[38].mxu1 }
 0x4bd   : > { %4515 = vmatmul.mubr.msk.bf16.gmra.mrb[76].mxu0 %vm1087_vm2, %v2711_v48  ;;  %v2715_v62 = vpack.c.bf16 %v4447_v61, %v4446_v59  ;;  %v2528_v63 = vpop.f32.mrb[39].mxu1 }
 0x4be   : > { %4520 = vmatprep.mubr.msk.bf16.mxu0 %vm1087_vm2, %v2712_v58  ;;  %v2714_v0 = vpack.c.bf16 %v2528_v63, %v2525_v60  ;;  %v3454_v58 = vsel %vm1100_vm1, %v4018_v47, 0 }
 0x4c2   : > { %v4450_v1 = vpop.f32.mrb[40].mxu1 }
 0x4c3   : > { %v2541_v3 = vpop.f32.mrb[41].mxu1 }
 0x4c4   : > { %v4451_v4 = vpop.f32.mrb[42].mxu1 }
 0x4c5   : > { %4521 = vmatmul.mubr.msk.bf16.vlgmr.msra.gmra.mrb[72].mxu0 %vm1087_vm2, %v2713_v56  ;;  %v2717_v6 = vpack.c.bf16 %v4451_v4, %v4450_v1  ;;  %v2544_v7 = vpop.f32.mrb[43].mxu1 }
 0x4c6   : > { %4529 = vmatpush3.bf16.msra.mxu0 %v3094_v2  ;;  %4524 = vmatprep.mubr.msk.bf16.mxu0 %vm1087_vm2, %v2714_v0  ;;  %v2716_v8 = vpack.c.bf16 %v2544_v7, %v2541_v3 }
 0x4c7   : > { %4723 = vmatprep.subr.msk.bf16.mxu0 %vm1100_vm1, %v4003_v5 }
 0x4ca   : > { %v4454_v9 = vpop.f32.mrb[44].mxu1 }
 0x4cb   : > { %v2557_v10 = vpop.f32.mrb[45].mxu1 }
 0x4cc   : > { %v4455_v11 = vpop.f32.mrb[46].mxu1 }
 0x4cd   : > { %4525 = vmatmul.mubr.msk.bf16.gmra.mrb[76].mxu0 %vm1087_vm2, %v2715_v62  ;;  %v2719_v12 = vpack.c.bf16 %v4455_v11, %v4454_v9  ;;  %v2560_v13 = vpop.f32.mrb[47].mxu1 }
 0x4ce   : > { %4530 = vmatprep.mubr.msk.bf16.mxu0 %vm1087_vm2, %v2716_v8  ;;  %v2718_v14 = vpack.c.bf16 %v2560_v13, %v2557_v10 }
 0x4d2   : > { %v4458_v15 = vpop.f32.mrb[48].mxu1 }
 0x4d3   : > { %v2573_v17 = vpop.f32.mrb[49].mxu1 }
 0x4d4   : > { %v4459_v18 = vpop.f32.mrb[50].mxu1 }
 0x4d5   : > { %4531 = vmatmul.mubr.msk.bf16.vlgmr.msra.gmra.mrb[72].mxu0 %vm1087_vm2, %v2717_v6  ;;  %v2721_v20 = vpack.c.bf16 %v4459_v18, %v4458_v15  ;;  %v2576_v21 = vpop.f32.mrb[51].mxu1 }
 0x4d6   : > { %4539 = vmatpush3.bf16.msra.mxu0 %v3184_v16  ;;  %4534 = vmatprep.mubr.msk.bf16.mxu0 %vm1087_vm2, %v2718_v14  ;;  %v2720_v22 = vpack.c.bf16 %v2576_v21, %v2573_v17 }
 0x4d7   : > { %4724 = vmatprep.subr.msk.bf16.mxu0 %vm1100_vm1, %v4008_v19 }
 0x4da   : > { %v4462_v23 = vpop.f32.mrb[52].mxu1 }
 0x4db   : > { %v2589_v24 = vpop.f32.mrb[53].mxu1 }
 0x4dc   : > { %v4463_v25 = vpop.f32.mrb[54].mxu1 }
 0x4dd   : > { %4535 = vmatmul.mubr.msk.bf16.gmra.mrb[76].mxu0 %vm1087_vm2, %v2719_v12  ;;  %v2723_v26 = vpack.c.bf16 %v4463_v25, %v4462_v23  ;;  %v2592_v27 = vpop.f32.mrb[55].mxu1 }
 0x4de   : > { %4540 = vmatprep.mubr.msk.bf16.mxu0 %vm1087_vm2, %v2720_v22  ;;  %v2722_v28 = vpack.c.bf16 %v2592_v27, %v2589_v24 }
 0x4e2   : > { %v4466_v29 = vpop.f32.mrb[56].mxu1 }
 0x4e3   : > { %v2605_v33 = vpop.f32.mrb[57].mxu1 }
 0x4e4   : > { %v4467_v34 = vpop.f32.mrb[58].mxu1 }
 0x4e5   : > { %4541 = vmatmul.mubr.msk.bf16.vlgmr.msra.gmra.mrb[72].mxu0 %vm1087_vm2, %v2721_v20  ;;  %v2725_v36 = vpack.c.bf16 %v4467_v34, %v4466_v29  ;;  %v2608_v37 = vpop.f32.mrb[59].mxu1 }
 0x4e6   : > { %4549 = vmatpush3.bf16.msra.mxu0 %v3274_v32  ;;  %4544 = vmatprep.mubr.msk.bf16.mxu0 %vm1087_vm2, %v2722_v28  ;;  %v2724_v38 = vpack.c.bf16 %v2608_v37, %v2605_v33 }
 0x4e7   : > { %4725 = vmatprep.subr.msk.bf16.mxu0 %vm1100_vm1, %v4013_v35 }
 0x4ea   : > { %v4470_v39 = vpop.f32.mrb[60].mxu1 }
 0x4eb   : > { %v2621_v40 = vpop.f32.mrb[61].mxu1 }
 0x4ec   : > { %v4471_v41 = vpop.f32.mrb[62].mxu1 }
 0x4ed   : > { %4545 = vmatmul.mubr.msk.bf16.gmra.mrb[76].mxu0 %vm1087_vm2, %v2723_v26  ;;  %v2727_v42 = vpack.c.bf16 %v4471_v41, %v4470_v39  ;;  %v2624_v43 = vpop.f32.mrb[63].mxu1 }
 0x4ee   : > { %4550 = vmatprep.mubr.msk.bf16.mxu0 %vm1087_vm2, %v2724_v38  ;;  %v2726_v44 = vpack.c.bf16 %v2624_v43, %v2621_v40 }
 0x4f2   : > { %v4474_v30 = vpop.f32.mrb[64].mxu1 }
 0x4f3   : > { %v2637_v45 = vpop.f32.mrb[65].mxu1 }
 0x4f4   : > { %v4475_v46 = vpop.f32.mrb[66].mxu1 }
 0x4f5   : > { %4551 = vmatmul.mubr.msk.bf16.vlgmr.msra.gmra.mrb[72].mxu0 %vm1087_vm2, %v2725_v36  ;;  %v2729_v48 = vpack.c.bf16 %v4475_v46, %v4474_v30  ;;  %v2640_v49 = vpop.f32.mrb[67].mxu1 }
 0x4f6   : > { %4559 = vmatpush3.bf16.msra.mxu0 %v3364_v31  ;;  %4554 = vmatprep.mubr.msk.bf16.mxu0 %vm1087_vm2, %v2726_v44  ;;  %v2728_v50 = vpack.c.bf16 %v2640_v49, %v2637_v45 }
 0x4f7   : > { %4726 = vmatprep.subr.msk.bf16.mxu0 %vm1100_vm1, %v4018_v47 }
 0x4fa   : > { %v4478_v51 = vpop.f32.mrb[68].mxu1 }
 0x4fb   : > { %v2653_v52 = vpop.f32.mrb[69].mxu1 }
 0x4fc   : > { %v4479_v53 = vpop.f32.mrb[70].mxu1 }
 0x4fd   : > { %4555 = vmatmul.mubr.msk.bf16.gmra.mrb[76].mxu0 %vm1087_vm2, %v2727_v42  ;;  %v2731_v54 = vpack.c.bf16 %v4479_v53, %v4478_v51  ;;  %v2656_v55 = vpop.f32.mrb[71].mxu1 }
 0x4fe   : > { %4560 = vmatprep.mubr.msk.bf16.mxu0 %vm1087_vm2, %v2728_v50  ;;  %v2730_v56 = vpack.c.bf16 %v2656_v55, %v2653_v52 }
 0x502   : > { %v4482_v57 = vpop.f32.mrb[72].mxu1 }
 0x503   : > { %v2669_v59 = vpop.f32.mrb[73].mxu1 }
 0x504   : > { %v4483_v60 = vpop.f32.mrb[74].mxu1 }
 0x505   : > { %4561 = vmatmul.mubr.msk.bf16.vlgmr.msra.gmra.mrb[72].mxu0 %vm1087_vm2, %v2729_v48  ;;  %v2733_v61 = vpack.c.bf16 %v4483_v60, %v4482_v57  ;;  %v2672_v62 = vpop.f32.mrb[75].mxu1 }
 0x506   : > { %4569 = vmatpush3.bf16.msra.mxu0 %v3454_v58  ;;  %4564 = vmatprep.mubr.msk.bf16.mxu0 %vm1087_vm2, %v2730_v56  ;;  %v2732_v63 = vpack.c.bf16 %v2672_v62, %v2669_v59 }
 0x50a   : > { %v4486_v0 = vpop.f32.mrb[76].mxu1 }
 0x50b   : > { %v2685_v1 = vpop.f32.mrb[77].mxu1 }
 0x50c   : > { %v4487_v2 = vpop.f32.mrb[78].mxu1 }
 0x50d   : > { %4565 = vmatmul.mubr.msk.bf16.gmra.mrb[76].mxu0 %vm1087_vm2, %v2731_v54  ;;  %v2735_v3 = vpack.c.bf16 %v4487_v2, %v4486_v0  ;;  %v2688_v4 = vpop.f32.mrb[79].mxu1 }
 0x50e   : > { %4570 = vmatprep.mubr.msk.bf16.mxu0 %vm1087_vm2, %v2732_v63  ;;  %v2734_v5 = vpack.c.bf16 %v2688_v4, %v2685_v1  ;;  %v4863_v1 = vld [vmem:[%s4945_s16] sm:$0xff]   ;;  %v4864_v4 = vld [vmem:[%s4945_s16 + $0x8] sm:$0xff]  }
 0x50f   : > { %v3529_v2 = vunpack.c.l.bf16 %v4863_v1 }
 0x515   : > { %4571 = vmatmul.mubr.msk.bf16.vlgmr.msra.gmra.mrb[72].mxu0 %vm1087_vm2, %v2733_v61 }
 0x516   : > { %4574 = vmatprep.mubr.msk.bf16.mxu0 %vm1087_vm2, %v2734_v5  ;;  %v3531_v5 = vunpack.c.l.bf16 %v4864_v4 }
 0x51d   : > { %4575 = vmatmul.mubr.msk.bf16.gmra.mrb[76].mxu0 %vm1087_vm2, %v2735_v3  ;;  %v3530_v3 = vunpack.c.h.bf16 %v4863_v1 }
 0x574   : > { %v4496_v6 = vpop.f32.mrb[80].mxu1 }
 0x575   : > { %v2804_v7 = vpop.f32.mrb[81].mxu1 }
 0x576   : > { %v4497_v8 = vpop.f32.mrb[82].mxu1 }
 0x577   : > { %v2807_v9 = vpop.f32.mrb[83].mxu1 }
 0x5e8   : > { %v5461_v10 = vpop.f32.mrb[72].mxu0 }
 0x5e9   : > { %v5463_v11 = vpop.f32.mrb[73].mxu0  ;;  %v3557_v17 = vmul.f32 %v5461_v10, %v5461_v10 }
 0x5ea   : > { %v5465_v12 = vpop.f32.mrb[74].mxu0  ;;  %v3555_v14 = vmul.f32 %v5463_v11, %v5463_v11 }
 0x5eb   : > { %v5467_v13 = vpop.f32.mrb[75].mxu0  ;;  %v3558_v20 = vmul.f32 %v5465_v12, %v5465_v12 }
 0x5ec   : > { %v3539_v15 = vadd.f32 %v5467_v13, %v5463_v11  ;;  %v3556_v16 = vmul.f32 %v5467_v13, %v5467_v13 }
 0x5ee   : > { %v3540_v18 = vadd.f32 %v5461_v10, %v3539_v15  ;;  %v3563_v19 = vadd.f32 %v3556_v16, %v3555_v14  ;;  %v4023_v14 = vld [vmem:[%s5534_s7] ss:$0 sm:$0xff] }
 0x5f0   : > { %v3564_v21 = vadd.f32 %v3563_v19, %v3557_v17  ;;  %v4576_v22 = vpop.f32.mrb[76].mxu0  ;;  %v3541_v23 = vadd.f32 %v5465_v12, %v3540_v18 }
 0x5f1   : > { %v5481_v24 = vadd.f32 %v4576_v22, %v4496_v6  ;;  %v3506_v25 = vpop.f32.mrb[77].mxu0  ;;  %v3532_v6 = vunpack.c.h.bf16 %v4864_v4 }
 0x5f2   : > { %v5483_v26 = vadd.f32 %v3506_v25, %v2804_v7  ;;  %v3565_v27 = vadd.f32 %v3564_v21, %v3558_v20  ;;  %v4577_v28 = vpop.f32.mrb[78].mxu0  ;;  %v4865_v7 = vld [vmem:[%s4945_s16 + $0x10] sm:$0xff]  }
 0x5f3   : > { %v5485_v29 = vadd.f32 %v4577_v28, %v4497_v8  ;;  %v3509_v32 = vpop.f32.mrb[79].mxu0  ;;  %v3561_v39 = vmul.f32 %v5481_v24, %v5481_v24  ;;  %v3533_v8 = vunpack.c.l.bf16 %v4865_v7 }
 0x5f4   : > { %v3542_v33 = vadd.f32 %v5483_v26, %v3541_v23  ;;  %v3559_v34 = vmul.f32 %v5483_v26, %v5483_v26  ;;  %v5490_v35 = vadd.f32 %v3509_v32, %v2807_v9  ;;  %v3534_v9 = vunpack.c.h.bf16 %v4865_v7  ;;  %v4024_v23 = vld [vmem:[%s5535_s8] ss:$0 sm:$0xff] }
 0x5f5   : > { %v3562_v44 = vmul.f32 %v5485_v29, %v5485_v29 }
 0x5f6   : > { %v3566_v36 = vadd.f32 %v3565_v27, %v3559_v34  ;;  %v3560_v37 = vmul.f32 %v5490_v35, %v5490_v35  ;;  %v3543_v38 = vadd.f32 %v5490_v35, %v3542_v33 }
 0x5f8   : > { %v3544_v40 = vadd.f32 %v5481_v24, %v3543_v38  ;;  %v3567_v41 = vadd.f32 %v3566_v36, %v3560_v37 }
 0x5fa   : > { %v3545_v42 = vadd.f32 %v5485_v29, %v3544_v40  ;;  %v3568_v43 = vadd.f32 %v3567_v41, %v3561_v39 }
 0x5fc   : > { %3546 = vadd.xlane.f32.xlu1 %v3545_v42  ;;  %v3569_v30 = vadd.f32 %v3568_v43, %v3562_v44 }
 0x600   : > { %3570 = vadd.xlane.f32.xlu1 %v3569_v30 }
 0x689   : > { %v3547_v31 = vpop.xlane.xlu1 %3546 }
 0x68a   : > { %v3548_v45 = vrot.slane %v3547_v31, 4 }
 0x68c   : > { %v3549_v46 = vadd.f32 %v3548_v45, %v3547_v31 }
 0x68d   : > { %v3571_v47 = vpop.xlane.xlu1 %3570 }
 0x68e   : > { %v3550_v48 = vrot.slane %v3549_v46, 2  ;;  %v3572_v49 = vrot.slane %v3571_v47, 4 }
 0x690   : > { %v3573_v50 = vadd.f32 %v3572_v49, %v3571_v47  ;;  %v3551_v51 = vadd.f32 %v3550_v48, %v3549_v46 }
 0x692   : > { %v3574_v52 = vrot.slane %v3573_v50, 2  ;;  %v3552_v53 = vrot.slane %v3551_v51, 1 }
 0x694   : > { %v3575_v54 = vadd.f32 %v3574_v52, %v3573_v50  ;;  %v3553_v55 = vadd.f32 %v3552_v53, %v3551_v51 }
 0x696   : > { %4733 = vpush %v3553_v55  ;;  %v3576_v56 = vrot.slane %v3575_v54, 1 }
 0x698   : > { %v3577_v57 = vadd.f32 %v3576_v56, %v3575_v54 }
 0x69a   : > { %4735 = vpush %v3577_v57 }
 0x6c7   : > { %s4734_s20 = spop %4733 }
 0x6c8   : > { %s3579_s21 = smul.f32 0.001953125, %s4734_s20 }
 0x6ca   : > { %v3587_v58 = vstv %s3579_s21  ;;  %s3581_s22 = smul.f32 %s3579_s21, %s3579_s21 }
 0x6cb   : > { %s4736_s23 = spop %4735  ;;  %v3588_v59 = vsub.f32 %v5463_v11, %v3587_v58  ;;  %v3589_v60 = vsub.f32 %v5467_v13, %v3587_v58  ;;  %v3590_v61 = vsub.f32 %v5461_v10, %v3587_v58  ;;  %v3591_v62 = vsub.f32 %v5465_v12, %v3587_v58  ;;  %v4866_v10 = vld [vmem:[%s4945_s16 + $0x18] sm:$0xff]  }
 0x6cc   : > { %s3580_s24 = smul.f32 0.001953125, %s4736_s23  ;;  %v3535_v11 = vunpack.c.l.bf16 %v4866_v10  ;;  %v3536_v12 = vunpack.c.h.bf16 %v4866_v10  ;;  %v3592_v13 = vsub.f32 %v5483_v26, %v3587_v58  ;;  %v3593_v15 = vsub.f32 %v5490_v35, %v3587_v58 }
 0x6cd   : > { %v3594_v16 = vsub.f32 %v5481_v24, %v3587_v58  ;;  %v3595_v17 = vsub.f32 %v5485_v29, %v3587_v58 }
 0x6ce   : > { %s3582_s25 = ssub.f32 %s3580_s24, %s3581_s22 }
 0x6d0   : > { %s3583_s26 = sadd.f32 1e-05, %s3582_s25 }
 0x6d2   : > { %v3584_v63 = vstv %s3583_s26 }
 0x6d3   : > { %4845 = vrsqrt.f32 %v3584_v63 }
 0x6dd   : > { %v4846_v0 = vpop.eup %4845 }
 0x6de   : > { %4737 = vpush %v4846_v0 }
 0x70f   : > { %s4738_s27 = spop %4737 }
 0x710   : > { %v3596_v18 = vstv %s4738_s27 }
 0x711   : > { %v3597_v19 = vmul.f32 %v3596_v18, %v3588_v59  ;;  %v3598_v20 = vmul.f32 %v3596_v18, %v3589_v60  ;;  %v3599_v21 = vmul.f32 %v3596_v18, %v3590_v61  ;;  %v3600_v22 = vmul.f32 %v3596_v18, %v3591_v62 }
 0x712   : > { %v3601_v25 = vmul.f32 %v3596_v18, %v3592_v13  ;;  %v3602_v26 = vmul.f32 %v3596_v18, %v3593_v15  ;;  %v3603_v27 = vmul.f32 %v3596_v18, %v3594_v16  ;;  %v3604_v28 = vmul.f32 %v3596_v18, %v3595_v17 }
 0x713   : > { %v3611_v32 = vmul.f32 %v4023_v14, %v3597_v19  ;;  %v3612_v33 = vmul.f32 %v4023_v14, %v3598_v20  ;;  %v3613_v34 = vmul.f32 %v4023_v14, %v3599_v21  ;;  %v3614_v35 = vmul.f32 %v4023_v14, %v3600_v22 }
 0x714   : > { %v3615_v24 = vmul.f32 %v4023_v14, %v3601_v25  ;;  %v3616_v36 = vmul.f32 %v4023_v14, %v3602_v26  ;;  %v3617_v29 = vmul.f32 %v4023_v14, %v3603_v27  ;;  %v3618_v37 = vmul.f32 %v4023_v14, %v3604_v28 }
 0x715   : > { %v3625_v38 = vadd.f32 %v4024_v23, %v3611_v32  ;;  %v3626_v39 = vadd.f32 %v4024_v23, %v3612_v33  ;;  %v3627_v40 = vadd.f32 %v4024_v23, %v3613_v34  ;;  %v3628_v41 = vadd.f32 %v4024_v23, %v3614_v35 }
 0x716   : > { %v3629_v42 = vadd.f32 %v4024_v23, %v3615_v24  ;;  %v3630_v43 = vadd.f32 %v4024_v23, %v3616_v36  ;;  %v3631_v44 = vadd.f32 %v4024_v23, %v3617_v29  ;;  %v3632_v30 = vadd.f32 %v4024_v23, %v3618_v37 }
 0x717   : > { %v3633_v31 = vadd.f32 %v3625_v38, %v3529_v2  ;;  %v3634_v45 = vadd.f32 %v3626_v39, %v3530_v3  ;;  %v3635_v46 = vadd.f32 %v3627_v40, %v3531_v5  ;;  %v3636_v47 = vadd.f32 %v3628_v41, %v3532_v6 }
 0x718   : > { %v3637_v48 = vadd.f32 %v3629_v42, %v3533_v8  ;;  %v3638_v49 = vadd.f32 %v3630_v43, %v3534_v9  ;;  %v3639_v50 = vadd.f32 %v3631_v44, %v3535_v11  ;;  %v3640_v51 = vadd.f32 %v3632_v30, %v3536_v12 }
 0x719   : > { %v3649_v52 = vmul.f32 0.70710677, %v3633_v31  ;;  %v3650_v53 = vmul.f32 0.70710677, %v3634_v45  ;;  %v3651_v54 = vmul.f32 0.70710677, %v3635_v46 }
 0x71a   : > { %v3652_v55 = vmul.f32 0.70710677, %v3636_v47  ;;  %v3653_v56 = vmul.f32 0.70710677, %v3637_v48  ;;  %v3654_v57 = vmul.f32 0.70710677, %v3638_v49 }
 0x71b   : > { %4847 = verf.f32 %v3649_v52  ;;  %v3655_v58 = vmul.f32 0.70710677, %v3639_v50  ;;  %v3656_v59 = vmul.f32 0.70710677, %v3640_v51  ;;  %v3641_v62 = vmul.f32 0.5, %v3633_v31 }
 0x71c   : > { %4849 = verf.f32 %v3650_v53  ;;  %v3642_v1 = vmul.f32 0.5, %v3634_v45  ;;  %v3643_v4 = vmul.f32 0.5, %v3635_v46  ;;  %v3644_v8 = vmul.f32 0.5, %v3636_v47 }
 0x71d   : > { %4851 = verf.f32 %v3651_v54  ;;  %v3645_v12 = vmul.f32 0.5, %v3637_v48  ;;  %v3646_v16 = vmul.f32 0.5, %v3638_v49  ;;  %v3647_v21 = vmul.f32 0.5, %v3639_v50 }
 0x71e   : > { %4853 = verf.f32 %v3652_v55  ;;  %v3648_v25 = vmul.f32 0.5, %v3640_v51 }
 0x71f   : > { %4855 = verf.f32 %v3653_v56 }
 0x720   : > { %4857 = verf.f32 %v3654_v57 }
 0x721   : > { %4859 = verf.f32 %v3655_v58 }
 0x722   : > { %4861 = verf.f32 %v3656_v59 }
 0x725   : > { %v4848_v60 = vpop.eup %4847 }
 0x726   : > { %v4850_v61 = vpop.eup %4849  ;;  %v3665_v63 = vadd.f32 1.0, %v4848_v60 }
 0x727   : > { %v4852_v0 = vpop.eup %4851  ;;  %v3666_v2 = vadd.f32 1.0, %v4850_v61 }
 0x728   : > { %v4854_v3 = vpop.eup %4853  ;;  %v3667_v5 = vadd.f32 1.0, %v4852_v0  ;;  %v3673_v6 = vmul.f32 %v3665_v63, %v3641_v62 }
 0x729   : > { %v4856_v7 = vpop.eup %4855  ;;  %v3668_v9 = vadd.f32 1.0, %v4854_v3  ;;  %v3674_v10 = vmul.f32 %v3666_v2, %v3642_v1 }
 0x72a   : > { %v4858_v11 = vpop.eup %4857  ;;  %v3669_v13 = vadd.f32 1.0, %v4856_v7  ;;  %v3675_v14 = vmul.f32 %v3667_v5, %v3643_v4 }
 0x72b   : > { %v4860_v15 = vpop.eup %4859  ;;  %v3670_v17 = vadd.f32 1.0, %v4858_v11  ;;  %v3676_v18 = vmul.f32 %v3668_v9, %v3644_v8  ;;  %v4048_v19 = vpack.c.bf16 %v3674_v10, %v3673_v6 }
 0x72c   : > { %v4862_v20 = vpop.eup %4861  ;;  %v3671_v22 = vadd.f32 1.0, %v4860_v15  ;;  %v3677_v23 = vmul.f32 %v3669_v13, %v3645_v12 }
 0x72d   : > { %v3672_v26 = vadd.f32 1.0, %v4862_v20  ;;  %v3678_v27 = vmul.f32 %v3670_v17, %v3646_v16  ;;  %4049 = vst [vmem:[%s332_s15] sm:$0xff] %v4048_v19   ;;  %v4053_v28 = vpack.c.bf16 %v3676_v18, %v3675_v14 }
 0x72e   : > { %v3679_v32 = vmul.f32 %v3671_v22, %v3647_v21 }
 0x72f   : > { %v3680_v33 = vmul.f32 %v3672_v26, %v3648_v25  ;;  %4065 = vst [vmem:[%s332_s15 + $0x8] sm:$0xff] %v4053_v28   ;;  %v4058_v34 = vpack.c.bf16 %v3678_v27, %v3677_v23 }
 0x731   : > { %4066 = vst [vmem:[%s332_s15 + $0x10] sm:$0xff] %v4058_v34   ;;  %v4063_v35 = vpack.c.bf16 %v3680_v33, %v3679_v32 }
 0x733   : > { %4067 = vst [vmem:[%s332_s15 + $0x18] sm:$0xff] %v4063_v35  }
 0x734 PF: > { %s19_s30 = sadd.s32 1, %s4873_s30  }
 0x735   : > { %p16_p4 = scmp.ge.s32.totalorder %s19_s30, 4  }
 0x737   :  { %18 = sbr.rel (!%p16_p4) target bundleno = 1 (0x1), region = 102 }

// kernel: _lambda_.10
= control target key start
LH: loop header
LB: loop body
LE: loop exit
PB: predicated region body
PF: predicated region fallthrough
CT: control target
= control target key end

     0   :  { %s2801_s25 = smov 0   ;;  %s3187_s0 = inlined_call_operand.vmem [shape: bf16[2,4,128], index: 0, kind: input, shape index: {}]   ;;  %s3188_s1 = inlined_call_operand.vmem [shape: bf16[9,4], index: 1, kind: input, shape index: {}]   ;;  %s3189_s2 = inlined_call_operand.vmem [shape: bf16[9,32,128], index: 2, kind: input, shape index: {}]   ;;  %s3190_s3 = inlined_call_operand.vmem [shape: f32[1,128], index: 3, kind: input, shape index: {}, may-alias: {3,7,11}]   ;;  %s3191_s4 = inlined_call_operand.vmem [shape: f32[1,128], index: 4, kind: input, shape index: {}, may-alias: {4,8,12}]   ;;  %s3192_s5 = inlined_call_operand.vmem [shape: bf16[9,1], index: 5, kind: input, shape index: {}]   ;;  %s3193_s6 = inlined_call_operand.vmem [shape: bf16[9,64,128], index: 6, kind: input, shape index: {}]   ;;  %s3194_s7 = inlined_call_operand.vmem [shape: f32[1,128], index: 7, kind: input, shape index: {}, may-alias: {3,7,11}]   ;;  %s3195_s8 = inlined_call_operand.vmem [shape: f32[1,128], index: 8, kind: input, shape index: {}, may-alias: {4,8,12}]   ;;  %s3196_s9 = inlined_call_operand.vmem [shape: bf16[1,4], index: 9, kind: input, shape index: {}]   ;;  %s3197_s10 = inlined_call_operand.vmem [shape: bf16[32,128], index: 10, kind: input, shape index: {}]   ;;  %s3198_s11 = inlined_call_operand.vmem [shape: f32[1,128], index: 11, kind: input, shape index: {}, may-alias: {3,7,11}]   ;;  %s3199_s12 = inlined_call_operand.vmem [shape: f32[1,128], index: 12, kind: input, shape index: {}, may-alias: {4,8,12}]   ;;  %s3200_s13 = inlined_call_operand.vmem [shape: bf16[2,1,128], index: 13, kind: output, shape index: {}]  }
   0x1 LB: > { %s2091_s26 = sadd.s32 4294967295, %s2726_s25   ;;  %p2095_p0 = scmp.ge.s32.totalorder %s2726_s25, 1  ;;  %s2726_s25 = sphi %s2801_s25, %s23_s25  }
   0x2   : > { %p386_p1 = scmp.lt.s32.totalorder %s2726_s25, 3 }
   0x4   : > { %p387_p2 = pnand %p2095_p0, %p386_p1 }
   0x5   : > { %p427_p3 = scmp.lt.s32.totalorder (!%p387_p2), %s2091_s26, 1  ;;  %v2728_v0 = vmov (!%p387_p2), 0.0   ;;  %vm2729_vm0 = vmmov (!%p387_p2), 0   ;;  %vm447_vm1 = vcmask (!%p387_p2), 1041408   ;;  %v2652_v1 = vld [vmem:[%s3188_s1] sm:$0x1f] (!%p387_p2)  }
   0x6   : > { %390 = sbr.rel (%p387_p2) target bundleno = 1901 (0x76d), region = 72  ;;  %2356 = vmatprep.subr.bf16.mxu0 (!%p387_p2), %v2728_v0  ;;  %2358 = vmatprep.mubr.msk.bf16.mxu0 (!%p387_p2), %vm2729_vm0, %v2728_v0  ;;  %vm443_vm2 = vcmask (!%p387_p2), 31744   ;;  %v2653_v4 = vld [vmem:[%s3189_s2 + $0x10] sm:$0xff] (!%p387_p2)   ;;  %v2654_v5 = vld [vmem:[%s3189_s2 + $0x18] sm:$0xff] (!%p387_p2)   ;;  %vm517_vm3 = vcmask (!%p387_p2), 261120   ;;  %v2655_v11 = vld [vmem:[%s3189_s2] sm:$0xff] (!%p387_p2)  }
   0x7   : > { %2362 = vmatprep.subr.bf16.mxu1 (!%p387_p2), %v2728_v0  ;;  %2366 = vmatprep.mubr.msk.bf16.mxu1 (!%p387_p2), %vm2729_vm0, %v2728_v0  ;;  %v2656_v13 = vld [vmem:[%s3189_s2 + $0x8] sm:$0xff] (!%p387_p2)   ;;  %v2657_v14 = vld [vmem:[%s3189_s2 + $0x20] sm:$0xff] (!%p387_p2)   ;;  %v2659_v16 = vld [vmem:[%s3189_s2 + $0x30] sm:$0xff] (!%p387_p2)   ;;  %vm1052_vm4 = vcmask (!%p387_p2), 1040384   ;;  %vm1101_vm5 = vcmask (!%p387_p2), 7168   ;;  %vm1196_vm6 = vcmask (!%p387_p2), 523264  }
   0x8   : > { %2363 = vmatpush3.bf16.msra.mxu1 (!%p387_p2), %v2653_v4  ;;  %v2658_v15 = vld [vmem:[%s3189_s2 + $0x28] sm:$0xff] (!%p387_p2)   ;;  %v2660_v18 = vld [vmem:[%s3189_s2 + $0x38] sm:$0xff] (!%p387_p2)   ;;  %v2661_v19 = vld [vmem:[%s3189_s2 + $0x40] sm:$0xff] (!%p387_p2)   ;;  %vm2039_vm7 = vsmask.f32 (!%p387_p2), 256 }
   0x9   : > { %2364 = vmatprep.subr.bf16.mxu1 (!%p387_p2), %v2728_v0  ;;  %v2662_v21 = vld [vmem:[%s3189_s2 + $0x48] sm:$0xff] (!%p387_p2)   ;;  %v2663_v22 = vld [vmem:[%s3189_s2 + $0x50] sm:$0xff] (!%p387_p2)   ;;  %v2664_v24 = vld [vmem:[%s3189_s2 + $0x58] sm:$0xff] (!%p387_p2)  }
   0xa   : > { %v2665_v25 = vld [vmem:[%s3189_s2 + $0x60] sm:$0xff] (!%p387_p2)   ;;  %v2666_v27 = vld [vmem:[%s3189_s2 + $0x68] sm:$0xff] (!%p387_p2)   ;;  %v2667_v28 = vld [vmem:[%s3189_s2 + $0x70] sm:$0xff] (!%p387_p2)  }
   0xb   : > { %v2668_v30 = vld [vmem:[%s3189_s2 + $0x78] sm:$0xff] (!%p387_p2)   ;;  %v2669_v31 = vld [vmem:[%s3189_s2 + $0x80] sm:$0xff] (!%p387_p2)   ;;  %v2670_v33 = vld [vmem:[%s3189_s2 + $0x88] sm:$0xff] (!%p387_p2)  }
   0xc   : > { %2365 = vmatpush3.bf16.msra.mxu1 (!%p387_p2), %v2654_v5  ;;  %v2672_v56 = vld [vmem:[%s3193_s6 + $0x20] sm:$0xff] (!%p387_p2)   ;;  %v2674_v57 = vld [vmem:[%s3193_s6 + $0x28] sm:$0xff] (!%p387_p2)   ;;  %v2676_v58 = vld [vmem:[%s3193_s6 + $0x30] sm:$0xff] (!%p387_p2)  }
   0xd   : > { %s3202_s26 = smov (!%p427_p3, %s2091_s26), 1  ;;  %2370 = vmatprep.subr.bf16.mxu1 %v2728_v0  ;;  %v1050_v63 = vld [vmem:[%s3190_s3] sm:$0x1]  ;;  %vm2040_vm8 = vmand %vm1052_vm4, %vm2039_vm7 }
   0xe   : > { %s2096_s27 = sshll.u32 %s3202_s26, 1  ;;  %v1051_v4 = vld [vmem:[%s3191_s4] sm:$0x1] }
   0xf   : > { %s430_s30 = scalar_lea.vmem %s3187_s0, %s2096_s27 }
  0x10   : > { %v435_v2 = vld [vmem:[%s430_s30] sm:$0x3] }
  0x11   : > { %v2824_v3 = vsel %vm447_vm1, %v435_v2, 0 }
  0x12   : > { %2357 = vmatpush3.bf16.msra.mxu0 %v2824_v3 }
  0x13   : > { %2434 = vmatprep.subr.bf16.mxu0 %v2728_v0 }
  0x15   : > { %2359 = vmatmul.mubr.msk.bf16.vlgmr.msra.gmra.mrb[0].mxu0 %vm443_vm2, %v2652_v1 }
  0x16   : > { %2436 = vmatprep.mubr.msk.bf16.mxu0 %vm2729_vm0, %v2728_v0 }
  0xe8   : > { %v485_v6 = vpop.f32.mrb[0].mxu0 }
  0xe9   : > { %v2360_v7 = vpop.f32.mrb[1].mxu0 }
  0xea   : > { %v488_v8 = vpop.f32.mrb[2].mxu0 }
  0xeb   : > { %v2839_v9 = vpack.c.bf16 %v488_v8, %v485_v6  ;;  %v2361_v10 = vpop.f32.mrb[3].mxu0 }
  0xed   : > { %v2845_v12 = vshrl.u32 %v2839_v9, 16  ;;  %v621_v17 = vrot.slane %v2839_v9, 1  ;;  %v745_v23 = vrot.slane %v2839_v9, 2  ;;  %v869_v29 = vrot.slane %v2839_v9, 3 }
  0xee   : > { %v993_v34 = vrot.slane %v2839_v9, 4 }
  0xef   : > { %2367 = vmatmul.mubr.msk.bf16.vlgmr.msra.gmra.mrb[0].mxu1 %vm517_vm3, %v2845_v12  ;;  %v683_v20 = vrot.slane %v2845_v12, 1  ;;  %v807_v26 = vrot.slane %v2845_v12, 2  ;;  %v931_v32 = vrot.slane %v2845_v12, 3  ;;  %v2730_v12 = vmov 0  }
  0xf0   : > { %2371 = vmatpush3.bf16.msra.mxu1 %v2655_v11  ;;  %2374 = vmatprep.mubr.msk.bf16.mxu1 %vm2729_vm0, %v2728_v0 }
  0xf1   : > { %2372 = vmatprep.subr.bf16.mxu1 %v2728_v0 }
  0xf4   : > { %2373 = vmatpush3.bf16.msra.mxu1 %v2656_v13  ;;  %v1106_v13 = vsel %vm1052_vm4, 65535, %v2730_v12 }
  0xf5   : > { %2378 = vmatprep.subr.bf16.mxu1 %v2728_v0 }
  0xfb   : > { %2375 = vmatmul.mubr.msk.bf16.vlgmr.msra.gmra.mrb[0].mxu1 %vm517_vm3, %v2839_v9 }
  0xfc   : > { %2379 = vmatpush3.bf16.msra.mxu1 %v2657_v14  ;;  %2382 = vmatprep.mubr.msk.bf16.mxu1 %vm2729_vm0, %v2728_v0 }
  0xfd   : > { %2380 = vmatprep.subr.bf16.mxu1 %v2728_v0 }
 0x100   : > { %2381 = vmatpush3.bf16.msra.mxu1 %v2658_v15 }
 0x101   : > { %2386 = vmatprep.subr.bf16.mxu1 %v2728_v0 }
 0x107   : > { %2383 = vmatmul.mubr.msk.bf16.vlgmr.msra.gmra.mrb[0].mxu1 %vm517_vm3, %v621_v17  ;;  %v2673_v17 = vld [vmem:[%s3193_s6 + $0x40] sm:$0xff]  }
 0x108   : > { %2387 = vmatpush3.bf16.msra.mxu1 %v2659_v16  ;;  %2390 = vmatprep.mubr.msk.bf16.mxu1 %vm2729_vm0, %v2728_v0  ;;  %v2671_v16 = vld [vmem:[%s3192_s5] sm:$0x1f]  }
 0x109   : > { %2388 = vmatprep.subr.bf16.mxu1 %v2728_v0 }
 0x10c   : > { %2389 = vmatpush3.bf16.msra.mxu1 %v2660_v18  ;;  %v2675_v18 = vld [vmem:[%s3193_s6 + $0x48] sm:$0xff]  }
 0x10d   : > { %2394 = vmatprep.subr.bf16.mxu1 %v2728_v0 }
 0x113   : > { %2391 = vmatmul.mubr.msk.bf16.vlgmr.msra.gmra.mrb[0].mxu1 %vm517_vm3, %v683_v20  ;;  %v2678_v20 = vld [vmem:[%s3193_s6 + $0x38] sm:$0xff]  }
 0x114   : > { %2395 = vmatpush3.bf16.msra.mxu1 %v2661_v19  ;;  %2398 = vmatprep.mubr.msk.bf16.mxu1 %vm2729_vm0, %v2728_v0  ;;  %v2677_v19 = vld [vmem:[%s3193_s6 + $0x50] sm:$0xff]  }
 0x115   : > { %2396 = vmatprep.subr.bf16.mxu1 %v2728_v0 }
 0x118   : > { %2397 = vmatpush3.bf16.msra.mxu1 %v2662_v21  ;;  %v2679_v21 = vld [vmem:[%s3193_s6 + $0x58] sm:$0xff]  }
 0x119   : > { %2402 = vmatprep.subr.bf16.mxu1 %v2728_v0 }
 0x11f   : > { %2399 = vmatmul.mubr.msk.bf16.vlgmr.msra.gmra.mrb[0].mxu1 %vm517_vm3, %v745_v23 }
 0x120   : > { %2403 = vmatpush3.bf16.msra.mxu1 %v2663_v22  ;;  %2406 = vmatprep.mubr.msk.bf16.mxu1 %vm2729_vm0, %v2728_v0 }
 0x121   : > { %2404 = vmatprep.subr.bf16.mxu1 %v2728_v0 }
 0x124   : > { %2405 = vmatpush3.bf16.msra.mxu1 %v2664_v24 }
 0x125   : > { %2410 = vmatprep.subr.bf16.mxu1 %v2728_v0 }
 0x12b   : > { %2407 = vmatmul.mubr.msk.bf16.vlgmr.msra.gmra.mrb[0].mxu1 %vm517_vm3, %v807_v26 }
 0x12c   : > { %2411 = vmatpush3.bf16.msra.mxu1 %v2665_v25  ;;  %2414 = vmatprep.mubr.msk.bf16.mxu1 %vm2729_vm0, %v2728_v0 }
 0x12d   : > { %2412 = vmatprep.subr.bf16.mxu1 %v2728_v0 }
 0x130   : > { %2413 = vmatpush3.bf16.msra.mxu1 %v2666_v27  ;;  %v2680_v27 = vld [vmem:[%s3193_s6] sm:$0xff]  }
 0x131   : > { %2418 = vmatprep.subr.bf16.mxu1 %v2728_v0 }
 0x137   : > { %2415 = vmatmul.mubr.msk.bf16.vlgmr.msra.gmra.mrb[0].mxu1 %vm517_vm3, %v869_v29 }
 0x138   : > { %2419 = vmatpush3.bf16.msra.mxu1 %v2667_v28  ;;  %2422 = vmatprep.mubr.msk.bf16.mxu1 %vm2729_vm0, %v2728_v0  ;;  %v2681_v28 = vld [vmem:[%s3193_s6 + $0x60] sm:$0xff]  }
 0x139   : > { %2420 = vmatprep.subr.bf16.mxu1 %v2728_v0 }
 0x13c   : > { %2421 = vmatpush3.bf16.msra.mxu1 %v2668_v30 }
 0x13d   : > { %2426 = vmatprep.subr.bf16.mxu1 %v2728_v0 }
 0x143   : > { %2423 = vmatmul.mubr.msk.bf16.vlgmr.msra.gmra.mrb[0].mxu1 %vm517_vm3, %v931_v32  ;;  %v2683_v32 = vld [vmem:[%s3193_s6 + $0x68] sm:$0xff]  }
 0x144   : > { %2427 = vmatpush3.bf16.msra.mxu1 %v2669_v31  ;;  %2430 = vmatprep.mubr.msk.bf16.mxu1 %vm2729_vm0, %v2728_v0  ;;  %v2682_v31 = vld [vmem:[%s3193_s6 + $0x8] sm:$0xff]  }
 0x145   : > { %2428 = vmatprep.subr.bf16.mxu1 %v2728_v0 }
 0x148   : > { %2429 = vmatpush3.bf16.msra.mxu1 %v2670_v33  ;;  %v2684_v33 = vld [vmem:[%s3193_s6 + $0x10] sm:$0xff]  }
 0x149   : > { %2440 = vmatprep.subr.bf16.mxu1 %v2728_v0 }
 0x14f   : > { %2431 = vmatmul.mubr.msk.bf16.vlgmr.msra.gmra.mrb[0].mxu1 %vm517_vm3, %v993_v34  ;;  %v2685_v34 = vld [vmem:[%s3193_s6 + $0x70] sm:$0xff]  }
 0x150   : > { %2448 = vmatprep.mubr.msk.bf16.mxu1 %vm2729_vm0, %v2728_v0  ;;  %2441 = vmatpush3.bf16.msra.mxu1 %v2672_v56  ;;  %v2703_v56 = vld [vmem:[%s3193_s6 + $0xf8] sm:$0xff]  }
 0x151   : > { %2442 = vmatprep.subr.bf16.mxu1 %v2728_v0 }
 0x154   : > { %2443 = vmatpush3.bf16.msra.mxu1 %v2674_v57  ;;  %v2704_v57 = vld [vmem:[%s3193_s6 + $0x100] sm:$0xff]  }
 0x155   : > { %2444 = vmatprep.subr.bf16.mxu1 %v2728_v0 }
 0x158   : > { %2445 = vmatpush3.bf16.msra.mxu1 %v2676_v58 }
 0x159   : > { %2446 = vmatprep.subr.bf16.mxu1 %v2728_v0 }
 0x15c   : > { %2447 = vmatpush3.bf16.msra.mxu1 %v2678_v20 }
 0x15d   : > { %2452 = vmatprep.subr.bf16.mxu1 %v2728_v0 }
 0x222   : > { %v1043_v35 = vpop.f32.mrb[0].mxu1 }
 0x223   : > { %v2432_v36 = vpop.f32.mrb[1].mxu1  ;;  %v1053_v37 = vsel %vm1052_vm4, %v1043_v35, 0.0  ;;  %v1063_v38 = vmul.f32 %v1043_v35, %v1043_v35 }
 0x224   : > { %1054 = vadd.xlane.f32.xlu0 %v1053_v37  ;;  %v1046_v39 = vpop.f32.mrb[2].mxu1  ;;  %v2687_v36 = vld [vmem:[%s3193_s6 + $0x78] sm:$0xff]   ;;  %v2688_v37 = vld [vmem:[%s3193_s6 + $0x80] sm:$0xff]  }
 0x225   : > { %v2433_v40 = vpop.f32.mrb[3].mxu1  ;;  %v1064_v41 = vsel %vm1052_vm4, %v1063_v38, 0.0  ;;  %v2689_v39 = vld [vmem:[%s3193_s6 + $0x88] sm:$0xff]  }
 0x226   : > { %v1853_v40 = vld [vmem:[%s3196_s9] sm:$0x1] }
 0x228   : > { %1065 = vadd.xlane.f32.xlu0 %v1064_v41  ;;  %v2690_v41 = vld [vmem:[%s3193_s6 + $0x90] sm:$0xff]  }
 0x2b1   : > { %v1055_v42 = vpop.xlane.xlu0 %1054 }
 0x2b2   : > { %v1056_v43 = vrot.slane %v1055_v42, 4 }
 0x2b4   : > { %v1057_v44 = vadd.f32 %v1056_v43, %v1055_v42  ;;  %v2692_v42 = vld [vmem:[%s3193_s6 + $0xa0] sm:$0xff]  }
 0x2b5   : > { %v1066_v45 = vpop.xlane.xlu0 %1065 }
 0x2b6   : > { %v1058_v46 = vrot.slane %v1057_v44, 2  ;;  %v1067_v47 = vrot.slane %v1066_v45, 4 }
 0x2b8   : > { %v1068_v48 = vadd.f32 %v1067_v47, %v1066_v45  ;;  %v1059_v49 = vadd.f32 %v1058_v46, %v1057_v44  ;;  %v2693_v44 = vld [vmem:[%s3193_s6 + $0xa8] sm:$0xff]   ;;  %v2694_v45 = vld [vmem:[%s3193_s6 + $0xb0] sm:$0xff]   ;;  %v2695_v46 = vld [vmem:[%s3193_s6 + $0xb8] sm:$0xff]  }
 0x2b9   : > { %v2696_v47 = vld [vmem:[%s3193_s6 + $0xc0] sm:$0xff]  }
 0x2ba   : > { %v1069_v50 = vrot.slane %v1068_v48, 2  ;;  %v1060_v51 = vrot.slane %v1059_v49, 1 }
 0x2bc   : > { %v1061_v52 = vadd.f32 %v1060_v51, %v1059_v49  ;;  %v1070_v53 = vadd.f32 %v1069_v50, %v1068_v48  ;;  %v2697_v49 = vld [vmem:[%s3193_s6 + $0xc8] sm:$0xff]   ;;  %v2698_v50 = vld [vmem:[%s3193_s6 + $0xd0] sm:$0xff]   ;;  %v2699_v51 = vld [vmem:[%s3193_s6 + $0xd8] sm:$0xff]  }
 0x2be   : > { %2623 = vpush %v1061_v52  ;;  %v1071_v54 = vrot.slane %v1070_v53, 1  ;;  %v2700_v52 = vld [vmem:[%s3193_s6 + $0xe0] sm:$0xff]  }
 0x2c0   : > { %v1072_v55 = vadd.f32 %v1071_v54, %v1070_v53  ;;  %v2701_v54 = vld [vmem:[%s3193_s6 + $0xe8] sm:$0xff]  }
 0x2c2   : > { %2625 = vpush %v1072_v55  ;;  %v2702_v55 = vld [vmem:[%s3193_s6 + $0xf0] sm:$0xff]  }
 0x2ef   : > { %s2624_s30 = spop %2623 }
 0x2f0   : > { %s1074_s14 = smul.f32 0.015625, %s2624_s30 }
 0x2f2   : > { %v1082_v59 = vstv %s1074_s14  ;;  %s1076_s15 = smul.f32 %s1074_s14, %s1074_s14 }
 0x2f3   : > { %s2626_s16 = spop %2625  ;;  %v1083_v60 = vsub.f32 %v1043_v35, %v1082_v59  ;;  %v2686_v35 = vld [vmem:[%s3193_s6 + $0x18] sm:$0xff]   ;;  %v2705_v59 = vld [vmem:[%s3193_s6 + $0x108] sm:$0xff]  }
 0x2f4   : > { %s1075_s17 = smul.f32 0.015625, %s2626_s16 }
 0x2f6   : > { %s1077_s18 = ssub.f32 %s1075_s17, %s1076_s15 }
 0x2f8   : > { %s1078_s19 = sadd.f32 1e-05, %s1077_s18 }
 0x2fa   : > { %v1079_v61 = vstv %s1078_s19 }
 0x2fb   : > { %2710 = vrsqrt.f32 %v1079_v61  ;;  %v2707_v61 = vld [vmem:[%s3193_s6 + $0x118] sm:$0xff]  }
 0x305   : > { %v2711_v62 = vpop.eup %2710 }
 0x306   : > { %2627 = vpush %v2711_v62 }
 0x337   : > { %s2628_s20 = spop %2627 }
 0x338   : > { %v1084_v1 = vstv %s2628_s20 }
 0x339   : > { %v1085_v2 = vmul.f32 %v1084_v1, %v1083_v60  ;;  %v2706_v60 = vld [vmem:[%s3193_s6 + $0x110] sm:$0xff]   ;;  %v2709_v1 = vld [vmem:[%s3197_s10 + $0x8] sm:$0xff]  }
 0x33b   : > { %v1086_v5 = vmul.f32 %v1085_v2, %v1050_v63  ;;  %v2708_v63 = vld [vmem:[%s3197_s10] sm:$0xff]  }
 0x33d   : > { %v1087_v6 = vadd.f32 %v1086_v5, %v1051_v4 }
 0x33f   : > { %v1089_v7 = vmul.f32 0.70710677, %v1087_v6  ;;  %v1088_v9 = vmul.f32 0.5, %v1087_v6 }
 0x341   : > { %2712 = verf.f32 %v1089_v7 }
 0x34b   : > { %v2713_v8 = vpop.eup %2712 }
 0x34c   : > { %v1091_v10 = vadd.f32 1.0, %v2713_v8 }
 0x34e   : > { %v1092_v11 = vmul.f32 %v1091_v10, %v1088_v9 }
 0x350   : > { %v1093_v14 = vpack.c.bf16 %v1092_v11, %v1092_v11 }
 0x352   : > { %v1108_v15 = vand.u32 %v1106_v13, %v1093_v14 }
 0x354   : > { %2435 = vmatpush3.bf16.msra.mxu0 %v1108_v15 }
 0x355   : > { %2464 = vmatprep.subr.bf16.mxu0 %v2728_v0 }
 0x357   : > { %2437 = vmatmul.mubr.msk.bf16.vlgmr.msra.gmra.mrb[4].mxu0 %vm1101_vm5, %v2671_v16 }
 0x358   : > { %2465 = vmatpush3.bf16.msra.mxu0 %v2673_v17  ;;  %2472 = vmatprep.mubr.msk.bf16.mxu0 %vm2729_vm0, %v2728_v0 }
 0x359   : > { %2466 = vmatprep.subr.bf16.mxu0 %v2728_v0 }
 0x35c   : > { %2467 = vmatpush3.bf16.msra.mxu0 %v2675_v18 }
 0x35d   : > { %2468 = vmatprep.subr.bf16.mxu0 %v2728_v0 }
 0x360   : > { %2469 = vmatpush3.bf16.msra.mxu0 %v2677_v19 }
 0x361   : > { %2470 = vmatprep.subr.bf16.mxu0 %v2728_v0 }
 0x364   : > { %2471 = vmatpush3.bf16.msra.mxu0 %v2679_v21 }
 0x365   : > { %2476 = vmatprep.subr.bf16.mxu0 %v2728_v0 }
 0x42a   : > { %v1144_v22 = vpop.f32.mrb[4].mxu0 }
 0x42b   : > { %v2438_v23 = vpop.f32.mrb[5].mxu0 }
 0x42c   : > { %v1147_v24 = vpop.f32.mrb[6].mxu0 }
 0x42d   : > { %v2991_v25 = vpack.c.bf16 %v1147_v24, %v1144_v22  ;;  %v2439_v26 = vpop.f32.mrb[7].mxu0 }
 0x42f   : > { %v3000_v29 = vshrl.u32 %v2991_v25, 16  ;;  %v1316_v30 = vrot.slane %v2991_v25, 1  ;;  %v1472_v43 = vrot.slane %v2991_v25, 2  ;;  %v1628_v53 = vrot.slane %v2991_v25, 3 }
 0x430   : > { %v1784_v62 = vrot.slane %v2991_v25, 4 }
 0x431   : > { %2449 = vmatmul.mubr.msk.bf16.vlgmr.msra.gmra.mrb[4].mxu1 %vm1196_vm6, %v3000_v29  ;;  %2473 = vmatmul.mubr.msk.bf16.vlgmr.msra.gmra.mrb[8].mxu0 %vm1196_vm6, %v1316_v30  ;;  %v1394_v38 = vrot.slane %v3000_v29, 1  ;;  %v1550_v48 = vrot.slane %v3000_v29, 2  ;;  %v1706_v58 = vrot.slane %v3000_v29, 3 }
 0x432   : > { %2453 = vmatpush3.bf16.msra.mxu1 %v2680_v27  ;;  %2477 = vmatpush3.bf16.msra.mxu0 %v2681_v28 }
 0x433   : > { %2454 = vmatprep.subr.bf16.mxu1 %v2728_v0  ;;  %2478 = vmatprep.subr.bf16.mxu0 %v2728_v0 }
 0x434   : > { %2460 = vmatprep.mubr.msk.bf16.mxu1 %vm2729_vm0, %v2728_v0  ;;  %2484 = vmatprep.mubr.msk.bf16.mxu0 %vm2729_vm0, %v2728_v0 }
 0x436   : > { %2455 = vmatpush3.bf16.msra.mxu1 %v2682_v31  ;;  %2479 = vmatpush3.bf16.msra.mxu0 %v2683_v32 }
 0x437   : > { %2456 = vmatprep.subr.bf16.mxu1 %v2728_v0  ;;  %2480 = vmatprep.subr.bf16.mxu0 %v2728_v0 }
 0x43a   : > { %2457 = vmatpush3.bf16.msra.mxu1 %v2684_v33  ;;  %2481 = vmatpush3.bf16.msra.mxu0 %v2685_v34 }
 0x43b   : > { %2458 = vmatprep.subr.bf16.mxu1 %v2728_v0  ;;  %2482 = vmatprep.subr.bf16.mxu0 %v2728_v0 }
 0x43e   : > { %2459 = vmatpush3.bf16.msra.mxu1 %v2686_v35  ;;  %2483 = vmatpush3.bf16.msra.mxu0 %v2687_v36 }
 0x43f   : > { %2488 = vmatprep.subr.bf16.mxu0 %v2728_v0  ;;  %2548 = vmatprep.subr.bf16.mxu1 %v2728_v0 }
 0x441   : > { %2461 = vmatmul.mubr.msk.bf16.vlgmr.msra.gmra.mrb[4].mxu1 %vm1196_vm6, %v2991_v25  ;;  %2485 = vmatmul.mubr.msk.bf16.vlgmr.msra.gmra.mrb[8].mxu0 %vm1196_vm6, %v1394_v38 }
 0x442   : > { %2489 = vmatpush3.bf16.msra.mxu0 %v2688_v37  ;;  %2549 = vmatpush3.bf16.msra.mxu1 %v2824_v3  ;;  %v2691_v3 = vld [vmem:[%s3193_s6 + $0x98] sm:$0xff]  }
 0x443   : > { %2490 = vmatprep.subr.bf16.mxu0 %v2728_v0  ;;  %2550 = vmatprep.mubr.msk.bf16.mxu1 %vm2729_vm0, %v2728_v0 }
 0x444   : > { %2496 = vmatprep.mubr.msk.bf16.mxu0 %vm2729_vm0, %v2728_v0  ;;  %2554 = vmatprep.subr.bf16.mxu1 %v2728_v0 }
 0x446   : > { %2491 = vmatpush3.bf16.msra.mxu0 %v2689_v39 }
 0x447   : > { %2492 = vmatprep.subr.bf16.mxu0 %v2728_v0 }
 0x449   : > { %2551 = vmatmul.mubr.msk.bf16.vlgmr.msra.gmra.mrb[8].mxu1 %vm443_vm2, %v1853_v40 }
 0x44a   : > { %2493 = vmatpush3.bf16.msra.mxu0 %v2690_v41  ;;  %2558 = vmatprep.mubr.msk.bf16.mxu1 %vm2729_vm0, %v2728_v0 }
 0x44b   : > { %2494 = vmatprep.subr.bf16.mxu0 %v2728_v0  ;;  %2555 = vmatpush3.bf16.msra.mxu1 %v2708_v63 }
 0x44c   : > { %2556 = vmatprep.subr.bf16.mxu1 %v2728_v0 }
 0x44e   : > { %2495 = vmatpush3.bf16.msra.mxu0 %v2691_v3 }
 0x44f   : > { %2500 = vmatprep.subr.bf16.mxu0 %v2728_v0  ;;  %2557 = vmatpush3.bf16.msra.mxu1 %v2709_v1  ;;  %v1994_v1 = vld [vmem:[%s3194_s7] sm:$0x1] }
 0x451   : > { %2497 = vmatmul.mubr.msk.bf16.vlgmr.msra.gmra.mrb[8].mxu0 %vm1196_vm6, %v1472_v43 }
 0x452   : > { %2501 = vmatpush3.bf16.msra.mxu0 %v2692_v42  ;;  %2508 = vmatprep.mubr.msk.bf16.mxu0 %vm2729_vm0, %v2728_v0 }
 0x453   : > { %2502 = vmatprep.subr.bf16.mxu0 %v2728_v0 }
 0x456   : > { %2503 = vmatpush3.bf16.msra.mxu0 %v2693_v44 }
 0x457   : > { %2504 = vmatprep.subr.bf16.mxu0 %v2728_v0 }
 0x45a   : > { %2505 = vmatpush3.bf16.msra.mxu0 %v2694_v45 }
 0x45b   : > { %2506 = vmatprep.subr.bf16.mxu0 %v2728_v0 }
 0x45e   : > { %2507 = vmatpush3.bf16.msra.mxu0 %v2695_v46 }
 0x45f   : > { %2512 = vmatprep.subr.bf16.mxu0 %v2728_v0 }
 0x461   : > { %2509 = vmatmul.mubr.msk.bf16.vlgmr.msra.gmra.mrb[8].mxu0 %vm1196_vm6, %v1550_v48 }
 0x462   : > { %2513 = vmatpush3.bf16.msra.mxu0 %v2696_v47  ;;  %2520 = vmatprep.mubr.msk.bf16.mxu0 %vm2729_vm0, %v2728_v0 }
 0x463   : > { %2514 = vmatprep.subr.bf16.mxu0 %v2728_v0 }
 0x466   : > { %2515 = vmatpush3.bf16.msra.mxu0 %v2697_v49 }
 0x467   : > { %2516 = vmatprep.subr.bf16.mxu0 %v2728_v0 }
 0x46a   : > { %2517 = vmatpush3.bf16.msra.mxu0 %v2698_v50 }
 0x46b   : > { %2518 = vmatprep.subr.bf16.mxu0 %v2728_v0 }
 0x46e   : > { %2519 = vmatpush3.bf16.msra.mxu0 %v2699_v51 }
 0x46f   : > { %2524 = vmatprep.subr.bf16.mxu0 %v2728_v0 }
 0x471   : > { %2521 = vmatmul.mubr.msk.bf16.vlgmr.msra.gmra.mrb[8].mxu0 %vm1196_vm6, %v1628_v53 }
 0x472   : > { %2525 = vmatpush3.bf16.msra.mxu0 %v2700_v52  ;;  %2532 = vmatprep.mubr.msk.bf16.mxu0 %vm2729_vm0, %v2728_v0 }
 0x473   : > { %2526 = vmatprep.subr.bf16.mxu0 %v2728_v0 }
 0x476   : > { %2527 = vmatpush3.bf16.msra.mxu0 %v2701_v54 }
 0x477   : > { %2528 = vmatprep.subr.bf16.mxu0 %v2728_v0 }
 0x47a   : > { %2529 = vmatpush3.bf16.msra.mxu0 %v2702_v55 }
 0x47b   : > { %2530 = vmatprep.subr.bf16.mxu0 %v2728_v0 }
 0x47e   : > { %2531 = vmatpush3.bf16.msra.mxu0 %v2703_v56 }
 0x47f   : > { %2536 = vmatprep.subr.bf16.mxu0 %v2728_v0 }
 0x481   : > { %2533 = vmatmul.mubr.msk.bf16.vlgmr.msra.gmra.mrb[8].mxu0 %vm1196_vm6, %v1706_v58 }
 0x482   : > { %2537 = vmatpush3.bf16.msra.mxu0 %v2704_v57  ;;  %2544 = vmatprep.mubr.msk.bf16.mxu0 %vm2729_vm0, %v2728_v0 }
 0x483   : > { %2538 = vmatprep.subr.bf16.mxu0 %v2728_v0 }
 0x486   : > { %2539 = vmatpush3.bf16.msra.mxu0 %v2705_v59 }
 0x487   : > { %2540 = vmatprep.subr.bf16.mxu0 %v2728_v0 }
 0x48a   : > { %2541 = vmatpush3.bf16.msra.mxu0 %v2706_v60 }
 0x48b   : > { %2542 = vmatprep.subr.bf16.mxu0 %v2728_v0 }
 0x48e   : > { %2543 = vmatpush3.bf16.msra.mxu0 %v2707_v61 }
 0x491   : > { %2545 = vmatmul.mubr.msk.bf16.vlgmr.msra.gmra.mrb[8].mxu0 %vm1196_vm6, %v1784_v62  ;;  %v1957_v62 = vld [vmem:[%s3198_s11] sm:$0x1] }
 0x514   : > { %v1300_v2 = vpop.f32.mrb[4].mxu1 }
 0x515   : > { %v2462_v4 = vpop.f32.mrb[5].mxu1 }
 0x516   : > { %v1303_v5 = vpop.f32.mrb[6].mxu1 }
 0x517   : > { %v2463_v6 = vpop.f32.mrb[7].mxu1 }
 0x518   : > { %v1958_v6 = vld [vmem:[%s3199_s12] sm:$0x1] }
 0x51c   : > { %v1891_v7 = vpop.f32.mrb[8].mxu1 }
 0x51d   : > { %v1897_v8 = vpack.c.bf16 %v1891_v7, %v1891_v7  ;;  %v2552_v9 = vpop.f32.mrb[9].mxu1  ;;  %v1995_v7 = vld [vmem:[%s3195_s8] sm:$0x1] }
 0x51e   : > { %v1894_v10 = vpop.f32.mrb[10].mxu1 }
 0x51f   : > { %2559 = vmatmul.mubr.msk.bf16.vlgmr.msra.gmra.mrb[12].mxu1 %vm517_vm3, %v1897_v8  ;;  %v2553_v11 = vpop.f32.mrb[11].mxu1 }
 0x564   : > { %v1846_v12 = vpop.f32.mrb[8].mxu0 }
 0x565   : > { %v3157_v13 = vadd.f32 %v1846_v12, %v1300_v2  ;;  %v2546_v0 = vpop.f32.mrb[9].mxu0 }
 0x566   : > { %v1849_v14 = vpop.f32.mrb[10].mxu0 }
 0x567   : > { %v2547_v15 = vpop.f32.mrb[11].mxu0  ;;  %v1996_v16 = vsel %vm1052_vm4, %v3157_v13, 0.0  ;;  %v2006_v24 = vmul.f32 %v3157_v13, %v3157_v13 }
 0x568   : > { %1997 = vadd.xlane.f32.xlu0 %v1996_v16 }
 0x569   : > { %v2007_v25 = vsel %vm1052_vm4, %v2006_v24, 0.0 }
 0x5f2   : > { %v1951_v17 = vpop.f32.mrb[12].mxu1 }
 0x5f3   : > { %v1959_v18 = vsel %vm1052_vm4, %v1951_v17, 0.0  ;;  %v2560_v19 = vpop.f32.mrb[13].mxu1  ;;  %v1969_v20 = vmul.f32 %v1951_v17, %v1951_v17 }
 0x5f4   : > { %1960 = vadd.xlane.f32.xlu1 %v1959_v18  ;;  %v1954_v21 = vpop.f32.mrb[14].mxu1 }
 0x5f5   : > { %v2561_v22 = vpop.f32.mrb[15].mxu1  ;;  %v1970_v23 = vsel %vm1052_vm4, %v1969_v20, 0.0  ;;  %v1998_v40 = vpop.xlane.xlu0 %1997 }
 0x5f6   : > { %v1999_v3 = vrot.slane %v1998_v40, 4 }
 0x5f8   : > { %1971 = vadd.xlane.f32.xlu1 %v1970_v23  ;;  %v2000_v45 = vadd.f32 %v1999_v3, %v1998_v40 }
 0x5fa   : > { %v2001_v47 = vrot.slane %v2000_v45, 2 }
 0x5fc   : > { %2008 = vadd.xlane.f32.xlu1 %v2007_v25  ;;  %v2002_v50 = vadd.f32 %v2001_v47, %v2000_v45 }
 0x5fe   : > { %v2003_v52 = vrot.slane %v2002_v50, 1 }
 0x600   : > { %v2004_v55 = vadd.f32 %v2003_v52, %v2002_v50 }
 0x681   : > { %v1961_v26 = vpop.xlane.xlu1 %1960 }
 0x682   : > { %v1962_v27 = vrot.slane %v1961_v26, 4 }
 0x684   : > { %v1963_v28 = vadd.f32 %v1962_v27, %v1961_v26 }
 0x685   : > { %v1972_v29 = vpop.xlane.xlu1 %1971 }
 0x686   : > { %v1964_v30 = vrot.slane %v1963_v28, 2  ;;  %v1973_v31 = vrot.slane %v1972_v29, 4 }
 0x688   : > { %v1974_v32 = vadd.f32 %v1973_v31, %v1972_v29  ;;  %v1965_v33 = vadd.f32 %v1964_v30, %v1963_v28 }
 0x689   : > { %v2009_v41 = vpop.xlane.xlu1 %2008 }
 0x68a   : > { %v1975_v34 = vrot.slane %v1974_v32, 2  ;;  %v1966_v35 = vrot.slane %v1965_v33, 1  ;;  %v2010_v42 = vrot.slane %v2009_v41, 4 }
 0x68c   : > { %v1967_v36 = vadd.f32 %v1966_v35, %v1965_v33  ;;  %v1976_v37 = vadd.f32 %v1975_v34, %v1974_v32  ;;  %v2011_v46 = vadd.f32 %v2010_v42, %v2009_v41 }
 0x68e   : > { %2629 = vpush %v1967_v36  ;;  %v1977_v38 = vrot.slane %v1976_v37, 1  ;;  %v2012_v48 = vrot.slane %v2011_v46, 2 }
 0x690   : > { %v1978_v39 = vadd.f32 %v1977_v38, %v1976_v37  ;;  %v2013_v51 = vadd.f32 %v2012_v48, %v2011_v46 }
 0x692   : > { %2631 = vpush %v1978_v39  ;;  %v2014_v53 = vrot.slane %v2013_v51, 1 }
 0x694   : > { %v2015_v56 = vadd.f32 %v2014_v53, %v2013_v51 }
 0x6bf   : > { %s2630_s24 = spop %2629 }
 0x6c0   : > { %s1980_s27 = smul.f32 0.015625, %s2630_s24 }
 0x6c2   : > { %v1988_v43 = vstv %s1980_s27  ;;  %s1982_s28 = smul.f32 %s1980_s27, %s1980_s27 }
 0x6c3   : > { %s2632_s29 = spop %2631  ;;  %v1989_v44 = vsub.f32 %v1951_v17, %v1988_v43 }
 0x6c4   : > { %s1981_s30 = smul.f32 0.015625, %s2632_s29 }
 0x6c6   : > { %s1983_s14 = ssub.f32 %s1981_s30, %s1982_s28 }
 0x6c8   : > { %s1984_s15 = sadd.f32 1e-05, %s1983_s14 }
 0x6ca   : > { %v1985_v49 = vstv %s1984_s15 }
 0x6cb   : > { %2714 = vrsqrt.f32 %v1985_v49 }
 0x6d5   : > { %v2715_v54 = vpop.eup %2714 }
 0x6d6   : > { %2633 = vpush %v2715_v54 }
 0x6d7   : > { %2635 = vpush %v2004_v55 }
 0x6d8   : > { %2637 = vpush %v2015_v56 }
 0x707   : > { %s2634_s16 = spop %2633 }
 0x708   : > { %v1990_v57 = vstv %s2634_s16  ;;  %s2636_s17 = spop %2635 }
 0x709   : > { %v1991_v58 = vmul.f32 %v1990_v57, %v1989_v44  ;;  %s2017_s18 = smul.f32 0.015625, %s2636_s17  ;;  %s2638_s19 = spop %2637 }
 0x70a   : > { %s2018_s20 = smul.f32 0.015625, %s2638_s19 }
 0x70b   : > { %s2019_s21 = smul.f32 %s2017_s18, %s2017_s18  ;;  %v2025_v61 = vstv %s2017_s18  ;;  %v1992_v4 = vmul.f32 %v1991_v58, %v1957_v62 }
 0x70c   : > { %v2026_v63 = vsub.f32 %v3157_v13, %v2025_v61 }
 0x70d   : > { %s2020_s22 = ssub.f32 %s2018_s20, %s2019_s21  ;;  %v1993_v9 = vadd.f32 %v1992_v4, %v1958_v6  ;;  %s433_s20 = scalar_lea.vmem %s3200_s13, %s3202_s26 }
 0x70e   : > { %v2041_v16 = vld [vmem:[%s433_s20] sm:$0x1] }
 0x70f   : > { %s2021_s23 = sadd.f32 1e-05, %s2020_s22 }
 0x711   : > { %v2022_v59 = vstv %s2021_s23 }
 0x712   : > { %2716 = vrsqrt.f32 %v2022_v59 }
 0x71c   : > { %v2717_v60 = vpop.eup %2716 }
 0x71d   : > { %2639 = vpush %v2717_v60 }
 0x74e   : > { %s2640_s28 = spop %2639 }
 0x74f   : > { %v2027_v2 = vstv %s2640_s28 }
 0x750   : > { %v2028_v5 = vmul.f32 %v2027_v2, %v2026_v63 }
 0x752   : > { %v2029_v8 = vmul.f32 %v2028_v5, %v1994_v1 }
 0x754   : > { %v2030_v10 = vadd.f32 %v2029_v8, %v1995_v7 }
 0x756   : > { %v2031_v11 = vadd.f32 %v2030_v10, %v1993_v9 }
 0x758   : > { %v2033_v12 = vmul.f32 0.70710677, %v2031_v11  ;;  %v2032_v0 = vmul.f32 0.5, %v2031_v11 }
 0x75a   : > { %2718 = verf.f32 %v2033_v12 }
 0x764   : > { %v2719_v13 = vpop.eup %2718 }
 0x765   : > { %v2035_v14 = vadd.f32 1.0, %v2719_v13 }
 0x767   : > { %v2036_v15 = vmul.f32 %v2035_v14, %v2032_v0 }
 0x769   : > { %v2037_v17 = vpack.c.bf16 %v2036_v15, %v2036_v15 }
 0x76b   : > { %v2042_v18 = vsel %vm2040_vm8, %v2037_v17, %v2041_v16 }
 0x76c   : > { %2043 = vst [vmem:[%s433_s20] sm:$0x1] %v2042_v18 }
 0x76d PF: > { %s23_s25 = sadd.s32 1, %s2726_s25  }
 0x76e   : > { %p20_p4 = scmp.ge.s32.totalorder %s23_s25, 4  }
 0x770   :  { %22 = sbr.rel (!%p20_p4) target bundleno = 1 (0x1), region = 118 }

// kernel: _lambda_.9
= control target key start
LH: loop header
LB: loop body
LE: loop exit
PB: predicated region body
PF: predicated region fallthrough
CT: control target
= control target key end

     0   :  { %s2542_s25 = smov 0   ;;  %s2826_s0 = inlined_call_operand.vmem [shape: bf16[2,16,128], index: 0, kind: input, shape index: {}]   ;;  %s2827_s1 = inlined_call_operand.vmem [shape: bf16[36,16], index: 1, kind: input, shape index: {}]   ;;  %s2828_s2 = inlined_call_operand.vmem [shape: bf16[9,16,128], index: 2, kind: input, shape index: {}]   ;;  %s2829_s3 = inlined_call_operand.vmem [shape: f32[1,128], index: 3, kind: input, shape index: {}, may-alias: {3,7,11}]   ;;  %s2830_s4 = inlined_call_operand.vmem [shape: f32[1,128], index: 4, kind: input, shape index: {}, may-alias: {4,8,12}]   ;;  %s2831_s5 = inlined_call_operand.vmem [shape: bf16[36,4], index: 5, kind: input, shape index: {}]   ;;  %s2832_s6 = inlined_call_operand.vmem [shape: bf16[9,32,128], index: 6, kind: input, shape index: {}]   ;;  %s2833_s7 = inlined_call_operand.vmem [shape: f32[1,128], index: 7, kind: input, shape index: {}, may-alias: {3,7,11}]   ;;  %s2834_s8 = inlined_call_operand.vmem [shape: f32[1,128], index: 8, kind: input, shape index: {}, may-alias: {4,8,12}]   ;;  %s2835_s9 = inlined_call_operand.vmem [shape: bf16[4,16], index: 9, kind: input, shape index: {}]   ;;  %s2836_s10 = inlined_call_operand.vmem [shape: bf16[16,128], index: 10, kind: input, shape index: {}]   ;;  %s2837_s11 = inlined_call_operand.vmem [shape: f32[1,128], index: 11, kind: input, shape index: {}, may-alias: {3,7,11}]   ;;  %s2838_s12 = inlined_call_operand.vmem [shape: f32[1,128], index: 12, kind: input, shape index: {}, may-alias: {4,8,12}]   ;;  %s2839_s13 = inlined_call_operand.vmem [shape: bf16[2,4,128], index: 13, kind: output, shape index: {}]  }
   0x1 LB: > { %s1974_s26 = sadd.s32 4294967295, %s2468_s25   ;;  %p1978_p0 = scmp.ge.s32.totalorder %s2468_s25, 1  ;;  %s2468_s25 = sphi %s2542_s25, %s23_s25  }
   0x2   : > { %p387_p1 = scmp.lt.s32.totalorder %s2468_s25, 3 }
   0x4   : > { %p388_p2 = pnand %p1978_p0, %p387_p1 }
   0x5   : > { %p430_p3 = scmp.lt.s32.totalorder (!%p388_p2), %s1974_s26, 1  ;;  %v2470_v0 = vmov (!%p388_p2), 0.0   ;;  %vm2471_vm0 = vmmov (!%p388_p2), 0   ;;  %v2418_v1 = vld [vmem:[%s2827_s1] sm:$0xff] (!%p388_p2)   ;;  %v2419_v2 = vld [vmem:[%s2827_s1 + $0x8] sm:$0xff] (!%p388_p2)   ;;  %vm466_vm1 = vcmask (!%p388_p2), 130048  }
   0x6   : > { %391 = sbr.rel (%p388_p2) target bundleno = 1684 (0x694), region = 72  ;;  %2157 = vmatprep.subr.bf16.mxu0 (!%p388_p2), %v2470_v0  ;;  %2159 = vmatprep.mubr.msk.bf16.mxu0 (!%p388_p2), %vm2471_vm0, %v2470_v0  ;;  %v2421_v4 = vld [vmem:[%s2828_s2 + $0x8] sm:$0xff] (!%p388_p2)   ;;  %v2420_v5 = vld [vmem:[%s2827_s1 + $0x10] ss:$0 sps:$4 sm:$0x33] (!%p388_p2)   ;;  %v2422_v16 = vld [vmem:[%s2828_s2] sm:$0xff] (!%p388_p2)  }
   0x7   : > { %2323 = vmatprep.subr.bf16.mxu1 (!%p388_p2), %v2470_v0  ;;  %2163 = vmatprep.mubr.msk.bf16.mxu1 (!%p388_p2), %vm2471_vm0, %v2470_v0  ;;  %v2423_v22 = vld [vmem:[%s2828_s2 + $0x10] sm:$0xff] (!%p388_p2)   ;;  %v2424_v23 = vld [vmem:[%s2828_s2 + $0x18] sm:$0xff] (!%p388_p2)   ;;  %v2425_v25 = vld [vmem:[%s2828_s2 + $0x20] sm:$0xff] (!%p388_p2)   ;;  %vm1019_vm2 = vcmask (!%p388_p2), 1043456   ;;  %vm1101_vm3 = vcmask (!%p388_p2), 1041408   ;;  %vm1091_vm4 = vcmask (!%p388_p2), 31744  }
   0x8   : > { %v2426_v27 = vld [vmem:[%s2828_s2 + $0x28] sm:$0xff] (!%p388_p2)   ;;  %v2427_v28 = vld [vmem:[%s2828_s2 + $0x30] sm:$0xff] (!%p388_p2)   ;;  %v2428_v30 = vld [vmem:[%s2828_s2 + $0x38] sm:$0xff] (!%p388_p2)   ;;  %vm1187_vm5 = vcmask (!%p388_p2), 261120  }
   0x9   : > { %v2429_v32 = vld [vmem:[%s2828_s2 + $0x40] sm:$0xff] (!%p388_p2)  }
   0xa   : > { %v1719_v35 = vld [vmem:[%s2835_s9] sm:$0x3] (!%p388_p2) }
   0xb   : > { %v2430_v44 = vld [vmem:[%s2836_s10] sm:$0xff] (!%p388_p2)  }
   0xd   : > { %s2841_s26 = smov (!%p430_p3, %s1974_s26), 1 }
   0xe   : > { %s2099_s27 = sshll.u32 %s2841_s26, 3 }
   0xf   : > { %s434_s30 = scalar_lea.vmem %s2826_s0, %s2099_s27 }
  0x10   : > { %v2568_v3 = vld [vmem:[%s434_s30] sm:$0xff]  }
  0x11   : > { %2158 = vmatpush3.bf16.msra.mxu0 %v2568_v3  ;;  %2324 = vmatpush3.bf16.msra.mxu1 %v2568_v3 }
  0x12   : > { %2171 = vmatprep.subr.bf16.mxu1 %v2470_v0  ;;  %2225 = vmatprep.subr.bf16.mxu0 %v2470_v0 }
  0x14   : > { %2160 = vmatmul.mubr.msk.bf16.vlgmr.msra.gmra.mrb[0].mxu0 %vm466_vm1, %v2418_v1  ;;  %2164 = vmatmul.mubr.msk.bf16.vlgmr.msra.gmra.mrb[0].mxu1 %vm466_vm1, %v2419_v2 }
  0x15   : > { %2167 = vmatprep.mubr.msk.bf16.mxu1 %vm2471_vm0, %v2470_v0  ;;  %2172 = vmatpush3.bf16.msra.mxu1 %v2421_v4  ;;  %v2023_v4 = vld [vmem:[%s2829_s3] ss:$0 sm:$0xff] }
  0x16   : > { %2177 = vmatprep.subr.bf16.mxu1 %v2470_v0  ;;  %2227 = vmatprep.mubr.msk.bf16.mxu0 %vm2471_vm0, %v2470_v0 }
  0x1c   : > { %2168 = vmatmul.mubr.msk.bf16.gmra.mrb[4].mxu1 %vm466_vm1, %v2420_v5 }
  0x1d   : > { %2173 = vmatprep.mubr.msk.bf16.mxu1 %vm2471_vm0, %v2470_v0 }
  0xe7   : > { %v510_v6 = vpop.f32.mrb[0].mxu0  ;;  %v518_v7 = vpop.f32.mrb[0].mxu1 }
  0xe8   : > { %v2161_v8 = vpop.f32.mrb[1].mxu0  ;;  %v2165_v9 = vpop.f32.mrb[1].mxu1 }
  0xe9   : > { %v513_v10 = vpop.f32.mrb[2].mxu0  ;;  %v521_v11 = vpop.f32.mrb[2].mxu1 }
  0xea   : > { %v532_v12 = vpack.c.bf16 %v513_v10, %v510_v6  ;;  %v2162_v13 = vpop.f32.mrb[3].mxu0  ;;  %v533_v14 = vpack.c.bf16 %v521_v11, %v518_v7  ;;  %v2166_v15 = vpop.f32.mrb[3].mxu1  ;;  %v2024_v7 = vld [vmem:[%s2830_s4] ss:$0 sm:$0xff] }
  0xec   : > { %v541_v17 = vrot.slane %v532_v12, 2  ;;  %v643_v24 = vrot.slane %v532_v12, 4  ;;  %v697_v26 = vrot.slane %v532_v12, 6  ;;  %v805_v29 = vrot.slane %v533_v14, 2 }
  0xed   : > { %v859_v31 = vrot.slane %v533_v14, 4  ;;  %v913_v33 = vrot.slane %v533_v14, 6 }
  0xee   : > { %2174 = vmatmul.mubr.msk.bf16.vlgmr.msra.gmra.mrb[8].mxu1 %vm466_vm1, %v541_v17  ;;  %v2431_v17 = vld [vmem:[%s2831_s5] sm:$0xff]  }
  0xef   : > { %2178 = vmatpush3.bf16.msra.mxu1 %v2422_v16  ;;  %2179 = vmatprep.mubr.msk.bf16.mxu1 %vm2471_vm0, %v2470_v0  ;;  %v526_v18 = vpop.f32.mrb[4].mxu1 }
  0xf0   : > { %2183 = vmatprep.subr.bf16.mxu1 %v2470_v0  ;;  %v2169_v19 = vpop.f32.mrb[5].mxu1  ;;  %v534_v34 = vpack.c.bf16 %v526_v18, %v526_v18  ;;  %v2434_v18 = vld [vmem:[%s2832_s6 + $0x10] sm:$0xff]  }
  0xf1   : > { %v529_v20 = vpop.f32.mrb[6].mxu1  ;;  %v2432_v19 = vld [vmem:[%s2831_s5 + $0x8] sm:$0xff]  }
  0xf2   : > { %v2170_v21 = vpop.f32.mrb[7].mxu1 }
  0xfa   : > { %2180 = vmatmul.mubr.msk.bf16.vlgmr.msra.gmra.mrb[8].mxu1 %vm466_vm1, %v532_v12 }
  0xfb   : > { %2184 = vmatpush3.bf16.msra.mxu1 %v2423_v22  ;;  %2185 = vmatprep.mubr.msk.bf16.mxu1 %vm2471_vm0, %v2470_v0 }
  0xfc   : > { %2189 = vmatprep.subr.bf16.mxu1 %v2470_v0 }
 0x106   : > { %2186 = vmatmul.mubr.msk.bf16.vlgmr.msra.gmra.mrb[8].mxu1 %vm466_vm1, %v643_v24 }
 0x107   : > { %2190 = vmatpush3.bf16.msra.mxu1 %v2424_v23  ;;  %2191 = vmatprep.mubr.msk.bf16.mxu1 %vm2471_vm0, %v2470_v0 }
 0x108   : > { %2195 = vmatprep.subr.bf16.mxu1 %v2470_v0 }
 0x112   : > { %2192 = vmatmul.mubr.msk.bf16.vlgmr.msra.gmra.mrb[8].mxu1 %vm466_vm1, %v697_v26 }
 0x113   : > { %2196 = vmatpush3.bf16.msra.mxu1 %v2425_v25  ;;  %2197 = vmatprep.mubr.msk.bf16.mxu1 %vm2471_vm0, %v2470_v0 }
 0x114   : > { %2201 = vmatprep.subr.bf16.mxu1 %v2470_v0 }
 0x11e   : > { %2198 = vmatmul.mubr.msk.bf16.vlgmr.msra.gmra.mrb[8].mxu1 %vm466_vm1, %v533_v14 }
 0x11f   : > { %2202 = vmatpush3.bf16.msra.mxu1 %v2426_v27  ;;  %2203 = vmatprep.mubr.msk.bf16.mxu1 %vm2471_vm0, %v2470_v0  ;;  %v2433_v27 = vld [vmem:[%s2831_s5 + $0x10] ss:$0 sps:$4 sm:$0x33]  }
 0x120   : > { %2207 = vmatprep.subr.bf16.mxu1 %v2470_v0 }
 0x12a   : > { %2204 = vmatmul.mubr.msk.bf16.vlgmr.msra.gmra.mrb[8].mxu1 %vm466_vm1, %v805_v29 }
 0x12b   : > { %2208 = vmatpush3.bf16.msra.mxu1 %v2427_v28  ;;  %2209 = vmatprep.mubr.msk.bf16.mxu1 %vm2471_vm0, %v2470_v0  ;;  %v2435_v28 = vld [vmem:[%s2832_s6 + $0x18] sm:$0xff]  }
 0x12c   : > { %2213 = vmatprep.subr.bf16.mxu1 %v2470_v0 }
 0x136   : > { %2210 = vmatmul.mubr.msk.bf16.vlgmr.msra.gmra.mrb[8].mxu1 %vm466_vm1, %v859_v31 }
 0x137   : > { %2214 = vmatpush3.bf16.msra.mxu1 %v2428_v30  ;;  %2215 = vmatprep.mubr.msk.bf16.mxu1 %vm2471_vm0, %v2470_v0 }
 0x138   : > { %2219 = vmatprep.subr.bf16.mxu1 %v2470_v0 }
 0x142   : > { %2216 = vmatmul.mubr.msk.bf16.vlgmr.msra.gmra.mrb[8].mxu1 %vm466_vm1, %v913_v33 }
 0x143   : > { %2220 = vmatpush3.bf16.msra.mxu1 %v2429_v32  ;;  %2221 = vmatprep.mubr.msk.bf16.mxu1 %vm2471_vm0, %v2470_v0 }
 0x144   : > { %2311 = vmatprep.subr.bf16.mxu1 %v2470_v0 }
 0x14e   : > { %2222 = vmatmul.mubr.msk.bf16.vlgmr.msra.gmra.mrb[8].mxu1 %vm466_vm1, %v534_v34 }
 0x14f   : > { %2312 = vmatpush3.bf16.msra.mxu1 %v2568_v3  ;;  %2313 = vmatprep.mubr.msk.bf16.mxu1 %vm2471_vm0, %v2470_v0 }
 0x150   : > { %2317 = vmatprep.subr.bf16.mxu1 %v2470_v0 }
 0x156   : > { %2314 = vmatmul.mubr.msk.bf16.vlgmr.msra.gmra.mrb[12].mxu1 %vm466_vm1, %v1719_v35 }
 0x157   : > { %2319 = vmatprep.mubr.msk.bf16.mxu1 %vm2471_vm0, %v2470_v0  ;;  %2318 = vmatpush3.bf16.msra.mxu1 %v2430_v44 }
 0x221   : > { %v1010_v36 = vpop.f32.mrb[8].mxu1 }
 0x222   : > { %v2223_v37 = vpop.f32.mrb[9].mxu1  ;;  %v1020_v38 = vsel %vm1019_vm2, %v1010_v36, 0.0  ;;  %v1030_v39 = vmul.f32 %v1010_v36, %v1010_v36 }
 0x223   : > { %1021 = vadd.xlane.f32.xlu0 %v1020_v38  ;;  %v1013_v40 = vpop.f32.mrb[10].mxu1 }
 0x224   : > { %v2224_v41 = vpop.f32.mrb[11].mxu1  ;;  %v1031_v42 = vsel %vm1019_vm2, %v1030_v39, 0.0 }
 0x227   : > { %1032 = vadd.xlane.f32.xlu0 %v1031_v42 }
 0x229   : > { %v1757_v43 = vpop.f32.mrb[12].mxu1 }
 0x22a   : > { %v1763_v45 = vpack.c.bf16 %v1757_v43, %v1757_v43  ;;  %v2315_v46 = vpop.f32.mrb[13].mxu1 }
 0x22b   : > { %v1760_v47 = vpop.f32.mrb[14].mxu1 }
 0x22c   : > { %v2316_v48 = vpop.f32.mrb[15].mxu1  ;;  %2320 = vmatmul.mubr.msk.bf16.vlgmr.msra.gmra.mrb[16].mxu1 %vm466_vm1, %v1763_v45 }
 0x22d   : > { %v2436_v48 = vld [vmem:[%s2832_s6] sm:$0xff]  }
 0x2b0   : > { %v1022_v49 = vpop.xlane.xlu0 %1021 }
 0x2b1   : > { %v1023_v50 = vrot.slane %v1022_v49, 4 }
 0x2b3   : > { %v1024_v51 = vadd.f32 %v1023_v50, %v1022_v49  ;;  %v2437_v50 = vld [vmem:[%s2832_s6 + $0x8] sm:$0xff]  }
 0x2b4   : > { %v1033_v52 = vpop.xlane.xlu0 %1032 }
 0x2b5   : > { %v1025_v53 = vrot.slane %v1024_v51, 2  ;;  %v1034_v54 = vrot.slane %v1033_v52, 4 }
 0x2b7   : > { %v1035_v55 = vadd.f32 %v1034_v54, %v1033_v52  ;;  %v1026_v56 = vadd.f32 %v1025_v53, %v1024_v51 }
 0x2b9   : > { %v1036_v57 = vrot.slane %v1035_v55, 2  ;;  %v1027_v58 = vrot.slane %v1026_v56, 1 }
 0x2bb   : > { %v1028_v59 = vadd.f32 %v1027_v58, %v1026_v56  ;;  %v1037_v60 = vadd.f32 %v1036_v57, %v1035_v55  ;;  %v2438_v56 = vld [vmem:[%s2832_s6 + $0x20] sm:$0xff]  }
 0x2bd   : > { %2389 = vpush %v1028_v59  ;;  %v1038_v61 = vrot.slane %v1037_v60, 1 }
 0x2bf   : > { %v1039_v62 = vadd.f32 %v1038_v61, %v1037_v60  ;;  %v2439_v61 = vld [vmem:[%s2832_s6 + $0x28] sm:$0xff]  }
 0x2c1   : > { %2391 = vpush %v1039_v62  ;;  %v2440_v62 = vld [vmem:[%s2832_s6 + $0x30] sm:$0xff]  }
 0x2ee   : > { %s2390_s29 = spop %2389 }
 0x2ef   : > { %s1041_s30 = smul.f32 0.0078125, %s2390_s29 }
 0x2f1   : > { %v1049_v63 = vstv %s1041_s30  ;;  %s1043_s14 = smul.f32 %s1041_s30, %s1041_s30 }
 0x2f2   : > { %s2392_s15 = spop %2391  ;;  %v1050_v1 = vsub.f32 %v1010_v36, %v1049_v63 }
 0x2f3   : > { %s1042_s16 = smul.f32 0.0078125, %s2392_s15 }
 0x2f5   : > { %s1044_s17 = ssub.f32 %s1042_s16, %s1043_s14 }
 0x2f7   : > { %s1045_s18 = sadd.f32 1e-05, %s1044_s17 }
 0x2f9   : > { %v1046_v2 = vstv %s1045_s18 }
 0x2fa   : > { %2452 = vrsqrt.f32 %v1046_v2  ;;  %v2442_v2 = vld [vmem:[%s2832_s6 + $0x40] sm:$0xff]  }
 0x2ff   : > { %v2684_v20 = vpop.f32.mrb[16].mxu1 }
 0x300   : > { %v1817_v21 = vsel %vm1019_vm2, %v2684_v20, 0.0  ;;  %v1827_v22 = vmul.f32 %v2684_v20, %v2684_v20  ;;  %v2321_v23 = vpop.f32.mrb[17].mxu1 }
 0x301   : > { %1818 = vadd.xlane.f32.xlu1 %v1817_v21  ;;  %v1812_v24 = vpop.f32.mrb[18].mxu1 }
 0x302   : > { %v1828_v25 = vsel %vm1019_vm2, %v1827_v22, 0.0  ;;  %v2322_v26 = vpop.f32.mrb[19].mxu1 }
 0x304   : > { %v2453_v3 = vpop.eup %2452 }
 0x305   : > { %2393 = vpush %v2453_v3  ;;  %1829 = vadd.xlane.f32.xlu1 %v1828_v25 }
 0x336   : > { %s2394_s19 = spop %2393 }
 0x337   : > { %v1051_v5 = vstv %s2394_s19 }
 0x338   : > { %v1052_v6 = vmul.f32 %v1051_v5, %v1050_v1  ;;  %v2441_v1 = vld [vmem:[%s2832_s6 + $0x38] sm:$0xff]  }
 0x33a   : > { %v1059_v8 = vmul.f32 %v2023_v4, %v1052_v6  ;;  %v2443_v6 = vld [vmem:[%s2832_s6 + $0x48] sm:$0xff]  }
 0x33c   : > { %v1066_v9 = vadd.f32 %v2024_v7, %v1059_v8  ;;  %v2444_v8 = vld [vmem:[%s2832_s6 + $0x50] sm:$0xff]  }
 0x33e   : > { %v1068_v10 = vmul.f32 0.70710677, %v1066_v9  ;;  %v1067_v12 = vmul.f32 0.5, %v1066_v9  ;;  %v2445_v9 = vld [vmem:[%s2832_s6 + $0x58] sm:$0xff]  }
 0x340   : > { %2454 = verf.f32 %v1068_v10 }
 0x34a   : > { %v2455_v11 = vpop.eup %2454 }
 0x34b   : > { %v1070_v13 = vadd.f32 1.0, %v2455_v11  ;;  %v2446_v11 = vld [vmem:[%s2832_s6 + $0x60] sm:$0xff]  }
 0x34d   : > { %v1071_v14 = vmul.f32 %v1070_v13, %v1067_v12  ;;  %v2447_v13 = vld [vmem:[%s2832_s6 + $0x68] sm:$0xff]  }
 0x34f   : > { %v1072_v15 = vpack.c.bf16 %v1071_v14, %v1071_v14  ;;  %v2448_v14 = vld [vmem:[%s2832_s6 + $0x70] sm:$0xff]  }
 0x351   : > { %v1103_v16 = vsel %vm1101_vm3, %v1072_v15, 0 }
 0x352   : > { %2226 = vmatpush3.bf16.msra.mxu0 %v1103_v16  ;;  %v2449_v16 = vld [vmem:[%s2832_s6 + $0x78] sm:$0xff]  }
 0x353   : > { %2239 = vmatprep.subr.bf16.mxu0 %v2470_v0 }
 0x355   : > { %2228 = vmatmul.mubr.msk.bf16.vlgmr.msra.gmra.mrb[4].mxu0 %vm1091_vm4, %v2431_v17  ;;  %v2450_v17 = vld [vmem:[%s2832_s6 + $0x80] sm:$0xff]  }
 0x356   : > { %2231 = vmatprep.mubr.msk.bf16.mxu0 %vm2471_vm0, %v2470_v0  ;;  %2240 = vmatpush3.bf16.msra.mxu0 %v2434_v18 }
 0x357   : > { %2241 = vmatprep.subr.bf16.mxu0 %v2470_v0 }
 0x35a   : > { %2242 = vmatpush3.bf16.msra.mxu0 %v2435_v28 }
 0x35b   : > { %2247 = vmatprep.subr.bf16.mxu0 %v2470_v0 }
 0x35d   : > { %2232 = vmatmul.mubr.msk.bf16.gmra.mrb[8].mxu0 %vm1091_vm4, %v2432_v19  ;;  %v2451_v19 = vld [vmem:[%s2832_s6 + $0x88] sm:$0xff]  }
 0x35e   : > { %2235 = vmatprep.mubr.msk.bf16.mxu0 %vm2471_vm0, %v2470_v0 }
 0x365   : > { %2236 = vmatmul.mubr.msk.bf16.gmra.mrb[12].mxu0 %vm1091_vm4, %v2433_v27 }
 0x366   : > { %2243 = vmatprep.mubr.msk.bf16.mxu0 %vm2471_vm0, %v2470_v0 }
 0x38e   : > { %v1819_v29 = vpop.xlane.xlu1 %1818 }
 0x38f   : > { %v1820_v30 = vrot.slane %v1819_v29, 4 }
 0x391   : > { %v1821_v31 = vadd.f32 %v1820_v30, %v1819_v29 }
 0x392   : > { %v1830_v32 = vpop.xlane.xlu1 %1829 }
 0x393   : > { %v1822_v33 = vrot.slane %v1821_v31, 2  ;;  %v1831_v34 = vrot.slane %v1830_v32, 4 }
 0x395   : > { %v1832_v35 = vadd.f32 %v1831_v34, %v1830_v32  ;;  %v1823_v36 = vadd.f32 %v1822_v33, %v1821_v31 }
 0x397   : > { %v1833_v37 = vrot.slane %v1832_v35, 2  ;;  %v1824_v38 = vrot.slane %v1823_v36, 1 }
 0x399   : > { %v1825_v39 = vadd.f32 %v1824_v38, %v1823_v36  ;;  %v1834_v40 = vadd.f32 %v1833_v37, %v1832_v35 }
 0x39b   : > { %2395 = vpush %v1825_v39  ;;  %v1835_v41 = vrot.slane %v1834_v40, 1 }
 0x39d   : > { %v1836_v42 = vadd.f32 %v1835_v41, %v1834_v40 }
 0x39f   : > { %2397 = vpush %v1836_v42 }
 0x3cc   : > { %s2396_s16 = spop %2395 }
 0x3cd   : > { %s1838_s17 = smul.f32 0.0078125, %s2396_s16 }
 0x3cf   : > { %s1840_s20 = smul.f32 %s1838_s17, %s1838_s17  ;;  %v1846_v3 = vstv %s1838_s17 }
 0x3d0   : > { %s2398_s21 = spop %2397  ;;  %v2744_v5 = vsub.f32 %v2684_v20, %v1846_v3 }
 0x3d1   : > { %s1839_s22 = smul.f32 0.0078125, %s2398_s21 }
 0x3d3   : > { %s1841_s27 = ssub.f32 %s1839_s22, %s1840_s20 }
 0x3d5   : > { %s1842_s28 = sadd.f32 1e-05, %s1841_s27 }
 0x3d7   : > { %v1843_v7 = vstv %s1842_s28 }
 0x3d8   : > { %2456 = vrsqrt.f32 %v1843_v7 }
 0x3e2   : > { %v2457_v10 = vpop.eup %2456 }
 0x3e3   : > { %2399 = vpush %v2457_v10 }
 0x414   : > { %s2400_s30 = spop %2399 }
 0x428   : > { %v1139_v43 = vpop.f32.mrb[4].mxu0 }
 0x429   : > { %v2229_v44 = vpop.f32.mrb[5].mxu0 }
 0x42a   : > { %v1142_v45 = vpop.f32.mrb[6].mxu0 }
 0x42b   : > { %v1161_v46 = vpack.c.bf16 %v1142_v45, %v1139_v43  ;;  %v2230_v47 = vpop.f32.mrb[7].mxu0  ;;  %v1848_v45 = vstv %s2400_s30 }
 0x42c   : > { %v2093_v47 = vld [vmem:[%s2837_s11] ss:$0 sm:$0xff] }
 0x42d   : > { %v1174_v49 = vrot.slane %v1161_v46, 2  ;;  %v1291_v63 = vrot.slane %v1161_v46, 4  ;;  %v1353_v4 = vrot.slane %v1161_v46, 6 }
 0x42f   : > { %2244 = vmatmul.mubr.msk.bf16.vlgmr.msra.gmra.mrb[16].mxu0 %vm1187_vm5, %v1174_v49 }
 0x430   : > { %2248 = vmatpush3.bf16.msra.mxu0 %v2436_v48  ;;  %2251 = vmatprep.mubr.msk.bf16.mxu0 %vm2471_vm0, %v2470_v0  ;;  %v1147_v51 = vpop.f32.mrb[8].mxu0  ;;  %v2095_v48 = vld [vmem:[%s2833_s7] ss:$0 sm:$0xff] }
 0x431   : > { %2249 = vmatprep.subr.bf16.mxu0 %v2470_v0  ;;  %v2233_v52 = vpop.f32.mrb[9].mxu0 }
 0x432   : > { %v1150_v53 = vpop.f32.mrb[10].mxu0  ;;  %v2094_v52 = vld [vmem:[%s2838_s12] ss:$0 sm:$0xff] }
 0x433   : > { %v2713_v54 = vpack.c.bf16 %v1150_v53, %v1147_v51  ;;  %v2234_v55 = vpop.f32.mrb[11].mxu0  ;;  %v2096_v53 = vld [vmem:[%s2834_s8] ss:$0 sm:$0xff] }
 0x434   : > { %2250 = vmatpush3.bf16.msra.mxu0 %v2437_v50 }
 0x435   : > { %2255 = vmatprep.subr.bf16.mxu0 %v2470_v0  ;;  %v1477_v12 = vrot.slane %v2713_v54, 2  ;;  %v1539_v15 = vrot.slane %v2713_v54, 4  ;;  %v1601_v18 = vrot.slane %v2713_v54, 6 }
 0x438   : > { %v2719_v57 = vpop.f32.mrb[12].mxu0 }
 0x439   : > { %v2237_v58 = vpop.f32.mrb[13].mxu0  ;;  %v1163_v20 = vpack.c.bf16 %v2719_v57, %v2719_v57 }
 0x43a   : > { %v1158_v59 = vpop.f32.mrb[14].mxu0 }
 0x43b   : > { %2252 = vmatmul.mubr.msk.bf16.vlgmr.msra.gmra.mrb[16].mxu0 %vm1187_vm5, %v1161_v46  ;;  %v2238_v60 = vpop.f32.mrb[15].mxu0  ;;  %v1849_v46 = vmul.f32 %v1848_v45, %v2744_v5 }
 0x43c   : > { %2256 = vmatpush3.bf16.msra.mxu0 %v2438_v56  ;;  %2259 = vmatprep.mubr.msk.bf16.mxu0 %vm2471_vm0, %v2470_v0 }
 0x43d   : > { %2257 = vmatprep.subr.bf16.mxu0 %v2470_v0  ;;  %v1856_v50 = vmul.f32 %v2093_v47, %v1849_v46 }
 0x43f   : > { %v1863_v55 = vadd.f32 %v2094_v52, %v1856_v50 }
 0x440   : > { %2258 = vmatpush3.bf16.msra.mxu0 %v2439_v61 }
 0x441   : > { %2263 = vmatprep.subr.bf16.mxu0 %v2470_v0 }
 0x447   : > { %2260 = vmatmul.mubr.msk.bf16.vlgmr.msra.gmra.mrb[16].mxu0 %vm1187_vm5, %v1291_v63 }
 0x448   : > { %2264 = vmatpush3.bf16.msra.mxu0 %v2440_v62  ;;  %2267 = vmatprep.mubr.msk.bf16.mxu0 %vm2471_vm0, %v2470_v0 }
 0x449   : > { %2265 = vmatprep.subr.bf16.mxu0 %v2470_v0 }
 0x44c   : > { %2266 = vmatpush3.bf16.msra.mxu0 %v2441_v1 }
 0x44d   : > { %2271 = vmatprep.subr.bf16.mxu0 %v2470_v0 }
 0x453   : > { %2268 = vmatmul.mubr.msk.bf16.vlgmr.msra.gmra.mrb[16].mxu0 %vm1187_vm5, %v1353_v4 }
 0x454   : > { %2272 = vmatpush3.bf16.msra.mxu0 %v2442_v2  ;;  %2275 = vmatprep.mubr.msk.bf16.mxu0 %vm2471_vm0, %v2470_v0 }
 0x455   : > { %2273 = vmatprep.subr.bf16.mxu0 %v2470_v0 }
 0x458   : > { %2274 = vmatpush3.bf16.msra.mxu0 %v2443_v6 }
 0x459   : > { %2279 = vmatprep.subr.bf16.mxu0 %v2470_v0 }
 0x45f   : > { %2276 = vmatmul.mubr.msk.bf16.vlgmr.msra.gmra.mrb[16].mxu0 %vm1187_vm5, %v2713_v54 }
 0x460   : > { %2280 = vmatpush3.bf16.msra.mxu0 %v2444_v8  ;;  %2283 = vmatprep.mubr.msk.bf16.mxu0 %vm2471_vm0, %v2470_v0 }
 0x461   : > { %2281 = vmatprep.subr.bf16.mxu0 %v2470_v0 }
 0x464   : > { %2282 = vmatpush3.bf16.msra.mxu0 %v2445_v9 }
 0x465   : > { %2287 = vmatprep.subr.bf16.mxu0 %v2470_v0 }
 0x46b   : > { %2284 = vmatmul.mubr.msk.bf16.vlgmr.msra.gmra.mrb[16].mxu0 %vm1187_vm5, %v1477_v12 }
 0x46c   : > { %2288 = vmatpush3.bf16.msra.mxu0 %v2446_v11  ;;  %2291 = vmatprep.mubr.msk.bf16.mxu0 %vm2471_vm0, %v2470_v0 }
 0x46d   : > { %2289 = vmatprep.subr.bf16.mxu0 %v2470_v0 }
 0x470   : > { %2290 = vmatpush3.bf16.msra.mxu0 %v2447_v13 }
 0x471   : > { %2295 = vmatprep.subr.bf16.mxu0 %v2470_v0 }
 0x477   : > { %2292 = vmatmul.mubr.msk.bf16.vlgmr.msra.gmra.mrb[16].mxu0 %vm1187_vm5, %v1539_v15 }
 0x478   : > { %2296 = vmatpush3.bf16.msra.mxu0 %v2448_v14  ;;  %2299 = vmatprep.mubr.msk.bf16.mxu0 %vm2471_vm0, %v2470_v0 }
 0x479   : > { %2297 = vmatprep.subr.bf16.mxu0 %v2470_v0 }
 0x47c   : > { %2298 = vmatpush3.bf16.msra.mxu0 %v2449_v16 }
 0x47d   : > { %2303 = vmatprep.subr.bf16.mxu0 %v2470_v0 }
 0x483   : > { %2300 = vmatmul.mubr.msk.bf16.vlgmr.msra.gmra.mrb[16].mxu0 %vm1187_vm5, %v1601_v18 }
 0x484   : > { %2304 = vmatpush3.bf16.msra.mxu0 %v2450_v17  ;;  %2307 = vmatprep.mubr.msk.bf16.mxu0 %vm2471_vm0, %v2470_v0 }
 0x485   : > { %2305 = vmatprep.subr.bf16.mxu0 %v2470_v0 }
 0x488   : > { %2306 = vmatpush3.bf16.msra.mxu0 %v2451_v19 }
 0x48f   : > { %2308 = vmatmul.mubr.msk.bf16.vlgmr.msra.gmra.mrb[16].mxu0 %vm1187_vm5, %v1163_v20 }
 0x562   : > { %v1712_v21 = vpop.f32.mrb[16].mxu0 }
 0x563   : > { %v2309_v22 = vpop.f32.mrb[17].mxu0  ;;  %v1866_v23 = vsel %vm1019_vm2, %v1712_v21, 0.0  ;;  %v1876_v24 = vmul.f32 %v1712_v21, %v1712_v21 }
 0x564   : > { %1867 = vadd.xlane.f32.xlu0 %v1866_v23  ;;  %v1715_v25 = vpop.f32.mrb[18].mxu0 }
 0x565   : > { %v2310_v26 = vpop.f32.mrb[19].mxu0  ;;  %v1877_v27 = vsel %vm1019_vm2, %v1876_v24, 0.0 }
 0x566   : > { %1878 = vadd.xlane.f32.xlu1 %v1877_v27 }
 0x5f1   : > { %v1868_v28 = vpop.xlane.xlu0 %1867 }
 0x5f2   : > { %v1869_v29 = vrot.slane %v1868_v28, 4 }
 0x5f3   : > { %v1879_v0 = vpop.xlane.xlu1 %1878 }
 0x5f4   : > { %v1870_v30 = vadd.f32 %v1869_v29, %v1868_v28  ;;  %v1880_v31 = vrot.slane %v1879_v0, 4 }
 0x5f6   : > { %v1871_v32 = vrot.slane %v1870_v30, 2  ;;  %v1881_v33 = vadd.f32 %v1880_v31, %v1879_v0 }
 0x5f8   : > { %v1872_v34 = vadd.f32 %v1871_v32, %v1870_v30  ;;  %v1882_v35 = vrot.slane %v1881_v33, 2 }
 0x5fa   : > { %v1883_v36 = vadd.f32 %v1882_v35, %v1881_v33  ;;  %v1873_v37 = vrot.slane %v1872_v34, 1 }
 0x5fc   : > { %v1874_v38 = vadd.f32 %v1873_v37, %v1872_v34  ;;  %v1884_v39 = vrot.slane %v1883_v36, 1 }
 0x5fe   : > { %2401 = vpush %v1874_v38  ;;  %v1885_v40 = vadd.f32 %v1884_v39, %v1883_v36 }
 0x600   : > { %2403 = vpush %v1885_v40 }
 0x62f   : > { %s2402_s14 = spop %2401 }
 0x630   : > { %s1887_s15 = smul.f32 0.0078125, %s2402_s14 }
 0x631   : > { %s2404_s16 = spop %2403 }
 0x632   : > { %s1889_s17 = smul.f32 %s1887_s15, %s1887_s15  ;;  %v1895_v41 = vstv %s1887_s15  ;;  %s1981_s15 = sshll.u32 %s2841_s26, 1 }
 0x633   : > { %s1888_s18 = smul.f32 0.0078125, %s2404_s16  ;;  %v1896_v42 = vsub.f32 %v1712_v21, %v1895_v41 }
 0x635   : > { %s1890_s19 = ssub.f32 %s1888_s18, %s1889_s17  ;;  %s438_s18 = scalar_lea.vmem %s2839_s13, %s1981_s15 }
 0x637   : > { %s1891_s20 = sadd.f32 1e-05, %s1890_s19 }
 0x639   : > { %v1892_v43 = vstv %s1891_s20 }
 0x63a   : > { %2458 = vrsqrt.f32 %v1892_v43 }
 0x644   : > { %v2459_v44 = vpop.eup %2458 }
 0x645   : > { %2405 = vpush %v2459_v44 }
 0x676   : > { %s2406_s23 = spop %2405 }
 0x677   : > { %v1897_v49 = vstv %s2406_s23 }
 0x678   : > { %v1898_v51 = vmul.f32 %v1897_v49, %v1896_v42 }
 0x67a   : > { %v1905_v54 = vmul.f32 %v2095_v48, %v1898_v51 }
 0x67c   : > { %v1912_v56 = vadd.f32 %v2096_v53, %v1905_v54 }
 0x67e   : > { %v1913_v57 = vadd.f32 %v1912_v56, %v1863_v55 }
 0x680   : > { %v1915_v58 = vmul.f32 0.70710677, %v1913_v57  ;;  %v1914_v60 = vmul.f32 0.5, %v1913_v57 }
 0x682   : > { %2460 = verf.f32 %v1915_v58 }
 0x68c   : > { %v2461_v59 = vpop.eup %2460 }
 0x68d   : > { %v1917_v61 = vadd.f32 1.0, %v2461_v59 }
 0x68f   : > { %v1918_v62 = vmul.f32 %v1917_v61, %v1914_v60 }
 0x691   : > { %v1919_v63 = vpack.c.bf16 %v1918_v62, %v1918_v62 }
 0x693   : > { %1920 = vst [vmem:[%s438_s18] sm:$0x3] %v1919_v63 }
 0x694 PF: > { %s23_s25 = sadd.s32 1, %s2468_s25  }
 0x695   : > { %p20_p4 = scmp.ge.s32.totalorder %s23_s25, 4  }
 0x697   :  { %22 = sbr.rel (!%p20_p4) target bundleno = 1 (0x1), region = 118 }

// kernel: _lambda_.11
= control target key start
LH: loop header
LB: loop body
LE: loop exit
PB: predicated region body
PF: predicated region fallthrough
CT: control target
= control target key end

     0   :  { %v17_v2 = vlaneseq  ;;  %s97_s0 = inlined_call_operand.vmem [shape: bf16[2,1,128], index: 0, kind: input, shape index: {}]   ;;  %s98_s1 = inlined_call_operand.hbm [shape: f32[2,128], index: 1, kind: output, shape index: {}]  }
   0x1   :  { %v9_v0 = vld [vmem:[%s97_s0] sm:$0x1]  ;;  %v10_v1 = vld [vmem:[%s97_s0 + $0x1] sm:$0x1] }
   0x2   :  { %6 = vsyncpa [#allocation3], 0  ;;  %v11_v3 = vunpack.c.l.bf16 %v9_v0  ;;  %v12_v4 = vunpack.c.l.bf16 %v10_v1  ;;  %v18_v5 = vshrl.u32 %v17_v2, 7  ;;  %s68_s10 = smov [#allocation2]   ;;  %vm25_vm0 = vcmask 1041409  }
   0x3   :  { %s35_s11 = sshll.u32 %s68_s10, 4  ;;  %s36_s11 = int_to_ptr.vmem [resolvable:$true] %s35_s11 }
   0x4   :  { %v19_v6 = vsub.s32 0, %v18_v5  ;;  %s44_s12 = scalar_lea.vmem %s36_s11, 32  ;;  %p49_p1 = scmp.lt.s32.totalorder %s36_s11, %s36_s11 }
   0x5   :  { %p45_p0 = scmp.ne.s32.totalorder %s36_s11, %s44_s12  ;;  %p50_p2 = scmp.lt.s32.totalorder %s44_s12, %s44_s12 }
   0x6   :  { %v20_v7 = vrot.slane %v11_v3, %v19_v6  ;;  %v24_v8 = vrot.slane %v12_v4, %v19_v6 }
   0x7   :  { %p51_p3 = por %p50_p2, %p49_p1 }
   0x8   :  { %v26_v9 = vsel %vm25_vm0, %v24_v8, %v20_v7 }
   0x9   :  { %28 = vst [vmem:[#allocation2] sm:$0x3] %v26_v9  ;;  %p52_p4 = pnand %p51_p3, %p45_p0 }
   0xb   :  { %55 = shalt.err (!%p52_p4)
}
   0xc   :  { %s56_s14 = scalar_lea.hbm %s98_s1, 32 }
   0xd   :  { %p57_p5 = scmp.ne.s32.totalorder %s98_s1, %s56_s14  ;;  %p60_p6 = scmp.lt.u32.totalorder %s56_s14, %s98_s1 }
   0xf   :  { %p62_p7 = pnand %p60_p6, %p57_p5 }
  0x11   :  { %65 = shalt.err (!%p62_p7)
}
  0x12   :  { %38 = dma.vmem_to_hbm [thread:$0]  %s36_s11, 32, %s98_s1, [#allocation3]  }
  0x13   :  { %66 = dma.done.wait [#allocation3], 32  }
  0x14   :  { %67 = vsyncadd [#allocation3], 4294967264 }
  0x15   :  { %42 = vsyncpa [#allocation3], 1 }

</bundles_post_ra>
